<compile_context>
chip_gen: v6e
topology: v6e:2x2x1
jax: 0.10.0
libtpu: 0.0.40
codegen_flags: <defaults>
</compile_context>

<pallas_src>
import functools

import jax
import jax.numpy as jnp
import numpy as np
from jax.experimental import pallas as pl
from jax.experimental.pallas import tpu as pltpu

_EPS = 1e-5
_LANE = 128


def _round_up(x, m):
    return ((x + m - 1) // m) * m


def _vmem_limit_bytes():
    """~75% of physical VMEM, capped at 96 MiB (v5e/v6e -> 96 MiB, v7x -> 48 MiB)."""
    try:
        cap = int(pltpu.get_tpu_info().vmem_capacity_bytes)
    except Exception:
        cap = 128 * 1024 * 1024
    return min(cap * 3 // 4, 96 * 1024 * 1024)


# --------------------------------------------------------------------------
# In-kernel helpers
# --------------------------------------------------------------------------
def _zero_border(ref, H, W):
    """Zero only the 1-pixel frame of a (H+2, W+2, C) padded scratch.

    The interior is fully overwritten every grid step, so no full memset needed.
    """
    c = ref.shape[-1]
    zrow = jnp.zeros((1, W + 2, c), ref.dtype)
    ref[pl.ds(0, 1), :, :] = zrow
    ref[pl.ds(H + 1, 1), :, :] = zrow
    zcol = jnp.zeros((H + 2, 1, c), ref.dtype)
    ref[:, pl.ds(0, 1), :] = zcol
    ref[:, pl.ds(W + 1, 1), :] = zcol


def _conv3x3(pad_ref, w_ref, H, W):
    """3x3 'valid' conv over the (H+2, W+2, Cin) bf16 zero-padded scratch.

    Nine accumulating MXU matmuls (one per tap), K = Cin (multiple of 128),
    f32 accumulation.  No im2col buffer is materialized.
    """
    cin = pad_ref.shape[-1]
    acc = None
    for kh in range(3):
        for kw in range(3):
            tap = pad_ref[pl.ds(kh, H), pl.ds(kw, W), :].reshape(H * W, cin)
            k = 3 * kh + kw
            part = jnp.dot(tap, w_ref[k * cin:(k + 1) * cin, :],
                           preferred_element_type=jnp.float32)
            acc = part if acc is None else acc + part
    return acc                                               # (H*W, Cout) f32


def _store_upsampled(dst_ref, img, s):
    """Nearest-neighbor upsample `img` (H, W, C) by s into the interior
    (origin (1, 1)) of the padded scratch `dst_ref`.

    Row replication is a free major-dim broadcast+reshape; column replication is
    one narrow store per source column (pure store work, zero MXU FLOPs).
    """
    H, W, C = img.shape
    if s == 1:
        dst_ref[pl.ds(1, H), pl.ds(1, W), :] = img
        return
    # TODO(synk): a sublane-strided store (ref[..., pl.ds(1+dx, W, stride=s), :])
    #             would do this in s*s stores; per-column stores kept for
    #             portability of the lowering.
    for j in range(W):
        col = img[:, j, :]                                   # (H, C)
        blk = jnp.broadcast_to(col[:, None, None, :], (H, s, s, C))
        dst_ref[pl.ds(1, s * H), pl.ds(1 + s * j, s), :] = blk.reshape(s * H, s, C)


# --------------------------------------------------------------------------
# Fused kernels (one pallas_call per block)
# --------------------------------------------------------------------------
def _block_s1_kernel(x_ref, w2_ref, s2_ref, b2_ref, w1_ref, s1_ref, b1_ref,
                     o_ref, pad_ref, *, H, W):
    """stride==1: ReLU( ReLU(BN1(conv1( ReLU(BN2(conv2(x))) ))) + x )."""
    cp = x_ref.shape[-1]
    x = x_ref[0]                                             # (H, W, Cp)

    _zero_border(pad_ref, H, W)
    pad_ref[pl.ds(1, H), pl.ds(1, W), :] = x.astype(pad_ref.dtype)

    # conv2 + BN + ReLU
    h = _conv3x3(pad_ref, w2_ref, H, W)                      # (H*W, Cp) f32
    h = jnp.maximum(h * s2_ref[...] + b2_ref[...], 0.0)

    # re-store interior with h (border stays zero), conv1 + BN + ReLU
    pad_ref[pl.ds(1, H), pl.ds(1, W), :] = h.reshape(H, W, cp).astype(pad_ref.dtype)
    y = _conv3x3(pad_ref, w1_ref, H, W)
    y = jnp.maximum(y * s1_ref[...] + b1_ref[...], 0.0)

    # identity shortcut + final ReLU, lane-dense store
    out = jnp.maximum(y + x.reshape(H * W, cp).astype(jnp.float32), 0.0)
    o_ref[0] = out.reshape(H, W, cp).astype(o_ref.dtype)


def _block_up_kernel(x_ref, w2_ref, s2_ref, b2_ref, w1_ref, s1_ref, b1_ref,
                     ws_ref, ss_ref, bs_ref, o_ref, pad_ref, padu_ref,
                     *, H, W, s):
    """stride>1: ReLU( BN1(conv1(up(h))) + BNs(convS(up(x))) ), h=ReLU(BN2(conv2(x)))."""
    cp_in = x_ref.shape[-1]
    cp_out = o_ref.shape[-1]
    sH, sW = s * H, s * W
    x = x_ref[0]                                             # (H, W, Cp_in)

    # --- conv2 + BN + ReLU at low resolution ---
    _zero_border(pad_ref, H, W)
    pad_ref[pl.ds(1, H), pl.ds(1, W), :] = x.astype(pad_ref.dtype)
    h = _conv3x3(pad_ref, w2_ref, H, W)                      # (H*W, Cp_in) f32
    h = jnp.maximum(h * s2_ref[...] + b2_ref[...], 0.0)

    _zero_border(padu_ref, sH, sW)

    # conv1 path: nearest-up(h) -> 3x3 conv (+bias) -> BN   (no inner ReLU)
    _store_upsampled(padu_ref, h.reshape(H, W, cp_in).astype(padu_ref.dtype), s)
    y = _conv3x3(padu_ref, w1_ref, sH, sW)                   # (sH*sW, Cp_out) f32
    y = y * s1_ref[...] + b1_ref[...]

    # shortcut path: nearest-up(x) -> 3x3 conv (+bias) -> BN  (reuses padu scratch)
    _store_upsampled(padu_ref, x.astype(padu_ref.dtype), s)
    sc = _conv3x3(padu_ref, ws_ref, sH, sW)
    sc = sc * ss_ref[...] + bs_ref[...]

    out = jnp.maximum(y + sc, 0.0)
    o_ref[0] = out.reshape(sH, sW, cp_out).astype(o_ref.dtype)


# --------------------------------------------------------------------------
# Parameter init (deterministic), folding and packing
# --------------------------------------------------------------------------
def _init_conv_bn(key, cin, cout, with_bias):
    ks = jax.random.split(key, 6)
    p = {
        "w": 0.1 * jax.random.normal(ks[0], (3, 3, cin, cout), jnp.float32),
        "gamma": 1.0 + 0.1 * jax.random.normal(ks[1], (cout,), jnp.float32),
        "beta": 0.05 * jax.random.normal(ks[2], (cout,), jnp.float32),
        "mean": 0.1 * jax.random.normal(ks[3], (cout,), jnp.float32),
        "var": 1.0 + 0.2 * jax.random.uniform(ks[4], (cout,), jnp.float32),
    }
    p["b"] = (0.05 * jax.random.normal(ks[5], (cout,), jnp.float32)
              if with_bias else None)
    return p


def init_basic_block_dec(key, in_planes, stride):
    planes = in_planes // stride
    k2, k1, ks = jax.random.split(key, 3)
    params = {
        "conv2": _init_conv_bn(k2, in_planes, in_planes, with_bias=False),
        "conv1": _init_conv_bn(k1, in_planes, planes, with_bias=(stride != 1)),
    }
    if stride != 1:
        params["shortcut"] = _init_conv_bn(ks, in_planes, planes, with_bias=True)
    return params


def _fold_affine(p, cout_p):
    """Fold BN (inference) + optional conv bias into lane-padded scale/bias."""
    scale = p["gamma"] / jnp.sqrt(p["var"] + _EPS)
    bias = p["beta"] - p["mean"] * scale
    if p["b"] is not None:
        bias = bias + p["b"] * scale
    cout = scale.shape[0]
    sp = jnp.zeros((1, cout_p), jnp.float32).at[0, :cout].set(scale)
    bp = jnp.zeros((1, cout_p), jnp.float32).at[0, :cout].set(bias)
    return sp, bp


def _prep_weight(w, cin_p, cout_p):
    """(3,3,Cin,Cout) -> channel-padded, tap-flattened (9*Cin_p, Cout_p) bf16."""
    _, _, cin, cout = w.shape
    wp = jnp.zeros((3, 3, cin_p, cout_p), jnp.float32).at[:, :, :cin, :cout].set(w)
    return wp.reshape(9 * cin_p, cout_p).astype(jnp.bfloat16)


def _const_spec(a):
    nd = a.ndim
    return pl.BlockSpec(a.shape, lambda n, _nd=nd: (0,) * _nd)


# --------------------------------------------------------------------------
# Forward passes
# --------------------------------------------------------------------------
def basic_block_dec_forward_nhwc(params, x_nhwc, stride,
                                 keep_padded_channels=False):
    """NHWC-native forward.  Pass bf16 activations to halve HBM traffic (v5e),
    and keep_padded_channels=True inside a decoder stack to avoid a per-block
    lane pad/slice round-trip (padded lanes are exactly zero)."""
    N, H, W, C = x_nhwc.shape
    in_planes = params["conv2"]["w"].shape[2]
    planes = params["conv1"]["w"].shape[3]
    cp_in = _round_up(in_planes, _LANE)
    cp_out = _round_up(planes, _LANE)
    assert C in (in_planes, cp_in), "input channels must match params (optionally lane-padded)"
    assert W % 8 == 0 and (stride * W) % 8 == 0, "W must be a multiple of 8"

    # lane-dense channel padding (no-op when C is already a multiple of 128)
    if C != cp_in:
        x_nhwc = jnp.pad(x_nhwc, ((0, 0), (0, 0), (0, 0), (0, cp_in - C)))

    w2 = _prep_weight(params["conv2"]["w"], cp_in, cp_in)
    s2, b2 = _fold_affine(params["conv2"], cp_in)
    w1 = _prep_weight(params["conv1"]["w"], cp_in, cp_out)
    s1, b1 = _fold_affine(params["conv1"], cp_out)

    cparams = pltpu.CompilerParams(
        dimension_semantics=("parallel",),
        vmem_limit_bytes=_vmem_limit_bytes())

    if stride == 1:
        kernel = functools.partial(_block_s1_kernel, H=H, W=W)
        out = pl.pallas_call(
            kernel,
            out_shape=jax.ShapeDtypeStruct((N, H, W, cp_out), x_nhwc.dtype),
            grid=(N,),
            in_specs=[
                pl.BlockSpec((1, H, W, cp_in), lambda n: (n, 0, 0, 0)),
                _const_spec(w2), _const_spec(s2), _const_spec(b2),
                _const_spec(w1), _const_spec(s1), _const_spec(b1),
            ],
            out_specs=pl.BlockSpec((1, H, W, cp_out), lambda n: (n, 0, 0, 0)),
            scratch_shapes=[pltpu.VMEM((H + 2, W + 2, cp_in), jnp.bfloat16)],
            compiler_params=cparams,
        )(x_nhwc, w2, s2, b2, w1, s1, b1)
    else:
        ws = _prep_weight(params["shortcut"]["w"], cp_in, cp_out)
        ss, bs = _fold_affine(params["shortcut"], cp_out)
        sH, sW = stride * H, stride * W
        kernel = functools.partial(_block_up_kernel, H=H, W=W, s=stride)
        out = pl.pallas_call(
            kernel,
            out_shape=jax.ShapeDtypeStruct((N, sH, sW, cp_out), x_nhwc.dtype),
            grid=(N,),
            in_specs=[
                pl.BlockSpec((1, H, W, cp_in), lambda n: (n, 0, 0, 0)),
                _const_spec(w2), _const_spec(s2), _const_spec(b2),
                _const_spec(w1), _const_spec(s1), _const_spec(b1),
                _const_spec(ws), _const_spec(ss), _const_spec(bs),
            ],
            out_specs=pl.BlockSpec((1, sH, sW, cp_out), lambda n: (n, 0, 0, 0)),
            scratch_shapes=[
                pltpu.VMEM((H + 2, W + 2, cp_in), jnp.bfloat16),
                pltpu.VMEM((sH + 2, sW + 2, cp_in), jnp.bfloat16),
            ],
            compiler_params=cparams,
        )(x_nhwc, w2, s2, b2, w1, s1, b1, ws, ss, bs)

    if keep_padded_channels or cp_out == planes:
        return out
    return out[..., :planes]


def basic_block_dec_forward(params, x_nchw, stride):
    """NCHW in / NCHW out, matching the PyTorch module (boundary glue only)."""
    x = jnp.transpose(x_nchw, (0, 2, 3, 1))                  # NCHW -> NHWC
    y = basic_block_dec_forward_nhwc(params, x, stride)
    return jnp.transpose(y, (0, 3, 1, 2))                    # NHWC -> NCHW


# --------------------------------------------------------------------------
# Pure-JAX reference (mirrors the PyTorch forward, eval-mode BN; convs use
# bf16 MXU inputs with f32 accumulation, same as the Pallas kernels)
# --------------------------------------------------------------------------
def _conv_ref(x_nhwc, w, b=None):
    y = jax.lax.conv_general_dilated(
        x_nhwc.astype(jnp.bfloat16), w.astype(jnp.bfloat16), (1, 1), "SAME",
        dimension_numbers=("NHWC", "HWIO", "NHWC"),
        preferred_element_type=jnp.float32)
    return y if b is None else y + b


def _bn_ref(x, p):
    return (x - p["mean"]) / jnp.sqrt(p["var"] + _EPS) * p["gamma"] + p["beta"]


def reference_forward(params, x_nchw, stride):
    x = jnp.transpose(x_nchw, (0, 2, 3, 1))
    h = jax.nn.relu(_bn_ref(_conv_ref(x, params["conv2"]["w"]), params["conv2"]))
    if stride == 1:
        o = jax.nn.relu(_bn_ref(_conv_ref(h, params["conv1"]["w"]),
                                params["conv1"]))
        o = jax.nn.relu(o + x)
    else:
        hu = jnp.repeat(jnp.repeat(h, stride, axis=1), stride, axis=2)
        xu = jnp.repeat(jnp.repeat(x, stride, axis=1), stride, axis=2)
        o = _bn_ref(_conv_ref(hu, params["conv1"]["w"], params["conv1"]["b"]),
                    params["conv1"])
        sc = _bn_ref(_conv_ref(xu, params["shortcut"]["w"],
                               params["shortcut"]["b"]), params["shortcut"])
        o = jax.nn.relu(o + sc)
    return jnp.transpose(o, (0, 3, 1, 2))


# --------------------------------------------------------------------------
if __name__ == "__main__":
    key = jax.random.PRNGKey(0)
    kx, kp1, kp2 = jax.random.split(key, 3)

    N, C, Hsp, Wsp = 2, 8, 16, 16
    x = jax.random.normal(kx, (N, C, Hsp, Wsp), jnp.float32)

    # stride = 1 (identity shortcut)
    p1 = init_basic_block_dec(kp1, C, stride=1)
    y1 = jax.block_until_ready(basic_block_dec_forward(p1, x, stride=1))
    r1 = reference_forward(p1, x, stride=1)
    np.testing.assert_allclose(np.asarray(y1), np.asarray(r1),
                               rtol=2e-3, atol=2e-3)
    assert y1.shape == (N, C, Hsp, Wsp)

    # stride = 2 (ResizeConv2d upsampling path)
    p2 = init_basic_block_dec(kp2, C, stride=2)
    y2 = jax.block_until_ready(basic_block_dec_forward(p2, x, stride=2))
    r2 = reference_forward(p2, x, stride=2)
    np.testing.assert_allclose(np.asarray(y2), np.asarray(r2),
                               rtol=2e-3, atol=2e-3)
    assert y2.shape == (N, C // 2, 2 * Hsp, 2 * Wsp)

    print("KERNEL_OK")
</pallas_src>

<mosaic_0001>
module attributes {stable_mosaic.version = 11 : i64} {
  func.func @_block_s1_kernel(%arg0: i32, %arg1: memref<1x16x16x128xf32, #tpu.memory_space<vmem>>, %arg2: memref<1152x128xbf16, #tpu.memory_space<vmem>>, %arg3: memref<1x128xf32, #tpu.memory_space<vmem>>, %arg4: memref<1x128xf32, #tpu.memory_space<vmem>>, %arg5: memref<1152x128xbf16, #tpu.memory_space<vmem>>, %arg6: memref<1x128xf32, #tpu.memory_space<vmem>>, %arg7: memref<1x128xf32, #tpu.memory_space<vmem>>, %arg8: memref<1x16x16x128xf32, #tpu.memory_space<vmem>>, %arg9: memref<18x18x128xbf16, #tpu.memory_space<vmem>>) attributes {dimension_semantics = [#tpu.dimension_semantics<parallel>], iteration_bounds = array<i64: 2>, scalar_prefetch = 0 : i64, scratch_operands = 1 : i64, tpu.core_type = #tpu.core_type<tc>, window_params = [{transform_indices = @transform_0, window_bounds = array<i64: 1, 16, 16, 128>}, {pipeline_mode = #tpu.pipeline_mode<synchronous>, transform_indices = @transform_1, window_bounds = array<i64: 1152, 128>}, {pipeline_mode = #tpu.pipeline_mode<synchronous>, transform_indices = @transform_2, window_bounds = array<i64: 1, 128>}, {pipeline_mode = #tpu.pipeline_mode<synchronous>, transform_indices = @transform_3, window_bounds = array<i64: 1, 128>}, {pipeline_mode = #tpu.pipeline_mode<synchronous>, transform_indices = @transform_4, window_bounds = array<i64: 1152, 128>}, {pipeline_mode = #tpu.pipeline_mode<synchronous>, transform_indices = @transform_5, window_bounds = array<i64: 1, 128>}, {pipeline_mode = #tpu.pipeline_mode<synchronous>, transform_indices = @transform_6, window_bounds = array<i64: 1, 128>}, {transform_indices = @transform_7, window_bounds = array<i64: 1, 16, 16, 128>}]} {
    %c0 = arith.constant 0 : index
    %c0_0 = arith.constant 0 : index
    %c0_1 = arith.constant 0 : index
    %c0_2 = arith.constant 0 : index
    %0 = vector.load %arg1[%c0, %c0_0, %c0_1, %c0_2] : memref<1x16x16x128xf32, #tpu.memory_space<vmem>>, vector<1x16x16x128xf32>
    %1 = vector.shape_cast %0 : vector<1x16x16x128xf32> to vector<16x16x128xf32>
    %cst = arith.constant 0.000000e+00 : bf16
    %2 = vector.broadcast %cst : bf16 to vector<1x18x128xbf16>
    %c0_3 = arith.constant 0 : index
    %c0_4 = arith.constant 0 : index
    %c0_5 = arith.constant 0 : index
    %3 = vector.load %arg9[%c0_3, %c0_4, %c0_5] : memref<18x18x128xbf16, #tpu.memory_space<vmem>>, vector<1x18x128xbf16>
    tpu.vector_store %arg9[%c0_3, %c0_4, %c0_5], %2 {strides = array<i32>} : memref<18x18x128xbf16, #tpu.memory_space<vmem>>, vector<1x18x128xbf16>,
    %c17 = arith.constant 17 : index
    %c0_6 = arith.constant 0 : index
    %c0_7 = arith.constant 0 : index
    %4 = vector.load %arg9[%c17, %c0_6, %c0_7] : memref<18x18x128xbf16, #tpu.memory_space<vmem>>, vector<1x18x128xbf16>
    tpu.vector_store %arg9[%c17, %c0_6, %c0_7], %2 {strides = array<i32>} : memref<18x18x128xbf16, #tpu.memory_space<vmem>>, vector<1x18x128xbf16>,
    %cst_8 = arith.constant 0.000000e+00 : bf16
    %5 = vector.broadcast %cst_8 : bf16 to vector<18x1x128xbf16>
    %c0_9 = arith.constant 0 : index
    %c0_10 = arith.constant 0 : index
    %c0_11 = arith.constant 0 : index
    %6 = vector.load %arg9[%c0_9, %c0_10, %c0_11] : memref<18x18x128xbf16, #tpu.memory_space<vmem>>, vector<18x1x128xbf16>
    tpu.vector_store %arg9[%c0_9, %c0_10, %c0_11], %5 {strides = array<i32>} : memref<18x18x128xbf16, #tpu.memory_space<vmem>>, vector<18x1x128xbf16>,
    %c0_12 = arith.constant 0 : index
    %c17_13 = arith.constant 17 : index
    %c0_14 = arith.constant 0 : index
    %7 = vector.load %arg9[%c0_12, %c17_13, %c0_14] : memref<18x18x128xbf16, #tpu.memory_space<vmem>>, vector<18x1x128xbf16>
    tpu.vector_store %arg9[%c0_12, %c17_13, %c0_14], %5 {strides = array<i32>} : memref<18x18x128xbf16, #tpu.memory_space<vmem>>, vector<18x1x128xbf16>,
    %8 = arith.truncf %1 : vector<16x16x128xf32> to vector<16x16x128xbf16>
    %c1 = arith.constant 1 : index
    %c1_15 = arith.constant 1 : index
    %c0_16 = arith.constant 0 : index
    %9 = vector.load %arg9[%c1, %c1_15, %c0_16] : memref<18x18x128xbf16, #tpu.memory_space<vmem>>, vector<16x16x128xbf16>
    tpu.vector_store %arg9[%c1, %c1_15, %c0_16], %8 {strides = array<i32>} : memref<18x18x128xbf16, #tpu.memory_space<vmem>>, vector<16x16x128xbf16>,
    %c0_17 = arith.constant 0 : index
    %c0_18 = arith.constant 0 : index
    %c0_19 = arith.constant 0 : index
    %10 = vector.load %arg9[%c0_17, %c0_18, %c0_19] : memref<18x18x128xbf16, #tpu.memory_space<vmem>>, vector<16x16x128xbf16>
    %11 = vector.shape_cast %10 : vector<16x16x128xbf16> to vector<256x128xbf16>
    %c0_20 = arith.constant 0 : index
    %c0_21 = arith.constant 0 : index
    %12 = vector.load %arg2[%c0_20, %c0_21] : memref<1152x128xbf16, #tpu.memory_space<vmem>>, vector<128x128xbf16>
    %cst_22 = arith.constant dense<0.000000e+00> : vector<256x128xf32>
    %13 = tpu.matmul %11, %12, %cst_22 {dimension_numbers = #tpu.dot_dimension_numbers<[1], [0], [0], [1], [0, 0, 1, 1], [], []>} : vector<256x128xbf16>, vector<128x128xbf16>, vector<256x128xf32> -> vector<256x128xf32>
    %c0_23 = arith.constant 0 : index
    %c1_24 = arith.constant 1 : index
    %c0_25 = arith.constant 0 : index
    %14 = vector.load %arg9[%c0_23, %c1_24, %c0_25] : memref<18x18x128xbf16, #tpu.memory_space<vmem>>, vector<16x16x128xbf16>
    %15 = vector.shape_cast %14 : vector<16x16x128xbf16> to vector<256x128xbf16>
    %c128 = arith.constant 128 : index
    %c0_26 = arith.constant 0 : index
    %16 = vector.load %arg2[%c128, %c0_26] : memref<1152x128xbf16, #tpu.memory_space<vmem>>, vector<128x128xbf16>
    %cst_27 = arith.constant dense<0.000000e+00> : vector<256x128xf32>
    %17 = tpu.matmul %15, %16, %cst_27 {dimension_numbers = #tpu.dot_dimension_numbers<[1], [0], [0], [1], [0, 0, 1, 1], [], []>} : vector<256x128xbf16>, vector<128x128xbf16>, vector<256x128xf32> -> vector<256x128xf32>
    %18 = arith.addf %13, %17 : vector<256x128xf32>
    %c0_28 = arith.constant 0 : index
    %c2 = arith.constant 2 : index
    %c0_29 = arith.constant 0 : index
    %19 = vector.load %arg9[%c0_28, %c2, %c0_29] : memref<18x18x128xbf16, #tpu.memory_space<vmem>>, vector<16x16x128xbf16>
    %20 = vector.shape_cast %19 : vector<16x16x128xbf16> to vector<256x128xbf16>
    %c256 = arith.constant 256 : index
    %c0_30 = arith.constant 0 : index
    %21 = vector.load %arg2[%c256, %c0_30] : memref<1152x128xbf16, #tpu.memory_space<vmem>>, vector<128x128xbf16>
    %cst_31 = arith.constant dense<0.000000e+00> : vector<256x128xf32>
    %22 = tpu.matmul %20, %21, %cst_31 {dimension_numbers = #tpu.dot_dimension_numbers<[1], [0], [0], [1], [0, 0, 1, 1], [], []>} : vector<256x128xbf16>, vector<128x128xbf16>, vector<256x128xf32> -> vector<256x128xf32>
    %23 = arith.addf %18, %22 : vector<256x128xf32>
    %c1_32 = arith.constant 1 : index
    %c0_33 = arith.constant 0 : index
    %c0_34 = arith.constant 0 : index
    %24 = vector.load %arg9[%c1_32, %c0_33, %c0_34] : memref<18x18x128xbf16, #tpu.memory_space<vmem>>, vector<16x16x128xbf16>
    %25 = vector.shape_cast %24 : vector<16x16x128xbf16> to vector<256x128xbf16>
    %c384 = arith.constant 384 : index
    %c0_35 = arith.constant 0 : index
    %26 = vector.load %arg2[%c384, %c0_35] : memref<1152x128xbf16, #tpu.memory_space<vmem>>, vector<128x128xbf16>
    %cst_36 = arith.constant dense<0.000000e+00> : vector<256x128xf32>
    %27 = tpu.matmul %25, %26, %cst_36 {dimension_numbers = #tpu.dot_dimension_numbers<[1], [0], [0], [1], [0, 0, 1, 1], [], []>} : vector<256x128xbf16>, vector<128x128xbf16>, vector<256x128xf32> -> vector<256x128xf32>
    %28 = arith.addf %23, %27 : vector<256x128xf32>
    %c1_37 = arith.constant 1 : index
    %c1_38 = arith.constant 1 : index
    %c0_39 = arith.constant 0 : index
    %29 = vector.load %arg9[%c1_37, %c1_38, %c0_39] : memref<18x18x128xbf16, #tpu.memory_space<vmem>>, vector<16x16x128xbf16>
    %30 = vector.shape_cast %29 : vector<16x16x128xbf16> to vector<256x128xbf16>
    %c512 = arith.constant 512 : index
    %c0_40 = arith.constant 0 : index
    %31 = vector.load %arg2[%c512, %c0_40] : memref<1152x128xbf16, #tpu.memory_space<vmem>>, vector<128x128xbf16>
    %cst_41 = arith.constant dense<0.000000e+00> : vector<256x128xf32>
    %32 = tpu.matmul %30, %31, %cst_41 {dimension_numbers = #tpu.dot_dimension_numbers<[1], [0], [0], [1], [0, 0, 1, 1], [], []>} : vector<256x128xbf16>, vector<128x128xbf16>, vector<256x128xf32> -> vector<256x128xf32>
    %33 = arith.addf %28, %32 : vector<256x128xf32>
    %c1_42 = arith.constant 1 : index
    %c2_43 = arith.constant 2 : index
    %c0_44 = arith.constant 0 : index
    %34 = vector.load %arg9[%c1_42, %c2_43, %c0_44] : memref<18x18x128xbf16, #tpu.memory_space<vmem>>, vector<16x16x128xbf16>
    %35 = vector.shape_cast %34 : vector<16x16x128xbf16> to vector<256x128xbf16>
    %c640 = arith.constant 640 : index
    %c0_45 = arith.constant 0 : index
    %36 = vector.load %arg2[%c640, %c0_45] : memref<1152x128xbf16, #tpu.memory_space<vmem>>, vector<128x128xbf16>
    %cst_46 = arith.constant dense<0.000000e+00> : vector<256x128xf32>
    %37 = tpu.matmul %35, %36, %cst_46 {dimension_numbers = #tpu.dot_dimension_numbers<[1], [0], [0], [1], [0, 0, 1, 1], [], []>} : vector<256x128xbf16>, vector<128x128xbf16>, vector<256x128xf32> -> vector<256x128xf32>
    %38 = arith.addf %33, %37 : vector<256x128xf32>
    %c2_47 = arith.constant 2 : index
    %c0_48 = arith.constant 0 : index
    %c0_49 = arith.constant 0 : index
    %39 = vector.load %arg9[%c2_47, %c0_48, %c0_49] : memref<18x18x128xbf16, #tpu.memory_space<vmem>>, vector<16x16x128xbf16>
    %40 = vector.shape_cast %39 : vector<16x16x128xbf16> to vector<256x128xbf16>
    %c768 = arith.constant 768 : index
    %c0_50 = arith.constant 0 : index
    %41 = vector.load %arg2[%c768, %c0_50] : memref<1152x128xbf16, #tpu.memory_space<vmem>>, vector<128x128xbf16>
    %cst_51 = arith.constant dense<0.000000e+00> : vector<256x128xf32>
    %42 = tpu.matmul %40, %41, %cst_51 {dimension_numbers = #tpu.dot_dimension_numbers<[1], [0], [0], [1], [0, 0, 1, 1], [], []>} : vector<256x128xbf16>, vector<128x128xbf16>, vector<256x128xf32> -> vector<256x128xf32>
    %43 = arith.addf %38, %42 : vector<256x128xf32>
    %c2_52 = arith.constant 2 : index
    %c1_53 = arith.constant 1 : index
    %c0_54 = arith.constant 0 : index
    %44 = vector.load %arg9[%c2_52, %c1_53, %c0_54] : memref<18x18x128xbf16, #tpu.memory_space<vmem>>, vector<16x16x128xbf16>
    %45 = vector.shape_cast %44 : vector<16x16x128xbf16> to vector<256x128xbf16>
    %c896 = arith.constant 896 : index
    %c0_55 = arith.constant 0 : index
    %46 = vector.load %arg2[%c896, %c0_55] : memref<1152x128xbf16, #tpu.memory_space<vmem>>, vector<128x128xbf16>
    %cst_56 = arith.constant dense<0.000000e+00> : vector<256x128xf32>
    %47 = tpu.matmul %45, %46, %cst_56 {dimension_numbers = #tpu.dot_dimension_numbers<[1], [0], [0], [1], [0, 0, 1, 1], [], []>} : vector<256x128xbf16>, vector<128x128xbf16>, vector<256x128xf32> -> vector<256x128xf32>
    %48 = arith.addf %43, %47 : vector<256x128xf32>
    %c2_57 = arith.constant 2 : index
    %c2_58 = arith.constant 2 : index
    %c0_59 = arith.constant 0 : index
    %49 = vector.load %arg9[%c2_57, %c2_58, %c0_59] : memref<18x18x128xbf16, #tpu.memory_space<vmem>>, vector<16x16x128xbf16>
    %50 = vector.shape_cast %49 : vector<16x16x128xbf16> to vector<256x128xbf16>
    %c1024 = arith.constant 1024 : index
    %c0_60 = arith.constant 0 : index
    %51 = vector.load %arg2[%c1024, %c0_60] : memref<1152x128xbf16, #tpu.memory_space<vmem>>, vector<128x128xbf16>
    %cst_61 = arith.constant dense<0.000000e+00> : vector<256x128xf32>
    %52 = tpu.matmul %50, %51, %cst_61 {dimension_numbers = #tpu.dot_dimension_numbers<[1], [0], [0], [1], [0, 0, 1, 1], [], []>} : vector<256x128xbf16>, vector<128x128xbf16>, vector<256x128xf32> -> vector<256x128xf32>
    %53 = arith.addf %48, %52 : vector<256x128xf32>
    %c0_62 = arith.constant 0 : index
    %c0_63 = arith.constant 0 : index
    %54 = vector.load %arg3[%c0_62, %c0_63] : memref<1x128xf32, #tpu.memory_space<vmem>>, vector<1x128xf32>
    %55 = vector.broadcast %54 : vector<1x128xf32> to vector<256x128xf32>
    %56 = arith.mulf %53, %55 : vector<256x128xf32>
    %c0_64 = arith.constant 0 : index
    %c0_65 = arith.constant 0 : index
    %57 = vector.load %arg4[%c0_64, %c0_65] : memref<1x128xf32, #tpu.memory_space<vmem>>, vector<1x128xf32>
    %58 = vector.broadcast %57 : vector<1x128xf32> to vector<256x128xf32>
    %59 = arith.addf %56, %58 : vector<256x128xf32>
    %cst_66 = arith.constant 0.000000e+00 : f32
    %60 = vector.broadcast %cst_66 : f32 to vector<256x128xf32>
    %61 = arith.maximumf %59, %60 : vector<256x128xf32>
    %62 = vector.shape_cast %61 : vector<256x128xf32> to vector<16x16x128xf32>
    %63 = arith.truncf %62 : vector<16x16x128xf32> to vector<16x16x128xbf16>
    %c1_67 = arith.constant 1 : index
    %c1_68 = arith.constant 1 : index
    %c0_69 = arith.constant 0 : index
    %64 = vector.load %arg9[%c1_67, %c1_68, %c0_69] : memref<18x18x128xbf16, #tpu.memory_space<vmem>>, vector<16x16x128xbf16>
    tpu.vector_store %arg9[%c1_67, %c1_68, %c0_69], %63 {strides = array<i32>} : memref<18x18x128xbf16, #tpu.memory_space<vmem>>, vector<16x16x128xbf16>,
    %c0_70 = arith.constant 0 : index
    %c0_71 = arith.constant 0 : index
    %c0_72 = arith.constant 0 : index
    %65 = vector.load %arg9[%c0_70, %c0_71, %c0_72] : memref<18x18x128xbf16, #tpu.memory_space<vmem>>, vector<16x16x128xbf16>
    %66 = vector.shape_cast %65 : vector<16x16x128xbf16> to vector<256x128xbf16>
    %c0_73 = arith.constant 0 : index
    %c0_74 = arith.constant 0 : index
    %67 = vector.load %arg5[%c0_73, %c0_74] : memref<1152x128xbf16, #tpu.memory_space<vmem>>, vector<128x128xbf16>
    %cst_75 = arith.constant dense<0.000000e+00> : vector<256x128xf32>
    %68 = tpu.matmul %66, %67, %cst_75 {dimension_numbers = #tpu.dot_dimension_numbers<[1], [0], [0], [1], [0, 0, 1, 1], [], []>} : vector<256x128xbf16>, vector<128x128xbf16>, vector<256x128xf32> -> vector<256x128xf32>
    %c0_76 = arith.constant 0 : index
    %c1_77 = arith.constant 1 : index
    %c0_78 = arith.constant 0 : index
    %69 = vector.load %arg9[%c0_76, %c1_77, %c0_78] : memref<18x18x128xbf16, #tpu.memory_space<vmem>>, vector<16x16x128xbf16>
    %70 = vector.shape_cast %69 : vector<16x16x128xbf16> to vector<256x128xbf16>
    %c128_79 = arith.constant 128 : index
    %c0_80 = arith.constant 0 : index
    %71 = vector.load %arg5[%c128_79, %c0_80] : memref<1152x128xbf16, #tpu.memory_space<vmem>>, vector<128x128xbf16>
    %cst_81 = arith.constant dense<0.000000e+00> : vector<256x128xf32>
    %72 = tpu.matmul %70, %71, %cst_81 {dimension_numbers = #tpu.dot_dimension_numbers<[1], [0], [0], [1], [0, 0, 1, 1], [], []>} : vector<256x128xbf16>, vector<128x128xbf16>, vector<256x128xf32> -> vector<256x128xf32>
    %73 = arith.addf %68, %72 : vector<256x128xf32>
    %c0_82 = arith.constant 0 : index
    %c2_83 = arith.constant 2 : index
    %c0_84 = arith.constant 0 : index
    %74 = vector.load %arg9[%c0_82, %c2_83, %c0_84] : memref<18x18x128xbf16, #tpu.memory_space<vmem>>, vector<16x16x128xbf16>
    %75 = vector.shape_cast %74 : vector<16x16x128xbf16> to vector<256x128xbf16>
    %c256_85 = arith.constant 256 : index
    %c0_86 = arith.constant 0 : index
    %76 = vector.load %arg5[%c256_85, %c0_86] : memref<1152x128xbf16, #tpu.memory_space<vmem>>, vector<128x128xbf16>
    %cst_87 = arith.constant dense<0.000000e+00> : vector<256x128xf32>
    %77 = tpu.matmul %75, %76, %cst_87 {dimension_numbers = #tpu.dot_dimension_numbers<[1], [0], [0], [1], [0, 0, 1, 1], [], []>} : vector<256x128xbf16>, vector<128x128xbf16>, vector<256x128xf32> -> vector<256x128xf32>
    %78 = arith.addf %73, %77 : vector<256x128xf32>
    %c1_88 = arith.constant 1 : index
    %c0_89 = arith.constant 0 : index
    %c0_90 = arith.constant 0 : index
    %79 = vector.load %arg9[%c1_88, %c0_89, %c0_90] : memref<18x18x128xbf16, #tpu.memory_space<vmem>>, vector<16x16x128xbf16>
    %80 = vector.shape_cast %79 : vector<16x16x128xbf16> to vector<256x128xbf16>
    %c384_91 = arith.constant 384 : index
    %c0_92 = arith.constant 0 : index
    %81 = vector.load %arg5[%c384_91, %c0_92] : memref<1152x128xbf16, #tpu.memory_space<vmem>>, vector<128x128xbf16>
    %cst_93 = arith.constant dense<0.000000e+00> : vector<256x128xf32>
    %82 = tpu.matmul %80, %81, %cst_93 {dimension_numbers = #tpu.dot_dimension_numbers<[1], [0], [0], [1], [0, 0, 1, 1], [], []>} : vector<256x128xbf16>, vector<128x128xbf16>, vector<256x128xf32> -> vector<256x128xf32>
    %83 = arith.addf %78, %82 : vector<256x128xf32>
    %c1_94 = arith.constant 1 : index
    %c1_95 = arith.constant 1 : index
    %c0_96 = arith.constant 0 : index
    %84 = vector.load %arg9[%c1_94, %c1_95, %c0_96] : memref<18x18x128xbf16, #tpu.memory_space<vmem>>, vector<16x16x128xbf16>
    %85 = vector.shape_cast %84 : vector<16x16x128xbf16> to vector<256x128xbf16>
    %c512_97 = arith.constant 512 : index
    %c0_98 = arith.constant 0 : index
    %86 = vector.load %arg5[%c512_97, %c0_98] : memref<1152x128xbf16, #tpu.memory_space<vmem>>, vector<128x128xbf16>
    %cst_99 = arith.constant dense<0.000000e+00> : vector<256x128xf32>
    %87 = tpu.matmul %85, %86, %cst_99 {dimension_numbers = #tpu.dot_dimension_numbers<[1], [0], [0], [1], [0, 0, 1, 1], [], []>} : vector<256x128xbf16>, vector<128x128xbf16>, vector<256x128xf32> -> vector<256x128xf32>
    %88 = arith.addf %83, %87 : vector<256x128xf32>
    %c1_100 = arith.constant 1 : index
    %c2_101 = arith.constant 2 : index
    %c0_102 = arith.constant 0 : index
    %89 = vector.load %arg9[%c1_100, %c2_101, %c0_102] : memref<18x18x128xbf16, #tpu.memory_space<vmem>>, vector<16x16x128xbf16>
    %90 = vector.shape_cast %89 : vector<16x16x128xbf16> to vector<256x128xbf16>
    %c640_103 = arith.constant 640 : index
    %c0_104 = arith.constant 0 : index
    %91 = vector.load %arg5[%c640_103, %c0_104] : memref<1152x128xbf16, #tpu.memory_space<vmem>>, vector<128x128xbf16>
    %cst_105 = arith.constant dense<0.000000e+00> : vector<256x128xf32>
    %92 = tpu.matmul %90, %91, %cst_105 {dimension_numbers = #tpu.dot_dimension_numbers<[1], [0], [0], [1], [0, 0, 1, 1], [], []>} : vector<256x128xbf16>, vector<128x128xbf16>, vector<256x128xf32> -> vector<256x128xf32>
    %93 = arith.addf %88, %92 : vector<256x128xf32>
    %c2_106 = arith.constant 2 : index
    %c0_107 = arith.constant 0 : index
    %c0_108 = arith.constant 0 : index
    %94 = vector.load %arg9[%c2_106, %c0_107, %c0_108] : memref<18x18x128xbf16, #tpu.memory_space<vmem>>, vector<16x16x128xbf16>
    %95 = vector.shape_cast %94 : vector<16x16x128xbf16> to vector<256x128xbf16>
    %c768_109 = arith.constant 768 : index
    %c0_110 = arith.constant 0 : index
    %96 = vector.load %arg5[%c768_109, %c0_110] : memref<1152x128xbf16, #tpu.memory_space<vmem>>, vector<128x128xbf16>
    %cst_111 = arith.constant dense<0.000000e+00> : vector<256x128xf32>
    %97 = tpu.matmul %95, %96, %cst_111 {dimension_numbers = #tpu.dot_dimension_numbers<[1], [0], [0], [1], [0, 0, 1, 1], [], []>} : vector<256x128xbf16>, vector<128x128xbf16>, vector<256x128xf32> -> vector<256x128xf32>
    %98 = arith.addf %93, %97 : vector<256x128xf32>
    %c2_112 = arith.constant 2 : index
    %c1_113 = arith.constant 1 : index
    %c0_114 = arith.constant 0 : index
    %99 = vector.load %arg9[%c2_112, %c1_113, %c0_114] : memref<18x18x128xbf16, #tpu.memory_space<vmem>>, vector<16x16x128xbf16>
    %100 = vector.shape_cast %99 : vector<16x16x128xbf16> to vector<256x128xbf16>
    %c896_115 = arith.constant 896 : index
    %c0_116 = arith.constant 0 : index
    %101 = vector.load %arg5[%c896_115, %c0_116] : memref<1152x128xbf16, #tpu.memory_space<vmem>>, vector<128x128xbf16>
    %cst_117 = arith.constant dense<0.000000e+00> : vector<256x128xf32>
    %102 = tpu.matmul %100, %101, %cst_117 {dimension_numbers = #tpu.dot_dimension_numbers<[1], [0], [0], [1], [0, 0, 1, 1], [], []>} : vector<256x128xbf16>, vector<128x128xbf16>, vector<256x128xf32> -> vector<256x128xf32>
    %103 = arith.addf %98, %102 : vector<256x128xf32>
    %c2_118 = arith.constant 2 : index
    %c2_119 = arith.constant 2 : index
    %c0_120 = arith.constant 0 : index
    %104 = vector.load %arg9[%c2_118, %c2_119, %c0_120] : memref<18x18x128xbf16, #tpu.memory_space<vmem>>, vector<16x16x128xbf16>
    %105 = vector.shape_cast %104 : vector<16x16x128xbf16> to vector<256x128xbf16>
    %c1024_121 = arith.constant 1024 : index
    %c0_122 = arith.constant 0 : index
    %106 = vector.load %arg5[%c1024_121, %c0_122] : memref<1152x128xbf16, #tpu.memory_space<vmem>>, vector<128x128xbf16>
    %cst_123 = arith.constant dense<0.000000e+00> : vector<256x128xf32>
    %107 = tpu.matmul %105, %106, %cst_123 {dimension_numbers = #tpu.dot_dimension_numbers<[1], [0], [0], [1], [0, 0, 1, 1], [], []>} : vector<256x128xbf16>, vector<128x128xbf16>, vector<256x128xf32> -> vector<256x128xf32>
    %108 = arith.addf %103, %107 : vector<256x128xf32>
    %c0_124 = arith.constant 0 : index
    %c0_125 = arith.constant 0 : index
    %109 = vector.load %arg6[%c0_124, %c0_125] : memref<1x128xf32, #tpu.memory_space<vmem>>, vector<1x128xf32>
    %110 = vector.broadcast %109 : vector<1x128xf32> to vector<256x128xf32>
    %111 = arith.mulf %108, %110 : vector<256x128xf32>
    %c0_126 = arith.constant 0 : index
    %c0_127 = arith.constant 0 : index
    %112 = vector.load %arg7[%c0_126, %c0_127] : memref<1x128xf32, #tpu.memory_space<vmem>>, vector<1x128xf32>
    %113 = vector.broadcast %112 : vector<1x128xf32> to vector<256x128xf32>
    %114 = arith.addf %111, %113 : vector<256x128xf32>
    %cst_128 = arith.constant 0.000000e+00 : f32
    %115 = vector.broadcast %cst_128 : f32 to vector<256x128xf32>
    %116 = arith.maximumf %114, %115 : vector<256x128xf32>
    %117 = vector.shape_cast %1 : vector<16x16x128xf32> to vector<256x128xf32>
    %118 = arith.addf %116, %117 : vector<256x128xf32>
    %cst_129 = arith.constant 0.000000e+00 : f32
    %119 = vector.broadcast %cst_129 : f32 to vector<256x128xf32>
    %120 = arith.maximumf %118, %119 : vector<256x128xf32>
    %121 = vector.shape_cast %120 : vector<256x128xf32> to vector<16x16x128xf32>
    %c0_130 = arith.constant 0 : index
    %c0_131 = arith.constant 0 : index
    %c0_132 = arith.constant 0 : index
    %c0_133 = arith.constant 0 : index
    %122 = vector.load %arg8[%c0_130, %c0_131, %c0_132, %c0_133] : memref<1x16x16x128xf32, #tpu.memory_space<vmem>>, vector<1x16x16x128xf32>
    %123 = vector.shape_cast %122 : vector<1x16x16x128xf32> to vector<16x16x128xf32>
    %124 = vector.shape_cast %121 : vector<16x16x128xf32> to vector<1x16x16x128xf32>
    tpu.vector_store %arg8[%c0_130, %c0_131, %c0_132, %c0_133], %124 {strides = array<i32>} : memref<1x16x16x128xf32, #tpu.memory_space<vmem>>, vector<1x16x16x128xf32>,
    return
  }
  func.func @transform_0(%arg0: i32) -> (i32, i32, i32, i32) {
    %c0_i32 = arith.constant 0 : i32
    %c0_i32_0 = arith.constant 0 : i32
    %c0_i32_1 = arith.constant 0 : i32
    %c0_i32_2 = arith.constant 0 : i32
    return %arg0, %c0_i32, %c0_i32_0, %c0_i32_1 : i32, i32, i32, i32
  }
  func.func @transform_1(%arg0: i32) -> (i32, i32) {
    %c0_i32 = arith.constant 0 : i32
    %c0_i32_0 = arith.constant 0 : i32
    %c0_i32_1 = arith.constant 0 : i32
    return %c0_i32, %c0_i32_0 : i32, i32
  }
  func.func @transform_2(%arg0: i32) -> (i32, i32) {
    %c0_i32 = arith.constant 0 : i32
    %c0_i32_0 = arith.constant 0 : i32
    %c0_i32_1 = arith.constant 0 : i32
    return %c0_i32, %c0_i32_0 : i32, i32
  }
  func.func @transform_3(%arg0: i32) -> (i32, i32) {
    %c0_i32 = arith.constant 0 : i32
    %c0_i32_0 = arith.constant 0 : i32
    %c0_i32_1 = arith.constant 0 : i32
    return %c0_i32, %c0_i32_0 : i32, i32
  }
  func.func @transform_4(%arg0: i32) -> (i32, i32) {
    %c0_i32 = arith.constant 0 : i32
    %c0_i32_0 = arith.constant 0 : i32
    %c0_i32_1 = arith.constant 0 : i32
    return %c0_i32, %c0_i32_0 : i32, i32
  }
  func.func @transform_5(%arg0: i32) -> (i32, i32) {
    %c0_i32 = arith.constant 0 : i32
    %c0_i32_0 = arith.constant 0 : i32
    %c0_i32_1 = arith.constant 0 : i32
    return %c0_i32, %c0_i32_0 : i32, i32
  }
  func.func @transform_6(%arg0: i32) -> (i32, i32) {
    %c0_i32 = arith.constant 0 : i32
    %c0_i32_0 = arith.constant 0 : i32
    %c0_i32_1 = arith.constant 0 : i32
    return %c0_i32, %c0_i32_0 : i32, i32
  }
  func.func @transform_7(%arg0: i32) -> (i32, i32, i32, i32) {
    %c0_i32 = arith.constant 0 : i32
    %c0_i32_0 = arith.constant 0 : i32
    %c0_i32_1 = arith.constant 0 : i32
    %c0_i32_2 = arith.constant 0 : i32
    return %arg0, %c0_i32, %c0_i32_0, %c0_i32_1 : i32, i32, i32, i32
  }
}

</mosaic_0001>

<bundles_post_ra>
// kernel: tpu_custom_call.1
= control target key start
LH: loop header
LB: loop body
LE: loop exit
PB: predicated region body
PF: predicated region fallthrough
CT: control target
= control target key end

     0   :  { %s18935_s0 = inlined_call_operand.hbm [shape: f32[2,16,16,128], index: 0, kind: input, shape index: {}]   ;;  %s18936_s1 = inlined_call_operand.hbm [shape: bf16[1152,128], index: 1, kind: input, shape index: {}]   ;;  %s18937_s2 = inlined_call_operand.vmem [shape: f32[1,128], index: 2, kind: input, shape index: {}]   ;;  %s18938_s3 = inlined_call_operand.vmem [shape: f32[1,128], index: 3, kind: input, shape index: {}]   ;;  %s18939_s4 = inlined_call_operand.hbm [shape: bf16[1152,128], index: 4, kind: input, shape index: {}]   ;;  %s18940_s5 = inlined_call_operand.vmem [shape: f32[1,128], index: 5, kind: input, shape index: {}]   ;;  %s18941_s6 = inlined_call_operand.vmem [shape: f32[1,128], index: 6, kind: input, shape index: {}]   ;;  %s18942_s7 = inlined_call_operand.hbm [shape: f32[2,16,16,128], index: 7, kind: output, shape index: {}]  }
   0x1   :  { %18972 = sst [smem:[#allocation76_spill]] %s18936_s1 }
   0x2   :  { %12 = vsyncpa [#allocation4], 0 }
   0x3   :  { %14 = vsyncpa [#allocation4 + $0x1], 0 }
   0x4   :  { %15 = vsyncpa [#allocation7], 0 }
   0x5   :  { %16 = vsyncpa [#allocation5], 0 }
   0x6   :  { %18 = vsyncpa [#allocation5 + $0x1], 0  ;;  %s14113_s24 = smov 0   ;;  %s14115_s25 = smov 0  }
   0x7   :  { %s14117_s26 = smov 0   ;;  %s14119_s27 = smov 0  }
   0x8 LB: > { %s14134_s28 = sadd.s32 4294967295, %s14060_s27   ;;  %s11554_s29 = sadd.s32 4294967294, %s14060_s27   ;;  %s14060_s27 = sphi %s14119_s27, %s19358_s27   ;;  %s14056_s26 = sphi %s14117_s26, %s19357_s26   ;;  %s14052_s25 = sphi %s14115_s25, %s19356_s25   ;;  %s14048_s24 = sphi %s14113_s24, %s19355_s24  }
   0x9   : > { %p44_p0 = scmp.ne.s32.totalorder %s14052_s25, %s14048_s24  ;;  %p18943_p1 = scmp.eq.s32.totalorder %s14134_s28, 0 }
   0xa   : > { %p200_p3 = scmp.eq.s32.totalorder %s11554_s29, 1  ;;  %p11555_p5 = scmp.ge.s32.totalorder %s14060_s27, 1 }
   0xb   : > { %p14143_p4 = por %p18943_p1, %p44_p0  ;;  %p207_p7 = scmp.lt.s32.totalorder %s14060_s27, 3 }
   0xc   : > { %p14148_p6 = por %p200_p3, %p44_p0  ;;  %s14062_s10 = smov [#allocation6]  }
   0xd   : > { %s18973_s30 = scalar_select %p14143_p4, 1, 0 }
   0xe   : > { %s18974_s8 = scalar_select %p14148_p6, 1, 0 }
   0xf   : > { %p14153_p8 = pnand %p11555_p5, %p207_p7  ;;  %s219_s11 = sshll.u32 %s14062_s10, 4  ;;  %s220_s11 = int_to_ptr.vmem [resolvable:$true] %s219_s11 }
  0x10   : > { %s14063_s13 = smov [#allocation8]   ;;  %s13923_s15 = scalar_lea.vmem %s220_s11, 9216 }
  0x11   : > { %s18975_s9 = scalar_select %p14153_p8, 1, 0 }
  0x12   : > { %p13542_p9 = pneg %p14153_p8  ;;  %s238_s14 = sshll.u32 %s14063_s13, 4  ;;  %s239_s14 = int_to_ptr.vmem [resolvable:$true] %s238_s14 }
  0x13   : > { %p13924_p13 = scmp.ne.s32.totalorder %s220_s11, %s13923_s15  ;;  %p13931_p5 = scmp.lt.s32.totalorder %s220_s11, %s220_s11 }
  0x14   : > { %p14162_p11 = pnand %p13542_p9, %p18943_p1  ;;  %p13932_p7 = scmp.lt.s32.totalorder %s13923_s15, %s13923_s15 }
  0x16   : > { %p13914_p12 = pneg %p14162_p11  ;;  %p13933_p10 = por %p13932_p7, %p13931_p5 }
  0x18   : > { %p13926_p0 = pnand %p13924_p13, %p13914_p12 }
  0x1a   : > { %p13927_p3 = pneg %p13926_p0 }
  0x1c   : > { %p13934_p9 = pnand %p13933_p10, %p13927_p3 }
  0x1e   : > { %13937 = shalt.err (!%p13934_p9)
}
  0x1f   : > { %s14064_s16 = smov 64   ;;  %s14065_s17 = smov 4  }
  0x20   : > { %s18977_s1 = sld [smem:[#allocation76_spill]]  ;;  %s13949_s20 = scalar_lea.vmem %s239_s14, 9216 }
  0x21   : > { %p13950_p1 = scmp.ne.s32.totalorder %s239_s14, %s13949_s20  ;;  %p13957_p2 = scmp.lt.s32.totalorder %s239_s14, %s239_s14 }
  0x22   : > { %p13958_p6 = scmp.lt.s32.totalorder %s13949_s20, %s13949_s20 }
  0x23   : > { %p13952_p13 = pnand %p13950_p1, %p13914_p12 }
  0x24   : > { %p13959_p5 = por %p13958_p6, %p13957_p2 }
  0x25   : > { %p13953_p0 = pneg %p13952_p13 }
  0x26   : > { %13545 = dma.hbm_to_vmem [thread:$0]  (!%p14162_p11), %s18977_s1, 9216, %s220_s11, [#allocation7], %s14064_s16, %s14064_s16, %s14065_s17  }
  0x27   : > { %p13960_p10 = pnand %p13959_p5, %p13953_p0 }
  0x29   : > { %13963 = shalt.err (!%p13960_p10)
}
  0x2a   : > { %13548 = dma.hbm_to_vmem [thread:$0]  (!%p14162_p11), %s18939_s4, 9216, %s239_s14, [#allocation7], %s14064_s16, %s14064_s16, %s14065_s17  }
  0x2b   : > { %s14185_s23 = sadd.s32 1, %s14060_s27   ;;  %s31_s29 = sadd.s32 1, %s14056_s26 }
  0x2c   : > { %s28_s10 = ssub.s32 %s14060_s27, %s14185_s23  ;;  %p38_p1 = scmp.ne.s32.totalorder %s14056_s26, %s14052_s25 }
  0x2d   : > { %p29_p2 = scmp.eq.s32.totalorder %s28_s10, 0  ;;  %p39_p6 = scmp.eq.s32.totalorder %s14060_s27, 0 }
  0x2e   : > { %p18978_p12 = scmp.eq.s32.totalorder %s14134_s28, 1  ;;  %p13559_p7 = scmp.lt.s32.totalorder %s14060_s27, 2 }
  0x2f   : > { %s14201_s12 = scalar_select %p29_p2, %s14056_s26, %s31_s29  }
  0x30   : > { %p14195_p3 = por %p18978_p12, %p38_p1  ;;  %p40_p9 = por %p39_p6, %p38_p1 }
  0x31   : > { %s258_s13 = sand.u32 1, %s14056_s26   ;;  %s12168_s14 = sshll.u32 %s14060_s27, 12 }
  0x32   : > { %s18979_s11 = scalar_select %p14195_p3, 1, 0 }
  0x33   : > { %s11559_s15 = sshll.u32 %s258_s13, 8  ;;  %s14208_s18 = scalar_lea.hbm %s18935_s0, %s12168_s14 }
  0x34   : > { %s262_s19 = scalar_lea.vmem [#allocation3], %s11559_s15  ;;  %p14212_p11 = pnand %p13559_p7, %p40_p9 }
  0x35   : > { %s269_s20 = sshll.u32 %s262_s19, 4  ;;  %s14216_s22 = scalar_lea.sflag [#allocation4], %s258_s13  ;;  %s14210_s20 = int_to_ptr.vmem [resolvable:$true] %s269_s20 }
  0x36   : > { %s13964_s29 = scalar_lea.hbm %s14208_s18, 4096  ;;  %p13966_p0 = pneg %p14212_p11 }
  0x37   : > { %p13965_p13 = scmp.ne.s32.totalorder %s14208_s18, %s13964_s29  ;;  %s13969_s15 = scalar_lea.hbm %s18935_s0, 8192 }
  0x38   : > { %p13970_p1 = scmp.lt.s32.totalorder %s14208_s18, %s18935_s0  ;;  %p13971_p2 = scmp.lt.s32.totalorder %s13969_s15, %s13964_s29 }
  0x39   : > { %p13967_p5 = pnand %p13966_p0, %p13965_p13 }
  0x3a   : > { %p13972_p6 = por %p13971_p2, %p13970_p1 }
  0x3b   : > { %p13968_p10 = pneg %p13967_p5 }
  0x3d   : > { %p13973_p12 = pnand %p13972_p6, %p13968_p10 }
  0x3f   : > { %13976 = shalt.err (!%p13973_p12)
}
  0x40   : > { %s13977_s13 = scalar_lea.vmem %s14210_s20, 4096  ;;  %s14066_s19 = smov [#allocation3]  }
  0x41   : > { %p13978_p7 = scmp.ne.s32.totalorder %s14210_s20, %s13977_s13  ;;  %s13982_s1 = sshll.u32 %s14066_s19, 4  ;;  %s13983_s1 = int_to_ptr.vmem [resolvable:$false] %s13982_s1 }
  0x42   : > { %s13984_s10 = scalar_lea.vmem %s13983_s1, 8192  ;;  %p13985_p5 = scmp.lt.s32.totalorder %s14210_s20, %s13983_s1 }
  0x43   : > { %p13980_p9 = pnand %p13978_p7, %p13966_p0  ;;  %p13986_p3 = scmp.lt.s32.totalorder %s13984_s10, %s13977_s13 }
  0x45   : > { %p13981_p13 = pneg %p13980_p9  ;;  %p13987_p4 = por %p13986_p3, %p13985_p5 }
  0x47   : > { %p13988_p8 = pnand %p13987_p4, %p13981_p13 }
  0x49   : > { %13991 = shalt.err (!%p13988_p8)
}
  0x4a   : > { %s14067_s29 = smov 128   ;;  %s14068_s14 = smov 8  }
  0x4b   : > { %13552 = dma.hbm_to_vmem [thread:$0]  (!%p14212_p11), %s14208_s18, 4096, %s14210_s20, %s14216_s22, %s14067_s29, %s14067_s29, %s14068_s14  }
  0x4c   : > { %p18981_p0 = scmp.ne.s32.totalorder %s18975_s9, 0 }
  0x4e   : > { %281 = sbr.rel (%p18981_p0) target bundleno = 1308 (0x51c), region = 48 }
  0x53   : > { %s14240_s15 = sand.u32 1, %s14052_s25   ;;  %p18982_p4 = scmp.ne.s32.totalorder %s18973_s30, 0 }
  0x54   : > { %s11563_s1 = sshll.u32 %s14240_s15, 8  ;;  %s284_s16 = scalar_lea.sflag [#allocation4], %s14240_s15 }
  0x55   : > { %s14246_s17 = scalar_lea.vmem [#allocation3], %s11563_s1 }
  0x56   : > { %14035 = dma.done.wait (%p18982_p4), %s284_s16, 4096  }
  0x57   : > { %14037 = vsyncadd (%p18982_p4), %s284_s16, 4294963200  ;;  %p18983_p8 = scmp.eq.s32.totalorder %s14134_s28, 0 }
  0x59   : > { %14039 = dma.done.wait (%p18983_p8), [#allocation7], 18432   ;;  %p18984_p3 = pmov %p18983_p8 }
  0x5a   : > { %v14069_v0 = vmov 0   ;;  %v13604_v1 = vld [vmem:[#allocation6 + $0x78] sm:$0xff]   ;;  %v13606_v3 = vld [vmem:[#allocation6 + $0x70] sm:$0xff]   ;;  %v13608_v5 = vld [vmem:[#allocation6 + $0x68] sm:$0xff]   ;;  %vm366_vm0 = vcmask 1040384   ;;  %v18985_v9 = vmov 0 }
  0x5b   : > { %14041 = vsyncadd (%p18984_p3), [#allocation7], 4294948864  ;;  %359 = vst [vmem:[#allocation2] sm:$0xf] %v14069_v0  ;;  %v13605_v2 = vld [vmem:[#allocation6 + $0x38] sm:$0xff]   ;;  %12666 = vmatprep.subr.bf16.mxu0 %v13604_v1  ;;  %v13607_v4 = vld [vmem:[#allocation6 + $0x30] sm:$0xff]  }
  0x5c   : > { %360 = vst [vmem:[#allocation2 + $0x4] sm:$0xf] %v14069_v0  ;;  %361 = vst [vmem:[#allocation2 + $0x8] sm:$0x1] %v14069_v0  ;;  %12714 = vmatprep.subr.bf16.mxu1 %v13605_v2  ;;  %12667 = vmatpush3.bf16.msra.mxu0 %v13604_v1  ;;  %v13609_v6 = vld [vmem:[#allocation6 + $0x28] sm:$0xff]   ;;  %v13610_v7 = vld [vmem:[#allocation6 + $0x60] sm:$0xff]  }
  0x5d   : > { %363 = vst [vmem:[#allocation2 + $0xcc] sm:$0xf] %v14069_v0  ;;  %364 = vst [vmem:[#allocation2 + $0xd0] sm:$0xf] %v14069_v0  ;;  %12715 = vmatpush3.bf16.msra.mxu1 %v13605_v2  ;;  %12668 = vmatprep.subr.bf16.mxu0 %v13606_v3  ;;  %vm367_vm1 = vsmask.f32 256 }
  0x5e   : > { %365 = vst [vmem:[#allocation2 + $0xd4] sm:$0x1] %v14069_v0  ;;  %12716 = vmatprep.subr.bf16.mxu1 %v13607_v4  ;;  %vm423_vm2 = vsmask.f32 7938  ;;  %v13611_v8 = vld [vmem:[#allocation6 + $0x20] sm:$0xff]   ;;  %vm14257_vm3 = vmand %vm366_vm0, %vm367_vm1  ;;  %v13612_v11 = vld [vmem:[#allocation6 + $0x58] sm:$0xff]  }
  0x5f   : > { %v18986_v9 = vsel %vm14257_vm3, 4294967295, %v18985_v9  ;;  %vm14262_vm4 = vmand %vm366_vm0, %vm423_vm2  ;;  %v13613_v12 = vld [vmem:[#allocation6 + $0x18] sm:$0xff]   ;;  %vm575_vm5 = vsmask.f32 4368  ;;  %v13614_v13 = vld [vmem:[#allocation6 + $0x50] sm:$0xff]   ;;  %vm898_vm8 = vcmask 1043456  }
  0x60   : > { %12669 = vmatpush3.bf16.msra.mxu0 %v13606_v3  ;;  %18987 = vst [vmem:[#allocation13_spill] sm:$0xff] %v18986_v9  ;;  %v13615_v14 = vld [vmem:[#allocation6 + $0x10] sm:$0xff]   ;;  %vm1076_vm6 = vsmask.f32 3328  ;;  %vm1077_vm7 = vsmask.f32 7440  ;;  %vm14300_vm9 = vmor %vm367_vm1, %vm575_vm5 }
  0x61   : > { %12717 = vmatpush3.bf16.msra.mxu1 %v13607_v4  ;;  %12670 = vmatprep.subr.bf16.mxu0 %v13608_v5  ;;  %v327_v22 = vld [vmem:[%s14246_s17] sm:$0xff]  ;;  %v328_v23 = vld [vmem:[%s14246_s17 + $0x8] sm:$0xff]  ;;  %v372_v25 = vld [vmem:[#allocation2 + $0xc] sm:$0x1]  ;;  %v18990_v56 = vmov 0  ;;  %v18993_v62 = vmov 0 }
  0x62   : > { %12718 = vmatprep.subr.bf16.mxu1 %v13609_v6  ;;  %v369_v15 = vld [vmem:[#allocation2] sm:$0x1]  ;;  %v428_v26 = vld [vmem:[#allocation2 + $0x14] sm:$0x1]  ;;  %v12169_v27 = vpack.c.bf16 %v327_v22, %v327_v22  ;;  %v12170_v28 = vpack.c.bf16 %v328_v23, %v328_v23  ;;  %v373_v31 = vsel %vm14257_vm3, 0, %v372_v25  ;;  %v329_v38 = vld [vmem:[%s14246_s17 + $0x10] sm:$0xff] }
  0x63   : > { %v425_v16 = vld [vmem:[#allocation2 + $0x8] sm:$0x1]  ;;  %v14266_v17 = vld [vmem:[#allocation2 + $0x4] sm:$0xf]  ;;  %v370_v18 = vsel %vm14257_vm3, 0, %v369_v15  ;;  %v429_v32 = vsel %vm14262_vm4, 0, %v428_v26  ;;  %v12171_v43 = vpack.c.bf16 %v329_v38, %v329_v38  ;;  %vm14306_vm10 = vmand %vm898_vm8, %vm423_vm2 }
  0x64   : > { %12671 = vmatpush3.bf16.msra.mxu0 %v13608_v5  ;;  %v426_v19 = vsel %vm14262_vm4, 0, %v425_v16  ;;  %v1089_v20 = vshll.u32 %v14266_v17, 16  ;;  %v1093_v21 = vshrl.u32 %v14266_v17, 16  ;;  %v14276_v24 = vld [vmem:[#allocation6 + $0x48] sm:$0xff]   ;;  %371 = vst [vmem:[#allocation2] sm:$0x1] %v370_v18  ;;  %vm14318_vm11 = vmor %vm1076_vm6, %vm1077_vm7 }
  0x65   : > { %12719 = vmatpush3.bf16.msra.mxu1 %v13609_v6  ;;  %12672 = vmatprep.subr.bf16.mxu0 %v13610_v7  ;;  %427 = vst [vmem:[#allocation2 + $0x8] sm:$0x1] %v426_v19  ;;  %v13617_v33 = vld [vmem:[#allocation6 + $0x8] sm:$0xff]   ;;  %374 = vst [vmem:[#allocation2 + $0xc] sm:$0x1] %v373_v31  ;;  %v578_v34 = vshrl.u32 %v12169_v27, 16 }
  0x66   : > { %12720 = vmatprep.subr.bf16.mxu1 %v13611_v8  ;;  %v14278_v29 = vrot.slane %v1089_v20, 5  ;;  %v1095_v30 = vrot.slane %v1093_v21, 4  ;;  %430 = vst [vmem:[#allocation2 + $0x14] sm:$0x1] %v429_v32  ;;  %v581_v35 = vshll.u32 %v12169_v27, 16  ;;  %v586_v36 = vshrl.u32 %v12170_v28, 16 }
  0x67   : > { %v589_v37 = vshll.u32 %v12170_v28, 16  ;;  %v330_v40 = vld [vmem:[%s14246_s17 + $0x18] sm:$0xff]  ;;  %v375_v41 = vld [vmem:[#allocation2 + $0x18] sm:$0x1]  ;;  %v431_v42 = vld [vmem:[#allocation2 + $0x20] sm:$0x1] }
  0x68   : > { %12673 = vmatpush3.bf16.msra.mxu0 %v13610_v7  ;;  %v1096_v39 = vor.u32 %v1095_v30, %v14278_v29  ;;  %v580_v44 = vrot.slane %v578_v34, 7  ;;  %v588_v45 = vrot.slane %v586_v36, 7  ;;  %v376_v46 = vsel %vm14257_vm3, 0, %v375_v41  ;;  %v331_v48 = vld [vmem:[%s14246_s17 + $0x20] sm:$0xff]  ;;  %v332_v55 = vld [vmem:[%s14246_s17 + $0x28] sm:$0xff]  ;;  %v14327_v23 = vld [vmem:[#allocation6 + $0xb8] sm:$0xff]  }
  0x69   : > { %12721 = vmatpush3.bf16.msra.mxu1 %v13611_v8  ;;  %12674 = vmatprep.subr.bf16.mxu0 %v13612_v11  ;;  %v432_v47 = vsel %vm14262_vm4, 0, %v431_v42  ;;  %v13618_v49 = vld [vmem:[#allocation6 + $0x40] sm:$0xff]   ;;  %377 = vst [vmem:[#allocation2 + $0x18] sm:$0x1] %v376_v46  ;;  %v12172_v52 = vpack.c.bf16 %v330_v40, %v330_v40  ;;  %v595_v53 = vshrl.u32 %v12171_v43, 16  ;;  %v598_v54 = vshll.u32 %v12171_v43, 16 }
  0x6a   : > { %12722 = vmatprep.subr.bf16.mxu1 %v13613_v12  ;;  %v14292_v50 = vld [vmem:[#allocation6] sm:$0xff]   ;;  %v14294_v51 = vrot.slane %v1096_v39, 4  ;;  %433 = vst [vmem:[#allocation2 + $0x20] sm:$0x1] %v432_v47  ;;  %v18991_v56 = vsel %vm14300_vm9, 4294967295, %v18990_v56  ;;  %v583_v57 = vor.u32 %v581_v35, %v580_v44  ;;  %v584_v58 = vrot.slane %v580_v44, 4 }
  0x6b   : > { %18992 = vst [vmem:[#allocation14_spill] sm:$0xff] %v18991_v56  ;;  %v591_v59 = vor.u32 %v589_v37, %v588_v45  ;;  %v593_v60 = vrot.slane %v588_v45, 4  ;;  %v378_v61 = vld [vmem:[#allocation2 + $0x24] sm:$0x1]  ;;  %v18994_v62 = vsel %vm14306_vm10, 4294967295, %v18993_v62  ;;  %v597_v1 = vrot.slane %v595_v53, 7 }
  0x6c   : > { %12675 = vmatpush3.bf16.msra.mxu0 %v13612_v11  ;;  %18995 = vst [vmem:[#allocation15_spill] sm:$0xff] %v18994_v62  ;;  %v1012_v63 = vld [vmem:[#allocation2] sm:$0xf]  ;;  %v14310_v0 = vld [vmem:[#allocation2 + $0x8] sm:$0x1]  ;;  %v603_v2 = vshrl.u32 %v12172_v52, 16  ;;  %v12173_v4 = vpack.c.bf16 %v331_v48, %v331_v48  ;;  %v14313_v8 = vpack.c.bf16 %v332_v55, %v332_v55 }
  0x6d   : > { %12723 = vmatpush3.bf16.msra.mxu1 %v13613_v12  ;;  %12676 = vmatprep.subr.bf16.mxu0 %v13614_v13  ;;  %v434_v3 = vld [vmem:[#allocation2 + $0x2c] sm:$0x1]  ;;  %v1080_v5 = vshrl.u32 %v1012_v63, 16  ;;  %v1083_v6 = vshll.u32 %v1012_v63, 16  ;;  %v1099_v7 = vshll.u32 %v14310_v0, 16  ;;  %v18996_v11 = vmov 0 }
  0x6e   : > { %12724 = vmatprep.subr.bf16.mxu1 %v13615_v14  ;;  %v18997_v11 = vsel %vm14318_vm11, 4294967295, %v18996_v11  ;;  %v11623_v12 = vcombine.low %v1012_v63, %v14266_v17  ;;  %v904_v15 = vld [vmem:[#allocation2 + $0x14] sm:$0x1]  ;;  %v600_v16 = vor.u32 %v598_v54, %v597_v1  ;;  %v601_v18 = vrot.slane %v597_v1, 4  ;;  %v437_v28 = vld [vmem:[#allocation2 + $0x38] sm:$0x1] }
  0x6f   : > { %18998 = vst [vmem:[#allocation16_spill] sm:$0xff] %v18997_v11  ;;  %v1082_v19 = vrot.slane %v1080_v5, 4  ;;  %v1085_v20 = vrot.slane %v1083_v6, 5  ;;  %v1101_v21 = vrot.slane %v1099_v7, 5  ;;  %v905_v17 = vsel %vm14257_vm3, %v593_v60, %v904_v15  ;;  %v333_v40 = vld [vmem:[%s14246_s17 + $0x30] sm:$0xff]  ;;  %v334_v54 = vld [vmem:[%s14246_s17 + $0x38] sm:$0xff] }
  0x70   : > { %12677 = vmatpush3.bf16.msra.mxu0 %v13614_v13  ;;  %v592_v13 = vsel %vm14300_vm9, %v584_v58, %v591_v59  ;;  %12730 = vmatprep.mubr.bf16.mxu1 %v11623_v12  ;;  %v605_v25 = vrot.slane %v603_v2, 7  ;;  %v606_v26 = vshll.u32 %v12172_v52, 16  ;;  %v379_v27 = vsel %vm14257_vm3, 0, %v378_v61  ;;  %906 = vst [vmem:[#allocation2 + $0x14] sm:$0x1] %v905_v17  ;;  %v335_v60 = vld [vmem:[%s14246_s17 + $0x40] sm:$0xff] }
  0x71   : > { %12725 = vmatpush3.bf16.msra.mxu1 %v13615_v14  ;;  %12678 = vmatprep.subr.bf16.mxu0 %v14276_v24  ;;  %v900_v14 = vld [vmem:[#allocation2 + $0xc] sm:$0xf]  ;;  %903 = vst [vmem:[#allocation2 + $0x10] sm:$0xf] %v592_v13  ;;  %v1086_v30 = vor.u32 %v1085_v20, %v1082_v19  ;;  %v1102_v31 = vsel %vm14318_vm11, %v14294_v51, %v1101_v21  ;;  %v907_v32 = vld [vmem:[#allocation2 + $0x18] sm:$0xf] }
  0x72   : > { %12726 = vmatprep.subr.bf16.mxu1 %v13617_v33  ;;  %v901_v22 = vsel %vm14306_vm10, %v583_v57, %v900_v14  ;;  %380 = vst [vmem:[#allocation2 + $0x24] sm:$0x1] %v379_v27  ;;  %v435_v34 = vsel %vm14262_vm4, 0, %v434_v3  ;;  %v612_v35 = vshrl.u32 %v12173_v4, 16  ;;  %v608_v36 = vor.u32 %v606_v26, %v605_v25  ;;  %v384_v45 = vld [vmem:[#allocation2 + $0x3c] sm:$0x1] }
  0x73   : > { %902 = vst [vmem:[#allocation2 + $0xc] sm:$0xf] %v901_v22  ;;  %v610_v37 = vrot.slane %v605_v25, 4  ;;  %v908_v38 = vsel %vm14306_vm10, %v600_v16, %v907_v32  ;;  %436 = vst [vmem:[#allocation2 + $0x2c] sm:$0x1] %v435_v34  ;;  %v615_v39 = vshll.u32 %v12173_v4, 16  ;;  %v12175_v59 = vpack.c.bf16 %v333_v40, %v333_v40 }
  0x74   : > { %12679 = vmatpush3.bf16.msra.mxu0 %v14276_v24  ;;  %v381_v24 = vld [vmem:[#allocation2 + $0x30] sm:$0x1]  ;;  %v1087_v41 = vrot.slane %v1086_v30, 4  ;;  %909 = vst [vmem:[#allocation2 + $0x18] sm:$0xf] %v908_v38  ;;  %v614_v42 = vrot.slane %v612_v35, 7  ;;  %v609_v46 = vsel %vm14300_vm9, %v601_v18, %v608_v36  ;;  %v14362_v12 = vpack.c.bf16 %v334_v54, %v334_v54 }
  0x75   : > { %12727 = vmatpush3.bf16.msra.mxu1 %v13617_v33  ;;  %12680 = vmatprep.subr.bf16.mxu0 %v13618_v49  ;;  %v911_v33 = vld [vmem:[#allocation2 + $0x20] sm:$0x1]  ;;  %v620_v43 = vshrl.u32 %v14313_v8, 16  ;;  %v623_v44 = vshll.u32 %v14313_v8, 16  ;;  %v382_v48 = vsel %vm14257_vm3, 0, %v381_v24  ;;  %v2113_v51 = vrot.slane %v14310_v0, 5 }
  0x76   : > { %12728 = vmatprep.subr.bf16.mxu1 %v14292_v50  ;;  %v912_v47 = vsel %vm14257_vm3, %v610_v37, %v911_v33  ;;  %910 = vst [vmem:[#allocation2 + $0x1c] sm:$0xf] %v609_v46  ;;  %v617_v52 = vor.u32 %v615_v39, %v614_v42  ;;  %383 = vst [vmem:[#allocation2 + $0x30] sm:$0x1] %v382_v48  ;;  %v618_v58 = vrot.slane %v614_v42, 4  ;;  %v385_v61 = vsel %vm14257_vm3, 0, %v384_v45 }
  0x77   : > { %913 = vst [vmem:[#allocation2 + $0x20] sm:$0x1] %v912_v47  ;;  %v622_v53 = vrot.slane %v620_v43, 7  ;;  %386 = vst [vmem:[#allocation2 + $0x3c] sm:$0x1] %v385_v61  ;;  %v14364_v18 = vpack.c.bf16 %v335_v60, %v335_v60  ;;  %v629_v33 = vshrl.u32 %v12175_v59, 16 }
  0x78   : > { %12681 = vmatpush3.bf16.msra.mxu0 %v13618_v49  ;;  %v438_v49 = vsel %vm14262_vm4, 0, %v437_v28  ;;  %v1015_v57 = vld [vmem:[#allocation2 + $0x10] sm:$0xf]  ;;  %v1061_v4 = vld [vmem:[#allocation2 + $0x14] sm:$0x1]  ;;  %v632_v34 = vshll.u32 %v12175_v59, 16 }
  0x79   : > { %12729 = vmatpush3.bf16.msra.mxu1 %v14292_v50  ;;  %12762 = vmatprep.subr.bf16.mxu0 %v14327_v23  ;;  %v1092_v50 = vsel %vm14318_vm11, %v1087_v41, %v14278_v29  ;;  %439 = vst [vmem:[#allocation2 + $0x38] sm:$0x1] %v438_v49  ;;  %v1113_v1 = vshll.u32 %v1015_v57, 16  ;;  %v1117_v29 = vshrl.u32 %v1015_v57, 16  ;;  %v625_v2 = vor.u32 %v623_v44, %v622_v53  ;;  %v914_v8 = vld [vmem:[#allocation2 + $0x24] sm:$0xf] }
  0x7a   : > { %v11599_v55 = vcombine.low %v1092_v50, %v1102_v31  ;;  %v1014_v63 = vld [vmem:[#allocation2 + $0xc] sm:$0xf]  ;;  %v627_v3 = vrot.slane %v622_v53, 4  ;;  %v1123_v15 = vshll.u32 %v1061_v4, 16  ;;  %v915_v24 = vsel %vm14306_vm10, %v617_v52, %v914_v8  ;;  %v336_v47 = vld [vmem:[%s14246_s17 + $0x48] sm:$0xff]  ;;  %s18685_s30 = scalar_lea.vmem [#allocation9], %s11563_s1 }
  0x7b   : > { %v1104_v5 = vshrl.u32 %v1014_v63, 16  ;;  %v1107_v6 = vshll.u32 %v1014_v63, 16  ;;  %v11624_v7 = vcombine.low %v1014_v63, %v1015_v57  ;;  %v1115_v13 = vrot.slane %v1113_v1, 5  ;;  %v918_v16 = vld [vmem:[#allocation2 + $0x2c] sm:$0x1]  ;;  %s12233_s1 = sshll.u32 %s14134_s28, 12 }
  0x7c   : > { %12682 = vmatprep.mubr.bf16.mxu0 %v11599_v55  ;;  %v1119_v14 = vrot.slane %v1117_v29, 4  ;;  %v1016_v21 = vld [vmem:[#allocation2 + $0x18] sm:$0xf]  ;;  %v626_v22 = vsel %vm14300_vm9, %v618_v58, %v625_v2  ;;  %v1125_v25 = vrot.slane %v1123_v15, 5  ;;  %916 = vst [vmem:[#allocation2 + $0x24] sm:$0xf] %v915_v24  ;;  %v919_v32 = vsel %vm14257_vm3, %v627_v3, %v918_v16  ;;  %s18888_s21 = scalar_lea.hbm %s18942_s7, %s12233_s1 }
  0x7d   : > { %v1106_v19 = vrot.slane %v1104_v5, 4  ;;  %v1109_v20 = vrot.slane %v1107_v6, 5  ;;  %12731 = vmatmul.mubr.bf16.vlgmr.msra.gmra.mxu1 %v11624_v7  ;;  %v1128_v26 = vshrl.u32 %v1016_v21, 16  ;;  %v1131_v27 = vshll.u32 %v1016_v21, 16  ;;  %917 = vst [vmem:[#allocation2 + $0x28] sm:$0xf] %v626_v22 }
  0x7e   : > { %v1120_v17 = vor.u32 %v1119_v14, %v1115_v13  ;;  %v1017_v30 = vld [vmem:[#allocation2 + $0x1c] sm:$0xf]  ;;  %v1062_v31 = vld [vmem:[#allocation2 + $0x20] sm:$0x1]  ;;  %920 = vst [vmem:[#allocation2 + $0x2c] sm:$0x1] %v919_v32  ;;  %v14379_v29 = vpack.c.bf16 %v336_v47, %v336_v47 }
  0x7f   : > { %v1110_v28 = vor.u32 %v1109_v20, %v1106_v19  ;;  %v1130_v36 = vrot.slane %v1128_v26, 4  ;;  %v1133_v37 = vrot.slane %v1131_v27, 5  ;;  %v1137_v38 = vshll.u32 %v1017_v30, 16  ;;  %v13625_v55 = vld [vmem:[#allocation6 + $0xb0] sm:$0xff]   ;;  %v440_v6 = vld [vmem:[#allocation2 + $0x44] sm:$0x1] }
  0x80   : > { %v1121_v35 = vrot.slane %v1120_v17, 4  ;;  %v1141_v40 = vshrl.u32 %v1017_v30, 16  ;;  %v1147_v41 = vshll.u32 %v1062_v31, 16  ;;  %v11625_v42 = vcombine.low %v1016_v21, %v1017_v30  ;;  %v13628_v7 = vld [vmem:[#allocation6 + $0xa8] sm:$0xff]   ;;  %v925_v24 = vld [vmem:[#allocation2 + $0x38] sm:$0x1] }
  0x81   : > { %v1111_v39 = vrot.slane %v1110_v28, 4  ;;  %v1134_v44 = vor.u32 %v1133_v37, %v1130_v36  ;;  %v1139_v45 = vrot.slane %v1137_v38, 5  ;;  %v631_v46 = vrot.slane %v629_v33, 7  ;;  %v387_v17 = vld [vmem:[#allocation2 + $0x48] sm:$0x1]  ;;  %v338_v31 = vld [vmem:[%s14246_s17 + $0x58] sm:$0xff] }
  0x82   : > { %v1126_v43 = vsel %vm14318_vm11, %v1121_v35, %v1125_v25  ;;  %v1143_v49 = vrot.slane %v1141_v40, 4  ;;  %v1149_v50 = vrot.slane %v1147_v41, 5  ;;  %12734 = vmatprep.mubr.bf16.mxu1 %v11625_v42  ;;  %v637_v52 = vshrl.u32 %v14362_v12, 16  ;;  %v443_v25 = vld [vmem:[#allocation2 + $0x50] sm:$0x1]  ;;  %v337_v30 = vld [vmem:[%s14246_s17 + $0x50] sm:$0xff] }
  0x83   : > { %v1116_v48 = vsel %vm14318_vm11, %v1111_v39, %v1115_v13  ;;  %v1135_v54 = vrot.slane %v1134_v44, 4  ;;  %v634_v57 = vor.u32 %v632_v34, %v631_v46  ;;  %v635_v58 = vrot.slane %v631_v46, 4  ;;  %v1018_v60 = vld [vmem:[#allocation2 + $0x24] sm:$0xf]  ;;  %v390_v36 = vld [vmem:[#allocation2 + $0x54] sm:$0x1] }
  0x84   : > { %v11600_v53 = vcombine.low %v1116_v48, %v1126_v43  ;;  %v1144_v59 = vor.u32 %v1143_v49, %v1139_v45  ;;  %v1019_v61 = vld [vmem:[#allocation2 + $0x28] sm:$0xf]  ;;  %v639_v63 = vrot.slane %v637_v52, 7  ;;  %v640_v1 = vshll.u32 %v14362_v12, 16  ;;  %v921_v12 = vld [vmem:[#allocation2 + $0x30] sm:$0xf] }
  0x85   : > { %v1140_v2 = vsel %vm14318_vm11, %v1135_v54, %v1139_v45  ;;  %v1152_v3 = vshrl.u32 %v1018_v60, 16  ;;  %v1155_v4 = vshll.u32 %v1018_v60, 16  ;;  %v1161_v5 = vshll.u32 %v1019_v61, 16  ;;  %v1063_v13 = vld [vmem:[#allocation2 + $0x2c] sm:$0x1]  ;;  %v13635_v37 = vld [vmem:[#allocation6 + $0xf8] sm:$0xff]  }
  0x86   : > { %12683 = vmatmul.mubr.bf16.vlgmr.msra.gmra.mxu0 %v11600_v53  ;;  %v1145_v8 = vrot.slane %v1144_v59, 4  ;;  %v1165_v14 = vshrl.u32 %v1019_v61, 16  ;;  %v11626_v15 = vcombine.low %v1018_v60, %v1019_v61  ;;  %v642_v16 = vor.u32 %v640_v1, %v639_v63  ;;  %v13631_v46 = vld [vmem:[#allocation6 + $0xa0] sm:$0xff]   ;;  %v13636_v47 = vld [vmem:[#allocation6 + $0xf0] sm:$0xff]   ;;  %12810 = vmatprep.subr.bf16.mxu1 %v13635_v37  ;;  %v13634_v1 = vld [vmem:[#allocation6 + $0x98] sm:$0xff]   ;;  %s11462_s9 = sshll.u32 %s18685_s30, 4  ;;  %s18890_s9 = int_to_ptr.vmem [resolvable:$true] %s11462_s9 }
  0x87   : > { %12763 = vmatpush3.bf16.msra.mxu0 %v14327_v23  ;;  %v1154_v19 = vrot.slane %v1152_v3, 4  ;;  %v1157_v20 = vrot.slane %v1155_v4, 5  ;;  %v1163_v21 = vrot.slane %v1161_v5, 5  ;;  %v1171_v22 = vshll.u32 %v1063_v13, 16  ;;  %v928_v54 = vld [vmem:[#allocation2 + $0x3c] sm:$0xf]  ;;  %12811 = vmatpush3.bf16.msra.mxu1 %v13635_v37 }
  0x88   : > { %12764 = vmatprep.subr.bf16.mxu0 %v13625_v55  ;;  %v1150_v26 = vsel %vm14318_vm11, %v1145_v8, %v1149_v50  ;;  %v1167_v23 = vrot.slane %v1165_v14, 4  ;;  %12735 = vmatmul.mubr.bf16.gmra.mxu1 %v11626_v15  ;;  %v643_v27 = vsel %vm14300_vm9, %v635_v58, %v642_v16  ;;  %v644_v28 = vrot.slane %v639_v63, 4  ;;  %v339_v61 = vld [vmem:[%s14246_s17 + $0x60] sm:$0xff]  ;;  %s11449_s28 = scalar_lea.sflag [#allocation5], %s14240_s15  ;;  %s13992_s22 = scalar_lea.vmem %s18890_s9, 4096 }
  0x89   : > { %v11601_v32 = vcombine.low %v1140_v2, %v1150_v26  ;;  %v1158_v33 = vor.u32 %v1157_v20, %v1154_v19  ;;  %v1173_v34 = vrot.slane %v1171_v22, 5  ;;  %v922_v35 = vsel %vm14306_vm10, %v634_v57, %v921_v12  ;;  %924 = vst [vmem:[#allocation2 + $0x34] sm:$0xf] %v643_v27  ;;  %12812 = vmatprep.subr.bf16.mxu1 %v13636_v47  ;;  %v446_v14 = vld [vmem:[#allocation2 + $0x5c] sm:$0x1]  ;;  %v13639_v22 = vld [vmem:[#allocation6 + $0x90] sm:$0xff]   ;;  %p13993_p11 = scmp.ne.s32.totalorder %s18890_s9, %s13992_s22 }
  0x8a   : > { %v1168_v38 = vor.u32 %v1167_v23, %v1163_v21  ;;  %923 = vst [vmem:[#allocation2 + $0x30] sm:$0xf] %v922_v35  ;;  %v926_v39 = vsel %vm14257_vm3, %v644_v28, %v925_v24  ;;  %v441_v40 = vsel %vm14262_vm4, 0, %v440_v6  ;;  %v646_v41 = vshrl.u32 %v14364_v18, 16  ;;  %v13640_v24 = vld [vmem:[#allocation6 + $0xe8] sm:$0xff]   ;;  %p19352_p10 = scmp.ne.s32.totalorder %s18979_s11, 0 }
  0x8b   : > { %12765 = vmatpush3.bf16.msra.mxu0 %v13625_v55  ;;  %12686 = vmatprep.mubr.bf16.mxu0 %v11601_v32  ;;  %v1159_v42 = vrot.slane %v1158_v33, 4  ;;  %927 = vst [vmem:[#allocation2 + $0x38] sm:$0x1] %v926_v39  ;;  %442 = vst [vmem:[#allocation2 + $0x44] sm:$0x1] %v441_v40  ;;  %v649_v43 = vshll.u32 %v14364_v18, 16  ;;  %v12179_v55 = vpack.c.bf16 %v337_v30, %v337_v30 }
  0x8c   : > { %v654_v44 = vshrl.u32 %v14379_v29, 16  ;;  %v657_v45 = vshll.u32 %v14379_v29, 16  ;;  %12766 = vmatprep.subr.bf16.mxu0 %v13628_v7  ;;  %v1169_v48 = vrot.slane %v1168_v38, 4  ;;  %v648_v49 = vrot.slane %v646_v41, 7  ;;  %12813 = vmatpush3.bf16.msra.mxu1 %v13636_v47  ;;  %p13994_p1 = pnand %p13993_p11, %p19352_p10 }
  0x8d   : > { %v388_v50 = vsel %vm14257_vm3, 0, %v387_v17  ;;  %v444_v52 = vsel %vm14262_vm4, 0, %v443_v25  ;;  %v1164_v18 = vsel %vm14318_vm11, %v1159_v42, %v1163_v21  ;;  %v14406_v57 = vpack.c.bf16 %v338_v31, %v338_v31  ;;  %v340_v21 = vld [vmem:[%s14246_s17 + $0x68] sm:$0xff]  ;;  %12814 = vmatprep.subr.bf16.mxu1 %v13640_v24 }
  0x8e   : > { %v656_v53 = vrot.slane %v654_v44, 7  ;;  %389 = vst [vmem:[#allocation2 + $0x48] sm:$0x1] %v388_v50  ;;  %445 = vst [vmem:[#allocation2 + $0x50] sm:$0x1] %v444_v52  ;;  %v1174_v58 = vsel %vm14318_vm11, %v1169_v48, %v1173_v34  ;;  %v651_v59 = vor.u32 %v649_v43, %v648_v49  ;;  %v652_v60 = vrot.slane %v648_v49, 4  ;;  %p13995_p2 = pneg %p13994_p1 }
  0x8f   : > { %12767 = vmatpush3.bf16.msra.mxu0 %v13628_v7  ;;  %v391_v63 = vsel %vm14257_vm3, 0, %v390_v36  ;;  %v11602_v29 = vcombine.low %v1164_v18, %v1174_v58  ;;  %v663_v4 = vshrl.u32 %v12179_v55, 16  ;;  %v666_v8 = vshll.u32 %v12179_v55, 16  ;;  %v13641_v34 = vld [vmem:[#allocation6 + $0xe0] sm:$0xff]  }
  0x90   : > { %v659_v2 = vor.u32 %v657_v45, %v656_v53  ;;  %v661_v3 = vrot.slane %v656_v53, 4  ;;  %392 = vst [vmem:[#allocation2 + $0x54] sm:$0x1] %v391_v63  ;;  %12768 = vmatprep.subr.bf16.mxu0 %v13631_v46  ;;  %v1021_v5 = vld [vmem:[#allocation2 + $0x34] sm:$0xf]  ;;  %v929_v6 = vsel %vm14306_vm10, %v651_v59, %v928_v54  ;;  %v671_v7 = vshrl.u32 %v14406_v57, 16  ;;  %12815 = vmatpush3.bf16.msra.mxu1 %v13640_v24 }
  0x91   : > { %v674_v13 = vshll.u32 %v14406_v57, 16  ;;  %12687 = vmatmul.mubr.bf16.gmra.mxu0 %v11602_v29  ;;  %v1020_v15 = vld [vmem:[#allocation2 + $0x30] sm:$0xf]  ;;  %v1185_v16 = vshll.u32 %v1021_v5, 16  ;;  %v1189_v12 = vshrl.u32 %v1021_v5, 16  ;;  %v665_v20 = vrot.slane %v663_v4, 7  ;;  %12816 = vmatprep.subr.bf16.mxu1 %v13641_v34 }
  0x92   : > { %v660_v19 = vsel %vm14300_vm9, %v652_v60, %v659_v2  ;;  %930 = vst [vmem:[#allocation2 + $0x3c] sm:$0xf] %v929_v6  ;;  %v1064_v17 = vld [vmem:[#allocation2 + $0x38] sm:$0x1]  ;;  %v1176_v25 = vshrl.u32 %v1020_v15, 16  ;;  %v1179_v26 = vshll.u32 %v1020_v15, 16  ;;  %v11627_v23 = vcombine.low %v1020_v15, %v1021_v5 }
  0x93   : > { %931 = vst [vmem:[#allocation2 + $0x40] sm:$0xf] %v660_v19  ;;  %v932_v27 = vld [vmem:[#allocation2 + $0x44] sm:$0x1]  ;;  %v14420_v28 = vpack.c.bf16 %v339_v61, %v339_v61  ;;  %12769 = vmatpush3.bf16.msra.mxu0 %v13631_v46  ;;  %v1187_v30 = vrot.slane %v1185_v16, 5  ;;  %v1191_v31 = vrot.slane %v1189_v12, 4  ;;  %v668_v37 = vor.u32 %v666_v8, %v665_v20 }
  0x94   : > { %v1195_v32 = vshll.u32 %v1064_v17, 16  ;;  %v933_v33 = vsel %vm14257_vm3, %v661_v3, %v932_v27  ;;  %12770 = vmatprep.subr.bf16.mxu0 %v13634_v1  ;;  %v1178_v35 = vrot.slane %v1176_v25, 4  ;;  %v1181_v36 = vrot.slane %v1179_v26, 5  ;;  %12738 = vmatprep.mubr.bf16.mxu1 %v11627_v23  ;;  %v393_v5 = vld [vmem:[#allocation2 + $0x60] sm:$0x1]  ;;  %v341_v26 = vld [vmem:[%s14246_s17 + $0x70] sm:$0xff] }
  0x95   : > { %934 = vst [vmem:[#allocation2 + $0x44] sm:$0x1] %v933_v33  ;;  %v669_v38 = vrot.slane %v665_v20, 4  ;;  %v935_v39 = vld [vmem:[#allocation2 + $0x48] sm:$0xf]  ;;  %v1192_v40 = vor.u32 %v1191_v31, %v1187_v30  ;;  %v673_v42 = vrot.slane %v671_v7, 7  ;;  %v12182_v47 = vpack.c.bf16 %v340_v21, %v340_v21  ;;  %12817 = vmatpush3.bf16.msra.mxu1 %v13641_v34 }
  0x96   : > { %v1197_v41 = vrot.slane %v1195_v32, 5  ;;  %v447_v43 = vsel %vm14262_vm4, 0, %v446_v14  ;;  %v1182_v44 = vor.u32 %v1181_v36, %v1178_v35  ;;  %v936_v45 = vsel %vm14306_vm10, %v668_v37, %v935_v39  ;;  %v939_v46 = vld [vmem:[#allocation2 + $0x50] sm:$0x1]  ;;  %v449_v6 = vld [vmem:[#allocation2 + $0x68] sm:$0x1] }
  0x97   : > { %448 = vst [vmem:[#allocation2 + $0x5c] sm:$0x1] %v447_v43  ;;  %v680_v48 = vshrl.u32 %v14420_v28, 16  ;;  %12771 = vmatpush3.bf16.msra.mxu0 %v13634_v1  ;;  %v1193_v49 = vrot.slane %v1192_v40, 4  ;;  %v676_v50 = vor.u32 %v674_v13, %v673_v42  ;;  %v678_v52 = vrot.slane %v673_v42, 4  ;;  %v13644_v24 = vld [vmem:[#allocation6 + $0x88] sm:$0xff]  }
  0x98   : > { %937 = vst [vmem:[#allocation2 + $0x48] sm:$0xf] %v936_v45  ;;  %v683_v18 = vshll.u32 %v14420_v28, 16  ;;  %12772 = vmatprep.subr.bf16.mxu0 %v13639_v22  ;;  %v1183_v53 = vrot.slane %v1182_v44, 4  ;;  %v688_v57 = vshrl.u32 %v12182_v47, 16  ;;  %v691_v58 = vshll.u32 %v12182_v47, 16 }
  0x99   : > { %v1022_v54 = vld [vmem:[#allocation2 + $0x3c] sm:$0xf]  ;;  %v14430_v55 = vrot.slane %v680_v48, 7  ;;  %v1198_v59 = vsel %vm14318_vm11, %v1193_v49, %v1197_v41  ;;  %v677_v1 = vsel %vm14300_vm9, %v669_v38, %v676_v50  ;;  %v940_v15 = vsel %vm14257_vm3, %v678_v52, %v939_v46  ;;  %v942_v16 = vld [vmem:[#allocation2 + $0x54] sm:$0xf]  ;;  %v13646_v40 = vld [vmem:[#allocation6 + $0xd0] sm:$0xff]  }
  0x9a   : > { %v1023_v60 = vld [vmem:[#allocation2 + $0x40] sm:$0xf]  ;;  %v1200_v61 = vshrl.u32 %v1022_v54, 16  ;;  %v1203_v63 = vshll.u32 %v1022_v54, 16  ;;  %v1188_v29 = vsel %vm14318_vm11, %v1183_v53, %v1187_v30  ;;  %938 = vst [vmem:[#allocation2 + $0x4c] sm:$0xf] %v677_v1  ;;  %v12183_v43 = vpack.c.bf16 %v341_v26, %v341_v26 }
  0x9b   : > { %v1209_v2 = vshll.u32 %v1023_v60, 16  ;;  %v1213_v3 = vshrl.u32 %v1023_v60, 16  ;;  %v11628_v4 = vcombine.low %v1022_v54, %v1023_v60  ;;  %12773 = vmatpush3.bf16.msra.mxu0 %v13639_v22  ;;  %v11603_v8 = vcombine.low %v1188_v29, %v1198_v59  ;;  %941 = vst [vmem:[#allocation2 + $0x50] sm:$0x1] %v940_v15  ;;  %v342_v23 = vld [vmem:[%s14246_s17 + $0x78] sm:$0xff]  ;;  %v343_v60 = vld [vmem:[%s14246_s17 + $0x80] sm:$0xff] }
  0x9c   : > { %v1065_v7 = vld [vmem:[#allocation2 + $0x44] sm:$0x1]  ;;  %v1202_v13 = vrot.slane %v1200_v61, 4  ;;  %v1205_v14 = vrot.slane %v1203_v63, 5  ;;  %v685_v21 = vor.u32 %v683_v18, %v14430_v55  ;;  %v686_v17 = vrot.slane %v14430_v55, 4  ;;  %v13645_v28 = vld [vmem:[#allocation6 + $0xd8] sm:$0xff]   ;;  %12774 = vmatprep.subr.bf16.mxu0 %v13644_v24 }
  0x9d   : > { %v1211_v12 = vrot.slane %v1209_v2, 5  ;;  %v1215_v19 = vrot.slane %v1213_v3, 4  ;;  %v1219_v20 = vshll.u32 %v1065_v7, 16  ;;  %12739 = vmatmul.mubr.bf16.gmra.mxu1 %v11628_v4  ;;  %12690 = vmatprep.mubr.bf16.mxu0 %v11603_v8  ;;  %v690_v25 = vrot.slane %v688_v57, 7  ;;  %v396_v61 = vld [vmem:[#allocation2 + $0x6c] sm:$0x1] }
  0x9e   : > { %v1206_v22 = vor.u32 %v1205_v14, %v1202_v13  ;;  %v394_v27 = vsel %vm14257_vm3, 0, %v393_v5  ;;  %v943_v33 = vsel %vm14306_vm10, %v685_v21, %v942_v16  ;;  %v946_v34 = vld [vmem:[#allocation2 + $0x5c] sm:$0x1]  ;;  %v450_v35 = vsel %vm14262_vm4, 0, %v449_v6  ;;  %12818 = vmatprep.subr.bf16.mxu1 %v13645_v28  ;;  %v344_v3 = vld [vmem:[%s14246_s17 + $0x88] sm:$0xff] }
  0x9f   : > { %v1216_v30 = vor.u32 %v1215_v19, %v1211_v12  ;;  %v1221_v31 = vrot.slane %v1219_v20, 5  ;;  %v1024_v32 = vld [vmem:[#allocation2 + $0x48] sm:$0xf]  ;;  %395 = vst [vmem:[#allocation2 + $0x60] sm:$0x1] %v394_v27  ;;  %v693_v39 = vor.u32 %v691_v58, %v690_v25  ;;  %12775 = vmatpush3.bf16.msra.mxu0 %v13644_v24  ;;  %v695_v42 = vrot.slane %v690_v25, 4  ;;  %12819 = vmatpush3.bf16.msra.mxu1 %v13645_v28 }
  0xa0   : > { %v1207_v36 = vrot.slane %v1206_v22, 4  ;;  %v1224_v37 = vshrl.u32 %v1024_v32, 16  ;;  %v1227_v38 = vshll.u32 %v1024_v32, 16  ;;  %944 = vst [vmem:[#allocation2 + $0x54] sm:$0xf] %v943_v33  ;;  %v14450_v44 = vpack.c.bf16 %v342_v23, %v342_v23  ;;  %12820 = vmatprep.subr.bf16.mxu1 %v13646_v40 }
  0xa1   : > { %451 = vst [vmem:[#allocation2 + $0x68] sm:$0x1] %v450_v35  ;;  %v1217_v41 = vrot.slane %v1216_v30, 4  ;;  %v1025_v46 = vld [vmem:[#allocation2 + $0x4c] sm:$0xf]  ;;  %v694_v49 = vsel %vm14300_vm9, %v686_v17, %v693_v39  ;;  %v947_v58 = vsel %vm14257_vm3, %v695_v42, %v946_v34  ;;  %v697_v59 = vshrl.u32 %v12183_v43, 16 }
  0xa2   : > { %v1212_v45 = vsel %vm14318_vm11, %v1207_v36, %v1211_v12  ;;  %v1226_v47 = vrot.slane %v1224_v37, 4  ;;  %v1229_v48 = vrot.slane %v1227_v38, 5  ;;  %v1233_v52 = vshll.u32 %v1025_v46, 16  ;;  %945 = vst [vmem:[#allocation2 + $0x58] sm:$0xf] %v694_v49  ;;  %v13649_v17 = vld [vmem:[#allocation6 + $0x80] sm:$0xff]  }
  0xa3   : > { %v1222_v50 = vsel %vm14318_vm11, %v1217_v41, %v1221_v31  ;;  %v1237_v18 = vshrl.u32 %v1025_v46, 16  ;;  %v11629_v53 = vcombine.low %v1024_v32, %v1025_v46  ;;  %v1066_v55 = vld [vmem:[#allocation2 + $0x50] sm:$0x1]  ;;  %948 = vst [vmem:[#allocation2 + $0x5c] sm:$0x1] %v947_v58  ;;  %v700_v2 = vshll.u32 %v12183_v43, 16  ;;  %12821 = vmatpush3.bf16.msra.mxu1 %v13646_v40  ;;  %12776 = vmatprep.subr.bf16.mxu0 %v13649_v17 }
  0xa4   : > { %v11604_v54 = vcombine.low %v1212_v45, %v1222_v50  ;;  %v1230_v57 = vor.u32 %v1229_v48, %v1226_v47  ;;  %v1235_v63 = vrot.slane %v1233_v52, 5  ;;  %v1243_v29 = vshll.u32 %v1066_v55, 16  ;;  %v452_v7 = vld [vmem:[#allocation2 + $0x74] sm:$0x1]  ;;  %v399_v39 = vld [vmem:[#allocation2 + $0x78] sm:$0x1]  ;;  %12777 = vmatpush3.bf16.msra.mxu0 %v13649_v17 }
  0xa5   : > { %v1239_v1 = vrot.slane %v1237_v18, 4  ;;  %12742 = vmatprep.mubr.bf16.mxu1 %v11629_v53  ;;  %v699_v5 = vrot.slane %v697_v59, 7  ;;  %v705_v6 = vshrl.u32 %v14450_v44, 16  ;;  %v708_v8 = vshll.u32 %v14450_v44, 16  ;;  %v455_v40 = vld [vmem:[#allocation2 + $0x80] sm:$0x1] }
  0xa6   : > { %12691 = vmatmul.mubr.bf16.gmra.mxu0 %v11604_v54  ;;  %v1231_v4 = vrot.slane %v1230_v57, 4  ;;  %v1245_v14 = vrot.slane %v1243_v29, 5  ;;  %v949_v16 = vld [vmem:[#allocation2 + $0x60] sm:$0xf]  ;;  %v397_v12 = vsel %vm14257_vm3, 0, %v396_v61  ;;  %v14466_v19 = vpack.c.bf16 %v343_v60, %v343_v60  ;;  %v345_v52 = vld [vmem:[%s14246_s17 + $0x90] sm:$0xff] }
  0xa7   : > { %v1240_v13 = vor.u32 %v1239_v1, %v1235_v63  ;;  %v1026_v15 = vld [vmem:[#allocation2 + $0x54] sm:$0xf]  ;;  %v702_v22 = vor.u32 %v700_v2, %v699_v5  ;;  %398 = vst [vmem:[#allocation2 + $0x6c] sm:$0x1] %v397_v12  ;;  %v703_v26 = vrot.slane %v699_v5, 4  ;;  %v707_v23 = vrot.slane %v705_v6, 7 }
  0xa8   : > { %v1236_v20 = vsel %vm14318_vm11, %v1231_v4, %v1235_v63  ;;  %v1248_v21 = vshrl.u32 %v1026_v15, 16  ;;  %v1251_v24 = vshll.u32 %v1026_v15, 16  ;;  %v953_v27 = vld [vmem:[#allocation2 + $0x68] sm:$0x1]  ;;  %v453_v28 = vsel %vm14262_vm4, 0, %v452_v7  ;;  %v13650_v46 = vld [vmem:[#allocation6 + $0xc8] sm:$0xff]  }
  0xa9   : > { %v1241_v25 = vrot.slane %v1240_v13, 4  ;;  %v1027_v30 = vld [vmem:[#allocation2 + $0x58] sm:$0xf]  ;;  %v950_v33 = vsel %vm14306_vm10, %v702_v22, %v949_v16  ;;  %454 = vst [vmem:[#allocation2 + $0x74] sm:$0x1] %v453_v28  ;;  %v14474_v34 = vpack.c.bf16 %v344_v3, %v344_v3  ;;  %v710_v44 = vor.u32 %v708_v8, %v707_v23  ;;  %12822 = vmatprep.subr.bf16.mxu1 %v13650_v46  ;;  %v13652_v59 = vld [vmem:[#allocation6 + $0x138] sm:$0xff]  }
  0xaa   : > { %v1250_v31 = vrot.slane %v1248_v21, 4  ;;  %v1253_v32 = vrot.slane %v1251_v24, 5  ;;  %v1257_v36 = vshll.u32 %v1027_v30, 16  ;;  %v1261_v37 = vshrl.u32 %v1027_v30, 16  ;;  %951 = vst [vmem:[#allocation2 + $0x60] sm:$0xf] %v950_v33  ;;  %12823 = vmatpush3.bf16.msra.mxu1 %v13650_v46  ;;  %12858 = vmatprep.subr.bf16.mxu0 %v13652_v59 }
  0xab   : > { %v1246_v35 = vsel %vm14318_vm11, %v1241_v25, %v1245_v14  ;;  %v11630_v38 = vcombine.low %v1026_v15, %v1027_v30  ;;  %v1067_v42 = vld [vmem:[#allocation2 + $0x5c] sm:$0x1]  ;;  %v712_v45 = vrot.slane %v707_v23, 4  ;;  %v714_v50 = vshrl.u32 %v14466_v19, 16  ;;  %v402_v18 = vld [vmem:[#allocation2 + $0x84] sm:$0x1] }
  0xac   : > { %v11605_v41 = vcombine.low %v1236_v20, %v1246_v35  ;;  %v1254_v43 = vor.u32 %v1253_v32, %v1250_v31  ;;  %v1259_v47 = vrot.slane %v1257_v36, 5  ;;  %v1263_v48 = vrot.slane %v1261_v37, 4  ;;  %v13651_v58 = vld [vmem:[#allocation6 + $0xc0] sm:$0xff]   ;;  %v346_v29 = vld [vmem:[%s14246_s17 + $0x98] sm:$0xff]  ;;  %v458_v2 = vld [vmem:[#allocation2 + $0x8c] sm:$0x1] }
  0xad   : > { %v1267_v49 = vshll.u32 %v1067_v42, 16  ;;  %12743 = vmatmul.mubr.bf16.gmra.mxu1 %v11630_v38  ;;  %v711_v54 = vsel %vm14300_vm9, %v703_v26, %v710_v44  ;;  %v954_v55 = vsel %vm14257_vm3, %v712_v45, %v953_v27  ;;  %v717_v57 = vshll.u32 %v14466_v19, 16  ;;  %12824 = vmatprep.subr.bf16.mxu1 %v13651_v58  ;;  %v347_v16 = vld [vmem:[%s14246_s17 + $0xa0] sm:$0xff]  ;;  %v348_v46 = vld [vmem:[%s14246_s17 + $0xa8] sm:$0xff] }
  0xae   : > { %12694 = vmatprep.mubr.bf16.mxu0 %v11605_v41  ;;  %v1255_v53 = vrot.slane %v1254_v43, 4  ;;  %v1264_v60 = vor.u32 %v1263_v48, %v1259_v47  ;;  %952 = vst [vmem:[#allocation2 + $0x64] sm:$0xf] %v711_v54  ;;  %955 = vst [vmem:[#allocation2 + $0x68] sm:$0x1] %v954_v55  ;;  %v716_v63 = vrot.slane %v714_v50, 7  ;;  %v12187_v20 = vpack.c.bf16 %v345_v52, %v345_v52 }
  0xaf   : > { %v1269_v61 = vrot.slane %v1267_v49, 5  ;;  %v722_v1 = vshrl.u32 %v14474_v34, 16  ;;  %v725_v4 = vshll.u32 %v14474_v34, 16  ;;  %v400_v5 = vsel %vm14257_vm3, 0, %v399_v39  ;;  %v956_v15 = vld [vmem:[#allocation2 + $0x6c] sm:$0xf]  ;;  %12825 = vmatpush3.bf16.msra.mxu1 %v13651_v58 }
  0xb0   : > { %v1260_v3 = vsel %vm14318_vm11, %v1255_v53, %v1259_v47  ;;  %v456_v6 = vsel %vm14262_vm4, 0, %v455_v40  ;;  %v1265_v8 = vrot.slane %v1264_v60, 4  ;;  %v719_v7 = vor.u32 %v717_v57, %v716_v63  ;;  %401 = vst [vmem:[#allocation2 + $0x78] sm:$0x1] %v400_v5  ;;  %v960_v19 = vld [vmem:[#allocation2 + $0x74] sm:$0x1] }
  0xb1   : > { %v720_v13 = vrot.slane %v716_v63, 4  ;;  %v724_v14 = vrot.slane %v722_v1, 7  ;;  %457 = vst [vmem:[#allocation2 + $0x80] sm:$0x1] %v456_v6  ;;  %v1028_v12 = vld [vmem:[#allocation2 + $0x60] sm:$0xf]  ;;  %v12188_v21 = vpack.c.bf16 %v346_v29, %v346_v29  ;;  %v12189_v41 = vpack.c.bf16 %v347_v16, %v347_v16 }
  0xb2   : > { %v403_v24 = vsel %vm14257_vm3, 0, %v402_v18  ;;  %v459_v22 = vsel %vm14262_vm4, 0, %v458_v2  ;;  %v1270_v17 = vsel %vm14318_vm11, %v1265_v8, %v1269_v61  ;;  %v1272_v25 = vshrl.u32 %v1028_v12, 16 }
  0xb3   : > { %v1275_v26 = vshll.u32 %v1028_v12, 16  ;;  %v727_v23 = vor.u32 %v725_v4, %v724_v14  ;;  %404 = vst [vmem:[#allocation2 + $0x84] sm:$0x1] %v403_v24  ;;  %460 = vst [vmem:[#allocation2 + $0x8c] sm:$0x1] %v459_v22  ;;  %v11606_v27 = vcombine.low %v1260_v3, %v1270_v17  ;;  %v729_v28 = vrot.slane %v724_v14, 4 }
  0xb4   : > { %v957_v30 = vsel %vm14306_vm10, %v719_v7, %v956_v15  ;;  %v731_v31 = vshrl.u32 %v12187_v20, 16  ;;  %v1274_v32 = vrot.slane %v1272_v25, 4  ;;  %v734_v35 = vshll.u32 %v12187_v20, 16  ;;  %v461_v20 = vld [vmem:[#allocation2 + $0x98] sm:$0x1] }
  0xb5   : > { %v1277_v33 = vrot.slane %v1275_v26, 5  ;;  %v728_v34 = vsel %vm14300_vm9, %v720_v13, %v727_v23  ;;  %958 = vst [vmem:[#allocation2 + $0x6c] sm:$0xf] %v957_v30  ;;  %12695 = vmatmul.mubr.bf16.gmra.mxu0 %v11606_v27  ;;  %v14505_v36 = vld [vmem:[#allocation2 + $0x64] sm:$0xf]  ;;  %v961_v38 = vsel %vm14257_vm3, %v729_v28, %v960_v19  ;;  %v739_v40 = vshrl.u32 %v12188_v21, 16 }
  0xb6   : > { %v14507_v37 = vld [vmem:[#allocation2 + $0x68] sm:$0x1]  ;;  %959 = vst [vmem:[#allocation2 + $0x70] sm:$0xf] %v728_v34  ;;  %v733_v39 = vrot.slane %v731_v31, 7  ;;  %v1281_v43 = vshll.u32 %v14505_v36, 16  ;;  %v11631_v47 = vcombine.low %v1028_v12, %v14505_v36  ;;  %v12190_v61 = vpack.c.bf16 %v348_v46, %v348_v46 }
  0xb7   : > { %v1278_v42 = vor.u32 %v1277_v33, %v1274_v32  ;;  %v1285_v44 = vshrl.u32 %v14505_v36, 16  ;;  %v1291_v45 = vshll.u32 %v14507_v37, 16  ;;  %962 = vst [vmem:[#allocation2 + $0x74] sm:$0x1] %v961_v38  ;;  %v741_v50 = vrot.slane %v739_v40, 7  ;;  %v349_v40 = vld [vmem:[%s14246_s17 + $0xb0] sm:$0xff] }
  0xb8   : > { %v736_v48 = vor.u32 %v734_v35, %v733_v39  ;;  %v737_v49 = vrot.slane %v733_v39, 4  ;;  %v963_v52 = vld [vmem:[#allocation2 + $0x78] sm:$0xf]  ;;  %v1283_v53 = vrot.slane %v1281_v43, 5  ;;  %v967_v57 = vld [vmem:[#allocation2 + $0x80] sm:$0x1]  ;;  %12746 = vmatprep.mubr.bf16.mxu1 %v11631_v47 }
  0xb9   : > { %v1279_v18 = vrot.slane %v1278_v42, 4  ;;  %v1287_v54 = vrot.slane %v1285_v44, 4  ;;  %v1293_v55 = vrot.slane %v1291_v45, 5  ;;  %v742_v58 = vshll.u32 %v12188_v21, 16  ;;  %v405_v19 = vld [vmem:[#allocation2 + $0x90] sm:$0x1] }
  0xba   : > { %v746_v59 = vrot.slane %v741_v50, 4  ;;  %v964_v60 = vsel %vm14306_vm10, %v736_v48, %v963_v52  ;;  %v748_v29 = vshrl.u32 %v12189_v41, 16  ;;  %v751_v2 = vshll.u32 %v12189_v41, 16  ;;  %v970_v12 = vld [vmem:[#allocation2 + $0x84] sm:$0xf]  ;;  %v350_v41 = vld [vmem:[%s14246_s17 + $0xb8] sm:$0xff] }
  0xbb   : > { %v1284_v63 = vsel %vm14318_vm11, %v1279_v18, %v1283_v53  ;;  %v1288_v1 = vor.u32 %v1287_v54, %v1283_v53  ;;  %965 = vst [vmem:[#allocation2 + $0x78] sm:$0xf] %v964_v60  ;;  %v744_v4 = vor.u32 %v742_v58, %v741_v50  ;;  %v756_v6 = vshrl.u32 %v12190_v61, 16  ;;  %v974_v45 = vld [vmem:[#allocation2 + $0x8c] sm:$0x1] }
  0xbc   : > { %v1030_v3 = vld [vmem:[#allocation2 + $0x6c] sm:$0xf]  ;;  %v968_v5 = vsel %vm14257_vm3, %v746_v59, %v967_v57  ;;  %v759_v8 = vshll.u32 %v12190_v61, 16  ;;  %v750_v16 = vrot.slane %v748_v29, 7  ;;  %v406_v46 = vsel %vm14257_vm3, 0, %v405_v19  ;;  %v352_v19 = vld [vmem:[%s14246_s17 + $0xc8] sm:$0xff] }
  0xbd   : > { %v1289_v7 = vrot.slane %v1288_v1, 4  ;;  %v14522_v13 = vld [vmem:[#allocation2 + $0x70] sm:$0xf]  ;;  %v1296_v14 = vshrl.u32 %v1030_v3, 16  ;;  %v1299_v15 = vshll.u32 %v1030_v3, 16  ;;  %v745_v25 = vsel %vm14300_vm9, %v737_v49, %v744_v4  ;;  %v351_v4 = vld [vmem:[%s14246_s17 + $0xc0] sm:$0xff] }
  0xbe   : > { %969 = vst [vmem:[#allocation2 + $0x80] sm:$0x1] %v968_v5  ;;  %v14524_v21 = vld [vmem:[#allocation2 + $0x74] sm:$0x1]  ;;  %v1305_v24 = vshll.u32 %v14522_v13, 16  ;;  %v1309_v22 = vshrl.u32 %v14522_v13, 16  ;;  %v11632_v17 = vcombine.low %v1030_v3, %v14522_v13  ;;  %v753_v33 = vor.u32 %v751_v2, %v750_v16 }
  0xbf   : > { %v1294_v26 = vsel %vm14318_vm11, %v1289_v7, %v1293_v55  ;;  %v1298_v23 = vrot.slane %v1296_v14, 4  ;;  %v1301_v27 = vrot.slane %v1299_v15, 5  ;;  %v1315_v28 = vshll.u32 %v14524_v21, 16  ;;  %966 = vst [vmem:[#allocation2 + $0x7c] sm:$0xf] %v745_v25 }
  0xc0   : > { %v11607_v30 = vcombine.low %v1284_v63, %v1294_v26  ;;  %v1307_v31 = vrot.slane %v1305_v24, 5  ;;  %v1311_v32 = vrot.slane %v1309_v22, 4  ;;  %12747 = vmatmul.mubr.bf16.gmra.mxu1 %v11632_v17  ;;  %v754_v38 = vrot.slane %v750_v16, 4  ;;  %407 = vst [vmem:[#allocation2 + $0x90] sm:$0x1] %v406_v46 }
  0xc1   : > { %v1302_v34 = vor.u32 %v1301_v27, %v1298_v23  ;;  %v1317_v35 = vrot.slane %v1315_v28, 5  ;;  %v758_v39 = vrot.slane %v756_v6, 7  ;;  %v971_v44 = vsel %vm14306_vm10, %v753_v33, %v970_v12  ;;  %v464_v26 = vld [vmem:[#allocation2 + $0xa4] sm:$0x1]  ;;  %v15528_v56 = vld [vmem:[#allocation2 + $0x70] sm:$0xf] }
  0xc2   : > { %12698 = vmatprep.mubr.bf16.mxu0 %v11607_v30  ;;  %v1312_v42 = vor.u32 %v1311_v32, %v1307_v31  ;;  %v1032_v43 = vld [vmem:[#allocation2 + $0x78] sm:$0xf]  ;;  %v462_v47 = vsel %vm14262_vm4, 0, %v461_v20  ;;  %972 = vst [vmem:[#allocation2 + $0x84] sm:$0xf] %v971_v44  ;;  %v12191_v55 = vpack.c.bf16 %v349_v40, %v349_v40  ;;  %v12192_v57 = vpack.c.bf16 %v350_v41, %v350_v41 }
  0xc3   : > { %v1303_v48 = vrot.slane %v1302_v34, 4  ;;  %v1320_v49 = vshrl.u32 %v1032_v43, 16  ;;  %v1323_v50 = vshll.u32 %v1032_v43, 16  ;;  %v761_v52 = vor.u32 %v759_v8, %v758_v39  ;;  %463 = vst [vmem:[#allocation2 + $0x98] sm:$0x1] %v462_v47 }
  0xc4   : > { %v1313_v18 = vrot.slane %v1312_v42, 4  ;;  %v763_v54 = vrot.slane %v758_v39, 4  ;;  %v765_v3 = vshrl.u32 %v12191_v55, 16  ;;  %v768_v12 = vshll.u32 %v12191_v55, 16  ;;  %v408_v20 = vld [vmem:[#allocation2 + $0x9c] sm:$0x1] }
  0xc5   : > { %v14542_v53 = vld [vmem:[#allocation2 + $0x80] sm:$0x1]  ;;  %v1308_v58 = vsel %vm14318_vm11, %v1303_v48, %v1307_v31  ;;  %v1322_v59 = vrot.slane %v1320_v49, 4  ;;  %v1325_v60 = vrot.slane %v1323_v50, 5  ;;  %v762_v29 = vsel %vm14300_vm9, %v754_v38, %v761_v52  ;;  %v353_v39 = vld [vmem:[%s14246_s17 + $0xd0] sm:$0xff] }
  0xc6   : > { %v1339_v61 = vshll.u32 %v14542_v53, 16  ;;  %v1318_v63 = vsel %vm14318_vm11, %v1313_v18, %v1317_v35  ;;  %v14549_v1 = vld [vmem:[#allocation2 + $0x7c] sm:$0xf]  ;;  %v975_v2 = vsel %vm14257_vm3, %v763_v54, %v974_v45  ;;  %973 = vst [vmem:[#allocation2 + $0x88] sm:$0xf] %v762_v29  ;;  %v767_v16 = vrot.slane %v765_v3, 7 }
  0xc7   : > { %v11608_v5 = vcombine.low %v1308_v58, %v1318_v63  ;;  %v1326_v6 = vor.u32 %v1325_v60, %v1322_v59  ;;  %v1329_v8 = vshll.u32 %v14549_v1, 16  ;;  %v1333_v7 = vshrl.u32 %v14549_v1, 16  ;;  %976 = vst [vmem:[#allocation2 + $0x8c] sm:$0x1] %v975_v2  ;;  %v977_v31 = vld [vmem:[#allocation2 + $0x90] sm:$0xf] }
  0xc8   : > { %v1341_v14 = vrot.slane %v1339_v61, 5  ;;  %v11633_v15 = vcombine.low %v1032_v43, %v14549_v1  ;;  %v773_v25 = vshrl.u32 %v12192_v57, 16  ;;  %v770_v27 = vor.u32 %v768_v12, %v767_v16  ;;  %v354_v3 = vld [vmem:[%s14246_s17 + $0xd8] sm:$0xff] }
  0xc9   : > { %12699 = vmatmul.mubr.bf16.gmra.mxu0 %v11608_v5  ;;  %v1327_v24 = vrot.slane %v1326_v6, 4  ;;  %v1331_v22 = vrot.slane %v1329_v8, 5  ;;  %v1335_v17 = vrot.slane %v1333_v7, 4  ;;  %v1034_v23 = vld [vmem:[#allocation2 + $0x84] sm:$0xf]  ;;  %v771_v28 = vrot.slane %v767_v16, 4 }
  0xca   : > { %12750 = vmatprep.mubr.bf16.mxu1 %v11633_v15  ;;  %v776_v30 = vshll.u32 %v12192_v57, 16  ;;  %v12193_v32 = vpack.c.bf16 %v351_v4, %v351_v4  ;;  %v1344_v35 = vshrl.u32 %v1034_v23, 16  ;;  %v1347_v38 = vshll.u32 %v1034_v23, 16  ;;  %v981_v42 = vld [vmem:[#allocation2 + $0x98] sm:$0x1]  ;;  %v14586_v15 = vld [vmem:[#allocation6 + $0x178] sm:$0xff]  }
  0xcb   : > { %v1332_v33 = vsel %vm14318_vm11, %v1327_v24, %v1331_v22  ;;  %v1336_v34 = vor.u32 %v1335_v17, %v1331_v22  ;;  %v775_v40 = vrot.slane %v773_v25, 7  ;;  %v978_v41 = vsel %vm14306_vm10, %v770_v27, %v977_v31  ;;  %v411_v4 = vld [vmem:[#allocation2 + $0xa8] sm:$0x1]  ;;  %12906 = vmatprep.subr.bf16.mxu1 %v14586_v15 }
  0xcc   : > { %v409_v43 = vsel %vm14257_vm3, 0, %v408_v20  ;;  %v465_v44 = vsel %vm14262_vm4, 0, %v464_v26  ;;  %v1346_v46 = vrot.slane %v1344_v35, 4  ;;  %v1349_v47 = vrot.slane %v1347_v38, 5  ;;  %979 = vst [vmem:[#allocation2 + $0x90] sm:$0xf] %v978_v41 }
  0xcd   : > { %v1337_v45 = vrot.slane %v1336_v34, 4  ;;  %410 = vst [vmem:[#allocation2 + $0x9c] sm:$0x1] %v409_v43  ;;  %466 = vst [vmem:[#allocation2 + $0xa4] sm:$0x1] %v465_v44  ;;  %v12194_v48 = vpack.c.bf16 %v352_v19, %v352_v19  ;;  %v778_v52 = vor.u32 %v776_v30, %v775_v40  ;;  %v780_v18 = vrot.slane %v775_v40, 4 }
  0xce   : > { %v14569_v49 = vld [vmem:[#allocation2 + $0x88] sm:$0xf]  ;;  %v14571_v50 = vld [vmem:[#allocation2 + $0x8c] sm:$0x1]  ;;  %v782_v54 = vshrl.u32 %v12193_v32, 16  ;;  %v14573_v55 = vpack.c.bf16 %v353_v39, %v353_v39  ;;  %v1350_v58 = vor.u32 %v1349_v47, %v1346_v46  ;;  %v785_v19 = vshll.u32 %v12193_v32, 16 }
  0xcf   : > { %v1342_v57 = vsel %vm14318_vm11, %v1337_v45, %v1341_v14  ;;  %v1353_v59 = vshll.u32 %v14569_v49, 16  ;;  %v1357_v60 = vshrl.u32 %v14569_v49, 16  ;;  %v1363_v63 = vshll.u32 %v14571_v50, 16  ;;  %v467_v14 = vld [vmem:[#allocation2 + $0xb0] sm:$0x1] }
  0xd0   : > { %v11609_v61 = vcombine.low %v1332_v33, %v1342_v57  ;;  %v11634_v29 = vcombine.low %v1034_v23, %v14569_v49  ;;  %v779_v2 = vsel %vm14300_vm9, %v771_v28, %v778_v52  ;;  %v1351_v5 = vrot.slane %v1350_v58, 4  ;;  %v414_v47 = vld [vmem:[#allocation2 + $0xb4] sm:$0x1]  ;;  %v355_v58 = vld [vmem:[%s14246_s17 + $0xe0] sm:$0xff] }
  0xd1   : > { %v1355_v6 = vrot.slane %v1353_v59, 5  ;;  %v1359_v8 = vrot.slane %v1357_v60, 4  ;;  %980 = vst [vmem:[#allocation2 + $0x94] sm:$0xf] %v779_v2  ;;  %v982_v7 = vsel %vm14257_vm3, %v780_v18, %v981_v42  ;;  %v1365_v16 = vrot.slane %v1363_v63, 5 }
  0xd2   : > { %12702 = vmatprep.mubr.bf16.mxu0 %v11609_v61  ;;  %12751 = vmatmul.mubr.bf16.gmra.mxu1 %v11634_v29  ;;  %983 = vst [vmem:[#allocation2 + $0x98] sm:$0x1] %v982_v7  ;;  %v784_v12 = vrot.slane %v782_v54, 7  ;;  %v790_v20 = vshrl.u32 %v12194_v48, 16  ;;  %v793_v17 = vshll.u32 %v12194_v48, 16  ;;  %v412_v25 = vsel %vm14257_vm3, 0, %v411_v4 }
  0xd3   : > { %v1356_v24 = vsel %vm14318_vm11, %v1351_v5, %v1355_v6  ;;  %v1360_v22 = vor.u32 %v1359_v8, %v1355_v6  ;;  %v1036_v26 = vld [vmem:[#allocation2 + $0x90] sm:$0xf]  ;;  %413 = vst [vmem:[#allocation2 + $0xa8] sm:$0x1] %v412_v25  ;;  %v12196_v31 = vpack.c.bf16 %v354_v3, %v354_v3  ;;  %v468_v38 = vsel %vm14262_vm4, 0, %v467_v14  ;;  %v356_v29 = vld [vmem:[%s14246_s17 + $0xe8] sm:$0xff] }
  0xd4   : > { %v787_v23 = vor.u32 %v785_v19, %v784_v12  ;;  %v788_v27 = vrot.slane %v784_v12, 4  ;;  %v792_v28 = vrot.slane %v790_v20, 7  ;;  %v984_v30 = vld [vmem:[#allocation2 + $0x9c] sm:$0xf]  ;;  %v1368_v32 = vshrl.u32 %v1036_v26, 16 }
  0xd5   : > { %v1361_v33 = vrot.slane %v1360_v22, 4  ;;  %v1371_v34 = vshll.u32 %v1036_v26, 16  ;;  %v988_v35 = vld [vmem:[#allocation2 + $0xa4] sm:$0x1]  ;;  %469 = vst [vmem:[#allocation2 + $0xb0] sm:$0x1] %v468_v38 }
  0xd6   : > { %v795_v39 = vor.u32 %v793_v17, %v792_v28  ;;  %v797_v40 = vrot.slane %v792_v28, 4  ;;  %v985_v41 = vsel %vm14306_vm10, %v787_v23, %v984_v30  ;;  %v799_v42 = vshrl.u32 %v14573_v55, 16  ;;  %v470_v5 = vld [vmem:[#allocation2 + $0xbc] sm:$0x1] }
  0xd7   : > { %v1366_v43 = vsel %vm14318_vm11, %v1361_v33, %v1365_v16  ;;  %v1370_v44 = vrot.slane %v1368_v32, 4  ;;  %v1373_v45 = vrot.slane %v1371_v34, 5  ;;  %986 = vst [vmem:[#allocation2 + $0x9c] sm:$0xf] %v985_v41  ;;  %v802_v46 = vshll.u32 %v14573_v55, 16 }
  0xd8   : > { %v11610_v48 = vcombine.low %v1356_v24, %v1366_v43  ;;  %v14601_v52 = vld [vmem:[#allocation2 + $0x94] sm:$0xf]  ;;  %v796_v18 = vsel %vm14300_vm9, %v788_v27, %v795_v39  ;;  %v989_v54 = vsel %vm14257_vm3, %v797_v40, %v988_v35  ;;  %v801_v57 = vrot.slane %v799_v42, 7 }
  0xd9   : > { %v14608_v59 = vld [vmem:[#allocation2 + $0x98] sm:$0x1]  ;;  %v1374_v60 = vor.u32 %v1373_v45, %v1370_v44  ;;  %v1377_v61 = vshll.u32 %v14601_v52, 16  ;;  %v1381_v63 = vshrl.u32 %v14601_v52, 16  ;;  %v11635_v55 = vcombine.low %v1036_v26, %v14601_v52  ;;  %987 = vst [vmem:[#allocation2 + $0xa0] sm:$0xf] %v796_v18 }
  0xda   : > { %990 = vst [vmem:[#allocation2 + $0xa4] sm:$0x1] %v989_v54  ;;  %12703 = vmatmul.mubr.bf16.gmra.mxu0 %v11610_v48  ;;  %v1387_v2 = vshll.u32 %v14608_v59, 16  ;;  %v804_v3 = vor.u32 %v802_v46, %v801_v57  ;;  %v807_v4 = vshrl.u32 %v12196_v31, 16  ;;  %v810_v14 = vshll.u32 %v12196_v31, 16 }
  0xdb   : > { %v1375_v6 = vrot.slane %v1374_v60, 4  ;;  %v1379_v8 = vrot.slane %v1377_v61, 5  ;;  %v1383_v7 = vrot.slane %v1381_v63, 4  ;;  %12754 = vmatprep.mubr.bf16.mxu1 %v11635_v55  ;;  %v991_v16 = vld [vmem:[#allocation2 + $0xa8] sm:$0xf]  ;;  %v805_v12 = vrot.slane %v801_v57, 4 }
  0xdc   : > { %v809_v19 = vrot.slane %v807_v4, 7  ;;  %v992_v20 = vsel %vm14306_vm10, %v804_v3, %v991_v16  ;;  %v415_v24 = vsel %vm14257_vm3, 0, %v414_v47  ;;  %v1389_v17 = vrot.slane %v1387_v2, 5  ;;  %v995_v25 = vld [vmem:[#allocation2 + $0xb0] sm:$0x1] }
  0xdd   : > { %v1384_v22 = vor.u32 %v1383_v7, %v1379_v8  ;;  %993 = vst [vmem:[#allocation2 + $0xa8] sm:$0xf] %v992_v20  ;;  %416 = vst [vmem:[#allocation2 + $0xb4] sm:$0x1] %v415_v24  ;;  %v471_v26 = vsel %vm14262_vm4, 0, %v470_v5  ;;  %v12197_v23 = vpack.c.bf16 %v355_v58, %v355_v58  ;;  %v1380_v27 = vsel %vm14318_vm11, %v1375_v6, %v1379_v8 }
  0xde   : > { %v1038_v28 = vld [vmem:[#allocation2 + $0x9c] sm:$0xf]  ;;  %v812_v30 = vor.u32 %v810_v14, %v809_v19  ;;  %v814_v31 = vrot.slane %v809_v19, 4  ;;  %472 = vst [vmem:[#allocation2 + $0xbc] sm:$0x1] %v471_v26  ;;  %v12198_v33 = vpack.c.bf16 %v356_v29, %v356_v29  ;;  %vm2105_vm12 = vcmask 1042432  }
  0xdf   : > { %v1385_v32 = vrot.slane %v1384_v22, 4  ;;  %v1392_v34 = vshrl.u32 %v1038_v28, 16  ;;  %v1395_v35 = vshll.u32 %v1038_v28, 16  ;;  %v816_v38 = vshrl.u32 %v12197_v23, 16  ;;  %v2057_v29 = vld [vmem:[#allocation2] sm:$0xe] }
  0xe0   : > { %v14623_v39 = vld [vmem:[#allocation2 + $0xa0] sm:$0xf]  ;;  %v813_v41 = vsel %vm14300_vm9, %v805_v12, %v812_v30  ;;  %v996_v42 = vsel %vm14257_vm3, %v814_v31, %v995_v25  ;;  %v819_v43 = vshll.u32 %v12197_v23, 16  ;;  %v824_v44 = vshrl.u32 %v12198_v33, 16  ;;  %v2058_v12 = vld [vmem:[#allocation2 + $0xc] sm:$0xe] }
  0xe1   : > { %v14625_v40 = vld [vmem:[#allocation2 + $0xa4] sm:$0x1]  ;;  %v1390_v45 = vsel %vm14318_vm11, %v1385_v32, %v1389_v17  ;;  %v1394_v46 = vrot.slane %v1392_v34, 4  ;;  %v1397_v47 = vrot.slane %v1395_v35, 5  ;;  %v1401_v48 = vshll.u32 %v14623_v39, 16 }
  0xe2   : > { %994 = vst [vmem:[#allocation2 + $0xac] sm:$0xf] %v813_v41  ;;  %997 = vst [vmem:[#allocation2 + $0xb0] sm:$0x1] %v996_v42  ;;  %v11611_v18 = vcombine.low %v1380_v27, %v1390_v45  ;;  %v1405_v54 = vshrl.u32 %v14623_v39, 16  ;;  %v1411_v57 = vshll.u32 %v14625_v40, 16  ;;  %v11636_v58 = vcombine.low %v1038_v28, %v14623_v39 }
  0xe3   : > { %v1398_v60 = vor.u32 %v1397_v47, %v1394_v46  ;;  %v1403_v61 = vrot.slane %v1401_v48, 5  ;;  %v818_v63 = vrot.slane %v816_v38, 7  ;;  %v826_v55 = vrot.slane %v824_v44, 7  ;;  %v13844_v46 = vld [vmem:[#allocation2 + $0x4] sm:$0xf] }
  0xe4   : > { %12706 = vmatprep.mubr.bf16.mxu0 %v11611_v18  ;;  %v1407_v2 = vrot.slane %v1405_v54, 4  ;;  %v1413_v3 = vrot.slane %v1411_v57, 5  ;;  %12755 = vmatmul.mubr.bf16.gmra.mxu1 %v11636_v58  ;;  %v1040_v4 = vld [vmem:[#allocation2 + $0xa8] sm:$0xf]  ;;  %v827_v5 = vshll.u32 %v12198_v33, 16  ;;  %vm2106_vm13 = vcmask 1046532  }
  0xe5   : > { %v1399_v6 = vrot.slane %v1398_v60, 4  ;;  %v1416_v8 = vshrl.u32 %v1040_v4, 16  ;;  %v1419_v7 = vshll.u32 %v1040_v4, 16  ;;  %v821_v14 = vor.u32 %v819_v43, %v818_v63  ;;  %v998_v16 = vld [vmem:[#allocation2 + $0xb4] sm:$0xf]  ;;  %vm14657_vm14 = vmor %vm2105_vm12, %vm2106_vm13 }
  0xe6   : > { %v1408_v19 = vor.u32 %v1407_v2, %v1403_v61  ;;  %v822_v20 = vrot.slane %v818_v63, 4  ;;  %v829_v24 = vor.u32 %v827_v5, %v826_v55  ;;  %v831_v22 = vrot.slane %v826_v55, 4  ;;  %v1002_v17 = vld [vmem:[#allocation2 + $0xbc] sm:$0x1]  ;;  %v2059_v18 = vld [vmem:[#allocation2 + $0x18] sm:$0xe] }
  0xe7   : > { %v1404_v25 = vsel %vm14318_vm11, %v1399_v6, %v1403_v61  ;;  %v1418_v26 = vrot.slane %v1416_v8, 4  ;;  %v1421_v23 = vrot.slane %v1419_v7, 5  ;;  %v999_v27 = vsel %vm14306_vm10, %v821_v14, %v998_v16  ;;  %v13845_v61 = vld [vmem:[#allocation2 + $0x14] sm:$0x1]  ;;  %v13846_v2 = vld [vmem:[#allocation2 + $0x10] sm:$0xf] }
  0xe8   : > { %v1409_v28 = vrot.slane %v1408_v19, 4  ;;  %v830_v33 = vsel %vm14300_vm9, %v822_v20, %v829_v24  ;;  %1000 = vst [vmem:[#allocation2 + $0xb4] sm:$0xf] %v999_v27  ;;  %v1003_v32 = vsel %vm14257_vm3, %v831_v22, %v1002_v17  ;;  %v11647_v34 = vrot.slane %v2057_v29, 9  ;;  %v13847_v8 = vld [vmem:[#allocation2 + $0x1c] sm:$0xf] }
  0xe9   : > { %v14641_v30 = vld [vmem:[#allocation2 + $0xac] sm:$0xf]  ;;  %v14643_v31 = vld [vmem:[#allocation2 + $0xb0] sm:$0x1]  ;;  %v1422_v35 = vor.u32 %v1421_v23, %v1418_v26  ;;  %1001 = vst [vmem:[#allocation2 + $0xb8] sm:$0xf] %v830_v33 }
  0xea   : > { %v1425_v38 = vshll.u32 %v14641_v30, 16  ;;  %v1429_v41 = vshrl.u32 %v14641_v30, 16  ;;  %v1435_v42 = vshll.u32 %v14643_v31, 16  ;;  %1004 = vst [vmem:[#allocation2 + $0xbc] sm:$0x1] %v1003_v32  ;;  %v1414_v43 = vsel %vm14318_vm11, %v1409_v28, %v1413_v3 }
  0xeb   : > { %v11637_v44 = vcombine.low %v1040_v4, %v14641_v30  ;;  %v18999_v45 = vmov 0  ;;  %v2110_v47 = vrot.slane %v13844_v46, 5  ;;  %v11648_v48 = vrot.slane %v2058_v12, 9  ;;  %v13848_v12 = vld [vmem:[#allocation2 + $0x20] sm:$0x1] }
  0xec   : > { %v19000_v45 = vsel %vm14657_vm14, 4294967295, %v18999_v45  ;;  %v11612_v54 = vcombine.low %v1404_v25, %v1414_v43  ;;  %v1423_v57 = vrot.slane %v1422_v35, 4  ;;  %v1427_v58 = vrot.slane %v1425_v38, 5  ;;  %v2060_v26 = vld [vmem:[#allocation2 + $0x24] sm:$0xe] }
  0xed   : > { %19001 = vst [vmem:[#allocation17_spill] sm:$0xff] %v19000_v45  ;;  %v1431_v60 = vrot.slane %v1429_v41, 4  ;;  %v2120_v63 = vrot.slane %v13845_v61, 5  ;;  %v1437_v55 = vrot.slane %v1435_v42, 5  ;;  %12758 = vmatprep.mubr.bf16.mxu1 %v11637_v44  ;;  %v2112_v29 = vrot.slane %v2110_v47, 4  ;;  %v13653_v42 = vld [vmem:[#allocation2 + $0xc] sm:$0xff]  }
  0xee   : > { %v2117_v3 = vrot.slane %v13846_v2, 5  ;;  %12707 = vmatmul.mubr.bf16.gmra.mxu0 %v11612_v54  ;;  %v14663_v5 = vsel %vm14657_vm14, %v11647_v34, %v2110_v47  ;;  %v11649_v6 = vrot.slane %v2059_v18, 9  ;;  %v2124_v7 = vrot.slane %v13847_v8, 5  ;;  %v2061_v32 = vld [vmem:[#allocation2 + $0x30] sm:$0xe] }
  0xef   : > { %v1432_v4 = vor.u32 %v1431_v60, %v1427_v58  ;;  %v14669_v14 = vsel %vm14657_vm14, %v2112_v29, %v2113_v51  ;;  %v2127_v19 = vrot.slane %v13848_v12, 5  ;;  %v1428_v20 = vsel %vm14318_vm11, %v1423_v57, %v1427_v58  ;;  %v1042_v22 = vld [vmem:[#allocation2 + $0xb4] sm:$0xf]  ;;  %v2062_v29 = vld [vmem:[#allocation2 + $0x3c] sm:$0xe] }
  0xf0   : > { %v2119_v16 = vrot.slane %v2117_v3, 4  ;;  %v14675_v17 = vsel %vm14657_vm14, %v11648_v48, %v2117_v3  ;;  %v2126_v25 = vrot.slane %v2124_v7, 4  ;;  %v14677_v23 = vld [vmem:[#allocation2 + $0xb8] sm:$0xf]  ;;  %v1440_v51 = vshrl.u32 %v1042_v22, 16 }
  0xf1   : > { %v1433_v24 = vrot.slane %v1432_v4, 4  ;;  %v14679_v0 = vld [vmem:[#allocation2 + $0xbc] sm:$0x1]  ;;  %v1443_v27 = vshll.u32 %v1042_v22, 16  ;;  %v11663_v28 = vcombine.low %v14663_v5, %v14669_v14  ;;  %v1449_v35 = vshll.u32 %v14677_v23, 16 }
  0xf2   : > { %v14685_v33 = vsel %vm14657_vm14, %v2119_v16, %v2120_v63  ;;  %v1453_v38 = vshrl.u32 %v14677_v23, 16  ;;  %v1459_v41 = vshll.u32 %v14679_v0, 16  ;;  %v1442_v44 = vrot.slane %v1440_v51, 4  ;;  %v13849_v63 = vld [vmem:[#allocation2 + $0x28] sm:$0xf] }
  0xf3   : > { %v1438_v34 = vsel %vm14318_vm11, %v1433_v24, %v1437_v55  ;;  %v1445_v46 = vrot.slane %v1443_v27, 5  ;;  %v11638_v47 = vcombine.low %v1042_v22, %v14677_v23  ;;  %v1451_v48 = vrot.slane %v1449_v35, 5  ;;  %v13850_v4 = vld [vmem:[#allocation2 + $0x2c] sm:$0x1]  ;;  %v13851_v24 = vld [vmem:[#allocation2 + $0x34] sm:$0xf] }
  0xf4   : > { %v11613_v43 = vcombine.low %v1428_v20, %v1438_v34  ;;  %v1455_v18 = vrot.slane %v1453_v38, 4  ;;  %v1461_v54 = vrot.slane %v1459_v41, 5  ;;  %v14695_v57 = vsel %vm14657_vm14, %v11649_v6, %v2124_v7  ;;  %v2063_v7 = vld [vmem:[#allocation2 + $0x48] sm:$0xe]  ;;  %v13852_v27 = vld [vmem:[#allocation2 + $0x38] sm:$0x1] }
  0xf5   : > { %v1446_v58 = vor.u32 %v1445_v46, %v1442_v44  ;;  %12759 = vmatmul.mubr.bf16.gmra.mxu1 %v11638_v47  ;;  %v11664_v60 = vcombine.low %v14675_v17, %v14685_v33  ;;  %v11650_v61 = vrot.slane %v2060_v26, 9  ;;  %v2131_v55 = vrot.slane %v13849_v63, 5  ;;  %v2064_v26 = vld [vmem:[#allocation2 + $0x54] sm:$0xe]  ;;  %v13853_v38 = vld [vmem:[#allocation2 + $0x40] sm:$0xf] }
  0xf6   : > { %12710 = vmatprep.mubr.bf16.mxu0 %v11613_v43  ;;  %v1456_v2 = vor.u32 %v1455_v18, %v1451_v48  ;;  %12826 = vmatprep.mubr.bf16.mxu1 %v13653_v42  ;;  %v14701_v3 = vsel %vm14657_vm14, %v2126_v25, %v2127_v19  ;;  %v2134_v8 = vrot.slane %v13850_v4, 5  ;;  %v11651_v6 = vrot.slane %v2061_v32, 9  ;;  %v13654_v32 = vld [vmem:[#allocation2 + $0x18] sm:$0xff]   ;;  %v2065_v44 = vld [vmem:[#allocation2 + $0x60] sm:$0xe]  ;;  %v13656_v18 = vld [vmem:[#allocation2 + $0x24] sm:$0xff]  }
  0xf7   : > { %v1447_v16 = vrot.slane %v1446_v58, 4  ;;  %v14705_v12 = vsel %vm14657_vm14, %v11650_v61, %v2131_v55  ;;  %v2133_v20 = vrot.slane %v2131_v55, 4  ;;  %v2138_v22 = vrot.slane %v13851_v24, 5  ;;  %v13854_v55 = vld [vmem:[#allocation2 + $0x44] sm:$0x1] }
  0xf8   : > { %v1457_v51 = vrot.slane %v1456_v2, 4  ;;  %v2141_v34 = vrot.slane %v13852_v27, 5  ;;  %v11652_v35 = vrot.slane %v2062_v29, 9  ;;  %v2145_v19 = vrot.slane %v13853_v38, 5  ;;  %v13855_v4 = vld [vmem:[#allocation2 + $0x4c] sm:$0xf] }
  0xf9   : > { %v1452_v25 = vsel %vm14318_vm11, %v1447_v16, %v1451_v48  ;;  %v11665_v41 = vcombine.low %v14695_v57, %v14701_v3  ;;  %v14713_v42 = vsel %vm14657_vm14, %v2133_v20, %v2134_v8  ;;  %v2140_v43 = vrot.slane %v2138_v22, 4  ;;  %v13856_v16 = vld [vmem:[#allocation2 + $0x50] sm:$0x1]  ;;  %v13857_v27 = vld [vmem:[#allocation2 + $0x58] sm:$0xf]  ;;  %v13658_v17 = vld [vmem:[#allocation6 + $0x128] sm:$0xff]  }
  0xfa   : > { %v1462_v46 = vsel %vm14318_vm11, %v1457_v51, %v1461_v54  ;;  %v11666_v47 = vcombine.low %v14705_v12, %v14713_v42  ;;  %v14721_v48 = vsel %vm14657_vm14, %v11651_v6, %v2138_v22  ;;  %v2147_v58 = vrot.slane %v2145_v19, 4  ;;  %v2066_v6 = vld [vmem:[#allocation2 + $0x6c] sm:$0xe]  ;;  %v14865_v42 = vld [vmem:[#allocation2 + $0x14] sm:$0x1] }
  0xfb   : > { %v11614_v61 = vcombine.low %v1452_v25, %v1462_v46  ;;  %v14725_v63 = vsel %vm14657_vm14, %v2140_v43, %v2141_v34  ;;  %v2148_v29 = vrot.slane %v13854_v55, 5  ;;  %v11653_v2 = vrot.slane %v2063_v7, 9  ;;  %v13668_v22 = vld [vmem:[#allocation6 + $0x170] sm:$0xff]   ;;  %v13858_v7 = vld [vmem:[#allocation2 + $0x5c] sm:$0x1]  ;;  %v13657_v46 = vld [vmem:[#allocation2 + $0x30] sm:$0xff]  }
  0xfc   : > { %v14729_v54 = vsel %vm14657_vm14, %v11652_v35, %v2145_v19  ;;  %v2152_v8 = vrot.slane %v13855_v4, 5  ;;  %v2155_v20 = vrot.slane %v13856_v16, 5  ;;  %v11654_v24 = vrot.slane %v2064_v26, 9  ;;  %v2067_v43 = vld [vmem:[#allocation2 + $0x78] sm:$0xe]  ;;  %v13655_v16 = vld [vmem:[#allocation6 + $0x130] sm:$0xff]  }
  0xfd   : > { %12711 = vmatmul.mubr.bf16.gmra.mxu0 %v11614_v61  ;;  %12827 = vmatmul.mubr.bf16.vlgmr.msra.gmra.mxu1 %v13654_v32  ;;  %v14733_v51 = vsel %vm14657_vm14, %v2147_v58, %v2148_v29  ;;  %v2159_v34 = vrot.slane %v13857_v27, 5  ;;  %v2162_v38 = vrot.slane %v13858_v7, 5  ;;  %v11655_v25 = vrot.slane %v2065_v44, 9  ;;  %v2068_v29 = vld [vmem:[#allocation2 + $0x84] sm:$0xe]  ;;  %v13659_v27 = vld [vmem:[#allocation2 + $0x3c] sm:$0xff]  }
  0xfe   : > { %12778 = vmatprep.mubr.bf16.mxu0 %v11663_v28  ;;  %12830 = vmatprep.mubr.bf16.mxu1 %v13656_v18  ;;  %v11667_v26 = vcombine.low %v14721_v48, %v14725_v63  ;;  %v14742_v35 = vsel %vm14657_vm14, %v11653_v2, %v2152_v8  ;;  %v2154_v19 = vrot.slane %v2152_v8, 4  ;;  %v2166_v32 = vrot.slane %v14505_v36, 5  ;;  %v13672_v28 = vld [vmem:[#allocation6 + $0x168] sm:$0xff]   ;;  %v2069_v8 = vld [vmem:[#allocation2 + $0x90] sm:$0xe] }
  0xff   : > { %v14747_v44 = vsel %vm14657_vm14, %v11654_v24, %v2159_v34  ;;  %v2161_v58 = vrot.slane %v2159_v34, 4  ;;  %v2169_v5 = vrot.slane %v14507_v37, 5  ;;  %v11656_v14 = vrot.slane %v2066_v6, 9  ;;  %12907 = vmatpush3.bf16.msra.mxu1 %v14586_v15 }
 0x100   : > { %v11668_v18 = vcombine.low %v14729_v54, %v14733_v51  ;;  %v14755_v61 = vsel %vm14657_vm14, %v2154_v19, %v2155_v20  ;;  %v2168_v36 = vrot.slane %v2166_v32, 4  ;;  %v2173_v55 = vrot.slane %v14522_v13, 5  ;;  %12908 = vmatprep.subr.bf16.mxu1 %v13668_v22 }
 0x101   : > { %v14760_v2 = vsel %vm14657_vm14, %v2161_v58, %v2162_v38  ;;  %v14764_v37 = vsel %vm14657_vm14, %v11655_v25, %v2166_v32  ;;  %v2176_v15 = vrot.slane %v14524_v21, 5  ;;  %v11657_v4 = vrot.slane %v2067_v43, 9  ;;  %v2070_v25 = vld [vmem:[#allocation2 + $0x9c] sm:$0xe] }
 0x102   : > { %v11669_v20 = vcombine.low %v14742_v35, %v14755_v61  ;;  %v11670_v13 = vcombine.low %v14747_v44, %v14760_v2  ;;  %v14773_v24 = vsel %vm14657_vm14, %v2168_v36, %v2169_v5  ;;  %v2175_v6 = vrot.slane %v2173_v55, 4  ;;  %v13673_v5 = vld [vmem:[#allocation6 + $0x160] sm:$0xff]  }
 0x103   : > { %v14777_v34 = vsel %vm14657_vm14, %v11656_v14, %v2173_v55  ;;  %v2180_v21 = vrot.slane %v14549_v1, 5  ;;  %v2183_v7 = vrot.slane %v14542_v53, 5  ;;  %12909 = vmatpush3.bf16.msra.mxu1 %v13668_v22  ;;  %v11658_v38 = vrot.slane %v2068_v29, 9  ;;  %v13859_v14 = vld [vmem:[#allocation6 + $0x138] sm:$0xff]   ;;  %v13683_v35 = vld [vmem:[#allocation6 + $0x140] sm:$0xff]  }
 0x104   : > { %v11671_v19 = vcombine.low %v14764_v37, %v14773_v24  ;;  %v2187_v32 = vrot.slane %v14569_v49, 5  ;;  %v2190_v43 = vrot.slane %v14571_v50, 5  ;;  %12910 = vmatprep.subr.bf16.mxu1 %v13672_v28  ;;  %v11659_v58 = vrot.slane %v2069_v8, 9  ;;  %v2071_v50 = vld [vmem:[#allocation2 + $0xa8] sm:$0xe]  ;;  %v14956_v37 = vld [vmem:[#allocation6 + $0x1b8] sm:$0xff]  }
 0x105   : > { %12779 = vmatmul.mubr.bf16.vlgmr.msra.gmra.mxu0 %v11664_v60  ;;  %12831 = vmatmul.mubr.bf16.gmra.mxu1 %v13657_v46  ;;  %v14790_v53 = vsel %vm14657_vm14, %v2175_v6, %v2176_v15  ;;  %v14794_v1 = vsel %vm14657_vm14, %v11657_v4, %v2180_v21  ;;  %v2182_v22 = vrot.slane %v2180_v21, 4  ;;  %v2194_v49 = vrot.slane %v14601_v52, 5  ;;  %v2072_v4 = vld [vmem:[#allocation2 + $0xb4] sm:$0xe]  ;;  %v417_v8 = vld [vmem:[#allocation2 + $0xc0] sm:$0x1] }
 0x106   : > { %12859 = vmatpush3.bf16.msra.mxu0 %v13859_v14  ;;  %12782 = vmatprep.mubr.bf16.mxu0 %v11665_v41  ;;  %v14802_v33 = vsel %vm14657_vm14, %v11658_v38, %v2187_v32  ;;  %v2189_v60 = vrot.slane %v2187_v32, 4  ;;  %v2197_v46 = vrot.slane %v14608_v59, 5  ;;  %v11660_v36 = vrot.slane %v2070_v25, 9  ;;  %v13660_v6 = vld [vmem:[#allocation2 + $0x48] sm:$0xff]  }
 0x107   : > { %12860 = vmatprep.subr.bf16.mxu0 %v13655_v16  ;;  %12834 = vmatprep.mubr.bf16.mxu1 %v13659_v27  ;;  %v14807_v52 = vsel %vm14657_vm14, %v2182_v22, %v2183_v7  ;;  %v14811_v55 = vsel %vm14657_vm14, %v11659_v58, %v2194_v49  ;;  %v2196_v57 = vrot.slane %v2194_v49, 4  ;;  %v2201_v3 = vrot.slane %v14623_v39, 5  ;;  %v2926_v58 = vld [vmem:[#allocation2 + $0xc] sm:$0xf]  ;;  %v13661_v22 = vld [vmem:[#allocation6 + $0x120] sm:$0xff]  }
 0x108   : > { %v11672_v41 = vcombine.low %v14777_v34, %v14790_v53  ;;  %v14818_v59 = vsel %vm14657_vm14, %v2189_v60, %v2190_v43  ;;  %12911 = vmatpush3.bf16.msra.mxu1 %v13672_v28  ;;  %v2204_v29 = vrot.slane %v14625_v40, 5  ;;  %v11661_v15 = vrot.slane %v2071_v50, 9  ;;  %v357_v28 = vld [vmem:[%s14246_s17 + $0xf0] sm:$0xff]  ;;  %v358_v43 = vld [vmem:[%s14246_s17 + $0xf8] sm:$0xff] }
 0x109   : > { %v11673_v27 = vcombine.low %v14794_v1, %v14807_v52  ;;  %12912 = vmatprep.subr.bf16.mxu1 %v13673_v5  ;;  %v14827_v21 = vsel %vm14657_vm14, %v2196_v57, %v2197_v46  ;;  %v2203_v7 = vrot.slane %v2201_v3, 4  ;;  %v14834_v38 = vsel %vm14657_vm14, %v11660_v36, %v2201_v3  ;;  %v13662_v49 = vld [vmem:[#allocation2 + $0x54] sm:$0xff]   ;;  %v14851_v3 = vld [vmem:[#allocation2 + $0x10] sm:$0xf]  ;;  %v13669_v40 = vld [vmem:[#allocation6 + $0x110] sm:$0xff]  }
 0x10a   : > { %12861 = vmatpush3.bf16.msra.mxu0 %v13655_v16  ;;  %v2208_v25 = vrot.slane %v14641_v30, 5  ;;  %v2211_v32 = vrot.slane %v14643_v31, 5  ;;  %v11662_v16 = vrot.slane %v2072_v4, 9  ;;  %v2215_v14 = vrot.slane %v14677_v23, 5  ;;  %v13677_v46 = vld [vmem:[#allocation6 + $0x158] sm:$0xff]  }
 0x10b   : > { %12862 = vmatprep.subr.bf16.mxu0 %v13658_v17  ;;  %v14841_v50 = vsel %vm14657_vm14, %v2203_v7, %v2204_v29  ;;  %v418_v60 = vsel %vm14257_vm3, 0, %v417_v8  ;;  %v2218_v36 = vrot.slane %v14679_v0, 5  ;;  %v12199_v57 = vpack.c.bf16 %v357_v28, %v357_v28  ;;  %v13678_v0 = vld [vmem:[#allocation6 + $0x150] sm:$0xff]  }
 0x10c   : > { %12913 = vmatpush3.bf16.msra.mxu1 %v13673_v5  ;;  %v14848_v30 = vsel %vm14657_vm14, %v11661_v15, %v2208_v25  ;;  %v2210_v31 = vrot.slane %v2208_v25, 4  ;;  %419 = vst [vmem:[#allocation2 + $0xc0] sm:$0x1] %v418_v60  ;;  %v2217_v5 = vrot.slane %v2215_v14, 4  ;;  %v12200_v29 = vpack.c.bf16 %v358_v43, %v358_v43 }
 0x10d   : > { %12783 = vmatmul.mubr.bf16.gmra.mxu0 %v11666_v47  ;;  %12835 = vmatmul.mubr.bf16.gmra.mxu1 %v13660_v6  ;;  %v2975_v4 = vshrl.u32 %v2926_v58, 16  ;;  %v833_v8 = vshrl.u32 %v12199_v57, 16  ;;  %v836_v12 = vshll.u32 %v12199_v57, 16  ;;  %v2978_v47 = vshll.u32 %v2926_v58, 16  ;;  %v13664_v6 = vld [vmem:[#allocation6 + $0x118] sm:$0xff]   ;;  %v13663_v58 = vld [vmem:[#allocation2 + $0x60] sm:$0xff]  }
 0x10e   : > { %12786 = vmatprep.mubr.bf16.mxu0 %v11667_v26  ;;  %12863 = vmatpush3.bf16.msra.mxu0 %v13658_v17  ;;  %v14863_v15 = vsel %vm14657_vm14, %v2210_v31, %v2211_v32  ;;  %v14871_v48 = vsel %vm14657_vm14, %v11662_v16, %v2215_v14  ;;  %v841_v63 = vshrl.u32 %v12200_v29, 16  ;;  %v844_v26 = vshll.u32 %v12200_v29, 16  ;;  %v2929_v17 = vld [vmem:[#allocation2 + $0x18] sm:$0xf] }
 0x10f   : > { %12864 = vmatprep.subr.bf16.mxu0 %v13661_v22  ;;  %12838 = vmatprep.mubr.bf16.mxu1 %v13662_v49  ;;  %v14875_v28 = vsel %vm14657_vm14, %v2217_v5, %v2218_v36  ;;  %v835_v25 = vrot.slane %v833_v8, 7  ;;  %v2977_v32 = vrot.slane %v2975_v4, 4  ;;  %v2980_v43 = vrot.slane %v2978_v47, 5  ;;  %v13665_v49 = vld [vmem:[#allocation2 + $0x6c] sm:$0xff]   ;;  %v14882_v5 = vld [vmem:[#allocation2 + $0x1c] sm:$0xf] }
 0x110   : > { %12914 = vmatprep.subr.bf16.mxu1 %v13677_v46  ;;  %v14877_v60 = vrot.slane %v841_v63, 7  ;;  %v2984_v31 = vshll.u32 %v14851_v3, 16  ;;  %v2988_v16 = vshrl.u32 %v14851_v3, 16  ;;  %v2994_v14 = vshll.u32 %v14865_v42, 16  ;;  %v14884_v4 = vld [vmem:[#allocation2 + $0x20] sm:$0x1] }
 0x111   : > { %12915 = vmatpush3.bf16.msra.mxu1 %v13677_v46  ;;  %v838_v57 = vor.u32 %v836_v12, %v835_v25  ;;  %v839_v29 = vrot.slane %v835_v25, 4  ;;  %v2981_v36 = vor.u32 %v2980_v43, %v2977_v32  ;;  %v2999_v8 = vshrl.u32 %v2929_v17, 16  ;;  %v13682_v25 = vld [vmem:[#allocation6 + $0x148] sm:$0xff]  }
 0x112   : > { %12865 = vmatpush3.bf16.msra.mxu0 %v13661_v22  ;;  %12916 = vmatprep.subr.bf16.mxu1 %v13678_v0  ;;  %v846_v47 = vor.u32 %v844_v26, %v14877_v60  ;;  %v14889_v7 = vrot.slane %v2984_v31, 5  ;;  %v2990_v23 = vrot.slane %v2988_v16, 4  ;;  %v3679_v22 = vld [vmem:[#allocation2 + $0xc] sm:$0xe]  ;;  %v2996_v43 = vrot.slane %v2994_v14, 5  ;;  %v13674_v14 = vld [vmem:[#allocation6 + $0x108] sm:$0xff]  }
 0x113   : > { %12866 = vmatprep.subr.bf16.mxu0 %v13664_v6  ;;  %v1005_v63 = vld [vmem:[#allocation2 + $0xc0] sm:$0xf]  ;;  %v2982_v32 = vrot.slane %v2981_v36, 4  ;;  %v3001_v39 = vrot.slane %v2999_v8, 4  ;;  %v3002_v16 = vshll.u32 %v2929_v17, 16  ;;  %v3008_v46 = vshll.u32 %v14882_v5, 16 }
 0x114   : > { %v1006_v12 = vsel %vm14306_vm10, %v838_v57, %v1005_v63  ;;  %v847_v26 = vsel %vm14300_vm9, %v839_v29, %v846_v47  ;;  %v2991_v31 = vor.u32 %v2990_v23, %v14889_v7  ;;  %v848_v57 = vrot.slane %v14877_v60, 4  ;;  %v3680_v36 = vld [vmem:[#allocation2 + $0x18] sm:$0xe]  ;;  %v2932_v47 = vld [vmem:[#allocation2 + $0x24] sm:$0xf] }
 0x115   : > { %12787 = vmatmul.mubr.bf16.gmra.mxu0 %v11668_v18  ;;  %12839 = vmatmul.mubr.bf16.gmra.mxu1 %v13663_v58  ;;  %1007 = vst [vmem:[#allocation2 + $0xc0] sm:$0xf] %v1006_v12  ;;  %1008 = vst [vmem:[#allocation2 + $0xc4] sm:$0xf] %v847_v26  ;;  %v3012_v54 = vshrl.u32 %v14882_v5, 16  ;;  %v3018_v51 = vshll.u32 %v14884_v4, 16  ;;  %v2987_v61 = vsel %vm14318_vm11, %v2982_v32, %v14889_v7 }
 0x116   : > { %12790 = vmatprep.mubr.bf16.mxu0 %v11669_v20  ;;  %12842 = vmatprep.mubr.bf16.mxu1 %v13665_v49  ;;  %v11735_v18 = vrot.slane %v3679_v22, 9  ;;  %v2992_v23 = vrot.slane %v2991_v31, 4  ;;  %v3004_v17 = vrot.slane %v3002_v16, 5  ;;  %v3010_v58 = vrot.slane %v3008_v46, 5  ;;  %v14917_v12 = vld [vmem:[#allocation2 + $0x28] sm:$0xf] }
 0x117   : > { %12867 = vmatpush3.bf16.msra.mxu0 %v13664_v6  ;;  %12917 = vmatpush3.bf16.msra.mxu1 %v13678_v0  ;;  %v3745_v29 = vrot.slane %v14851_v3, 5  ;;  %v3014_v20 = vrot.slane %v3012_v54, 4  ;;  %v3020_v49 = vrot.slane %v3018_v51, 5  ;;  %v3748_v8 = vrot.slane %v14865_v42, 5  ;;  %v13666_v6 = vld [vmem:[#allocation2 + $0x78] sm:$0xff]   ;;  %v13670_v0 = vld [vmem:[#allocation2 + $0x84] sm:$0xff]  }
 0x118   : > { %12868 = vmatprep.subr.bf16.mxu0 %v13669_v40  ;;  %12918 = vmatprep.subr.bf16.mxu1 %v13682_v25  ;;  %v2997_v46 = vsel %vm14318_vm11, %v2992_v23, %v2996_v43  ;;  %v3005_v63 = vor.u32 %v3004_v17, %v3001_v39  ;;  %v13679_v26 = vld [vmem:[#allocation6 + $0x100] sm:$0xff]   ;;  %v11736_v32 = vrot.slane %v3680_v36, 9  ;;  %v3752_v31 = vrot.slane %v14882_v5, 5  ;;  %v14921_v16 = vld [vmem:[#allocation2 + $0x2c] sm:$0x1]  ;;  %v14927_v23 = vld [vmem:[#allocation6 + $0x1f8] sm:$0xff]  }
 0x119   : > { %v14915_v3 = vsel %vm14657_vm14, %v11735_v18, %v3745_v29  ;;  %v3747_v22 = vrot.slane %v3745_v29, 4  ;;  %v3015_v7 = vor.u32 %v3014_v20, %v3010_v58  ;;  %v3755_v42 = vrot.slane %v14884_v4, 5  ;;  %v2935_v18 = vld [vmem:[#allocation2 + $0x30] sm:$0xf] }
 0x11a   : > { %v3006_v43 = vrot.slane %v3005_v63, 4  ;;  %v3023_v54 = vshrl.u32 %v2932_v47, 16  ;;  %v3026_v51 = vshll.u32 %v2932_v47, 16  ;;  %v14929_v17 = vcombine.low %v2987_v61, %v2997_v46  ;;  %v13671_v47 = vld [vmem:[#allocation2 + $0x90] sm:$0xff]  }
 0x11b   : > { %12869 = vmatpush3.bf16.msra.mxu0 %v13669_v40  ;;  %12919 = vmatpush3.bf16.msra.mxu1 %v13682_v25  ;;  %v14925_v39 = vsel %vm14657_vm14, %v3747_v22, %v3748_v8  ;;  %v3016_v5 = vrot.slane %v3015_v7, 4  ;;  %v3754_v40 = vrot.slane %v3752_v31, 4  ;;  %v14933_v25 = vld [vmem:[#allocation2 + $0x34] sm:$0xf]  ;;  %v3032_v61 = vshll.u32 %v14917_v12, 16 }
 0x11c   : > { %12870 = vmatprep.subr.bf16.mxu0 %v13674_v14  ;;  %12920 = vmatprep.subr.bf16.mxu1 %v13683_v35  ;;  %v11751_v4 = vcombine.low %v14915_v3, %v14925_v39  ;;  %v3011_v29 = vsel %vm14318_vm11, %v3006_v43, %v3010_v58  ;;  %v3025_v36 = vrot.slane %v3023_v54, 4  ;;  %v3028_v20 = vrot.slane %v3026_v51, 5  ;;  %v14952_v58 = vld [vmem:[#allocation2 + $0x38] sm:$0x1] }
 0x11d   : > { %12791 = vmatmul.mubr.bf16.gmra.mxu0 %v11670_v13  ;;  %12843 = vmatmul.mubr.bf16.gmra.mxu1 %v13666_v6  ;;  %v3021_v8 = vsel %vm14318_vm11, %v3016_v5, %v3020_v49  ;;  %v14948_v44 = vsel %vm14657_vm14, %v11736_v32, %v3752_v31  ;;  %v3036_v2 = vshrl.u32 %v14917_v12, 16  ;;  %v3042_v13 = vshll.u32 %v14921_v16, 16  ;;  %v3682_v32 = vld [vmem:[#allocation2 + $0x30] sm:$0xe] }
 0x11e   : > { %12794 = vmatprep.mubr.bf16.mxu0 %v11671_v19  ;;  %12846 = vmatprep.mubr.bf16.mxu1 %v13670_v0  ;;  %v14954_v6 = vcombine.low %v3011_v29, %v3021_v8  ;;  %v14960_v24 = vsel %vm14657_vm14, %v3754_v40, %v3755_v42  ;;  %v3029_v19 = vor.u32 %v3028_v20, %v3025_v36  ;;  %v3034_v49 = vrot.slane %v3032_v61, 5  ;;  %v3681_v0 = vld [vmem:[#allocation2 + $0x24] sm:$0xe]  ;;  %v13675_v42 = vld [vmem:[#allocation2 + $0x9c] sm:$0xff]  }
 0x11f   : > { %12871 = vmatpush3.bf16.msra.mxu0 %v13674_v14  ;;  %12921 = vmatpush3.bf16.msra.mxu1 %v13683_v35  ;;  %v3038_v46 = vrot.slane %v3036_v2, 4  ;;  %v3044_v63 = vrot.slane %v3042_v13, 5  ;;  %v3047_v22 = vshrl.u32 %v2935_v18, 16  ;;  %v3050_v7 = vshll.u32 %v2935_v18, 16 }
 0x120   : > { %12872 = vmatprep.subr.bf16.mxu0 %v13679_v26  ;;  %13002 = vmatprep.subr.bf16.mxu1 %v14927_v23  ;;  %v3030_v14 = vrot.slane %v3029_v19, 4  ;;  %v3056_v35 = vshll.u32 %v14933_v25, 16  ;;  %v3060_v31 = vshrl.u32 %v14933_v25, 16  ;;  %v3066_v43 = vshll.u32 %v14952_v58, 16 }
 0x121   : > { %v3039_v54 = vor.u32 %v3038_v46, %v3034_v49  ;;  %v3049_v51 = vrot.slane %v3047_v22, 4  ;;  %v3052_v5 = vrot.slane %v3050_v7, 5  ;;  %v11737_v40 = vrot.slane %v3681_v0, 9  ;;  %v2938_v46 = vld [vmem:[#allocation2 + $0x3c] sm:$0xf] }
 0x122   : > { %v3035_v29 = vsel %vm14318_vm11, %v3030_v14, %v3034_v49  ;;  %v3058_v18 = vrot.slane %v3056_v35, 5  ;;  %v3062_v36 = vrot.slane %v3060_v31, 4  ;;  %v3068_v20 = vrot.slane %v3066_v43, 5  ;;  %v14997_v35 = vld [vmem:[#allocation2 + $0x4c] sm:$0xf]  ;;  %v13680_v31 = vld [vmem:[#allocation2 + $0xb4] sm:$0xff]  }
 0x123   : > { %12873 = vmatpush3.bf16.msra.mxu0 %v13679_v26  ;;  %v3040_v61 = vrot.slane %v3039_v54, 4  ;;  %v3053_v8 = vor.u32 %v3052_v5, %v3049_v51  ;;  %v3759_v2 = vrot.slane %v14917_v12, 5  ;;  %v3762_v13 = vrot.slane %v14921_v16, 5  ;;  %v15007_v5 = vld [vmem:[#allocation2 + $0x50] sm:$0x1] }
 0x124   : > { %12954 = vmatprep.subr.bf16.mxu0 %v14956_v37  ;;  %v3063_v26 = vor.u32 %v3062_v36, %v3058_v18  ;;  %v11738_v19 = vrot.slane %v3682_v32, 9  ;;  %v3766_v49 = vrot.slane %v14933_v25, 5  ;;  %v3769_v0 = vrot.slane %v14952_v58, 5  ;;  %v13676_v25 = vld [vmem:[#allocation2 + $0xa8] sm:$0xff]  }
 0x125   : > { %12795 = vmatmul.mubr.bf16.gmra.mxu0 %v11672_v41  ;;  %12847 = vmatmul.mubr.bf16.gmra.mxu1 %v13671_v47  ;;  %v3045_v12 = vsel %vm14318_vm11, %v3040_v61, %v3044_v63  ;;  %v3054_v16 = vrot.slane %v3053_v8, 4  ;;  %v14983_v34 = vsel %vm14657_vm14, %v11737_v40, %v3759_v2  ;;  %v3761_v53 = vrot.slane %v3759_v2, 4  ;;  %v2939_v41 = vld [vmem:[#allocation2 + $0x40] sm:$0xf]  ;;  %v14985_v47 = vld [vmem:[#allocation2 + $0x44] sm:$0x1] }
 0x126   : > { %12798 = vmatprep.mubr.bf16.mxu0 %v11673_v27  ;;  %12850 = vmatprep.mubr.bf16.mxu1 %v13675_v42  ;;  %v11752_v58 = vcombine.low %v14948_v44, %v14960_v24  ;;  %v14989_v22 = vcombine.low %v3035_v29, %v3045_v12  ;;  %v3064_v1 = vrot.slane %v3063_v26, 4  ;;  %v3768_v52 = vrot.slane %v3766_v49, 4  ;;  %v2941_v27 = vld [vmem:[#allocation2 + $0x48] sm:$0xf] }
 0x127   : > { %v3059_v63 = vsel %vm14318_vm11, %v3054_v16, %v3058_v18  ;;  %v14995_v7 = vsel %vm14657_vm14, %v3761_v53, %v3762_v13  ;;  %v3071_v32 = vshrl.u32 %v2938_v46, 16  ;;  %v3074_v14 = vshll.u32 %v2938_v46, 16  ;;  %v3683_v46 = vld [vmem:[#allocation2 + $0x3c] sm:$0xe] }
 0x128   : > { %v3069_v43 = vsel %vm14318_vm11, %v3064_v1, %v3068_v20  ;;  %v11753_v42 = vcombine.low %v14983_v34, %v14995_v7  ;;  %v15005_v54 = vsel %vm14657_vm14, %v11738_v19, %v3766_v49  ;;  %v3080_v51 = vshll.u32 %v2939_v41, 16 }
 0x129   : > { %v15009_v40 = vcombine.low %v3059_v63, %v3069_v43  ;;  %v15013_v29 = vsel %vm14657_vm14, %v3768_v52, %v3769_v0  ;;  %v3073_v18 = vrot.slane %v3071_v32, 4  ;;  %v3076_v36 = vrot.slane %v3074_v14, 5  ;;  %v3684_v43 = vld [vmem:[#allocation2 + $0x48] sm:$0xe] }
 0x12a   : > { %v3082_v61 = vrot.slane %v3080_v51, 5  ;;  %v3084_v20 = vshrl.u32 %v2939_v41, 16  ;;  %v3090_v8 = vshll.u32 %v14985_v47, 16  ;;  %v3095_v2 = vshrl.u32 %v2941_v27, 16 }
 0x12b   : > { %v3077_v13 = vor.u32 %v3076_v36, %v3073_v18  ;;  %v3098_v26 = vshll.u32 %v2941_v27, 16  ;;  %v3104_v19 = vshll.u32 %v14997_v35, 16  ;;  %v3108_v49 = vshrl.u32 %v14997_v35, 16 }
 0x12c   : > { %v19002_v12 = vcombine.low %v14802_v33, %v14818_v59  ;;  %v3086_v0 = vrot.slane %v3084_v20, 4  ;;  %v3092_v16 = vrot.slane %v3090_v8, 5  ;;  %v3097_v53 = vrot.slane %v3095_v2, 4  ;;  %v2944_v2 = vld [vmem:[#allocation2 + $0x54] sm:$0xf] }
 0x12d   : > { %12851 = vmatmul.mubr.bf16.gmra.mxu1 %v13676_v25  ;;  %v3114_v1 = vshll.u32 %v15007_v5, 16  ;;  %v19003_v52 = vcombine.low %v14811_v55, %v14827_v21  ;;  %v3078_v27 = vrot.slane %v3077_v13, 4  ;;  %v3100_v63 = vrot.slane %v3098_v26, 5  ;;  %v13681_v55 = vld [vmem:[#allocation2 + $0xc0] sm:$0xff]  }
 0x12e   : > { %12799 = vmatmul.mubr.bf16.gmra.mxu0 %v19002_v12  ;;  %12854 = vmatprep.mubr.bf16.mxu1 %v13680_v31  ;;  %v3106_v32 = vrot.slane %v3104_v19, 5  ;;  %v3110_v14 = vrot.slane %v3108_v49, 4  ;;  %v3087_v51 = vor.u32 %v3086_v0, %v3082_v61  ;;  %v11739_v33 = vrot.slane %v3683_v46, 9  ;;  %v15032_v19 = vld [vmem:[#allocation2 + $0x58] sm:$0xf] }
 0x12f   : > { %12802 = vmatprep.mubr.bf16.mxu0 %v19003_v52  ;;  %v3116_v18 = vrot.slane %v3114_v1, 5  ;;  %v3773_v59 = vrot.slane %v2939_v41, 5  ;;  %v3083_v25 = vsel %vm14318_vm11, %v3078_v27, %v3082_v61  ;;  %v3101_v36 = vor.u32 %v3100_v63, %v3097_v53  ;;  %v15034_v49 = vld [vmem:[#allocation2 + $0x5c] sm:$0x1]  ;;  %v2947_v52 = vld [vmem:[#allocation2 + $0x60] sm:$0xf] }
 0x130   : > { %v3111_v20 = vor.u32 %v3110_v14, %v3106_v32  ;;  %v3776_v8 = vrot.slane %v14985_v47, 5  ;;  %v3088_v21 = vrot.slane %v3087_v51, 4  ;;  %v11740_v26 = vrot.slane %v3684_v43, 9  ;;  %v15044_v27 = vld [vmem:[#allocation2 + $0x64] sm:$0xf] }
 0x131   : > { %v15030_v31 = vsel %vm14657_vm14, %v11739_v33, %v3773_v59  ;;  %v3775_v13 = vrot.slane %v3773_v59, 4  ;;  %v3102_v41 = vrot.slane %v3101_v36, 4  ;;  %v3780_v61 = vrot.slane %v14997_v35, 5 }
 0x132   : > { %v3112_v46 = vrot.slane %v3111_v20, 4  ;;  %v3783_v12 = vrot.slane %v15007_v5, 5  ;;  %v3093_v47 = vsel %vm14318_vm11, %v3088_v21, %v3092_v16  ;;  %v3119_v53 = vshrl.u32 %v2944_v2, 16  ;;  %v15074_v20 = vld [vmem:[#allocation2 + $0x68] sm:$0x1] }
 0x133   : > { %v15042_v0 = vsel %vm14657_vm14, %v3775_v13, %v3776_v8  ;;  %v3122_v1 = vshll.u32 %v2944_v2, 16  ;;  %v11754_v63 = vcombine.low %v15005_v54, %v15013_v29  ;;  %v15048_v14 = vcombine.low %v3083_v25, %v3093_v47  ;;  %v3688_v29 = vld [vmem:[#allocation2 + $0x78] sm:$0xe] }
 0x134   : > { %v3107_v35 = vsel %vm14318_vm11, %v3102_v41, %v3106_v32  ;;  %v3117_v5 = vsel %vm14318_vm11, %v3112_v46, %v3116_v18  ;;  %v19004_v16 = vcombine.low %v14834_v38, %v14841_v50  ;;  %v11755_v51 = vcombine.low %v15030_v31, %v15042_v0 }
 0x135   : > { %12855 = vmatmul.mubr.bf16.gmra.mxu1 %v13681_v55  ;;  %v15057_v43 = vcombine.low %v3107_v35, %v3117_v5  ;;  %v3782_v33 = vrot.slane %v3780_v61, 4  ;;  %v3121_v59 = vrot.slane %v3119_v53, 4  ;;  %v19005_v25 = vcombine.low %v14848_v30, %v14863_v15  ;;  %v3685_v55 = vld [vmem:[#allocation2 + $0x54] sm:$0xe] }
 0x136   : > { %12803 = vmatmul.mubr.bf16.gmra.mxu0 %v19004_v16  ;;  %12922 = vmatprep.mubr.bf16.mxu1 %v11751_v4  ;;  %v3124_v32 = vrot.slane %v3122_v1, 5  ;;  %v3128_v38 = vshll.u32 %v15032_v19, 16  ;;  %v3132_v50 = vshrl.u32 %v15032_v19, 16  ;;  %v3138_v18 = vshll.u32 %v15034_v49, 16  ;;  %v13690_v16 = vld [vmem:[#allocation6 + $0x1f0] sm:$0xff]  }
 0x137   : > { %12806 = vmatprep.mubr.bf16.mxu0 %v19005_v25  ;;  %v15072_v36 = vsel %vm14657_vm14, %v11740_v26, %v3780_v61  ;;  %v3143_v8 = vshrl.u32 %v2947_v52, 16  ;;  %v3146_v30 = vshll.u32 %v2947_v52, 16  ;;  %v3152_v15 = vshll.u32 %v15044_v27, 16  ;;  %v3686_v26 = vld [vmem:[#allocation2 + $0x60] sm:$0xe] }
 0x138   : > { %v15079_v3 = vsel %vm14657_vm14, %v3782_v33, %v3783_v12  ;;  %v3125_v39 = vor.u32 %v3124_v32, %v3121_v59  ;;  %v3130_v4 = vrot.slane %v3128_v38, 5  ;;  %v3134_v2 = vrot.slane %v3132_v50, 4  ;;  %v2950_v38 = vld [vmem:[#allocation2 + $0x6c] sm:$0xf]  ;;  %v15089_v50 = vld [vmem:[#allocation2 + $0x70] sm:$0xf] }
 0x139   : > { %v3140_v21 = vrot.slane %v3138_v18, 5  ;;  %v3145_v13 = vrot.slane %v3143_v8, 4  ;;  %v3148_v41 = vrot.slane %v3146_v30, 5  ;;  %v3154_v46 = vrot.slane %v3152_v15, 5  ;;  %v15101_v15 = vld [vmem:[#allocation2 + $0x74] sm:$0x1] }
 0x13a   : > { %v3126_v61 = vrot.slane %v3125_v39, 4  ;;  %v3135_v47 = vor.u32 %v3134_v2, %v3130_v4  ;;  %v3156_v53 = vshrl.u32 %v15044_v27, 16  ;;  %v3162_v1 = vshll.u32 %v15074_v20, 16  ;;  %v2953_v39 = vld [vmem:[#allocation2 + $0x78] sm:$0xf] }
 0x13b   : > { %v3149_v52 = vor.u32 %v3148_v41, %v3145_v13  ;;  %v11741_v35 = vrot.slane %v3685_v55, 9  ;;  %v3787_v12 = vrot.slane %v15032_v19, 5  ;;  %v3790_v5 = vrot.slane %v15034_v49, 5  ;;  %v15124_v13 = vld [vmem:[#allocation2 + $0x80] sm:$0x1]  ;;  %v13685_v41 = vld [vmem:[#allocation6 + $0x1b0] sm:$0xff]  }
 0x13c   : > { %v11756_v33 = vcombine.low %v15072_v36, %v15079_v3  ;;  %v3131_v59 = vsel %vm14318_vm11, %v3126_v61, %v3130_v4  ;;  %v3136_v25 = vrot.slane %v3135_v47, 4  ;;  %v3158_v32 = vrot.slane %v3156_v53, 4 }
 0x13d   : > { %v19006_v18 = vcombine.low %v14871_v48, %v14875_v28  ;;  %12923 = vmatmul.mubr.bf16.vlgmr.msra.gmra.mxu1 %v11752_v58  ;;  %v3150_v19 = vrot.slane %v3149_v52, 4  ;;  %v3164_v49 = vrot.slane %v3162_v1, 5  ;;  %v15099_v8 = vsel %vm14657_vm14, %v11741_v35, %v3787_v12  ;;  %v13692_v58 = vld [vmem:[#allocation6 + $0x1e8] sm:$0xff]  }
 0x13e   : > { %v3789_v30 = vrot.slane %v3787_v12, 4  ;;  %12926 = vmatprep.mubr.bf16.mxu1 %v11753_v42  ;;  %v3141_v48 = vsel %vm14318_vm11, %v3136_v25, %v3140_v21  ;;  %v3159_v28 = vor.u32 %v3158_v32, %v3154_v46  ;;  %v11742_v44 = vrot.slane %v3686_v26, 9  ;;  %13003 = vmatpush3.bf16.msra.mxu1 %v14927_v23  ;;  %v15122_v21 = vld [vmem:[#allocation2 + $0x7c] sm:$0xf] }
 0x13f   : > { %12807 = vmatmul.mubr.bf16.gmra.mxu0 %v19006_v18  ;;  %v3794_v24 = vrot.slane %v15044_v27, 5  ;;  %v15110_v4 = vcombine.low %v3131_v59, %v3141_v48  ;;  %v3167_v55 = vshrl.u32 %v2950_v38, 16  ;;  %v3155_v34 = vsel %vm14318_vm11, %v3150_v19, %v3154_v46  ;;  %13004 = vmatprep.subr.bf16.mxu1 %v13690_v16  ;;  %v3687_v59 = vld [vmem:[#allocation2 + $0x6c] sm:$0xe] }
 0x140   : > { %12874 = vmatprep.mubr.bf16.mxu0 %v14929_v17  ;;  %v15114_v2 = vsel %vm14657_vm14, %v3789_v30, %v3790_v5  ;;  %v3797_v17 = vrot.slane %v15074_v20, 5  ;;  %v3160_v7 = vrot.slane %v3159_v28, 4  ;;  %v3170_v61 = vshll.u32 %v2950_v38, 16  ;;  %v13693_v28 = vld [vmem:[#allocation6 + $0x1e0] sm:$0xff]  }
 0x141   : > { %v11757_v42 = vcombine.low %v15099_v8, %v15114_v2  ;;  %v3796_v27 = vrot.slane %v3794_v24, 4  ;;  %v3169_v26 = vrot.slane %v3167_v55, 4  ;;  %v3176_v20 = vshll.u32 %v15089_v50, 16 }
 0x142   : > { %v3180_v23 = vshrl.u32 %v15089_v50, 16  ;;  %v3165_v46 = vsel %vm14318_vm11, %v3160_v7, %v3164_v49  ;;  %v15132_v47 = vsel %vm14657_vm14, %v11742_v44, %v3794_v24  ;;  %v3186_v53 = vshll.u32 %v15101_v15, 16  ;;  %13005 = vmatpush3.bf16.msra.mxu1 %v13690_v16  ;;  %v15148_v16 = vpop.f32.mrf.mxu1  ;;  %v2956_v7 = vld [vmem:[#allocation2 + $0x84] sm:$0xf] }
 0x143   : > { %v3191_v1 = vshrl.u32 %v2953_v39, 16  ;;  %v15135_v52 = vcombine.low %v3155_v34, %v3165_v46  ;;  %v15139_v35 = vsel %vm14657_vm14, %v3796_v27, %v3797_v17  ;;  %v3172_v12 = vrot.slane %v3170_v61, 5  ;;  %13006 = vmatprep.subr.bf16.mxu1 %v13692_v58  ;;  %v15160_v61 = vld [vmem:[#allocation2 + $0x88] sm:$0xf]  ;;  %v13687_v46 = vld [vmem:[#allocation6 + $0x1a0] sm:$0xff]  }
 0x144   : > { %v3178_v5 = vrot.slane %v3176_v20, 5  ;;  %v3182_v25 = vrot.slane %v3180_v23, 4  ;;  %v3188_v32 = vrot.slane %v3186_v53, 5  ;;  %v3194_v18 = vshll.u32 %v2953_v39, 16  ;;  %v13686_v39 = vld [vmem:[#allocation6 + $0x1a8] sm:$0xff]   ;;  %v15167_v23 = vpop.f32.mrf.mxu1 }
 0x145   : > { %v3193_v38 = vrot.slane %v3191_v1, 4  ;;  %12927 = vmatmul.mubr.bf16.gmra.mxu1 %v11754_v63  ;;  %v3173_v19 = vor.u32 %v3172_v12, %v3169_v26  ;;  %v3200_v49 = vshll.u32 %v15122_v21, 16  ;;  %v3204_v30 = vshrl.u32 %v15122_v21, 16  ;;  %v15165_v20 = vld [vmem:[#allocation2 + $0x8c] sm:$0x1] }
 0x146   : > { %v3210_v48 = vshll.u32 %v15124_v13, 16  ;;  %v3196_v44 = vrot.slane %v3194_v18, 5  ;;  %v11743_v24 = vrot.slane %v3687_v59, 9  ;;  %v3801_v54 = vrot.slane %v15089_v50, 5  ;;  %12930 = vmatprep.mubr.bf16.mxu1 %v11755_v51  ;;  %13007 = vmatpush3.bf16.msra.mxu1 %v13692_v58  ;;  %v13695_v18 = vld [vmem:[#allocation6 + $0x1d8] sm:$0xff]  }
 0x147   : > { %12875 = vmatmul.mubr.bf16.vlgmr.msra.gmra.mxu0 %v14954_v6  ;;  %v3183_v6 = vor.u32 %v3182_v25, %v3178_v5  ;;  %v3174_v63 = vrot.slane %v3173_v19, 4  ;;  %v3202_v17 = vrot.slane %v3200_v49, 5  ;;  %v3206_v55 = vrot.slane %v3204_v30, 4  ;;  %13008 = vmatprep.subr.bf16.mxu1 %v13693_v28  ;;  %v15185_v19 = vpop.f32.mrf.mxu0 }
 0x148   : > { %12955 = vmatpush3.bf16.msra.mxu0 %v14956_v37  ;;  %12878 = vmatprep.mubr.bf16.mxu0 %v14989_v22  ;;  %v3212_v34 = vrot.slane %v3210_v48, 5  ;;  %v3197_v27 = vor.u32 %v3196_v44, %v3193_v38  ;;  %v15158_v22 = vsel %vm14657_vm14, %v11743_v24, %v3801_v54  ;;  %v3803_v26 = vrot.slane %v3801_v54, 4  ;;  %v15194_v44 = vld [vmem:[#allocation2 + $0x94] sm:$0xf]  ;;  %v15196_v24 = vld [vmem:[#allocation6 + $0x1d0] sm:$0xff]  }
 0x149   : > { %12956 = vmatprep.subr.bf16.mxu0 %v13685_v41  ;;  %v3184_v37 = vrot.slane %v3183_v6, 4  ;;  %v3179_v50 = vsel %vm14318_vm11, %v3174_v63, %v3178_v5  ;;  %v3207_v31 = vor.u32 %v3206_v55, %v3202_v17  ;;  %v3804_v0 = vrot.slane %v15101_v15, 5  ;;  %v15209_v54 = vld [vmem:[#allocation2 + $0x98] sm:$0x1] }
 0x14a   : > { %v11744_v51 = vrot.slane %v3688_v29, 9  ;;  %v3198_v1 = vrot.slane %v3197_v27, 4  ;;  %v3808_v58 = vrot.slane %v15122_v21, 5  ;;  %v3811_v12 = vrot.slane %v15124_v13, 5  ;;  %v2959_v13 = vld [vmem:[#allocation2 + $0x90] sm:$0xf]  ;;  %13009 = vmatpush3.bf16.msra.mxu1 %v13693_v28  ;;  %v15198_v28 = vpop.f32.mrf.mxu1 }
 0x14b   : > { %v3189_v53 = vsel %vm14318_vm11, %v3184_v37, %v3188_v32  ;;  %v11758_v15 = vcombine.low %v15132_v47, %v15139_v35  ;;  %v3208_v5 = vrot.slane %v3207_v31, 4  ;;  %v15177_v59 = vsel %vm14657_vm14, %v3803_v26, %v3804_v0  ;;  %v3689_v29 = vld [vmem:[#allocation2 + $0x84] sm:$0xe]  ;;  %13010 = vmatprep.subr.bf16.mxu1 %v13695_v18 }
 0x14c   : > { %12957 = vmatpush3.bf16.msra.mxu0 %v13685_v41  ;;  %v3215_v25 = vshrl.u32 %v2956_v7, 16  ;;  %v15179_v41 = vcombine.low %v3179_v50, %v3189_v53  ;;  %v3203_v32 = vsel %vm14318_vm11, %v3198_v1, %v3202_v17  ;;  %v11759_v21 = vcombine.low %v15158_v22, %v15177_v59  ;;  %v15219_v50 = vpop.f32.mrf.mxu0  ;;  %v15223_v0 = vpop.f32.mrf.mxu1  ;;  %v15263_v59 = vld [vmem:[#allocation2 + $0xa4] sm:$0x1] }
 0x14d   : > { %12958 = vmatprep.subr.bf16.mxu0 %v13686_v39  ;;  %v3810_v38 = vrot.slane %v3808_v58, 4  ;;  %12931 = vmatmul.mubr.bf16.gmra.mxu1 %v11756_v33  ;;  %v3213_v49 = vsel %vm14318_vm11, %v3208_v5, %v3212_v34  ;;  %v3218_v48 = vshll.u32 %v2956_v7, 16  ;;  %v3224_v6 = vshll.u32 %v15160_v61, 16  ;;  %v3690_v34 = vld [vmem:[#allocation2 + $0x90] sm:$0xe]  ;;  %19007 = vst [vmem:[#allocation18_spill] sm:$0xff] %v15223_v0 }
 0x14e   : > { %v3217_v30 = vrot.slane %v3215_v25, 4  ;;  %v15205_v36 = vsel %vm14657_vm14, %v11744_v51, %v3808_v58  ;;  %v3228_v3 = vshrl.u32 %v15160_v61, 16  ;;  %v3234_v33 = vshll.u32 %v15165_v20, 16  ;;  %12934 = vmatprep.mubr.bf16.mxu1 %v11757_v42  ;;  %13011 = vmatpush3.bf16.msra.mxu1 %v13695_v18  ;;  %v13691_v58 = vld [vmem:[#allocation6 + $0x190] sm:$0xff]   ;;  %v2962_v5 = vld [vmem:[#allocation2 + $0x9c] sm:$0xf] }
 0x14f   : > { %12879 = vmatmul.mubr.bf16.gmra.mxu0 %v15009_v40  ;;  %v15201_v40 = vcombine.low %v3203_v32, %v3213_v49  ;;  %v3220_v63 = vrot.slane %v3218_v48, 5  ;;  %v3226_v17 = vrot.slane %v3224_v6, 5  ;;  %v3239_v55 = vshrl.u32 %v2959_v13, 16  ;;  %13012 = vmatprep.subr.bf16.mxu1 %v15196_v24  ;;  %v13698_v48 = vld [vmem:[#allocation6 + $0x1c8] sm:$0xff]   ;;  %v15232_v6 = vpop.f32.mrf.mxu0 }
 0x150   : > { %12882 = vmatprep.mubr.bf16.mxu0 %v15048_v14  ;;  %12959 = vmatpush3.bf16.msra.mxu0 %v13686_v39  ;;  %v13688_v14 = vld [vmem:[#allocation6 + $0x198] sm:$0xff]   ;;  %v15216_v39 = vsel %vm14657_vm14, %v3810_v38, %v3811_v12  ;;  %v3230_v7 = vrot.slane %v3228_v3, 4  ;;  %v3236_v37 = vrot.slane %v3234_v33, 5  ;;  %v3242_v27 = vshll.u32 %v2959_v13, 16 }
 0x151   : > { %12960 = vmatprep.subr.bf16.mxu0 %v13687_v46  ;;  %v3248_v26 = vshll.u32 %v15194_v44, 16  ;;  %v3221_v31 = vor.u32 %v3220_v63, %v3217_v30  ;;  %v3241_v8 = vrot.slane %v3239_v55, 4  ;;  %v3252_v2 = vshrl.u32 %v15194_v44, 16  ;;  %v15255_v63 = vld [vmem:[#allocation2 + $0xa0] sm:$0xf] }
 0x152   : > { %v3258_v42 = vshll.u32 %v15209_v54, 16  ;;  %v3231_v51 = vor.u32 %v3230_v7, %v3226_v17  ;;  %v3244_v53 = vrot.slane %v3242_v27, 5  ;;  %v11745_v12 = vrot.slane %v3689_v29, 9  ;;  %13013 = vmatpush3.bf16.msra.mxu1 %v15196_v24  ;;  %v15278_v7 = vld [vmem:[#allocation2 + $0xb0] sm:$0x1]  ;;  %v15280_v24 = vpop.f32.mrf.mxu0 }
 0x153   : > { %v15225_v1 = vrot.slane %v3248_v26, 5  ;;  %v3222_v25 = vrot.slane %v3221_v31, 4  ;;  %v3254_v32 = vrot.slane %v3252_v2, 4  ;;  %v3815_v13 = vrot.slane %v15160_v61, 5  ;;  %13014 = vmatprep.subr.bf16.mxu1 %v13698_v48  ;;  %19008 = vst [vmem:[#allocation19_spill] sm:$0xff] %v15280_v24 }
 0x154   : > { %12961 = vmatpush3.bf16.msra.mxu0 %v13687_v46  ;;  %v15228_v38 = vrot.slane %v3258_v42, 5  ;;  %v3232_v18 = vrot.slane %v3231_v51, 4  ;;  %v3245_v49 = vor.u32 %v3244_v53, %v3241_v8  ;;  %v3818_v46 = vrot.slane %v15165_v20, 5  ;;  %v15243_v20 = vpop.f32.mrf.mxu1  ;;  %v3691_v2 = vld [vmem:[#allocation2 + $0x9c] sm:$0xe] }
 0x155   : > { %12962 = vmatprep.subr.bf16.mxu0 %v13688_v14  ;;  %v11746_v30 = vrot.slane %v3690_v34, 9  ;;  %12935 = vmatmul.mubr.bf16.gmra.mxu1 %v11758_v15  ;;  %v3227_v3 = vsel %vm14318_vm11, %v3222_v25, %v3226_v17  ;;  %v3255_v33 = vor.u32 %v3254_v32, %v15225_v1  ;;  %v3816_v61 = vsel %vm14657_vm14, %v11745_v12, %v3815_v13  ;;  %v13694_v17 = vld [vmem:[#allocation6 + $0x188] sm:$0xff]   ;;  %v2965_v34 = vld [vmem:[#allocation2 + $0xa8] sm:$0xf] }
 0x156   : > { %v3817_v29 = vrot.slane %v3815_v13, 4  ;;  %12938 = vmatprep.mubr.bf16.mxu1 %v11759_v21  ;;  %v15251_v47 = vrot.slane %v3245_v49, 4  ;;  %v3822_v35 = vrot.slane %v15194_v44, 5  ;;  %v3825_v15 = vrot.slane %v15209_v54, 5  ;;  %v15283_v42 = vpop.f32.mrf.mxu1  ;;  %v3692_v49 = vld [vmem:[#allocation2 + $0xa8] sm:$0xe]  ;;  %13015 = vmatpush3.bf16.msra.mxu1 %v13698_v48 }
 0x157   : > { %12883 = vmatmul.mubr.bf16.gmra.mxu0 %v15057_v43  ;;  %v3237_v43 = vsel %vm14318_vm11, %v3232_v18, %v3236_v37  ;;  %v15259_v55 = vrot.slane %v3255_v33, 4  ;;  %v3263_v21 = vshrl.u32 %v2962_v5, 16  ;;  %v13699_v37 = vld [vmem:[#allocation6 + $0x1c0] sm:$0xff]   ;;  %v3266_v31 = vshll.u32 %v2962_v5, 16 }
 0x158   : > { %12886 = vmatprep.mubr.bf16.mxu0 %v15110_v4  ;;  %12963 = vmatpush3.bf16.msra.mxu0 %v13688_v14  ;;  %v11760_v4 = vcombine.low %v15205_v36, %v15216_v39  ;;  %v3819_v22 = vsel %vm14657_vm14, %v3817_v29, %v3818_v46  ;;  %v15266_v44 = vcombine.low %v3227_v3, %v3237_v43  ;;  %v3824_v14 = vrot.slane %v3822_v35, 4  ;;  %v15276_v39 = vld [vmem:[#allocation2 + $0xac] sm:$0xf]  ;;  %v13697_v46 = vld [vmem:[#allocation6 + $0x180] sm:$0xff]  }
 0x159   : > { %v3251_v54 = vsel %vm14318_vm11, %v15251_v47, %v15225_v1  ;;  %12964 = vmatprep.subr.bf16.mxu0 %v13691_v58  ;;  %v15274_v36 = vsel %vm14657_vm14, %v11746_v30, %v3822_v35  ;;  %v11761_v27 = vcombine.low %v3816_v61, %v3819_v22  ;;  %v3265_v26 = vrot.slane %v3263_v21, 4  ;;  %13016 = vmatprep.subr.bf16.mxu1 %v13699_v37  ;;  %v15298_v61 = vpop.f32.mrf.mxu0 }
 0x15a   : > { %v3272_v8 = vshll.u32 %v15255_v63, 16  ;;  %v3261_v51 = vsel %vm14318_vm11, %v15259_v55, %v15228_v38  ;;  %v15291_v53 = vsel %vm14657_vm14, %v3824_v14, %v3825_v15  ;;  %v3276_v12 = vshrl.u32 %v15255_v63, 16  ;;  %v15303_v15 = vpop.f32.mrf.mxu1  ;;  %13017 = vmatpush3.bf16.msra.mxu1 %v13699_v37  ;;  %v15321_v37 = vld [vmem:[#allocation2 + $0xb8] sm:$0xf] }
 0x15b   : > { %v3282_v25 = vshll.u32 %v15263_v59, 16  ;;  %v11762_v5 = vcombine.low %v15274_v36, %v15291_v53  ;;  %v3268_v32 = vrot.slane %v3266_v31, 5  ;;  %v3287_v18 = vshrl.u32 %v2965_v34, 16 }
 0x15c   : > { %12965 = vmatpush3.bf16.msra.mxu0 %v13691_v58  ;;  %v3274_v13 = vrot.slane %v3272_v8, 5  ;;  %v3278_v30 = vrot.slane %v3276_v12, 4  ;;  %v3290_v3 = vshll.u32 %v2965_v34, 16  ;;  %v3296_v33 = vshll.u32 %v15276_v39, 16 }
 0x15d   : > { %v3284_v38 = vrot.slane %v3282_v25, 5  ;;  %12966 = vmatprep.subr.bf16.mxu0 %v13694_v17  ;;  %12939 = vmatmul.mubr.bf16.gmra.mxu1 %v11760_v4  ;;  %v3269_v58 = vor.u32 %v3268_v32, %v3265_v26  ;;  %v3289_v29 = vrot.slane %v3287_v18, 4  ;;  %v3300_v43 = vshrl.u32 %v15276_v39, 16  ;;  %v15314_v25 = vpop.f32.mrf.mxu0  ;;  %v15323_v18 = vld [vmem:[#allocation2 + $0xbc] sm:$0x1] }
 0x15e   : > { %v3306_v35 = vshll.u32 %v15278_v7, 16  ;;  %12942 = vmatprep.mubr.bf16.mxu1 %v11761_v27  ;;  %v3279_v48 = vor.u32 %v3278_v30, %v3274_v13  ;;  %v3292_v55 = vrot.slane %v3290_v3, 5  ;;  %v15306_v22 = vrot.slane %v3296_v33, 5  ;;  %v15312_v27 = vld [vmem:[#allocation6 + $0x238] sm:$0xff]   ;;  %v473_v33 = vld [vmem:[#allocation2 + $0xc8] sm:$0x1] }
 0x15f   : > { %12887 = vmatmul.mubr.bf16.gmra.mxu0 %v15135_v52  ;;  %v11747_v21 = vrot.slane %v3691_v2, 9  ;;  %v3270_v34 = vrot.slane %v3269_v58, 4  ;;  %v3302_v14 = vrot.slane %v3300_v43, 4  ;;  %v3829_v4 = vrot.slane %v15255_v63, 5  ;;  %v15347_v1 = vpop.f32.mrf.mxu0 }
 0x160   : > { %12890 = vmatprep.mubr.bf16.mxu0 %v15179_v41  ;;  %v15308_v52 = vrot.slane %v3306_v35, 5  ;;  %12967 = vmatpush3.bf16.msra.mxu0 %v13694_v17  ;;  %v3280_v26 = vrot.slane %v3279_v48, 4  ;;  %v3293_v31 = vor.u32 %v3292_v55, %v3289_v29  ;;  %v3832_v8 = vrot.slane %v15263_v59, 5  ;;  %v2968_v41 = vld [vmem:[#allocation2 + $0xb4] sm:$0xf]  ;;  %v15325_v59 = vpop.f32.mrf.mxu1 }
 0x161   : > { %v11748_v12 = vrot.slane %v3692_v49, 9  ;;  %12968 = vmatprep.subr.bf16.mxu0 %v13697_v46  ;;  %v3275_v2 = vsel %vm14318_vm11, %v3270_v34, %v3274_v13  ;;  %v3303_v32 = vor.u32 %v3302_v14, %v15306_v22  ;;  %v3830_v63 = vsel %vm14657_vm14, %v11747_v21, %v3829_v4  ;;  %19009 = vst [vmem:[#allocation20_spill] sm:$0xff] %v15325_v59  ;;  %v15344_v21 = vld [vmem:[#allocation2 + $0xc4] sm:$0xf] }
 0x162   : > { %v3831_v17 = vrot.slane %v3829_v4, 4  ;;  %v3285_v49 = vsel %vm14318_vm11, %v3280_v26, %v3284_v38  ;;  %v15329_v30 = vrot.slane %v3293_v31, 4  ;;  %v3836_v3 = vrot.slane %v15276_v39, 5  ;;  %v2971_v38 = vld [vmem:[#allocation2 + $0xc0] sm:$0xf]  ;;  %v15358_v34 = vpop.f32.mrf.mxu1 }
 0x163   : > { %v3839_v13 = vrot.slane %v15278_v7, 5  ;;  %v11722_v58 = vcombine.low %v3251_v54, %v3261_v51  ;;  %v15338_v29 = vrot.slane %v3303_v32, 4  ;;  %v3311_v35 = vshrl.u32 %v2968_v41, 16 }
 0x164   : > { %v3833_v43 = vsel %vm14657_vm14, %v3831_v17, %v3832_v8  ;;  %12969 = vmatpush3.bf16.msra.mxu0 %v13697_v46  ;;  %v11723_v48 = vcombine.low %v3275_v2, %v3285_v49  ;;  %v3837_v39 = vsel %vm14657_vm14, %v11748_v12, %v3836_v3  ;;  %v3838_v7 = vrot.slane %v3836_v3, 4  ;;  %v15375_v49 = vpop.f32.mrf.mxu1 }
 0x165   : > { %v11763_v55 = vcombine.low %v3830_v63, %v3833_v43  ;;  %13050 = vmatprep.subr.bf16.mxu0 %v15312_v27  ;;  %12943 = vmatmul.mubr.bf16.gmra.mxu1 %v11762_v5  ;;  %v3299_v47 = vsel %vm14318_vm11, %v15329_v30, %v15306_v22  ;;  %v3313_v54 = vrot.slane %v3311_v35, 4  ;;  %v3314_v51 = vshll.u32 %v2968_v41, 16  ;;  %v3693_v22 = vld [vmem:[#allocation2 + $0xb4] sm:$0xe]  ;;  %v15371_v41 = vpop.f32.mrf.mxu0 }
 0x166   : > { %v3320_v46 = vshll.u32 %v15321_v37, 16  ;;  %v3840_v36 = vsel %vm14657_vm14, %v3838_v7, %v3839_v13  ;;  %v3324_v53 = vshrl.u32 %v15321_v37, 16  ;;  %v3330_v5 = vshll.u32 %v15323_v18, 16  ;;  %19010 = vst [vmem:[#allocation21_spill] sm:$0xff] %v15371_v41  ;;  %v13710_v41 = vld [vmem:[#allocation2 + $0x6c] sm:$0xff]  }
 0x167   : > { %12891 = vmatmul.mubr.bf16.gmra.mxu0 %v15201_v40  ;;  %v3309_v40 = vsel %vm14318_vm11, %v15338_v29, %v15308_v52  ;;  %12946 = vmatprep.mubr.bf16.mxu1 %v11763_v55  ;;  %v11764_v14 = vcombine.low %v3837_v39, %v3840_v36  ;;  %v3316_v4 = vrot.slane %v3314_v51, 5  ;;  %v3335_v12 = vshrl.u32 %v2971_v38, 16  ;;  %v3694_v29 = vld [vmem:[#allocation2 + $0xc0] sm:$0xe]  ;;  %v4562_v39 = vld [vmem:[#allocation2 + $0x18] sm:$0xf] }
 0x168   : > { %12894 = vmatprep.mubr.bf16.mxu0 %v15266_v44  ;;  %v3322_v26 = vrot.slane %v3320_v46, 5  ;;  %v474_v44 = vsel %vm14262_vm4, 0, %v473_v33  ;;  %v3326_v31 = vrot.slane %v3324_v53, 4  ;;  %v3332_v8 = vrot.slane %v3330_v5, 5  ;;  %v4563_v36 = vld [vmem:[#allocation2 + $0x1c] sm:$0xf]  ;;  %v15383_v53 = vpop.f32.mrf.mxu0 }
 0x169   : > { %475 = vst [vmem:[#allocation2 + $0xc8] sm:$0x1] %v474_v44  ;;  %v3338_v52 = vshll.u32 %v2971_v38, 16  ;;  %v3317_v2 = vor.u32 %v3316_v4, %v3313_v54  ;;  %v3344_v32 = vshll.u32 %v15344_v21, 16  ;;  %v3348_v63 = vshrl.u32 %v15344_v21, 16  ;;  %v15388_v4 = vpop.f32.mrf.mxu1 }
 0x16a   : > { %v11749_v17 = vrot.slane %v3693_v22, 9  ;;  %v3327_v30 = vor.u32 %v3326_v31, %v3322_v26  ;;  %v3337_v3 = vrot.slane %v3335_v12, 4  ;;  %v3843_v33 = vrot.slane %v15321_v37, 5  ;;  %v4564_v22 = vld [vmem:[#allocation2 + $0x20] sm:$0x1] }
 0x16b   : > { %v3340_v13 = vrot.slane %v3338_v52, 5  ;;  %v3318_v43 = vrot.slane %v3317_v2, 4  ;;  %v15378_v35 = vrot.slane %v3344_v32, 5  ;;  %v3350_v38 = vrot.slane %v3348_v63, 4  ;;  %v15407_v63 = vpop.f32.mrf.mxu0 }
 0x16c   : > { %v3846_v55 = vrot.slane %v15323_v18, 5  ;;  %v3328_v7 = vrot.slane %v3327_v30, 4  ;;  %v3844_v51 = vsel %vm14657_vm14, %v11749_v17, %v3843_v33  ;;  %v3845_v46 = vrot.slane %v3843_v33, 4 }
 0x16d   : > { %v3341_v54 = vor.u32 %v3340_v13, %v3337_v3  ;;  %12947 = vmatmul.mubr.bf16.gmra.mxu1 %v11764_v14  ;;  %v3323_v37 = vsel %vm14318_vm11, %v3318_v43, %v3322_v26  ;;  %v3351_v5 = vor.u32 %v3350_v38, %v15378_v35  ;;  %v11724_v18 = vcombine.low %v3299_v47, %v3309_v40  ;;  %v4565_v14 = vld [vmem:[#allocation2 + $0x24] sm:$0xf]  ;;  %v4566_v3 = vld [vmem:[#allocation2 + $0x28] sm:$0xf]  ;;  %v15409_v13 = vpop.f32.mrf.mxu1 }
 0x16e   : > { %v3333_v44 = vsel %vm14318_vm11, %v3328_v7, %v3332_v8  ;;  %v3847_v31 = vsel %vm14657_vm14, %v3845_v46, %v3846_v55  ;;  %v11750_v2 = vrot.slane %v3694_v29, 9  ;;  %v3850_v32 = vrot.slane %v15344_v21, 5  ;;  %19011 = vst [vmem:[#allocation22_spill] sm:$0xff] %v15409_v13  ;;  %v4568_v7 = vld [vmem:[#allocation2 + $0x30] sm:$0xf] }
 0x16f   : > { %12895 = vmatmul.mubr.bf16.gmra.mxu0 %v11722_v58  ;;  %v15396_v58 = vadd.f32 %v15148_v16, %v15185_v19  ;;  %v15398_v26 = vrot.slane %v3341_v54, 4  ;;  %v11765_v52 = vcombine.low %v3844_v51, %v3847_v31  ;;  %v15405_v40 = vrot.slane %v3351_v5, 4 }
 0x170   : > { %12898 = vmatprep.mubr.bf16.mxu0 %v11723_v48  ;;  %v1009_v12 = vld [vmem:[#allocation2 + $0xc8] sm:$0x1]  ;;  %v11725_v48 = vcombine.low %v3323_v37, %v3333_v44  ;;  %v4611_v8 = vshrl.u32 %v4562_v39, 16  ;;  %v4614_v16 = vshll.u32 %v4562_v39, 16  ;;  %v4620_v19 = vshll.u32 %v4563_v36, 16  ;;  %v15419_v37 = vpop.f32.mrf.mxu0  ;;  %v15422_v44 = vpop.f32.mrf.mxu1 }
 0x171   : > { %v1010_v47 = vsel %vm14257_vm3, %v848_v57, %v1009_v12  ;;  %12950 = vmatprep.mubr.bf16.mxu1 %v11765_v52  ;;  %v4624_v17 = vshrl.u32 %v4563_v36, 16  ;;  %v4630_v30 = vshll.u32 %v4564_v22, 16  ;;  %v15413_v60 = vadd.f32 %v15167_v23, %v15219_v50  ;;  %v15415_v57 = vld [vmem:[#allocation2 + $0x2c] sm:$0x1] }
 0x172   : > { %1011 = vst [vmem:[#allocation2 + $0xc8] sm:$0x1] %v1010_v47  ;;  %v4613_v21 = vrot.slane %v4611_v8, 4  ;;  %v4635_v33 = vshrl.u32 %v4565_v14, 16  ;;  %v4638_v29 = vshll.u32 %v4565_v14, 16  ;;  %v3851_v43 = vsel %vm14657_vm14, %v11750_v2, %v3850_v32 }
 0x173   : > { %v4616_v38 = vrot.slane %v4614_v16, 5  ;;  %v4622_v55 = vrot.slane %v4620_v19, 5  ;;  %v4626_v39 = vrot.slane %v4624_v17, 4  ;;  %v4644_v46 = vshll.u32 %v4566_v3, 16 }
 0x174   : > { %v4637_v54 = vrot.slane %v4635_v33, 4  ;;  %v4640_v51 = vrot.slane %v4638_v29, 5  ;;  %v4648_v36 = vshrl.u32 %v4566_v3, 16  ;;  %v4632_v5 = vrot.slane %v4630_v30, 5 }
 0x175   : > { %v4617_v23 = vor.u32 %v4616_v38, %v4613_v21  ;;  %v4627_v50 = vor.u32 %v4626_v39, %v4622_v55  ;;  %v4654_v22 = vshll.u32 %v15415_v57, 16  ;;  %v15424_v14 = vrot.slane %v4644_v46, 5  ;;  %v15435_v21 = vpop.f32.mrf.mxu0  ;;  %v15441_v38 = vpop.f32.mrf.mxu1 }
 0x176   : > { %v4641_v31 = vor.u32 %v4640_v51, %v4637_v54  ;;  %v4650_v12 = vrot.slane %v4648_v36, 4  ;;  %v15428_v52 = vadd.f32 %v15198_v28, %v15232_v6  ;;  %v3852_v2 = vrot.slane %v3850_v32, 4  ;;  %19012 = vst [vmem:[#allocation23_spill] sm:$0xff] %v15435_v21  ;;  %v4570_v32 = vld [vmem:[#allocation2 + $0x38] sm:$0x1] }
 0x177   : > { %12899 = vmatmul.mubr.bf16.gmra.mxu0 %v11724_v18  ;;  %v4618_v47 = vrot.slane %v4617_v23, 4  ;;  %v4628_v8 = vrot.slane %v4627_v50, 4  ;;  %v4656_v18 = vrot.slane %v4654_v22, 5  ;;  %v15433_v30 = vadd.f32 %v15243_v20, %v15298_v61  ;;  %v4571_v51 = vld [vmem:[#allocation2 + $0x3c] sm:$0xf] }
 0x178   : > { %12902 = vmatprep.mubr.bf16.mxu0 %v11725_v48  ;;  %v4642_v19 = vrot.slane %v4641_v31, 4  ;;  %v4651_v17 = vor.u32 %v4650_v12, %v15424_v14  ;;  %v4569_v48 = vld [vmem:[#allocation2 + $0x34] sm:$0xf]  ;;  %v4659_v3 = vshrl.u32 %v4568_v7, 16  ;;  %v3347_v20 = vsel %vm14318_vm11, %v15398_v26, %v15378_v35  ;;  %v15452_v35 = vpop.f32.mrf.mxu0 }
 0x179   : > { %v2973_v16 = vld [vmem:[#allocation2 + $0xc8] sm:$0x1]  ;;  %v4623_v28 = vsel %vm14318_vm11, %v4618_v47, %v4622_v55  ;;  %v4633_v6 = vsel %vm14318_vm11, %v4628_v8, %v4632_v5  ;;  %v13700_v55 = vld [vmem:[#allocation2 + $0x18] sm:$0xff]   ;;  %v4662_v23 = vshll.u32 %v4568_v7, 16  ;;  %v4668_v50 = vshll.u32 %v4569_v48, 16 }
 0x17a   : > { %v3354_v33 = vshll.u32 %v2973_v16, 16  ;;  %v3853_v29 = vrot.slane %v2973_v16, 5  ;;  %v11799_v61 = vcombine.low %v4623_v28, %v4633_v6  ;;  %v4652_v39 = vrot.slane %v4651_v17, 4  ;;  %v4572_v5 = vld [vmem:[#allocation2 + $0x40] sm:$0xf]  ;;  %v15459_v17 = vpop.f32.mrf.mxu1 }
 0x17b   : > { %v4661_v54 = vrot.slane %v4659_v3, 4  ;;  %v4647_v31 = vsel %vm14318_vm11, %v4642_v19, %v15424_v14  ;;  %v4672_v12 = vshrl.u32 %v4569_v48, 16  ;;  %v4678_v47 = vshll.u32 %v4570_v32, 16  ;;  %v4573_v16 = vld [vmem:[#allocation2 + $0x44] sm:$0x1] }
 0x17c   : > { %v3356_v46 = vrot.slane %v3354_v33, 5  ;;  %v3854_v36 = vsel %vm14657_vm14, %v3852_v2, %v3853_v29  ;;  %v4657_v2 = vsel %vm14318_vm11, %v4652_v39, %v4656_v18  ;;  %v4664_v8 = vrot.slane %v4662_v23, 5  ;;  %v15469_v39 = vpop.f32.mrf.mxu0 }
 0x17d   : > { %v11766_v22 = vcombine.low %v3851_v43, %v3854_v36  ;;  %v4670_v7 = vrot.slane %v4668_v50, 5  ;;  %v4674_v3 = vrot.slane %v4672_v12, 4  ;;  %v4680_v14 = vrot.slane %v4678_v47, 5  ;;  %v13701_v47 = vld [vmem:[#allocation2 + $0x24] sm:$0xff]  }
 0x17e   : > { %v3357_v26 = vsel %vm14318_vm11, %v15405_v40, %v3356_v46  ;;  %v15463_v19 = vadd.f32 %v15283_v42, %v15314_v25  ;;  %v4665_v48 = vor.u32 %v4664_v8, %v4661_v54  ;;  %v4683_v33 = vshrl.u32 %v4571_v51, 16  ;;  %v15471_v54 = vld [vmem:[#allocation2 + $0x4c] sm:$0xf] }
 0x17f   : > { %v11726_v43 = vcombine.low %v3347_v20, %v3357_v26  ;;  %12951 = vmatmul.mubr.bf16.gmra.mxu1 %v11766_v22  ;;  %v4686_v40 = vshll.u32 %v4571_v51, 16  ;;  %v4692_v29 = vshll.u32 %v4572_v5, 16  ;;  %v4675_v18 = vor.u32 %v4674_v3, %v4670_v7  ;;  %v4574_v20 = vld [vmem:[#allocation2 + $0x48] sm:$0xf]  ;;  %v15473_v51 = vpop.f32.mrf.mxu1 }
 0x180   : > { %13018 = vmatprep.mubr.bf16.mxu1 %v11799_v61  ;;  %v4696_v28 = vshrl.u32 %v4572_v5, 16  ;;  %v4702_v6 = vshll.u32 %v4573_v16, 16  ;;  %v15467_v32 = vadd.f32 %v15303_v15, %v15347_v1  ;;  %v4666_v46 = vrot.slane %v4665_v48, 4  ;;  %v4577_v16 = vld [vmem:[#allocation2 + $0x54] sm:$0xf]  ;;  %v13705_v3 = vld [vmem:[#allocation6 + $0x230] sm:$0xff]  }
 0x181   : > { %12903 = vmatmul.mubr.bf16.gmra.mxu0 %v11726_v43  ;;  %v4685_v42 = vrot.slane %v4683_v33, 4  ;;  %v4688_v25 = vrot.slane %v4686_v40, 5  ;;  %v4694_v61 = vrot.slane %v4692_v29, 5  ;;  %v11800_v36 = vcombine.low %v4647_v31, %v4657_v2  ;;  %v15486_v43 = vpop.f32.mrf.mxu0  ;;  %v15489_v40 = vpop.f32.mrf.mxu1 }
 0x182   : > { %12970 = vmatprep.mubr.bf16.mxu0 %v13700_v55  ;;  %v4676_v23 = vrot.slane %v4675_v18, 4  ;;  %v4698_v50 = vrot.slane %v4696_v28, 4  ;;  %v4704_v5 = vrot.slane %v4702_v6, 5  ;;  %v4671_v15 = vsel %vm14318_vm11, %v4666_v46, %v4670_v7  ;;  %v15481_v55 = vld [vmem:[#allocation2 + $0x50] sm:$0x1] }
 0x183   : > { %v4689_v1 = vor.u32 %v4688_v25, %v4685_v42  ;;  %v15479_v22 = vadd.f32 %v15358_v34, %v15383_v53  ;;  %v4707_v12 = vshrl.u32 %v4574_v20, 16  ;;  %v4710_v31 = vshll.u32 %v4574_v20, 16  ;;  %v13703_v7 = vld [vmem:[#allocation2 + $0x30] sm:$0xff]   ;;  %v15492_v6 = vld [vmem:[#allocation2 + $0x58] sm:$0xf] }
 0x184   : > { %v4681_v26 = vsel %vm14318_vm11, %v4676_v23, %v4680_v14  ;;  %v4699_v8 = vor.u32 %v4698_v50, %v4694_v61  ;;  %v4716_v2 = vshll.u32 %v15471_v54, 16  ;;  %v4720_v53 = vshrl.u32 %v15471_v54, 16  ;;  %v15500_v25 = vld [vmem:[#allocation2 + $0x5c] sm:$0x1] }
 0x185   : > { %v11801_v48 = vcombine.low %v4671_v15, %v4681_v26  ;;  %v4690_v33 = vrot.slane %v4689_v1, 4  ;;  %v4709_v34 = vrot.slane %v4707_v12, 4  ;;  %v4712_v18 = vrot.slane %v4710_v31, 5  ;;  %v15504_v12 = vpop.f32.mrf.mxu0  ;;  %v13708_v26 = vld [vmem:[#allocation6 + $0x228] sm:$0xff]   ;;  %v15508_v31 = vpop.f32.mrf.mxu1 }
 0x186   : > { %v4700_v29 = vrot.slane %v4699_v8, 4  ;;  %v4718_v14 = vrot.slane %v4716_v2, 5  ;;  %v4726_v28 = vshll.u32 %v15481_v55, 16  ;;  %v4722_v46 = vrot.slane %v4720_v53, 4 }
 0x187   : > { %13019 = vmatmul.mubr.bf16.vlgmr.msra.gmra.mxu1 %v11800_v36  ;;  %v4695_v20 = vsel %vm14318_vm11, %v4690_v33, %v4694_v61  ;;  %v15498_v42 = vadd.f32 %v15375_v49, %v15407_v63  ;;  %v4731_v23 = vshrl.u32 %v4577_v16, 16  ;;  %v4713_v50 = vor.u32 %v4712_v18, %v4709_v34  ;;  %v4580_v33 = vld [vmem:[#allocation2 + $0x60] sm:$0xf]  ;;  %v13706_v34 = vld [vmem:[#allocation2 + $0x48] sm:$0xff]   ;;  %v15530_v62 = vpop.f32.mrf.mxu1 }
 0x188   : > { %13022 = vmatprep.mubr.bf16.mxu1 %v11801_v48  ;;  %v4705_v36 = vsel %vm14318_vm11, %v4700_v29, %v4704_v5  ;;  %v4728_v15 = vrot.slane %v4726_v28, 5  ;;  %v4734_v1 = vshll.u32 %v4577_v16, 16  ;;  %v4723_v8 = vor.u32 %v4722_v46, %v4718_v14  ;;  %v15516_v29 = vld [vmem:[#allocation2 + $0x64] sm:$0xf]  ;;  %v15518_v18 = vld [vmem:[#allocation2 + $0x68] sm:$0x1] }
 0x189   : > { %12971 = vmatmul.mubr.bf16.vlgmr.msra.gmra.mxu0 %v13701_v47  ;;  %v11802_v61 = vcombine.low %v4695_v20, %v4705_v36  ;;  %v4733_v49 = vrot.slane %v4731_v23, 4  ;;  %v4740_v63 = vshll.u32 %v15492_v6, 16  ;;  %v13704_v47 = vld [vmem:[#allocation2 + $0x3c] sm:$0xff]   ;;  %v4714_v2 = vrot.slane %v4713_v50, 4  ;;  %v4583_v50 = vld [vmem:[#allocation2 + $0x6c] sm:$0xf] }
 0x18a   : > { %13051 = vmatpush3.bf16.msra.mxu0 %v15312_v27  ;;  %12974 = vmatprep.mubr.bf16.mxu0 %v13703_v7  ;;  %v4736_v5 = vrot.slane %v4734_v1, 5  ;;  %v4744_v48 = vshrl.u32 %v15492_v6, 16  ;;  %v4750_v16 = vshll.u32 %v15500_v25, 16  ;;  %v4724_v27 = vrot.slane %v4723_v8, 4  ;;  %v13711_v36 = vld [vmem:[#allocation6 + $0x220] sm:$0xff]   ;;  %v12700_v1 = vpop.f32.mrf.mxu0 }
 0x18b   : > { %13052 = vmatprep.subr.bf16.mxu0 %v13705_v3  ;;  %v4742_v7 = vrot.slane %v4740_v63, 5  ;;  %v15514_v53 = vadd.f32 %v15388_v4, %v15419_v37  ;;  %v4719_v28 = vsel %vm14318_vm11, %v4714_v2, %v4718_v14  ;;  %v15526_v4 = vadd.f32 %v15422_v44, %v15452_v35  ;;  %v15535_v35 = vld [vmem:[#allocation2 + $0x74] sm:$0x1] }
 0x18c   : > { %v4737_v20 = vor.u32 %v4736_v5, %v4733_v49  ;;  %v4746_v46 = vrot.slane %v4744_v48, 4  ;;  %v4752_v23 = vrot.slane %v4750_v16, 5  ;;  %v4729_v8 = vsel %vm14318_vm11, %v4724_v27, %v4728_v15 }
 0x18d   : > { %v4755_v37 = vshrl.u32 %v4580_v33, 16  ;;  %v4758_v63 = vshll.u32 %v4580_v33, 16  ;;  %v11803_v14 = vcombine.low %v4719_v28, %v4729_v8  ;;  %v4768_v15 = vshrl.u32 %v15516_v29, 16  ;;  %v15543_v28 = vpop.f32.mrf.mxu0 }
 0x18e   : > { %13053 = vmatpush3.bf16.msra.mxu0 %v13705_v3  ;;  %v4738_v49 = vrot.slane %v4737_v20, 4  ;;  %v4747_v2 = vor.u32 %v4746_v46, %v4742_v7  ;;  %v4764_v3 = vshll.u32 %v15516_v29, 16  ;;  %v4774_v44 = vshll.u32 %v15518_v18, 16 }
 0x18f   : > { %13023 = vmatmul.mubr.bf16.gmra.mxu1 %v11802_v61  ;;  %13054 = vmatprep.subr.bf16.mxu0 %v13708_v26  ;;  %v4757_v5 = vrot.slane %v4755_v37, 4  ;;  %v4760_v48 = vrot.slane %v4758_v63, 5  ;;  %v15541_v27 = vadd.f32 %v15441_v38, %v15469_v39  ;;  %v4770_v46 = vrot.slane %v4768_v15, 4  ;;  %v15545_v63 = vpop.f32.mrf.mxu1  ;;  %v13714_v39 = vld [vmem:[#allocation6 + $0x218] sm:$0xff]  }
 0x190   : > { %13026 = vmatprep.mubr.bf16.mxu1 %v11803_v14  ;;  %v4743_v16 = vsel %vm14318_vm11, %v4738_v49, %v4742_v7  ;;  %v4748_v61 = vrot.slane %v4747_v2, 4  ;;  %v4766_v33 = vrot.slane %v4764_v3, 5  ;;  %v4776_v8 = vrot.slane %v4774_v44, 5  ;;  %19014 = vst [vmem:[#allocation25_spill] sm:$0xff] %v15545_v63  ;;  %v4586_v2 = vld [vmem:[#allocation2 + $0x78] sm:$0xf] }
 0x191   : > { %12975 = vmatmul.mubr.bf16.gmra.mxu0 %v13704_v47  ;;  %19013 = vst [vmem:[#allocation24_spill] sm:$0xff] %v15541_v27  ;;  %v4761_v20 = vor.u32 %v4760_v48, %v4757_v5  ;;  %v4779_v37 = vshrl.u32 %v4583_v50, 16  ;;  %v13707_v47 = vld [vmem:[#allocation2 + $0x54] sm:$0xff]   ;;  %v4782_v14 = vshll.u32 %v4583_v50, 16  ;;  %v4788_v49 = vshll.u32 %v15528_v56, 16  ;;  %v12701_v50 = vpop.f32.mrf.mxu0 }
 0x192   : > { %12978 = vmatprep.mubr.bf16.mxu0 %v13706_v34  ;;  %13055 = vmatpush3.bf16.msra.mxu0 %v13708_v26  ;;  %v4753_v7 = vsel %vm14318_vm11, %v4748_v61, %v4752_v23  ;;  %v4792_v38 = vshrl.u32 %v15528_v56, 16  ;;  %v15551_v34 = vld [vmem:[#allocation2 + $0x7c] sm:$0xf]  ;;  %v4771_v5 = vor.u32 %v4770_v46, %v4766_v33  ;;  %v4798_v13 = vshll.u32 %v15535_v35, 16  ;;  %v15554_v23 = vld [vmem:[#allocation2 + $0x80] sm:$0x1] }
 0x193   : > { %13056 = vmatprep.subr.bf16.mxu0 %v13711_v36  ;;  %v11804_v26 = vcombine.low %v4743_v16, %v4753_v7  ;;  %v4762_v3 = vrot.slane %v4761_v20, 4  ;;  %v4781_v48 = vrot.slane %v4779_v37, 4  ;;  %v4784_v15 = vrot.slane %v4782_v14, 5  ;;  %v13709_v61 = vld [vmem:[#allocation2 + $0x60] sm:$0xff]   ;;  %v15562_v20 = vpop.f32.mrf.mxu1 }
 0x194   : > { %v4790_v44 = vrot.slane %v4788_v49, 5  ;;  %v4794_v63 = vrot.slane %v4792_v38, 4  ;;  %v4772_v59 = vrot.slane %v4771_v5, 4  ;;  %v15560_v16 = vadd.f32 %v15459_v17, %v15486_v43  ;;  %v4589_v49 = vld [vmem:[#allocation2 + $0x84] sm:$0xf]  ;;  %v13717_v38 = vld [vmem:[#allocation6 + $0x210] sm:$0xff]  }
 0x195   : > { %v4767_v21 = vsel %vm14318_vm11, %v4762_v3, %v4766_v33  ;;  %v4785_v46 = vor.u32 %v4784_v15, %v4781_v48  ;;  %v4800_v7 = vrot.slane %v4798_v13, 5  ;;  %v15565_v14 = vadd.f32 %v15489_v40, %v12700_v1  ;;  %v15570_v43 = vld [vmem:[#allocation2 + $0x88] sm:$0xf]  ;;  %v15573_v40 = vld [vmem:[#allocation2 + $0x8c] sm:$0x1]  ;;  %v15575_v1 = vpop.f32.mrf.mxu0 }
 0x196   : > { %13057 = vmatpush3.bf16.msra.mxu0 %v13711_v36  ;;  %19015 = vst [vmem:[#allocation26_spill] sm:$0xff] %v15560_v16  ;;  %v4795_v37 = vor.u32 %v4794_v63, %v4790_v44  ;;  %v4777_v33 = vsel %vm14318_vm11, %v4772_v59, %v4776_v8  ;;  %v4803_v36 = vshrl.u32 %v4586_v2, 16  ;;  %v4806_v3 = vshll.u32 %v4586_v2, 16  ;;  %19017 = vst [vmem:[#allocation28_spill] sm:$0xff] %v15575_v1  ;;  %v15578_v2 = vpop.f32.mrf.mxu1  ;;  %v13712_v1 = vld [vmem:[#allocation2 + $0x78] sm:$0xff]  }
 0x197   : > { %13027 = vmatmul.mubr.bf16.gmra.mxu1 %v11804_v26  ;;  %19016 = vst [vmem:[#allocation27_spill] sm:$0xff] %v15565_v14  ;;  %13058 = vmatprep.subr.bf16.mxu0 %v13714_v39  ;;  %v4812_v17 = vshll.u32 %v15551_v34, 16  ;;  %v11805_v26 = vcombine.low %v4767_v21, %v4777_v33  ;;  %v4786_v5 = vrot.slane %v4785_v46, 4  ;;  %v4816_v13 = vshrl.u32 %v15551_v34, 16 }
 0x198   : > { %v4796_v63 = vrot.slane %v4795_v37, 4  ;;  %v4805_v48 = vrot.slane %v4803_v36, 4  ;;  %v4808_v15 = vrot.slane %v4806_v3, 5  ;;  %v4822_v8 = vshll.u32 %v15554_v23, 16  ;;  %v13720_v37 = vld [vmem:[#allocation6 + $0x208] sm:$0xff]  }
 0x199   : > { %12979 = vmatmul.mubr.bf16.gmra.mxu0 %v13707_v47  ;;  %v4814_v59 = vrot.slane %v4812_v17, 5  ;;  %13030 = vmatprep.mubr.bf16.mxu1 %v11805_v26  ;;  %v4791_v21 = vsel %vm14318_vm11, %v4786_v5, %v4790_v44  ;;  %v4818_v46 = vrot.slane %v4816_v13, 4  ;;  %v4827_v3 = vshrl.u32 %v4589_v49, 16  ;;  %v4592_v17 = vld [vmem:[#allocation2 + $0x90] sm:$0xf] }
 0x19a   : > { %12982 = vmatprep.mubr.bf16.mxu0 %v13709_v61  ;;  %13059 = vmatpush3.bf16.msra.mxu0 %v13714_v39  ;;  %v4801_v47 = vsel %vm14318_vm11, %v4796_v63, %v4800_v7  ;;  %v15586_v61 = vadd.f32 %v15508_v31, %v15543_v28  ;;  %v4809_v36 = vor.u32 %v4808_v15, %v4805_v48  ;;  %v4824_v39 = vrot.slane %v4822_v8, 5  ;;  %v12704_v7 = vpop.f32.mrf.mxu0  ;;  %v15590_v63 = vld [vmem:[#allocation2 + $0x94] sm:$0xf]  ;;  %v15596_v48 = vld [vmem:[#allocation2 + $0x98] sm:$0x1]  ;;  %v12753_v15 = vpop.f32.mrf.mxu1 }
 0x19b   : > { %13060 = vmatprep.subr.bf16.mxu0 %v13717_v38  ;;  %v11806_v33 = vcombine.low %v4791_v21, %v4801_v47  ;;  %v4819_v26 = vor.u32 %v4818_v46, %v4814_v59  ;;  %v4830_v0 = vshll.u32 %v4589_v49, 16  ;;  %v4836_v44 = vshll.u32 %v15570_v43, 16  ;;  %v13723_v8 = vld [vmem:[#allocation6 + $0x200] sm:$0xff]  }
 0x19c   : > { %19018 = vst [vmem:[#allocation29_spill] sm:$0xff] %v15586_v61  ;;  %v4840_v5 = vshrl.u32 %v15570_v43, 16  ;;  %v4810_v13 = vrot.slane %v4809_v36, 4  ;;  %v4829_v31 = vrot.slane %v4827_v3, 4  ;;  %v4846_v28 = vshll.u32 %v15573_v40, 16 }
 0x19d   : > { %v15594_v21 = vadd.f32 %v15530_v62, %v12701_v50  ;;  %v4820_v49 = vrot.slane %v4819_v26, 4  ;;  %v4832_v47 = vrot.slane %v4830_v0, 5  ;;  %v4838_v46 = vrot.slane %v4836_v44, 5  ;;  %v4595_v62 = vld [vmem:[#allocation2 + $0x9c] sm:$0xf]  ;;  %v1705_v26 = vpop.f32.mrf.mxu0 }
 0x19e   : > { %13061 = vmatpush3.bf16.msra.mxu0 %v13717_v38  ;;  %v4842_v24 = vrot.slane %v4840_v5, 4  ;;  %v4815_v36 = vsel %vm14318_vm11, %v4810_v13, %v4814_v59  ;;  %v4848_v3 = vrot.slane %v4846_v28, 5  ;;  %v15601_v61 = vadd.f32 %v15562_v20, %v12704_v7  ;;  %v15607_v13 = vld [vmem:[#allocation2 + $0xa0] sm:$0xf]  ;;  %v15609_v20 = vld [vmem:[#allocation2 + $0xa4] sm:$0x1]  ;;  %v15611_v7 = vpop.f32.mrf.mxu1 }
 0x19f   : > { %19019 = vst [vmem:[#allocation30_spill] sm:$0xff] %v15594_v21  ;;  %13031 = vmatmul.mubr.bf16.gmra.mxu1 %v11806_v33  ;;  %13062 = vmatprep.subr.bf16.mxu0 %v13720_v37  ;;  %v4825_v50 = vsel %vm14318_vm11, %v4820_v49, %v4824_v39  ;;  %v4833_v38 = vor.u32 %v4832_v47, %v4829_v31  ;;  %v4851_v33 = vshrl.u32 %v4592_v17, 16  ;;  %v4854_v44 = vshll.u32 %v4592_v17, 16 }
 0x1a0   : > { %19020 = vst [vmem:[#allocation31_spill] sm:$0xff] %v15601_v61  ;;  %v4843_v21 = vor.u32 %v4842_v24, %v4838_v46  ;;  %v11807_v0 = vcombine.low %v4815_v36, %v4825_v50  ;;  %v4860_v5 = vshll.u32 %v15590_v63, 16  ;;  %v4864_v59 = vshrl.u32 %v15590_v63, 16  ;;  %19021 = vst [vmem:[#allocation32_spill] sm:$0xff] %v15607_v13  ;;  %v13715_v61 = vld [vmem:[#allocation2 + $0x90] sm:$0xff]  }
 0x1a1   : > { %12983 = vmatmul.mubr.bf16.gmra.mxu0 %v13710_v41  ;;  %19022 = vst [vmem:[#allocation33_spill] sm:$0xff] %v15609_v20  ;;  %19023 = vst [vmem:[#allocation34_spill] sm:$0xff] %v15611_v7  ;;  %v4834_v41 = vrot.slane %v4833_v38, 4  ;;  %v4853_v31 = vrot.slane %v4851_v33, 4  ;;  %v4870_v24 = vshll.u32 %v15596_v48, 16  ;;  %v4856_v17 = vrot.slane %v4854_v44, 5  ;;  %v12705_v38 = vpop.f32.mrf.mxu0 }
 0x1a2   : > { %12986 = vmatprep.mubr.bf16.mxu0 %v13712_v1  ;;  %13063 = vmatpush3.bf16.msra.mxu0 %v13720_v37  ;;  %v4844_v39 = vrot.slane %v4843_v21, 4  ;;  %v13713_v1 = vld [vmem:[#allocation2 + $0x84] sm:$0xff]   ;;  %v4862_v28 = vrot.slane %v4860_v5, 5  ;;  %v4866_v49 = vrot.slane %v4864_v59, 4  ;;  %v15615_v47 = vadd.f32 %v15578_v2, %v1705_v26  ;;  %v15621_v59 = vld [vmem:[#allocation2 + $0xac] sm:$0xf] }
 0x1a3   : > { %13064 = vmatprep.subr.bf16.mxu0 %v13723_v8  ;;  %13034 = vmatprep.mubr.bf16.mxu1 %v11807_v0  ;;  %v4839_v36 = vsel %vm14318_vm11, %v4834_v41, %v4838_v46  ;;  %v4872_v50 = vrot.slane %v4870_v24, 5  ;;  %v4875_v21 = vshrl.u32 %v4595_v62, 16  ;;  %v4598_v33 = vld [vmem:[#allocation2 + $0xa8] sm:$0xf]  ;;  %v4857_v14 = vor.u32 %v4856_v17, %v4853_v31  ;;  %19025 = vst [vmem:[#allocation36_spill] sm:$0xff] %v15621_v59  ;;  %v15637_v17 = vpop.f32.mrf.mxu0 }
 0x1a4   : > { %19024 = vst [vmem:[#allocation35_spill] sm:$0xff] %v15615_v47  ;;  %v4849_v37 = vsel %vm14318_vm11, %v4844_v39, %v4848_v3  ;;  %v4867_v0 = vor.u32 %v4866_v49, %v4862_v28  ;;  %v4878_v44 = vshll.u32 %v4595_v62, 16  ;;  %v12756_v5 = vpop.f32.mrf.mxu1  ;;  %v4884_v26 = vshll.u32 %v15607_v13, 16  ;;  %v15626_v41 = vld [vmem:[#allocation2 + $0xb0] sm:$0x1]  ;;  %19028 = vst [vmem:[#allocation39_spill] sm:$0xff] %v15637_v17 }
 0x1a5   : > { %v11808_v7 = vcombine.low %v4839_v36, %v4849_v37  ;;  %v4877_v2 = vrot.slane %v4875_v21, 4  ;;  %v4888_v46 = vshrl.u32 %v15607_v13, 16  ;;  %v4894_v3 = vshll.u32 %v15609_v20, 16  ;;  %19026 = vst [vmem:[#allocation37_spill] sm:$0xff] %v15626_v41  ;;  %v4601_v62 = vld [vmem:[#allocation2 + $0xb4] sm:$0xf] }
 0x1a6   : > { %13065 = vmatpush3.bf16.msra.mxu0 %v13723_v8  ;;  %v4858_v39 = vrot.slane %v4857_v14, 4  ;;  %v4868_v24 = vrot.slane %v4867_v0, 4  ;;  %v4880_v36 = vrot.slane %v4878_v44, 5  ;;  %v15628_v31 = vadd.f32 %v12753_v15, %v12705_v38  ;;  %v2026_v0 = vpop.f32.mrf.mxu1  ;;  %v15635_v44 = vld [vmem:[#allocation2 + $0xb8] sm:$0xf]  ;;  %v13716_v15 = vld [vmem:[#allocation2 + $0x9c] sm:$0xff]  }
 0x1a7   : > { %13035 = vmatmul.mubr.bf16.gmra.mxu1 %v11808_v7  ;;  %v4886_v8 = vrot.slane %v4884_v26, 5  ;;  %v4890_v49 = vrot.slane %v4888_v46, 4  ;;  %v4896_v37 = vrot.slane %v4894_v3, 5  ;;  %v4899_v14 = vshrl.u32 %v4598_v33, 16  ;;  %v4604_v20 = vld [vmem:[#allocation2 + $0xc0] sm:$0xf] }
 0x1a8   : > { %19027 = vst [vmem:[#allocation38_spill] sm:$0xff] %v15628_v31  ;;  %v4863_v21 = vsel %vm14318_vm11, %v4858_v39, %v4862_v28  ;;  %v4873_v47 = vsel %vm14318_vm11, %v4868_v24, %v4872_v50  ;;  %v4881_v7 = vor.u32 %v4880_v36, %v4877_v2  ;;  %v4908_v26 = vshll.u32 %v15621_v59, 16  ;;  %v15642_v50 = vld [vmem:[#allocation2 + $0xbc] sm:$0x1] }
 0x1a9   : > { %12987 = vmatmul.mubr.bf16.gmra.mxu0 %v13713_v1  ;;  %v11809_v38 = vcombine.low %v4863_v21, %v4873_v47  ;;  %v4891_v31 = vor.u32 %v4890_v49, %v4886_v8  ;;  %v4902_v1 = vshll.u32 %v4598_v33, 16  ;;  %v4901_v46 = vrot.slane %v4899_v14, 4  ;;  %v420_v47 = vld [vmem:[#allocation2 + $0xcc] sm:$0x1]  ;;  %v12757_v14 = vpop.f32.mrf.mxu1 }
 0x1aa   : > { %12990 = vmatprep.mubr.bf16.mxu0 %v13715_v61  ;;  %v4882_v61 = vrot.slane %v4881_v7, 4  ;;  %v4912_v28 = vshrl.u32 %v15621_v59, 16  ;;  %v4918_v3 = vshll.u32 %v15626_v41, 16  ;;  %v4910_v24 = vrot.slane %v4908_v26, 5  ;;  %v13718_v33 = vld [vmem:[#allocation2 + $0xa8] sm:$0xff]  }
 0x1ab   : > { %13038 = vmatprep.mubr.bf16.mxu1 %v11809_v38  ;;  %v4892_v2 = vrot.slane %v4891_v31, 4  ;;  %v4904_v39 = vrot.slane %v4902_v1, 5  ;;  %v4923_v36 = vshrl.u32 %v4601_v62, 16  ;;  %v4926_v7 = vshll.u32 %v4601_v62, 16 }
 0x1ac   : > { %v4887_v49 = vsel %vm14318_vm11, %v4882_v61, %v4886_v8  ;;  %v4914_v21 = vrot.slane %v4912_v28, 4  ;;  %v4920_v17 = vrot.slane %v4918_v3, 5  ;;  %v4932_v31 = vshll.u32 %v15635_v44, 16  ;;  %v15651_v8 = vld [vmem:[#allocation2 + $0xc4] sm:$0xf] }
 0x1ad   : > { %v4897_v41 = vsel %vm14318_vm11, %v4892_v2, %v4896_v37  ;;  %v4905_v59 = vor.u32 %v4904_v39, %v4901_v46  ;;  %v4925_v38 = vrot.slane %v4923_v36, 4  ;;  %v4928_v27 = vrot.slane %v4926_v7, 5  ;;  %v15661_v39 = vld [vmem:[#allocation2 + $0xc8] sm:$0x1] }
 0x1ae   : > { %v12708_v16 = vpop.f32.mrf.mxu0  ;;  %v11810_v1 = vcombine.low %v4887_v49, %v4897_v41  ;;  %v4915_v13 = vor.u32 %v4914_v21, %v4910_v24  ;;  %v4934_v28 = vrot.slane %v4932_v31, 5  ;;  %v4936_v3 = vshrl.u32 %v15635_v44, 16  ;;  %19032 = vst [vmem:[#allocation43_spill] sm:$0xff] %v15661_v39 }
 0x1af   : > { %v15649_v26 = vadd.f32 %v12756_v5, %v12708_v16  ;;  %v4906_v61 = vrot.slane %v4905_v59, 4  ;;  %v4942_v37 = vshll.u32 %v15642_v50, 16  ;;  %v4929_v41 = vor.u32 %v4928_v27, %v4925_v38  ;;  %v15657_v16 = vpop.f32.mrf.mxu1  ;;  %v476_v59 = vld [vmem:[#allocation2 + $0xd4] sm:$0x1] }
 0x1b0   : > { %v1721_v62 = vpop.f32.mrf.mxu0  ;;  %13039 = vmatmul.mubr.bf16.gmra.mxu1 %v11810_v1  ;;  %v4916_v46 = vrot.slane %v4915_v13, 4  ;;  %19031 = vst [vmem:[#allocation42_spill] sm:$0xff] %v15657_v16  ;;  %v421_v5 = vsel %vm14257_vm3, 0, %v420_v47  ;;  %v4938_v49 = vrot.slane %v4936_v3, 4  ;;  %v4947_v13 = vshrl.u32 %v4604_v20, 16  ;;  %v13721_v47 = vld [vmem:[#allocation2 + $0xc0] sm:$0xff]  }
 0x1b1   : > { %19029 = vst [vmem:[#allocation40_spill] sm:$0xff] %v15649_v26  ;;  %12991 = vmatmul.mubr.bf16.gmra.mxu0 %v13716_v15  ;;  %v15655_v2 = vadd.f32 %v2026_v0, %v1721_v62  ;;  %v13719_v15 = vld [vmem:[#allocation2 + $0xb4] sm:$0xff]   ;;  %v4911_v36 = vsel %vm14318_vm11, %v4906_v61, %v4910_v24  ;;  %v4944_v21 = vrot.slane %v4942_v37, 5  ;;  %422 = vst [vmem:[#allocation2 + $0xcc] sm:$0x1] %v421_v5  ;;  %v4950_v31 = vshll.u32 %v4604_v20, 16 }
 0x1b2   : > { %12994 = vmatprep.mubr.bf16.mxu0 %v13718_v33  ;;  %v12709_v7 = vpop.f32.mrf.mxu0  ;;  %v15665_v0 = vld [vmem:[#allocation2 + $0xd0] sm:$0xf]  ;;  %v4921_v27 = vsel %vm14318_vm11, %v4916_v46, %v4920_v17  ;;  %v4930_v33 = vrot.slane %v4929_v41, 4  ;;  %v5315_v1 = vld [vmem:[#allocation2 + $0x18] sm:$0xe]  ;;  %v4939_v9 = vor.u32 %v4938_v49, %v4934_v28  ;;  %v4949_v16 = vrot.slane %v4947_v13, 4 }
 0x1b3   : > { %19030 = vst [vmem:[#allocation41_spill] sm:$0xff] %v15655_v2  ;;  %19033 = vst [vmem:[#allocation44_spill] sm:$0xff] %v15665_v0  ;;  %v15669_v38 = vadd.f32 %v12757_v14, %v12709_v7  ;;  %v11811_v62 = vcombine.low %v4911_v36, %v4921_v27  ;;  %v4956_v24 = vshll.u32 %v15651_v8, 16  ;;  %v4952_v37 = vrot.slane %v4950_v31, 5  ;;  %v5316_v31 = vld [vmem:[#allocation2 + $0x24] sm:$0xe] }
 0x1b4   : > { %v4935_v61 = vsel %vm14318_vm11, %v4930_v33, %v4934_v28  ;;  %v4960_v5 = vshrl.u32 %v15651_v8, 16  ;;  %v4940_v17 = vrot.slane %v4939_v9, 4  ;;  %v4966_v14 = vshll.u32 %v15661_v39, 16  ;;  %v13860_v9 = vld [vmem:[#allocation2 + $0x1c] sm:$0xf] }
 0x1b5   : > { %19034 = vst [vmem:[#allocation45_spill] sm:$0xff] %v15669_v38  ;;  %v12760_v3 = vpop.f32.mrf.mxu1  ;;  %13042 = vmatprep.mubr.bf16.mxu1 %v11811_v62  ;;  %v4958_v46 = vrot.slane %v4956_v24, 5  ;;  %v477_v20 = vsel %vm14262_vm4, 0, %v476_v59  ;;  %v4953_v41 = vor.u32 %v4952_v37, %v4949_v16  ;;  %v4980_v7 = vshll.u32 %v15665_v0, 16  ;;  %v15682_v62 = vld [vmem:[#allocation2 + $0x30] sm:$0xe]  ;;  %v15684_v59 = vpop.f32.mrf.mxu0 }
 0x1b6   : > { %v4962_v36 = vrot.slane %v4960_v5, 4  ;;  %478 = vst [vmem:[#allocation2 + $0xd4] sm:$0x1] %v477_v20  ;;  %v4984_v28 = vshrl.u32 %v15665_v0, 16  ;;  %v4945_v13 = vsel %vm14318_vm11, %v4940_v17, %v4944_v21  ;;  %v11823_v27 = vrot.slane %v5315_v1, 9  ;;  %19035 = vst [vmem:[#allocation46_spill] sm:$0xff] %v15684_v59 }
 0x1b7   : > { %v2042_v49 = vpop.f32.mrf.mxu1  ;;  %v5381_v33 = vrot.slane %v13860_v9, 5  ;;  %v11812_v10 = vcombine.low %v4935_v61, %v4945_v13  ;;  %v4954_v16 = vrot.slane %v4953_v41, 4  ;;  %v4968_v37 = vrot.slane %v4966_v14, 5  ;;  %v13861_v9 = vld [vmem:[#allocation2 + $0x20] sm:$0x1] }
 0x1b8   : > { %v4963_v24 = vor.u32 %v4962_v36, %v4958_v46  ;;  %v4607_v5 = vld [vmem:[#allocation2 + $0xcc] sm:$0xf]  ;;  %v4982_v2 = vrot.slane %v4980_v7, 5  ;;  %v4986_v26 = vrot.slane %v4984_v28, 4  ;;  %v5384_v59 = vrot.slane %v13861_v9, 5 }
 0x1b9   : > { %12995 = vmatmul.mubr.bf16.gmra.mxu0 %v13719_v15  ;;  %v12761_v20 = vpop.f32.mrf.mxu1  ;;  %v4971_v38 = vshrl.u32 %v4607_v5, 16  ;;  %v4974_v15 = vshll.u32 %v4607_v5, 16  ;;  %13043 = vmatmul.mubr.bf16.gmra.mxu1 %v11812_v10  ;;  %v4959_v21 = vsel %vm14318_vm11, %v4954_v16, %v4958_v46  ;;  %v5382_v61 = vsel %vm14657_vm14, %v11823_v27, %v5381_v33  ;;  %v13722_v41 = vld [vmem:[#allocation2 + $0xcc] sm:$0xff]   ;;  %v15692_v5 = vld [vmem:[#allocation2 + $0x3c] sm:$0xe] }
 0x1ba   : > { %12998 = vmatprep.mubr.bf16.mxu0 %v13721_v47  ;;  %v4964_v1 = vrot.slane %v4963_v24, 4  ;;  %v5383_v47 = vrot.slane %v5381_v33, 4  ;;  %v4987_v13 = vor.u32 %v4986_v26, %v4982_v2  ;;  %v11824_v46 = vrot.slane %v5316_v31, 9  ;;  %v13862_v10 = vld [vmem:[#allocation2 + $0x28] sm:$0xf] }
 0x1bb   : > { %v15688_v17 = vpop.f32.mrf.mxu1  ;;  %v4973_v36 = vrot.slane %v4971_v38, 4  ;;  %v4976_v14 = vrot.slane %v4974_v15, 5  ;;  %v5388_v16 = vrot.slane %v13862_v10, 5  ;;  %v19037_v10 = vrot.slane %v15415_v57, 5 }
 0x1bc   : > { %19036 = vst [vmem:[#allocation47_spill] sm:$0xff] %v15688_v17  ;;  %v4969_v28 = vsel %vm14318_vm11, %v4964_v1, %v4968_v37  ;;  %v11825_v17 = vrot.slane %v15682_v62, 9  ;;  %v4988_v15 = vrot.slane %v4987_v13, 4  ;;  %v5385_v39 = vsel %vm14657_vm14, %v5383_v47, %v5384_v59 }
 0x1bd   : > { %v12712_v7 = vpop.f32.mrf.mxu0  ;;  %v12828_v24 = vpop.f32.mrf.mxu1  ;;  %v11813_v33 = vcombine.low %v4959_v21, %v4969_v28  ;;  %v15699_v38 = vld [vmem:[#allocation2 + $0xd4] sm:$0x1]  ;;  %v4977_v26 = vor.u32 %v4976_v14, %v4973_v36  ;;  %v5389_v31 = vsel %vm14657_vm14, %v11824_v46, %v5388_v16  ;;  %v5390_v37 = vrot.slane %v5388_v16, 4  ;;  %v5319_v14 = vld [vmem:[#allocation2 + $0x48] sm:$0xe] }
 0x1be   : > { %v15697_v27 = vadd.f32 %v12760_v3, %v12712_v7  ;;  %v4990_v0 = vshll.u32 %v15699_v38, 16  ;;  %v11839_v21 = vcombine.low %v5382_v61, %v5385_v39  ;;  %v13863_v7 = vld [vmem:[#allocation2 + $0x34] sm:$0xf]  ;;  %v13864_v46 = vld [vmem:[#allocation2 + $0x38] sm:$0x1] }
 0x1bf   : > { %v1737_v9 = vpop.f32.mrf.mxu0  ;;  %v2767_v1 = vpop.f32.mrf.mxu1  ;;  %13046 = vmatprep.mubr.bf16.mxu1 %v11813_v33  ;;  %v4978_v62 = vrot.slane %v4977_v26, 4  ;;  %v5395_v36 = vrot.slane %v13863_v7, 5  ;;  %v5392_v59 = vsel %vm14657_vm14, %v5390_v37, %v19037_v10  ;;  %v5398_v16 = vrot.slane %v13864_v46, 5  ;;  %v13866_v10 = vld [vmem:[#allocation2 + $0x44] sm:$0x1] }
 0x1c0   : > { %v15706_v3 = vadd.f32 %v2042_v49, %v1737_v9  ;;  %v4992_v13 = vrot.slane %v4990_v0, 5  ;;  %v13865_v9 = vld [vmem:[#allocation2 + $0x40] sm:$0xf]  ;;  %v11840_v7 = vcombine.low %v5389_v31, %v5392_v59  ;;  %v5320_v59 = vld [vmem:[#allocation2 + $0x54] sm:$0xe] }
 0x1c1   : > { %12999 = vmatmul.mubr.bf16.gmra.mxu0 %v13722_v41  ;;  %v12713_v28 = vpop.f32.mrf.mxu0  ;;  %v12829_v47 = vpop.f32.mrf.mxu1  ;;  %v11826_v41 = vrot.slane %v15692_v5, 9  ;;  %v4983_v49 = vsel %vm14318_vm11, %v4978_v62, %v4982_v2  ;;  %v5396_v57 = vsel %vm14657_vm14, %v11825_v17, %v5395_v36  ;;  %v5397_v61 = vrot.slane %v5395_v36, 4 }
 0x1c2   : > { %v15715_v33 = vadd.f32 %v12761_v20, %v12713_v28  ;;  %13066 = vmatprep.mubr.bf16.mxu0 %v11839_v21  ;;  %v4993_v39 = vsel %vm14318_vm11, %v4988_v15, %v4992_v13  ;;  %v5402_v37 = vrot.slane %v13865_v9, 5  ;;  %v5405_v2 = vrot.slane %v13866_v10, 5  ;;  %v5321_v10 = vld [vmem:[#allocation2 + $0x60] sm:$0xe] }
 0x1c3   : > { %v15719_v0 = vpop.f32.mrf.mxu0  ;;  %v15723_v26 = vpop.f32.mrf.mxu1  ;;  %v11814_v5 = vcombine.low %v4983_v49, %v4993_v39  ;;  %v5409_v20 = vrot.slane %v15471_v54, 5  ;;  %v5399_v15 = vsel %vm14657_vm14, %v5397_v61, %v5398_v16  ;;  %v11827_v28 = vrot.slane %v5319_v14, 9 }
 0x1c4   : > { %v5404_v21 = vrot.slane %v5402_v37, 4  ;;  %v11841_v36 = vcombine.low %v5396_v57, %v5399_v15  ;;  %v5412_v9 = vrot.slane %v15481_v55, 5  ;;  %v5403_v14 = vsel %vm14657_vm14, %v11826_v41, %v5402_v37 }
 0x1c5   : > { %v12780_v62 = vpop.f32.mrf.mxu0  ;;  %v12832_v13 = vpop.f32.mrf.mxu1  ;;  %13047 = vmatmul.mubr.bf16.gmra.mxu1 %v11814_v5  ;;  %v5411_v46 = vrot.slane %v5409_v20, 4  ;;  %v5410_v55 = vsel %vm14657_vm14, %v11827_v28, %v5409_v20  ;;  %v5416_v61 = vrot.slane %v15492_v6, 5  ;;  %v11828_v37 = vrot.slane %v5320_v59, 9 }
 0x1c6   : > { %v2511_v17 = vadd.f32 %v12780_v62, %v15396_v58  ;;  %v5406_v58 = vsel %vm14657_vm14, %v5404_v21, %v5405_v2  ;;  %v11829_v28 = vrot.slane %v5321_v10, 9 }
 0x1c7   : > { %v2382_v49 = vpop.f32.mrf.mxu0  ;;  %v2783_v31 = vpop.f32.mrf.mxu1  ;;  %v11842_v15 = vcombine.low %v5403_v14, %v5406_v58  ;;  %v5418_v6 = vrot.slane %v5416_v61, 4  ;;  %v5430_v14 = vrot.slane %v15528_v56, 5 }
 0x1c8   : > { %v2509_v54 = vadd.f32 %v2382_v49, %v15413_v60  ;;  %v15731_v39 = vadd.f32 %v12828_v24, %v2511_v17  ;;  %v5413_v24 = vsel %vm14657_vm14, %v5411_v46, %v5412_v9  ;;  %v5322_v49 = vld [vmem:[#allocation2 + $0x6c] sm:$0xe] }
 0x1c9   : > { %13067 = vmatmul.mubr.bf16.vlgmr.msra.gmra.mxu0 %v11840_v7  ;;  %v12781_v16 = vpop.f32.mrf.mxu0  ;;  %v12833_v57 = vpop.f32.mrf.mxu1  ;;  %v5423_v7 = vrot.slane %v15516_v29, 5  ;;  %v11843_v21 = vcombine.low %v5410_v55, %v5413_v24  ;;  %v5426_v29 = vrot.slane %v15518_v18, 5  ;;  %v5437_v55 = vrot.slane %v15551_v34, 5 }
 0x1ca   : > { %13070 = vmatprep.mubr.bf16.mxu0 %v11841_v36  ;;  %v2512_v5 = vadd.f32 %v12781_v16, %v15428_v52  ;;  %v15741_v60 = vadd.f32 %v2767_v1, %v2509_v54  ;;  %v5419_v52 = vrot.slane %v15500_v25, 5  ;;  %v5323_v54 = vld [vmem:[#allocation2 + $0x78] sm:$0xe]  ;;  %v5417_v25 = vsel %vm14657_vm14, %v11828_v37, %v5416_v61 }
 0x1cb   : > { %v15746_v62 = vpop.f32.mrf.mxu0  ;;  %v15748_v41 = vpop.f32.mrf.mxu1  ;;  %v5425_v36 = vrot.slane %v5423_v7, 4  ;;  %v5424_v18 = vsel %vm14657_vm14, %v11829_v28, %v5423_v7  ;;  %v11830_v24 = vrot.slane %v5322_v49, 9  ;;  %v5433_v37 = vrot.slane %v15535_v35, 5 }
 0x1cc   : > { %v15750_v2 = vadd.f32 %v12829_v47, %v2512_v5  ;;  %v5440_v34 = vrot.slane %v15554_v23, 5 }
 0x1cd   : > { %v12784_v20 = vpop.f32.mrf.mxu0  ;;  %v12836_v1 = vpop.f32.mrf.mxu1  ;;  %v5431_v49 = vsel %vm14657_vm14, %v11830_v24, %v5430_v14 }
 0x1ce   : > { %v2515_v17 = vadd.f32 %v12784_v20, %v15433_v30  ;;  %v5420_v30 = vsel %vm14657_vm14, %v5418_v6, %v5419_v52  ;;  %v5439_v52 = vrot.slane %v5437_v55, 4 }
 0x1cf   : > { %v2398_v46 = vpop.f32.mrf.mxu0  ;;  %v2799_v9 = vpop.f32.mrf.mxu1  ;;  %v11844_v7 = vcombine.low %v5417_v25, %v5420_v30  ;;  %v5451_v25 = vrot.slane %v15590_v63, 5  ;;  %v5454_v63 = vrot.slane %v15596_v48, 5 }
 0x1d0   : > { %v2513_v47 = vadd.f32 %v2398_v46, %v15463_v19  ;;  %v15756_v59 = vadd.f32 %v12832_v13, %v2515_v17  ;;  %v5427_v13 = vsel %vm14657_vm14, %v5425_v36, %v5426_v29  ;;  %v5324_v36 = vld [vmem:[#allocation2 + $0x84] sm:$0xe] }
 0x1d1   : > { %13071 = vmatmul.mubr.bf16.gmra.mxu0 %v11842_v15  ;;  %v12785_v16 = vpop.f32.mrf.mxu0  ;;  %v12837_v10 = vpop.f32.mrf.mxu1  ;;  %v11845_v20 = vcombine.low %v5424_v18, %v5427_v13 }
 0x1d2   : > { %13074 = vmatprep.mubr.bf16.mxu0 %v11843_v21  ;;  %v2516_v58 = vadd.f32 %v12785_v16, %v15467_v32  ;;  %v15766_v19 = vadd.f32 %v2783_v31, %v2513_v47  ;;  %v5432_v32 = vrot.slane %v5430_v14, 4  ;;  %v11831_v21 = vrot.slane %v5323_v54, 9 }
 0x1d3   : > { %v15771_v5 = vpop.f32.mrf.mxu0  ;;  %v15773_v61 = vpop.f32.mrf.mxu1  ;;  %v5444_v54 = vrot.slane %v15570_v43, 5  ;;  %v11832_v14 = vrot.slane %v5324_v36, 9 }
 0x1d4   : > { %v15776_v15 = vadd.f32 %v12833_v57, %v2516_v58  ;;  %v5325_v57 = vld [vmem:[#allocation2 + $0x90] sm:$0xe]  ;;  %v5438_v23 = vsel %vm14657_vm14, %v11831_v21, %v5437_v55  ;;  %v5326_v21 = vld [vmem:[#allocation2 + $0x9c] sm:$0xe] }
 0x1d5   : > { %v12788_v56 = vpop.f32.mrf.mxu0  ;;  %v12840_v31 = vpop.f32.mrf.mxu1  ;;  %v5446_v43 = vrot.slane %v5444_v54, 4 }
 0x1d6   : > { %v2519_v6 = vadd.f32 %v12788_v56, %v15479_v22  ;;  %v5434_v22 = vsel %vm14657_vm14, %v5432_v32, %v5433_v37  ;;  %v11833_v37 = vrot.slane %v5325_v57, 9  ;;  %v5453_v56 = vrot.slane %v5451_v25, 4 }
 0x1d7   : > { %v2414_v28 = vpop.f32.mrf.mxu0  ;;  %v2815_v17 = vpop.f32.mrf.mxu1  ;;  %v11846_v13 = vcombine.low %v5431_v49, %v5434_v22 }
 0x1d8   : > { %v2517_v29 = vadd.f32 %v2414_v28, %v15498_v42  ;;  %v15781_v35 = vadd.f32 %v12836_v1, %v2519_v6  ;;  %v5441_v1 = vsel %vm14657_vm14, %v5439_v52, %v5440_v34  ;;  %v19038_v6 = vld [vmem:[#allocation24_spill] sm:$0xff]  ;;  %v5327_v28 = vld [vmem:[#allocation2 + $0xa8] sm:$0xe] }
 0x1d9   : > { %13075 = vmatmul.mubr.bf16.gmra.mxu0 %v11844_v7  ;;  %v12789_v46 = vpop.f32.mrf.mxu0  ;;  %v12841_v47 = vpop.f32.mrf.mxu1  ;;  %v11847_v24 = vcombine.low %v5438_v23, %v5441_v1  ;;  %v5455_v23 = vsel %vm14657_vm14, %v5453_v56, %v5454_v63  ;;  %v19044_v56 = vld [vmem:[#allocation37_spill] sm:$0xff] }
 0x1da   : > { %13078 = vmatprep.mubr.bf16.mxu0 %v11845_v20  ;;  %v2520_v16 = vadd.f32 %v12789_v46, %v15514_v53  ;;  %v15791_v42 = vadd.f32 %v2799_v9, %v2517_v29  ;;  %v5447_v53 = vrot.slane %v15573_v40, 5  ;;  %v19039_v29 = vld [vmem:[#allocation32_spill] sm:$0xff]  ;;  %v5468_v63 = vrot.slane %v19044_v56, 5 }
 0x1db   : > { %v15796_v30 = vpop.f32.mrf.mxu0  ;;  %v15798_v18 = vpop.f32.mrf.mxu1  ;;  %v5458_v57 = vrot.slane %v19039_v29, 5  ;;  %v19040_v46 = vld [vmem:[#allocation36_spill] sm:$0xff] }
 0x1dc   : > { %v15800_v58 = vadd.f32 %v12837_v10, %v2520_v16  ;;  %v1982_v10 = vadd.f32 %v15473_v51, %v15504_v12  ;;  %v5448_v48 = vsel %vm14657_vm14, %v5446_v43, %v5447_v53  ;;  %v5465_v49 = vrot.slane %v19040_v46, 5  ;;  %v19041_v51 = vld [vmem:[#allocation26_spill] sm:$0xff] }
 0x1dd   : > { %v12792_v55 = vpop.f32.mrf.mxu0  ;;  %v12844_v9 = vpop.f32.mrf.mxu1  ;;  %v5460_v53 = vrot.slane %v5458_v57, 4 }
 0x1de   : > { %v2523_v7 = vadd.f32 %v12792_v55, %v15526_v4  ;;  %v5445_v4 = vsel %vm14657_vm14, %v11832_v14, %v5444_v54  ;;  %v11834_v55 = vrot.slane %v5326_v21, 9 }
 0x1df   : > { %v2430_v20 = vpop.f32.mrf.mxu0  ;;  %v2831_v32 = vpop.f32.mrf.mxu1 }
 0x1e0   : > { %v2521_v52 = vadd.f32 %v2430_v20, %v19038_v6  ;;  %v15808_v34 = vadd.f32 %v12840_v31, %v2523_v7  ;;  %v5452_v31 = vsel %vm14657_vm14, %v11833_v37, %v5451_v25  ;;  %v11835_v6 = vrot.slane %v5327_v28, 9  ;;  %v19043_v25 = vld [vmem:[#allocation27_spill] sm:$0xff] }
 0x1e1   : > { %13079 = vmatmul.mubr.bf16.gmra.mxu0 %v11846_v13  ;;  %v12793_v40 = vpop.f32.mrf.mxu0  ;;  %v12845_v36 = vpop.f32.mrf.mxu1  ;;  %v11848_v13 = vcombine.low %v5445_v4, %v5448_v48  ;;  %v11849_v43 = vcombine.low %v5452_v31, %v5455_v23  ;;  %v5459_v4 = vsel %vm14657_vm14, %v11834_v55, %v5458_v57  ;;  %v19046_v31 = vld [vmem:[#allocation30_spill] sm:$0xff] }
 0x1e2   : > { %13082 = vmatprep.mubr.bf16.mxu0 %v11847_v24  ;;  %v2524_v12 = vadd.f32 %v12793_v40, %v19041_v51  ;;  %v15817_v22 = vadd.f32 %v2815_v17, %v2521_v52  ;;  %v19042_v17 = vld [vmem:[#allocation33_spill] sm:$0xff]  ;;  %v5467_v52 = vrot.slane %v5465_v49, 4  ;;  %v5466_v51 = vsel %vm14657_vm14, %v11835_v6, %v5465_v49 }
 0x1e3   : > { %v2433_v16 = vpop.f32.mrf.mxu0  ;;  %v15823_v54 = vpop.f32.mrf.mxu1  ;;  %v5461_v7 = vrot.slane %v19042_v17, 5 }
 0x1e4   : > { %v15825_v1 = vadd.f32 %v2433_v16, %v1982_v10  ;;  %v15827_v14 = vadd.f32 %v12841_v47, %v2524_v12  ;;  %v19045_v10 = vld [vmem:[#allocation29_spill] sm:$0xff]  ;;  %v5472_v12 = vrot.slane %v15635_v44, 5 }
 0x1e5   : > { %v12796_v24 = vpop.f32.mrf.mxu0  ;;  %v12848_v20 = vpop.f32.mrf.mxu1  ;;  %v5462_v28 = vsel %vm14657_vm14, %v5460_v53, %v5461_v7 }
 0x1e6   : > { %v2527_v37 = vadd.f32 %v12796_v24, %v19043_v25  ;;  %v5479_v24 = vrot.slane %v15651_v8, 5  ;;  %v11850_v49 = vcombine.low %v5459_v4, %v5462_v28  ;;  %v5474_v6 = vrot.slane %v5472_v12, 4  ;;  %v19048_v8 = vld [vmem:[#allocation43_spill] sm:$0xff] }
 0x1e7   : > { %v2446_v40 = vpop.f32.mrf.mxu0  ;;  %v2847_v29 = vpop.f32.mrf.mxu1 }
 0x1e8   : > { %v2525_v47 = vadd.f32 %v2446_v40, %v19045_v10  ;;  %v15833_v46 = vadd.f32 %v12844_v9, %v2527_v37  ;;  %v5469_v9 = vsel %vm14657_vm14, %v5467_v52, %v5468_v63  ;;  %v19047_v37 = vld [vmem:[#allocation31_spill] sm:$0xff]  ;;  %v5481_v63 = vrot.slane %v5479_v24, 4 }
 0x1e9   : > { %13083 = vmatmul.mubr.bf16.gmra.mxu0 %v11848_v13  ;;  %v12797_v21 = vpop.f32.mrf.mxu0  ;;  %v12849_v48 = vpop.f32.mrf.mxu1  ;;  %v5328_v13 = vld [vmem:[#allocation2 + $0xb4] sm:$0xe]  ;;  %v11851_v44 = vcombine.low %v5466_v51, %v5469_v9  ;;  %v5482_v40 = vrot.slane %v19048_v8, 5 }
 0x1ea   : > { %13086 = vmatprep.mubr.bf16.mxu0 %v11849_v43  ;;  %v2528_v23 = vadd.f32 %v12797_v21, %v19046_v31  ;;  %v15843_v16 = vadd.f32 %v2831_v32, %v2525_v47  ;;  %v5329_v43 = vld [vmem:[#allocation2 + $0xc0] sm:$0xe]  ;;  %v11836_v7 = vrot.slane %v5328_v13, 9  ;;  %v5475_v32 = vrot.slane %v15642_v50, 5  ;;  %v19049_v21 = vld [vmem:[#allocation35_spill] sm:$0xff] }
 0x1eb   : > { %v15848_v57 = vpop.f32.mrf.mxu0  ;;  %v15850_v55 = vpop.f32.mrf.mxu1  ;;  %v11837_v56 = vrot.slane %v5329_v43, 9  ;;  %v19051_v13 = vld [vmem:[#allocation38_spill] sm:$0xff] }
 0x1ec   : > { %v15852_v53 = vadd.f32 %v12845_v36, %v2528_v23  ;;  %v5473_v28 = vsel %vm14657_vm14, %v11836_v7, %v5472_v12  ;;  %v5476_v50 = vsel %vm14657_vm14, %v5474_v6, %v5475_v32  ;;  %v19050_v23 = vld [vmem:[#allocation44_spill] sm:$0xff] }
 0x1ed   : > { %v12852_v25 = vpop.f32.mrf.mxu1  ;;  %v5486_v9 = vrot.slane %v19050_v23, 5  ;;  %v13724_v7 = vld [vmem:[#allocation8 + $0x78] sm:$0xff]   ;;  %v11852_v32 = vcombine.low %v5473_v28, %v5476_v50 }
 0x1ee   : > { %v12800_v17 = vpop.f32.mrf.mxu0  ;;  %13098 = vmatprep.subr.bf16.mxu1 %v13724_v7 }
 0x1ef   : > { %v2531_v52 = vadd.f32 %v12800_v17, %v19047_v37  ;;  %v2863_v47 = vpop.f32.mrf.mxu1  ;;  %13099 = vmatpush3.bf16.msra.mxu1 %v13724_v7 }
 0x1f0   : > { %v2462_v10 = vpop.f32.mrf.mxu0 }
 0x1f1   : > { %13087 = vmatmul.mubr.bf16.gmra.mxu0 %v11850_v49  ;;  %v2529_v36 = vadd.f32 %v2462_v10, %v19049_v21  ;;  %v15858_v31 = vadd.f32 %v12848_v20, %v2531_v52  ;;  %v12853_v51 = vpop.f32.mrf.mxu1  ;;  %v5480_v49 = vsel %vm14657_vm14, %v11837_v56, %v5479_v24  ;;  %v5483_v20 = vsel %vm14657_vm14, %v5481_v63, %v5482_v40  ;;  %v19052_v24 = vld [vmem:[#allocation40_spill] sm:$0xff] }
 0x1f2   : > { %v12801_v4 = vpop.f32.mrf.mxu0  ;;  %13090 = vmatprep.mubr.bf16.mxu0 %v11851_v44  ;;  %v5330_v44 = vld [vmem:[#allocation2 + $0xcc] sm:$0xe]  ;;  %v11853_v8 = vcombine.low %v5480_v49, %v5483_v20  ;;  %v5489_v21 = vrot.slane %v15699_v38, 5 }
 0x1f3   : > { %v2532_v43 = vadd.f32 %v12801_v4, %v19051_v13  ;;  %v15866_v17 = vadd.f32 %v2847_v29, %v2529_v36  ;;  %v15874_v12 = vpop.f32.mrf.mxu1  ;;  %v11838_v10 = vrot.slane %v5330_v44, 9  ;;  %v5488_v29 = vrot.slane %v5486_v9, 4  ;;  %v19053_v4 = vld [vmem:[#allocation41_spill] sm:$0xff] }
 0x1f4   : > { %v15872_v37 = vpop.f32.mrf.mxu0 }
 0x1f5   : > { %v15876_v6 = vadd.f32 %v12849_v48, %v2532_v43  ;;  %v12856_v36 = vpop.f32.mrf.mxu1  ;;  %v5487_v28 = vsel %vm14657_vm14, %v11838_v10, %v5486_v9  ;;  %v5490_v38 = vsel %vm14657_vm14, %v5488_v29, %v5489_v21  ;;  %v19054_v43 = vld [vmem:[#allocation45_spill] sm:$0xff] }
 0x1f6   : > { %v12804_v52 = vpop.f32.mrf.mxu0 }
 0x1f7   : > { %v2535_v56 = vadd.f32 %v12804_v52, %v19052_v24  ;;  %v2879_v40 = vpop.f32.mrf.mxu1  ;;  %v13725_v52 = vld [vmem:[#allocation8 + $0x70] sm:$0xff]  }
 0x1f8   : > { %v2478_v63 = vpop.f32.mrf.mxu0  ;;  %13100 = vmatprep.subr.bf16.mxu1 %v13725_v52 }
 0x1f9   : > { %13091 = vmatmul.mubr.bf16.gmra.mxu0 %v11852_v32  ;;  %v2533_v23 = vadd.f32 %v2478_v63, %v19053_v4  ;;  %v15881_v13 = vadd.f32 %v12852_v25, %v2535_v56  ;;  %v12857_v50 = vpop.f32.mrf.mxu1  ;;  %v11854_v25 = vcombine.low %v5487_v28, %v5490_v38  ;;  %13101 = vmatpush3.bf16.msra.mxu1 %v13725_v52 }
 0x1fa   : > { %v12805_v48 = vpop.f32.mrf.mxu0  ;;  %13094 = vmatprep.mubr.bf16.mxu0 %v11853_v8 }
 0x1fb   : > { %v2536_v49 = vadd.f32 %v12805_v48, %v19054_v43  ;;  %v15888_v20 = vadd.f32 %v2863_v47, %v2533_v23  ;;  %v15892_v7 = vpop.f32.mrf.mxu1 }
 0x1fc   : > { %v15890_v44 = vpop.f32.mrf.mxu0 }
 0x1fd   : > { %v15894_v32 = vadd.f32 %v12853_v51, %v2536_v49  ;;  %v15896_v24 = vpop.f32.mrf.mxu1  ;;  %v13726_v49 = vld [vmem:[#allocation8 + $0x68] sm:$0xff]  }
 0x1fe   : > { %13102 = vmatprep.subr.bf16.mxu1 %v13726_v49 }
 0x1ff   : > { %v12808_v8 = vpop.f32.mrf.mxu0  ;;  %v15899_v29 = vpop.f32.mrf.mxu1  ;;  %13103 = vmatpush3.bf16.msra.mxu1 %v13726_v49 }
 0x200   : > { %v2539_v9 = vadd.f32 %v12808_v8, %v15697_v27 }
 0x201   : > { %v2494_v10 = vpop.f32.mrf.mxu0  ;;  %13095 = vmatmul.mubr.bf16.gmra.mxu0 %v11854_v25  ;;  %v15904_v51 = vpop.f32.mrf.mxu1 }
 0x202   : > { %v2537_v47 = vadd.f32 %v2494_v10, %v15706_v3  ;;  %v15902_v21 = vadd.f32 %v12856_v36, %v2539_v9  ;;  %19055 = vst [vmem:[#allocation24_spill] sm:$0xff] %v15904_v51 }
 0x203   : > { %v12809_v56 = vpop.f32.mrf.mxu0  ;;  %v15911_v27 = vpop.f32.mrf.mxu1 }
 0x204   : > { %v2540_v63 = vadd.f32 %v12809_v56, %v15715_v33  ;;  %v15907_v4 = vadd.f32 %v2879_v40, %v2537_v47  ;;  %19056 = vst [vmem:[#allocation32_spill] sm:$0xff] %v15911_v27 }
 0x205   : > { %v15909_v23 = vpop.f32.mrf.mxu0  ;;  %v15915_v38 = vpop.f32.mrf.mxu1 }
 0x206   : > { %v15913_v48 = vadd.f32 %v12857_v50, %v2540_v63  ;;  %19057 = vst [vmem:[#allocation36_spill] sm:$0xff] %v15915_v38 }
 0x207   : > { %v12876_v28 = vpop.f32.mrf.mxu0  ;;  %v15920_v43 = vpop.f32.mrf.mxu1 }
 0x208   : > { %v15918_v3 = vadd.f32 %v12876_v28, %v15731_v39  ;;  %19058 = vst [vmem:[#allocation26_spill] sm:$0xff] %v15920_v43  ;;  %v13727_v39 = vld [vmem:[#allocation8 + $0x38] sm:$0xff]  }
 0x209   : > { %v3520_v36 = vpop.f32.mrf.mxu0  ;;  %v12929_v25 = vpop.f32.mrf.mxu1  ;;  %13146 = vmatprep.subr.bf16.mxu0 %v13727_v39 }
 0x20a   : > { %v15923_v33 = vadd.f32 %v3520_v36, %v15741_v60  ;;  %13147 = vmatpush3.bf16.msra.mxu0 %v13727_v39 }
 0x20b   : > { %v12877_v40 = vpop.f32.mrf.mxu0  ;;  %v15930_v8 = vpop.f32.mrf.mxu1 }
 0x20c   : > { %v15926_v52 = vadd.f32 %v12877_v40, %v15750_v2  ;;  %19060 = vst [vmem:[#allocation27_spill] sm:$0xff] %v15930_v8  ;;  %v13729_v2 = vld [vmem:[#allocation8 + $0x30] sm:$0xff]  }
 0x20d   : > { %v15928_v50 = vpop.f32.mrf.mxu0  ;;  %v12932_v10 = vpop.f32.mrf.mxu1  ;;  %13148 = vmatprep.subr.bf16.mxu0 %v13729_v2 }
 0x20e   : > { %19059 = vst [vmem:[#allocation33_spill] sm:$0xff] %v15926_v52  ;;  %13149 = vmatpush3.bf16.msra.mxu0 %v13729_v2 }
 0x20f   : > { %v12880_v9 = vpop.f32.mrf.mxu0  ;;  %v4049_v56 = vpop.f32.mrf.mxu1 }
 0x210   : > { %v15933_v47 = vadd.f32 %v12880_v9, %v15756_v59  ;;  %v13730_v9 = vld [vmem:[#allocation8 + $0x28] sm:$0xff]  }
 0x211   : > { %v3536_v60 = vpop.f32.mrf.mxu0  ;;  %v12933_v36 = vpop.f32.mrf.mxu1  ;;  %13150 = vmatprep.subr.bf16.mxu0 %v13730_v9 }
 0x212   : > { %19061 = vst [vmem:[#allocation37_spill] sm:$0xff] %v15933_v47  ;;  %v15936_v63 = vadd.f32 %v3536_v60, %v15766_v19  ;;  %13151 = vmatpush3.bf16.msra.mxu0 %v13730_v9  ;;  %v13732_v47 = vld [vmem:[#allocation8 + $0x20] sm:$0xff]  }
 0x213   : > { %v12881_v28 = vpop.f32.mrf.mxu0  ;;  %v15941_v45 = vpop.f32.mrf.mxu1  ;;  %13152 = vmatprep.subr.bf16.mxu0 %v13732_v47 }
 0x214   : > { %19062 = vst [vmem:[#allocation29_spill] sm:$0xff] %v15936_v63  ;;  %v3654_v49 = vadd.f32 %v12881_v28, %v15776_v15  ;;  %19063 = vst [vmem:[#allocation30_spill] sm:$0xff] %v15941_v45 }
 0x215   : > { %v15939_v40 = vpop.f32.mrf.mxu0  ;;  %v12936_v43 = vpop.f32.mrf.mxu1 }
 0x216   : > { %v15943_v59 = vadd.f32 %v12929_v25, %v3654_v49  ;;  %13153 = vmatpush3.bf16.msra.mxu0 %v13732_v47  ;;  %v13735_v47 = vld [vmem:[#allocation8 + $0x10] sm:$0xff]  }
 0x217   : > { %v12884_v8 = vpop.f32.mrf.mxu0  ;;  %v4065_v60 = vpop.f32.mrf.mxu1 }
 0x218   : > { %v3657_v39 = vadd.f32 %v12884_v8, %v15781_v35  ;;  %v13728_v8 = vld [vmem:[#allocation8 + $0x60] sm:$0xff]  }
 0x219   : > { %v3552_v19 = vpop.f32.mrf.mxu0  ;;  %v12937_v38 = vpop.f32.mrf.mxu1  ;;  %13104 = vmatprep.subr.bf16.mxu1 %v13728_v8 }
 0x21a   : > { %v3655_v63 = vadd.f32 %v3552_v19, %v15791_v42  ;;  %v15947_v15 = vadd.f32 %v12932_v10, %v3657_v39  ;;  %13105 = vmatpush3.bf16.msra.mxu1 %v13728_v8 }
 0x21b   : > { %v12885_v28 = vpop.f32.mrf.mxu0  ;;  %v15954_v49 = vpop.f32.mrf.mxu1 }
 0x21c   : > { %v3658_v45 = vadd.f32 %v12885_v28, %v15800_v58  ;;  %v15950_v2 = vadd.f32 %v4049_v56, %v3655_v63  ;;  %19064 = vst [vmem:[#allocation31_spill] sm:$0xff] %v15954_v49  ;;  %v13733_v63 = vld [vmem:[#allocation8 + $0x18] sm:$0xff]  }
 0x21d   : > { %v15952_v25 = vpop.f32.mrf.mxu0  ;;  %v12940_v9 = vpop.f32.mrf.mxu1  ;;  %13154 = vmatprep.subr.bf16.mxu0 %v13733_v63 }
 0x21e   : > { %v15956_v35 = vadd.f32 %v12933_v36, %v3658_v45  ;;  %13155 = vmatpush3.bf16.msra.mxu0 %v13733_v63 }
 0x21f   : > { %v12888_v27 = vpop.f32.mrf.mxu0  ;;  %v4081_v39 = vpop.f32.mrf.mxu1  ;;  %13156 = vmatprep.subr.bf16.mxu0 %v13735_v47 }
 0x220   : > { %v3661_v42 = vadd.f32 %v12888_v27, %v15808_v34 }
 0x221   : > { %v3568_v10 = vpop.f32.mrf.mxu0  ;;  %v12941_v28 = vpop.f32.mrf.mxu1 }
 0x222   : > { %v3659_v58 = vadd.f32 %v3568_v10, %v15817_v22  ;;  %v15960_v56 = vadd.f32 %v12936_v43, %v3661_v42  ;;  %v13731_v43 = vld [vmem:[#allocation8 + $0x58] sm:$0xff]   ;;  %13157 = vmatpush3.bf16.msra.mxu0 %v13735_v47  ;;  %v13734_v47 = vld [vmem:[#allocation8 + $0x50] sm:$0xff]  }
 0x223   : > { %v12889_v19 = vpop.f32.mrf.mxu0  ;;  %v15967_v34 = vpop.f32.mrf.mxu1  ;;  %13106 = vmatprep.subr.bf16.mxu1 %v13731_v43 }
 0x224   : > { %v3662_v45 = vadd.f32 %v12889_v19, %v15827_v14  ;;  %v15963_v36 = vadd.f32 %v4065_v60, %v3659_v58  ;;  %19066 = vst [vmem:[#allocation35_spill] sm:$0xff] %v15967_v34  ;;  %13107 = vmatpush3.bf16.msra.mxu1 %v13731_v43 }
 0x225   : > { %v15965_v49 = vpop.f32.mrf.mxu0  ;;  %v12944_v22 = vpop.f32.mrf.mxu1  ;;  %13108 = vmatprep.subr.bf16.mxu1 %v13734_v47 }
 0x226   : > { %19065 = vst [vmem:[#allocation43_spill] sm:$0xff] %v15965_v49  ;;  %v15969_v27 = vadd.f32 %v12937_v38, %v3662_v45 }
 0x227   : > { %v12892_v8 = vpop.f32.mrf.mxu0  ;;  %v4097_v51 = vpop.f32.mrf.mxu1 }
 0x228   : > { %v3665_v42 = vadd.f32 %v12892_v8, %v15833_v46  ;;  %v13736_v8 = vld [vmem:[#allocation8 + $0x8] sm:$0xff]   ;;  %13109 = vmatpush3.bf16.msra.mxu1 %v13734_v47 }
 0x229   : > { %v3584_v10 = vpop.f32.mrf.mxu0  ;;  %v12945_v63 = vpop.f32.mrf.mxu1  ;;  %13158 = vmatprep.subr.bf16.mxu0 %v13736_v8  ;;  %v6450_v47 = vld [vmem:[#allocation2 + $0x4] sm:$0xf] }
 0x22a   : > { %v3663_v14 = vadd.f32 %v3584_v10, %v15843_v16  ;;  %v15973_v60 = vadd.f32 %v12940_v9, %v3665_v42  ;;  %13159 = vmatpush3.bf16.msra.mxu0 %v13736_v8  ;;  %v6449_v8 = vld [vmem:[#allocation2] sm:$0xf] }
 0x22b   : > { %v12893_v58 = vpop.f32.mrf.mxu0  ;;  %v15980_v34 = vpop.f32.mrf.mxu1  ;;  %v6514_v52 = vshrl.u32 %v6449_v8, 16 }
 0x22c   : > { %v3666_v38 = vadd.f32 %v12893_v58, %v15852_v53  ;;  %v15976_v19 = vadd.f32 %v4081_v39, %v3663_v14  ;;  %19068 = vst [vmem:[#allocation38_spill] sm:$0xff] %v15980_v34  ;;  %v13737_v34 = vld [vmem:[#allocation8 + $0x48] sm:$0xff]  }
 0x22d   : > { %v15978_v45 = vpop.f32.mrf.mxu0  ;;  %v12948_v9 = vpop.f32.mrf.mxu1  ;;  %13110 = vmatprep.subr.bf16.mxu1 %v13737_v34 }
 0x22e   : > { %19067 = vst [vmem:[#allocation44_spill] sm:$0xff] %v15978_v45  ;;  %v15982_v46 = vadd.f32 %v12941_v28, %v3666_v38  ;;  %v13738_v38 = vld [vmem:[#allocation8] sm:$0xff]   ;;  %13111 = vmatpush3.bf16.msra.mxu1 %v13737_v34 }
 0x22f   : > { %v12896_v49 = vpop.f32.mrf.mxu0  ;;  %v4113_v14 = vpop.f32.mrf.mxu1  ;;  %13160 = vmatprep.subr.bf16.mxu0 %v13738_v38  ;;  %v13741_v34 = vld [vmem:[#allocation8 + $0x40] sm:$0xff]  }
 0x230   : > { %v3669_v16 = vadd.f32 %v12896_v49, %v15858_v31  ;;  %13161 = vmatpush3.bf16.msra.mxu0 %v13738_v38  ;;  %13112 = vmatprep.subr.bf16.mxu1 %v13741_v34 }
 0x231   : > { %v3600_v43 = vpop.f32.mrf.mxu0 }
 0x232   : > { %v3667_v53 = vadd.f32 %v3600_v43, %v15866_v17  ;;  %v15986_v39 = vadd.f32 %v12944_v22, %v3669_v16  ;;  %v12949_v22 = vpop.f32.mrf.mxu1  ;;  %13113 = vmatpush3.bf16.msra.mxu1 %v13741_v34 }
 0x233   : > { %v12897_v42 = vpop.f32.mrf.mxu0 }
 0x234   : > { %v3670_v10 = vadd.f32 %v12897_v42, %v15876_v6  ;;  %v15989_v28 = vadd.f32 %v4097_v51, %v3667_v53  ;;  %v11921_v6 = vcombine.low %v6449_v8, %v6450_v47 }
 0x235   : > { %v15991_v58 = vpop.f32.mrf.mxu0 }
 0x236   : > { %19069 = vst [vmem:[#allocation40_spill] sm:$0xff] %v15991_v58  ;;  %v15993_v31 = vadd.f32 %v12945_v63, %v3670_v10  ;;  %13162 = vmatprep.mubr.bf16.mxu0 %v11921_v6  ;;  %v16002_v10 = vpop.f32.mrf.mxu1  ;;  %v6527_v6 = vshrl.u32 %v6450_v47, 16 }
 0x237   : > { %v12900_v49 = vpop.f32.mrf.mxu0  ;;  %19070 = vst [vmem:[#allocation41_spill] sm:$0xff] %v16002_v10 }
 0x238   : > { %v3673_v17 = vadd.f32 %v12900_v49, %v15881_v13 }
 0x239   : > { %v3616_v16 = vpop.f32.mrf.mxu0 }
 0x23a   : > { %v3671_v51 = vadd.f32 %v3616_v16, %v15888_v20  ;;  %v15997_v43 = vadd.f32 %v12948_v9, %v3673_v17  ;;  %v6517_v9 = vshll.u32 %v6449_v8, 16 }
 0x23b   : > { %v12901_v53 = vpop.f32.mrf.mxu0 }
 0x23c   : > { %v3674_v63 = vadd.f32 %v12901_v53, %v15894_v32  ;;  %v16000_v42 = vadd.f32 %v4113_v14, %v3671_v51 }
 0x23d   : > { %v16004_v13 = vpop.f32.mrf.mxu0 }
 0x23e   : > { %19071 = vst [vmem:[#allocation45_spill] sm:$0xff] %v16004_v13  ;;  %v16006_v38 = vadd.f32 %v12949_v22, %v3674_v63  ;;  %v6516_v22 = vrot.slane %v6514_v52, 4  ;;  %v6497_v52 = vld [vmem:[#allocation2 + $0x8] sm:$0x1] }
 0x23f   : > { %v12952_v49 = vpop.f32.mrf.mxu1 }
 0x241   : > { %v12904_v58 = vpop.f32.mrf.mxu0  ;;  %v4129_v45 = vpop.f32.mrf.mxu1 }
 0x242   : > { %v3677_v20 = vadd.f32 %v12904_v58, %v15902_v21  ;;  %v6519_v21 = vrot.slane %v6517_v9, 5  ;;  %v6523_v58 = vshll.u32 %v6450_v47, 16  ;;  %v6533_v47 = vshll.u32 %v6497_v52, 16 }
 0x243   : > { %v3632_v17 = vpop.f32.mrf.mxu0  ;;  %v12953_v16 = vpop.f32.mrf.mxu1 }
 0x244   : > { %v3675_v32 = vadd.f32 %v3632_v17, %v15907_v4  ;;  %v16010_v14 = vadd.f32 %v12952_v49, %v3677_v20  ;;  %v6525_v49 = vrot.slane %v6523_v58, 5  ;;  %v6529_v20 = vrot.slane %v6527_v6, 4 }
 0x245   : > { %v12905_v51 = vpop.f32.mrf.mxu0  ;;  %v16012_v53 = vpop.f32.mrf.mxu1  ;;  %v6520_v34 = vor.u32 %v6519_v21, %v6516_v22 }
 0x246   : > { %19072 = vst [vmem:[#allocation48_spill] sm:$0xff] %v16010_v14  ;;  %19073 = vst [vmem:[#allocation49_spill] sm:$0xff] %v16012_v53  ;;  %v3678_v63 = vadd.f32 %v12905_v51, %v15913_v48  ;;  %v16015_v10 = vadd.f32 %v4129_v45, %v3675_v32  ;;  %v6530_v53 = vor.u32 %v6529_v20, %v6525_v49 }
 0x247   : > { %v16017_v8 = vpop.f32.mrf.mxu0  ;;  %v16019_v13 = vpop.f32.mrf.mxu1  ;;  %v6521_v9 = vrot.slane %v6520_v34, 4 }
 0x248   : > { %v16021_v4 = vadd.f32 %v12953_v16, %v3678_v63  ;;  %v6531_v32 = vrot.slane %v6530_v53, 4  ;;  %v6535_v63 = vrot.slane %v6533_v47, 5 }
 0x249   : > { %v16023_v17 = vpop.f32.mrf.mxu0  ;;  %v16025_v14 = vpop.f32.mrf.mxu1  ;;  %v6526_v6 = vsel %vm14318_vm11, %v6521_v9, %v6525_v49 }
 0x24a   : > { %19074 = vst [vmem:[#allocation50_spill] sm:$0xff] %v16025_v14  ;;  %v6536_v22 = vsel %vm14318_vm11, %v6531_v32, %v6535_v63 }
 0x24b   : > { %v16027_v48 = vpop.f32.mrf.mxu0  ;;  %v16029_v45 = vpop.f32.mrf.mxu1  ;;  %v11897_v21 = vcombine.low %v6526_v6, %v6536_v22  ;;  %v13745_v22 = vld [vmem:[#allocation8 + $0xb8] sm:$0xff]  }
 0x24c   : > { %13194 = vmatprep.subr.bf16.mxu1 %v13745_v22 }
 0x24d   : > { %v16031_v51 = vpop.f32.mrf.mxu0  ;;  %v16033_v16 = vpop.f32.mrf.mxu1  ;;  %13114 = vmatprep.mubr.bf16.mxu1 %v11897_v21 }
 0x24e   : > { %19075 = vst [vmem:[#allocation51_spill] sm:$0xff] %v16033_v16 }
 0x24f   : > { %v16037_v58 = vpop.f32.mrf.mxu0  ;;  %v16039_v14 = vpop.f32.mrf.mxu1 }
 0x251   : > { %v16043_v20 = vpop.f32.mrf.mxu0  ;;  %v16045_v52 = vpop.f32.mrf.mxu1 }
 0x252   : > { %19076 = vst [vmem:[#allocation52_spill] sm:$0xff] %v16045_v52 }
 0x253   : > { %v16047_v53 = vpop.f32.mrf.mxu0  ;;  %v16049_v34 = vpop.f32.mrf.mxu1 }
 0x254   : > { %19077 = vst [vmem:[#allocation53_spill] sm:$0xff] %v16049_v34 }
 0x255   : > { %v12977_v47 = vpop.f32.mrf.mxu0  ;;  %v16051_v16 = vpop.f32.mrf.mxu1 }
 0x256   : > { %19078 = vst [vmem:[#allocation54_spill] sm:$0xff] %v16051_v16  ;;  %v16054_v49 = vadd.f32 %v12977_v47, %v15943_v59 }
 0x257   : > { %v16056_v9 = vpop.f32.mrf.mxu0  ;;  %v16058_v11 = vpop.f32.mrf.mxu1 }
 0x258   : > { %19079 = vst [vmem:[#allocation55_spill] sm:$0xff] %v16058_v11 }
 0x259   : > { %v12980_v32 = vpop.f32.mrf.mxu0  ;;  %v16060_v63 = vpop.f32.mrf.mxu1 }
 0x25a   : > { %19080 = vst [vmem:[#allocation56_spill] sm:$0xff] %v16060_v63  ;;  %v16063_v6 = vadd.f32 %v12980_v32, %v15947_v15 }
 0x25b   : > { %v4435_v21 = vpop.f32.mrf.mxu0  ;;  %v16065_v52 = vpop.f32.mrf.mxu1 }
 0x25c   : > { %19081 = vst [vmem:[#allocation57_spill] sm:$0xff] %v16063_v6  ;;  %19082 = vst [vmem:[#allocation58_spill] sm:$0xff] %v16065_v52  ;;  %v16068_v34 = vadd.f32 %v4435_v21, %v15950_v2 }
 0x25d   : > { %v12981_v59 = vpop.f32.mrf.mxu0  ;;  %v16070_v47 = vpop.f32.mrf.mxu1 }
 0x25e   : > { %19083 = vst [vmem:[#allocation59_spill] sm:$0xff] %v16070_v47  ;;  %v16073_v16 = vadd.f32 %v12981_v59, %v15956_v35 }
 0x25f   : > { %v16075_v11 = vpop.f32.mrf.mxu0  ;;  %v16077_v63 = vpop.f32.mrf.mxu1 }
 0x260   : > { %19084 = vst [vmem:[#allocation60_spill] sm:$0xff] %v16073_v16  ;;  %19085 = vst [vmem:[#allocation61_spill] sm:$0xff] %v16077_v63 }
 0x261   : > { %v12984_v15 = vpop.f32.mrf.mxu0  ;;  %v16079_v32 = vpop.f32.mrf.mxu1 }
 0x262   : > { %19086 = vst [vmem:[#allocation62_spill] sm:$0xff] %v16079_v32  ;;  %v16082_v6 = vadd.f32 %v12984_v15, %v15960_v56 }
 0x263   : > { %v4451_v52 = vpop.f32.mrf.mxu0  ;;  %v16084_v2 = vpop.f32.mrf.mxu1 }
 0x264   : > { %19087 = vst [vmem:[#allocation63_spill] sm:$0xff] %v16082_v6  ;;  %19088 = vst [vmem:[#allocation64_spill] sm:$0xff] %v16084_v2  ;;  %v16087_v22 = vadd.f32 %v4451_v52, %v15963_v36  ;;  %v19107_v6 = vld [vmem:[#allocation22_spill] sm:$0xff] }
 0x265   : > { %v12985_v21 = vpop.f32.mrf.mxu0  ;;  %v16089_v47 = vpop.f32.mrf.mxu1 }
 0x266   : > { %19089 = vst [vmem:[#allocation65_spill] sm:$0xff] %v16087_v22  ;;  %19090 = vst [vmem:[#allocation66_spill] sm:$0xff] %v16089_v47  ;;  %v16092_v35 = vadd.f32 %v12985_v21, %v15969_v27  ;;  %v19106_v22 = vld [vmem:[#allocation23_spill] sm:$0xff] }
 0x267   : > { %v16094_v59 = vpop.f32.mrf.mxu0  ;;  %v16096_v63 = vpop.f32.mrf.mxu1  ;;  %v1966_v16 = vadd.f32 %v19107_v6, %v19106_v22  ;;  %v19113_v6 = vld [vmem:[#allocation34_spill] sm:$0xff] }
 0x268   : > { %19091 = vst [vmem:[#allocation67_spill] sm:$0xff] %v16092_v35  ;;  %19092 = vst [vmem:[#allocation68_spill] sm:$0xff] %v16096_v63 }
 0x269   : > { %v12988_v32 = vpop.f32.mrf.mxu0  ;;  %v16101_v15 = vpop.f32.mrf.mxu1 }
 0x26a   : > { %v16099_v56 = vadd.f32 %v12988_v32, %v15973_v60  ;;  %19094 = vst [vmem:[#allocation70_spill] sm:$0xff] %v16101_v15 }
 0x26b   : > { %v4467_v2 = vpop.f32.mrf.mxu0  ;;  %v16106_v52 = vpop.f32.mrf.mxu1 }
 0x26c   : > { %19093 = vst [vmem:[#allocation69_spill] sm:$0xff] %v16099_v56  ;;  %v16104_v36 = vadd.f32 %v4467_v2, %v15976_v19  ;;  %19096 = vst [vmem:[#allocation72_spill] sm:$0xff] %v16106_v52  ;;  %v19100_v56 = vld [vmem:[#allocation19_spill] sm:$0xff]  ;;  %v19101_v19 = vld [vmem:[#allocation18_spill] sm:$0xff] }
 0x26d   : > { %v12989_v47 = vpop.f32.mrf.mxu0  ;;  %v16111_v21 = vpop.f32.mrf.mxu1  ;;  %v1934_v2 = vadd.f32 %v19101_v19, %v19100_v56  ;;  %v19111_v19 = vld [vmem:[#allocation25_spill] sm:$0xff] }
 0x26e   : > { %19095 = vst [vmem:[#allocation71_spill] sm:$0xff] %v16104_v36  ;;  %v16109_v27 = vadd.f32 %v12989_v47, %v15982_v46  ;;  %19098 = vst [vmem:[#allocation74_spill] sm:$0xff] %v16111_v21  ;;  %v19104_v46 = vld [vmem:[#allocation21_spill] sm:$0xff]  ;;  %v19105_v47 = vld [vmem:[#allocation20_spill] sm:$0xff] }
 0x26f   : > { %v16113_v35 = vpop.f32.mrf.mxu0  ;;  %v1950_v21 = vadd.f32 %v19105_v47, %v19104_v46  ;;  %v2518_v46 = vadd.f32 %v15796_v30, %v1966_v16 }
 0x270   : > { %19097 = vst [vmem:[#allocation73_spill] sm:$0xff] %v16109_v27  ;;  %v16118_v32 = vpop.f32.mrf.mxu1 }
 0x271   : > { %v12992_v63 = vpop.f32.mrf.mxu0  ;;  %19099 = vst [vmem:[#allocation75_spill] sm:$0xff] %v16118_v32  ;;  %v2514_v56 = vadd.f32 %v15771_v5, %v1950_v21 }
 0x272   : > { %v16116_v60 = vadd.f32 %v12992_v63, %v15986_v39  ;;  %v16125_v36 = vpop.f32.mrf.mxu1  ;;  %v2510_v39 = vadd.f32 %v15746_v62, %v1934_v2  ;;  %v19114_v62 = vld [vmem:[#allocation46_spill] sm:$0xff] }
 0x273   : > { %v4483_v15 = vpop.f32.mrf.mxu0  ;;  %19103 = vst [vmem:[#allocation18_spill] sm:$0xff] %v16125_v36  ;;  %v19115_v2 = vld [vmem:[#allocation42_spill] sm:$0xff]  ;;  %v2899_v30 = vadd.f32 %v15748_v41, %v2514_v56  ;;  %v2907_v41 = vadd.f32 %v15798_v18, %v15825_v1  ;;  %v4144_v18 = vadd.f32 %v15899_v29, %v15923_v33  ;;  %v19118_v1 = vld [vmem:[#allocation24_spill] sm:$0xff]  ;;  %v19120_v56 = vld [vmem:[#allocation37_spill] sm:$0xff] }
 0x274   : > { %v16123_v52 = vadd.f32 %v4483_v15, %v15989_v28  ;;  %v16135_v32 = vpop.f32.mrf.mxu1  ;;  %v19110_v15 = vld [vmem:[#allocation28_spill] sm:$0xff]  ;;  %v2895_v5 = vadd.f32 %v15723_v26, %v2510_v39  ;;  %v19127_v33 = vld [vmem:[#allocation30_spill] sm:$0xff] }
 0x275   : > { %v12993_v27 = vpop.f32.mrf.mxu0  ;;  %19109 = vst [vmem:[#allocation20_spill] sm:$0xff] %v16135_v32  ;;  %v1998_v36 = vadd.f32 %v19111_v19, %v19110_v15 }
 0x276   : > { %19102 = vst [vmem:[#allocation19_spill] sm:$0xff] %v16123_v52  ;;  %v16133_v63 = vadd.f32 %v12993_v27, %v15993_v31  ;;  %v16143_v47 = vpop.f32.mrf.mxu1  ;;  %v19112_v52 = vld [vmem:[#allocation39_spill] sm:$0xff]  ;;  %v2030_v31 = vadd.f32 %v19115_v2, %v19114_v62  ;;  %v2903_v62 = vadd.f32 %v15773_v61, %v2518_v46  ;;  %v19121_v46 = vld [vmem:[#allocation36_spill] sm:$0xff] }
 0x277   : > { %v16138_v28 = vpop.f32.mrf.mxu0  ;;  %v2014_v22 = vadd.f32 %v19113_v6, %v19112_v52  ;;  %v19116_v27 = vld [vmem:[#allocation47_spill] sm:$0xff]  ;;  %v2526_v21 = vadd.f32 %v15848_v57, %v1998_v36 }
 0x278   : > { %19108 = vst [vmem:[#allocation21_spill] sm:$0xff] %v16133_v63  ;;  %v2046_v32 = vadd.f32 %v19116_v27, %v15719_v0  ;;  %v2534_v52 = vadd.f32 %v15890_v44, %v2030_v31  ;;  %v3648_v0 = vadd.f32 %v15928_v50, %v2895_v5  ;;  %v3656_v44 = vadd.f32 %v15952_v25, %v2903_v62  ;;  %v19124_v31 = vld [vmem:[#allocation27_spill] sm:$0xff]  ;;  %v19126_v5 = vld [vmem:[#allocation44_spill] sm:$0xff] }
 0x279   : > { %v12996_v63 = vpop.f32.mrf.mxu0  ;;  %v2530_v16 = vadd.f32 %v15872_v37, %v2014_v22  ;;  %v16165_v57 = vpop.f32.mrf.mxu1  ;;  %v2911_v37 = vadd.f32 %v15823_v54, %v2526_v21  ;;  %v19117_v54 = vld [vmem:[#allocation33_spill] sm:$0xff]  ;;  %v19130_v62 = vld [vmem:[#allocation48_spill] sm:$0xff] }
 0x27a   : > { %v16154_v15 = vadd.f32 %v12996_v63, %v15997_v43  ;;  %v2538_v19 = vadd.f32 %v15909_v23, %v2046_v32  ;;  %v3652_v43 = vadd.f32 %v15939_v40, %v2899_v30  ;;  %v4146_v40 = vadd.f32 %v15896_v24, %v15918_v3  ;;  %v19125_v3 = vld [vmem:[#allocation43_spill] sm:$0xff] }
 0x27b   : > { %v4499_v6 = vpop.f32.mrf.mxu0  ;;  %v16175_v61 = vpop.f32.mrf.mxu1  ;;  %v2915_v50 = vadd.f32 %v15850_v55, %v2530_v16  ;;  %v4147_v25 = vadd.f32 %v19118_v1, %v19117_v54  ;;  %v4150_v55 = vadd.f32 %v19121_v46, %v19120_v56  ;;  %v3660_v27 = vadd.f32 %v19125_v3, %v2907_v41  ;;  %v19128_v16 = vld [vmem:[#allocation40_spill] sm:$0xff]  ;;  %v19131_v56 = vld [vmem:[#allocation31_spill] sm:$0xff] }
 0x27c   : > { %v16163_v26 = vadd.f32 %v4499_v6, %v16000_v42  ;;  %v2919_v42 = vadd.f32 %v15874_v12, %v2534_v52  ;;  %v2923_v32 = vadd.f32 %v15892_v7, %v2538_v19  ;;  %v19122_v12 = vld [vmem:[#allocation29_spill] sm:$0xff]  ;;  %v19123_v7 = vld [vmem:[#allocation26_spill] sm:$0xff]  ;;  %v4149_v24 = vadd.f32 %v19124_v31, %v3652_v43  ;;  %v19137_v31 = vld [vmem:[#allocation51_spill] sm:$0xff] }
 0x27d   : > { %v12997_v36 = vpop.f32.mrf.mxu0  ;;  %v16191_v22 = vpop.f32.mrf.mxu1  ;;  %v4148_v2 = vadd.f32 %v19123_v7, %v19122_v12  ;;  %v3664_v21 = vadd.f32 %v19126_v5, %v2911_v37  ;;  %v4153_v30 = vadd.f32 %v19127_v33, %v3656_v44  ;;  %v3668_v52 = vadd.f32 %v19128_v16, %v2915_v50  ;;  %v19129_v19 = vld [vmem:[#allocation45_spill] sm:$0xff] }
 0x27e   : > { %v16173_v23 = vadd.f32 %v12997_v36, %v16006_v38  ;;  %v19119_v38 = vld [vmem:[#allocation32_spill] sm:$0xff]  ;;  %v3672_v6 = vadd.f32 %v19129_v19, %v2919_v42  ;;  %v3676_v36 = vadd.f32 %v16017_v8, %v2923_v32  ;;  %v4532_v54 = vadd.f32 %v16023_v17, %v4146_v40  ;;  %v19132_v32 = vld [vmem:[#allocation35_spill] sm:$0xff]  ;;  %v19141_v33 = vld [vmem:[#allocation57_spill] sm:$0xff] }
 0x27f   : > { %v16182_v39 = vpop.f32.mrf.mxu0  ;;  %v4145_v63 = vadd.f32 %v19119_v38, %v3648_v0  ;;  %v4530_v43 = vadd.f32 %v16027_v48, %v4144_v18  ;;  %v4533_v41 = vadd.f32 %v16031_v51, %v4147_v25  ;;  %v16208_v1 = vpop.f32.mrf.mxu1  ;;  %v4536_v50 = vadd.f32 %v16043_v20, %v4150_v55  ;;  %v19133_v51 = vld [vmem:[#allocation38_spill] sm:$0xff]  ;;  %v19134_v25 = vld [vmem:[#allocation41_spill] sm:$0xff] }
 0x280   : > { %v4534_v42 = vadd.f32 %v16047_v53, %v4148_v2  ;;  %v4157_v8 = vadd.f32 %v19131_v56, %v3660_v27  ;;  %v4161_v17 = vadd.f32 %v19132_v32, %v3664_v21  ;;  %v4535_v48 = vadd.f32 %v16056_v9, %v4149_v24  ;;  %v19135_v53 = vld [vmem:[#allocation49_spill] sm:$0xff]  ;;  %v19136_v55 = vld [vmem:[#allocation50_spill] sm:$0xff]  ;;  %v19138_v27 = vld [vmem:[#allocation52_spill] sm:$0xff] }
 0x281   : > { %v13000_v29 = vpop.f32.mrf.mxu0  ;;  %v4531_v44 = vadd.f32 %v16037_v58, %v4145_v63  ;;  %v4165_v18 = vadd.f32 %v19133_v51, %v3668_v52  ;;  %v4169_v46 = vadd.f32 %v19134_v25, %v3672_v6  ;;  %v4539_v58 = vadd.f32 %v16075_v11, %v4153_v30  ;;  %v16250_v19 = vld [vmem:[%s18937_s2] ss:$0 sm:$0xff]  ;;  %v19144_v6 = vld [vmem:[#allocation60_spill] sm:$0xff] }
 0x282   : > { %v16202_v0 = vadd.f32 %v13000_v29, %v19130_v62  ;;  %v4173_v63 = vadd.f32 %v19135_v53, %v3676_v36  ;;  %v5283_v12 = vadd.f32 %v19136_v55, %v4530_v43  ;;  %v5286_v7 = vadd.f32 %v16029_v45, %v4533_v41  ;;  %v19142_v45 = vld [vmem:[#allocation55_spill] sm:$0xff]  ;;  %v19145_v62 = vld [vmem:[#allocation58_spill] sm:$0xff]  ;;  %v19152_v32 = vld [vmem:[#allocation64_spill] sm:$0xff] }
 0x283   : > { %v4515_v37 = vpop.f32.mrf.mxu0  ;;  %v5284_v24 = vadd.f32 %v19137_v31, %v4531_v44  ;;  %v5289_v3 = vadd.f32 %v16039_v14, %v4536_v50  ;;  %v16232_v5 = vadd.f32 %v19138_v27, %v4534_v42  ;;  %v4543_v11 = vadd.f32 %v16094_v59, %v4157_v8  ;;  %v19143_v59 = vld [vmem:[#allocation56_spill] sm:$0xff]  ;;  %v19149_v50 = vld [vmem:[#allocation65_spill] sm:$0xff]  ;;  %v19150_v42 = vld [vmem:[#allocation62_spill] sm:$0xff] }
 0x284   : > { %v16214_v38 = vadd.f32 %v4515_v37, %v16015_v10  ;;  %v5285_v10 = vadd.f32 %v16019_v13, %v4532_v54  ;;  %v19140_v13 = vld [vmem:[#allocation54_spill] sm:$0xff]  ;;  %v16244_v30 = vadd.f32 %v19142_v45, %v19141_v33  ;;  %v4547_v16 = vadd.f32 %v16113_v35, %v4161_v17  ;;  %v19146_v54 = vld [vmem:[#allocation59_spill] sm:$0xff]  ;;  %v19148_v37 = vld [vmem:[#allocation61_spill] sm:$0xff] }
 0x285   : > { %v13001_v40 = vpop.f32.mrf.mxu0  ;;  %v13048_v2 = vpop.f32.mrf.mxu1  ;;  %v16240_v29 = vadd.f32 %v19140_v13, %v4535_v48  ;;  %v16258_v36 = vadd.f32 %v19145_v62, %v19144_v6  ;;  %v16261_v43 = vadd.f32 %v19146_v54, %v4539_v58  ;;  %v19147_v35 = vld [vmem:[#allocation63_spill] sm:$0xff]  ;;  %v16269_v56 = vadd.f32 %v19150_v42, %v19149_v50  ;;  %v16279_v48 = vld [vmem:[%s18938_s3] ss:$0 sm:$0xff]  ;;  %v19154_v58 = vld [vmem:[#allocation69_spill] sm:$0xff] }
 0x286   : > { %v16223_v20 = vadd.f32 %v13001_v40, %v16021_v4  ;;  %v19139_v4 = vld [vmem:[#allocation53_spill] sm:$0xff]  ;;  %v16265_v44 = vadd.f32 %v19148_v37, %v19147_v35  ;;  %v19151_v8 = vld [vmem:[#allocation67_spill] sm:$0xff]  ;;  %v4551_v17 = vadd.f32 %v16138_v28, %v4165_v18  ;;  %v19153_v51 = vld [vmem:[#allocation66_spill] sm:$0xff] }
 0x287   : > { %v4518_v9 = vpop.f32.mrf.mxu0  ;;  %v16237_v21 = vadd.f32 %v19139_v4, %v16054_v49  ;;  %v5268_v52 = vpop.f32.mrf.mxu1  ;;  %v16254_v49 = vadd.f32 %v19143_v59, %v16068_v34  ;;  %v16273_v34 = vadd.f32 %v19152_v32, %v19151_v8  ;;  %v16282_v25 = vadd.f32 %v19153_v51, %v4543_v11  ;;  %v19155_v53 = vld [vmem:[#allocation68_spill] sm:$0xff]  ;;  %v19156_v27 = vld [vmem:[#allocation71_spill] sm:$0xff]  ;;  %v19157_v4 = vld [vmem:[#allocation70_spill] sm:$0xff] }
 0x288   : > { %v16291_v13 = vadd.f32 %v19157_v4, %v19156_v27  ;;  %v19158_v28 = vld [vmem:[#allocation73_spill] sm:$0xff]  ;;  %v19159_v18 = vld [vmem:[#allocation72_spill] sm:$0xff]  ;;  %v19160_v45 = vld [vmem:[#allocation74_spill] sm:$0xff]  ;;  %v4555_v11 = vadd.f32 %v16182_v39, %v4169_v46  ;;  %v16316_v39 = vadd.f32 %v16143_v47, %v4551_v17  ;;  %v4559_v46 = vadd.f32 %v4518_v9, %v4173_v63 }
 0x289   : > { %v13068_v14 = vpop.f32.mrf.mxu0  ;;  %v16295_v33 = vadd.f32 %v19159_v18, %v19158_v28  ;;  %v13049_v59 = vpop.f32.mrf.mxu1  ;;  %v19161_v62 = vld [vmem:[#allocation75_spill] sm:$0xff]  ;;  %v19163_v50 = vld [vmem:[#allocation18_spill] sm:$0xff]  ;;  %v19164_v8 = vld [vmem:[#allocation21_spill] sm:$0xff]  ;;  %v16330_v47 = vadd.f32 %v16191_v22, %v16173_v23 }
 0x28a   : > { %v5782_v41 = vadd.f32 %v13068_v14, %v5285_v10  ;;  %v16286_v10 = vadd.f32 %v19155_v53, %v19154_v58  ;;  %v16298_v14 = vadd.f32 %v19160_v45, %v4547_v16  ;;  %v16303_v54 = vadd.f32 %v19161_v62, %v16116_v60  ;;  %v19162_v37 = vld [vmem:[#allocation19_spill] sm:$0xff]  ;;  %v19165_v16 = vld [vmem:[#allocation20_spill] sm:$0xff]  ;;  %v6344_v62 = vld [vmem:[#allocation2 + $0x18] sm:$0xf] }
 0x28b   : > { %v5653_v40 = vpop.f32.mrf.mxu0  ;;  %v16309_v42 = vadd.f32 %v19163_v50, %v19162_v37  ;;  %v16313_v32 = vadd.f32 %v19165_v16, %v19164_v8  ;;  %v16333_v63 = vadd.f32 %v16208_v1, %v4555_v11  ;;  %v5271_v9 = vpop.f32.mrf.mxu1  ;;  %v16344_v23 = vadd.f32 %v13049_v59, %v16223_v20  ;;  %v16348_v45 = vld [vmem:[#allocation8 + $0xf8] sm:$0xff]  }
 0x28c   : > { %v5821_v55 = vmul.f32 %v16250_v19, %v5782_v41  ;;  %v5780_v31 = vadd.f32 %v5653_v40, %v5283_v12  ;;  %v16346_v1 = vadd.f32 %v5271_v9, %v4559_v46  ;;  %13242 = vmatprep.subr.bf16.mxu0 %v16348_v45 }
 0x28d   : > { %v13069_v6 = vpop.f32.mrf.mxu0 }
 0x28e   : > { %v5860_v12 = vadd.f32 %v16279_v48, %v5821_v55  ;;  %v5819_v41 = vmul.f32 %v16250_v19, %v5780_v31  ;;  %v5783_v35 = vadd.f32 %v13069_v6, %v5286_v7  ;;  %v16322_v7 = vadd.f32 %v16165_v57, %v16154_v15 }
 0x28f   : > { %v5656_v40 = vpop.f32.mrf.mxu0  ;;  %v16326_v55 = vadd.f32 %v16175_v61, %v16163_v26  ;;  %v16338_v57 = vadd.f32 %v13048_v2, %v16202_v0  ;;  %v16341_v26 = vadd.f32 %v5268_v52, %v16214_v38 }
 0x290   : > { %v5892_v60 = vmax.f32 %v5860_v12, 0.0  ;;  %v5858_v51 = vadd.f32 %v16279_v48, %v5819_v41  ;;  %v5822_v58 = vmul.f32 %v16250_v19, %v5783_v35  ;;  %v5781_v53 = vadd.f32 %v5656_v40, %v5284_v24 }
 0x291   : > { %v13072_v17 = vpop.f32.mrf.mxu0 }
 0x292   : > { %v12203_v31 = vpack.c.bf16 %v5892_v60, %v5892_v60  ;;  %v5890_v27 = vmax.f32 %v5858_v51, 0.0  ;;  %v5861_v24 = vadd.f32 %v16279_v48, %v5822_v58  ;;  %v5820_v15 = vmul.f32 %v16250_v19, %v5781_v53 }
 0x293   : > { %v5786_v61 = vadd.f32 %v13072_v17, %v5289_v3  ;;  %v5669_v22 = vpop.f32.mrf.mxu0 }
 0x294   : > { %v6036_v4 = vshrl.u32 %v12203_v31, 16  ;;  %v12201_v28 = vpack.c.bf16 %v5890_v27, %v5890_v27  ;;  %v5893_v18 = vmax.f32 %v5861_v24, 0.0  ;;  %v6039_v11 = vshll.u32 %v12203_v31, 16 }
 0x295   : > { %v5859_v6 = vadd.f32 %v16279_v48, %v5820_v15  ;;  %v5825_v0 = vmul.f32 %v16250_v19, %v5786_v61  ;;  %v5784_v38 = vadd.f32 %v5669_v22, %v16232_v5  ;;  %v13073_v2 = vpop.f32.mrf.mxu0  ;;  %v6348_v15 = vld [vmem:[#allocation2 + $0x20] sm:$0x1] }
 0x296   : > { %v6038_v52 = vrot.slane %v6036_v4, 7  ;;  %v6019_v20 = vshrl.u32 %v12201_v28, 16  ;;  %v6022_v59 = vshll.u32 %v12201_v28, 16  ;;  %v12204_v3 = vpack.c.bf16 %v5893_v18, %v5893_v18  ;;  %v13867_v18 = vld [vmem:[#allocation2 + $0xc] sm:$0xf] }
 0x297   : > { %v5891_v12 = vmax.f32 %v5859_v6, 0.0  ;;  %v5864_v41 = vadd.f32 %v16279_v48, %v5825_v0  ;;  %v5823_v35 = vmul.f32 %v16250_v19, %v5784_v38  ;;  %v5787_v37 = vadd.f32 %v13073_v2, %v16237_v21  ;;  %v5672_v50 = vpop.f32.mrf.mxu0 }
 0x298   : > { %v6041_v8 = vor.u32 %v6039_v11, %v6038_v52  ;;  %v6042_v16 = vrot.slane %v6038_v52, 4  ;;  %v6021_v46 = vrot.slane %v6019_v20, 7  ;;  %v6044_v5 = vshrl.u32 %v12204_v3, 16 }
 0x299   : > { %v6047_v40 = vshll.u32 %v12204_v3, 16  ;;  %v12202_v60 = vpack.c.bf16 %v5891_v12, %v5891_v12  ;;  %v5896_v51 = vmax.f32 %v5864_v41, 0.0  ;;  %v5862_v58 = vadd.f32 %v16279_v48, %v5823_v35  ;;  %v13076_v53 = vpop.f32.mrf.mxu0 }
 0x29a   : > { %v6345_v17 = vsel %vm14306_vm10, %v6041_v8, %v6344_v62  ;;  %v6024_v31 = vor.u32 %v6022_v59, %v6021_v46  ;;  %v6025_v27 = vrot.slane %v6021_v46, 4  ;;  %v6046_v24 = vrot.slane %v6044_v5, 7  ;;  %v6341_v8 = vld [vmem:[#allocation2 + $0x14] sm:$0x1] }
 0x29b   : > { %6346 = vst [vmem:[#allocation2 + $0x18] sm:$0xf] %v6345_v17  ;;  %v6027_v21 = vshrl.u32 %v12202_v60, 16  ;;  %v6030_v61 = vshll.u32 %v12202_v60, 16  ;;  %v12207_v22 = vpack.c.bf16 %v5896_v51, %v5896_v51  ;;  %v5894_v4 = vmax.f32 %v5862_v58, 0.0  ;;  %v5685_v28 = vpop.f32.mrf.mxu0 }
 0x29c   : > { %v6338_v11 = vsel %vm14306_vm10, %v6024_v31, %v13867_v18  ;;  %v6049_v6 = vor.u32 %v6047_v40, %v6046_v24  ;;  %v6051_v0 = vrot.slane %v6046_v24, 4  ;;  %v5826_v38 = vmul.f32 %v16250_v19, %v5787_v37  ;;  %v6358_v17 = vld [vmem:[#allocation2 + $0x30] sm:$0xf] }
 0x29d   : > { %6339 = vst [vmem:[#allocation2 + $0xc] sm:$0xf] %v6338_v11  ;;  %v6029_v2 = vrot.slane %v6027_v21, 7  ;;  %v6070_v52 = vshrl.u32 %v12207_v22, 16  ;;  %v6073_v20 = vshll.u32 %v12207_v22, 16  ;;  %v12205_v59 = vpack.c.bf16 %v5894_v4, %v5894_v4  ;;  %v13077_v3 = vpop.f32.mrf.mxu0 }
 0x29e   : > { %v6050_v12 = vsel %vm14300_vm9, %v6042_v16, %v6049_v6  ;;  %v6349_v35 = vsel %vm14257_vm3, %v6051_v0, %v6348_v15  ;;  %v5865_v46 = vadd.f32 %v16279_v48, %v5826_v38  ;;  %v5785_v5 = vadd.f32 %v5672_v50, %v16240_v29 }
 0x29f   : > { %6347 = vst [vmem:[#allocation2 + $0x1c] sm:$0xf] %v6050_v12  ;;  %6350 = vst [vmem:[#allocation2 + $0x20] sm:$0x1] %v6349_v35  ;;  %v6032_v37 = vor.u32 %v6030_v61, %v6029_v2  ;;  %v6034_v40 = vrot.slane %v6029_v2, 4  ;;  %v6072_v60 = vrot.slane %v6070_v52, 7  ;;  %v5688_v58 = vpop.f32.mrf.mxu0  ;;  %v5790_v21 = vadd.f32 %v13076_v53, %v16244_v30 }
 0x2a0   : > { %v6053_v51 = vshrl.u32 %v12205_v59, 16  ;;  %v6056_v31 = vshll.u32 %v12205_v59, 16  ;;  %v5897_v24 = vmax.f32 %v5865_v46, 0.0  ;;  %v5824_v16 = vmul.f32 %v16250_v19, %v5785_v5  ;;  %v6351_v53 = vld [vmem:[#allocation2 + $0x24] sm:$0xf] }
 0x2a1   : > { %v6033_v15 = vsel %vm14300_vm9, %v6025_v27, %v6032_v37  ;;  %v6342_v29 = vsel %vm14257_vm3, %v6034_v40, %v6341_v8  ;;  %v6075_v50 = vor.u32 %v6073_v20, %v6072_v60  ;;  %v6076_v22 = vrot.slane %v6072_v60, 4  ;;  %v13080_v61 = vpop.f32.mrf.mxu0 }
 0x2a2   : > { %6340 = vst [vmem:[#allocation2 + $0x10] sm:$0xf] %v6033_v15  ;;  %6343 = vst [vmem:[#allocation2 + $0x14] sm:$0x1] %v6342_v29  ;;  %v16375_v4 = vrot.slane %v6053_v51, 7  ;;  %v12208_v18 = vpack.c.bf16 %v5897_v24, %v5897_v24  ;;  %v5863_v11 = vadd.f32 %v16279_v48, %v5824_v16  ;;  %v5829_v6 = vmul.f32 %v16250_v19, %v5790_v21 }
 0x2a3   : > { %v6359_v30 = vsel %vm14306_vm10, %v6075_v50, %v6358_v17  ;;  %v5788_v27 = vadd.f32 %v5685_v28, %v16254_v49  ;;  %v5791_v0 = vadd.f32 %v13077_v3, %v16258_v36  ;;  %v5789_v38 = vadd.f32 %v5688_v58, %v16261_v43  ;;  %v5701_v12 = vpop.f32.mrf.mxu0  ;;  %v6362_v43 = vld [vmem:[#allocation2 + $0x38] sm:$0x1] }
 0x2a4   : > { %6360 = vst [vmem:[#allocation2 + $0x30] sm:$0xf] %v6359_v30  ;;  %v6058_v2 = vor.u32 %v6056_v31, %v16375_v4  ;;  %v6059_v52 = vrot.slane %v16375_v4, 4  ;;  %v6078_v20 = vshrl.u32 %v12208_v18, 16  ;;  %v6081_v59 = vshll.u32 %v12208_v18, 16 }
 0x2a5   : > { %v5895_v35 = vmax.f32 %v5863_v11, 0.0  ;;  %v5868_v8 = vadd.f32 %v16279_v48, %v5829_v6  ;;  %v5827_v46 = vmul.f32 %v16250_v19, %v5788_v27  ;;  %v5830_v5 = vmul.f32 %v16250_v19, %v5791_v0  ;;  %v13081_v16 = vpop.f32.mrf.mxu0  ;;  %v6355_v27 = vld [vmem:[#allocation2 + $0x2c] sm:$0x1] }
 0x2a6   : > { %v6352_v49 = vsel %vm14306_vm10, %v6058_v2, %v6351_v53  ;;  %v6080_v36 = vrot.slane %v6078_v20, 7  ;;  %v5828_v28 = vmul.f32 %v16250_v19, %v5789_v38  ;;  %v5794_v3 = vadd.f32 %v13080_v61, %v16265_v44 }
 0x2a7   : > { %6353 = vst [vmem:[#allocation2 + $0x24] sm:$0xf] %v6352_v49  ;;  %v12206_v37 = vpack.c.bf16 %v5895_v35, %v5895_v35  ;;  %v5900_v40 = vmax.f32 %v5868_v8, 0.0  ;;  %v5866_v60 = vadd.f32 %v16279_v48, %v5827_v46  ;;  %v5869_v51 = vadd.f32 %v16279_v48, %v5830_v5  ;;  %v6372_v5 = vld [vmem:[#allocation2 + $0x48] sm:$0xf] }
 0x2a8   : > { %v6083_v58 = vor.u32 %v6081_v59, %v6080_v36  ;;  %v6085_v17 = vrot.slane %v6080_v36, 4  ;;  %v5867_v31 = vadd.f32 %v16279_v48, %v5828_v28  ;;  %v5833_v24 = vmul.f32 %v16250_v19, %v5794_v3  ;;  %v5704_v59 = vpop.f32.mrf.mxu0 }
 0x2a9   : > { %v6061_v21 = vshrl.u32 %v12206_v37, 16  ;;  %v6064_v15 = vshll.u32 %v12206_v37, 16  ;;  %v12211_v29 = vpack.c.bf16 %v5900_v40, %v5900_v40  ;;  %v5898_v50 = vmax.f32 %v5866_v60, 0.0 }
 0x2aa   : > { %v6084_v44 = vsel %vm14300_vm9, %v6076_v22, %v6083_v58  ;;  %v6363_v61 = vsel %vm14257_vm3, %v6085_v17, %v6362_v43  ;;  %v5901_v4 = vmax.f32 %v5869_v51, 0.0  ;;  %v5899_v18 = vmax.f32 %v5867_v31, 0.0  ;;  %v13084_v17 = vpop.f32.mrf.mxu0 }
 0x2ab   : > { %6361 = vst [vmem:[#allocation2 + $0x34] sm:$0xf] %v6084_v44  ;;  %6364 = vst [vmem:[#allocation2 + $0x38] sm:$0x1] %v6363_v61  ;;  %v6063_v11 = vrot.slane %v6061_v21, 7  ;;  %v6104_v6 = vshrl.u32 %v12211_v29, 16  ;;  %v12209_v53 = vpack.c.bf16 %v5898_v50, %v5898_v50  ;;  %v5872_v2 = vadd.f32 %v16279_v48, %v5833_v24 }
 0x2ac   : > { %v6107_v30 = vshll.u32 %v12211_v29, 16  ;;  %v12212_v0 = vpack.c.bf16 %v5901_v4, %v5901_v4  ;;  %v12210_v38 = vpack.c.bf16 %v5899_v18, %v5899_v18  ;;  %v5792_v20 = vadd.f32 %v5701_v12, %v16269_v56  ;;  %v6365_v24 = vld [vmem:[#allocation2 + $0x3c] sm:$0xf]  ;;  %v6376_v21 = vld [vmem:[#allocation2 + $0x50] sm:$0x1] }
 0x2ad   : > { %v6066_v22 = vor.u32 %v6064_v15, %v6063_v11  ;;  %v6068_v35 = vrot.slane %v6063_v11, 4  ;;  %v6106_v8 = vrot.slane %v6104_v6, 7  ;;  %v6087_v46 = vshrl.u32 %v12209_v53, 16  ;;  %v6369_v18 = vld [vmem:[#allocation2 + $0x44] sm:$0x1] }
 0x2ae   : > { %v6090_v49 = vshll.u32 %v12209_v53, 16  ;;  %v6112_v36 = vshrl.u32 %v12212_v0, 16  ;;  %v6115_v43 = vshll.u32 %v12212_v0, 16  ;;  %v6095_v28 = vshrl.u32 %v12210_v38, 16 }
 0x2af   : > { %v6067_v3 = vsel %vm14300_vm9, %v6059_v52, %v6066_v22  ;;  %v6356_v37 = vsel %vm14257_vm3, %v6068_v35, %v6355_v27  ;;  %v6109_v40 = vor.u32 %v6107_v30, %v6106_v8  ;;  %v6110_v60 = vrot.slane %v6106_v8, 4 }
 0x2b0   : > { %6354 = vst [vmem:[#allocation2 + $0x28] sm:$0xf] %v6067_v3  ;;  %6357 = vst [vmem:[#allocation2 + $0x2c] sm:$0x1] %v6356_v37  ;;  %v6089_v56 = vrot.slane %v6087_v46, 7  ;;  %v6114_v12 = vrot.slane %v6112_v36, 7  ;;  %v5831_v52 = vmul.f32 %v16250_v19, %v5792_v20  ;;  %v5795_v29 = vadd.f32 %v13081_v16, %v16273_v34 }
 0x2b1   : > { %v6097_v51 = vrot.slane %v6095_v28, 7  ;;  %v6098_v58 = vshll.u32 %v12210_v38, 16  ;;  %v6373_v31 = vsel %vm14306_vm10, %v6109_v40, %v6372_v5  ;;  %v5904_v15 = vmax.f32 %v5872_v2, 0.0  ;;  %v5717_v38 = vpop.f32.mrf.mxu0  ;;  %v6451_v2 = vld [vmem:[#allocation2 + $0xc] sm:$0xf] }
 0x2b2   : > { %6374 = vst [vmem:[#allocation2 + $0x48] sm:$0xf] %v6373_v31  ;;  %v6092_v50 = vor.u32 %v6090_v49, %v6089_v56  ;;  %v6093_v44 = vrot.slane %v6089_v56, 4  ;;  %v6117_v61 = vor.u32 %v6115_v43, %v6114_v12  ;;  %v6119_v4 = vrot.slane %v6114_v12, 4  ;;  %v6386_v40 = vld [vmem:[#allocation2 + $0x60] sm:$0xf] }
 0x2b3   : > { %v6100_v11 = vor.u32 %v6098_v58, %v6097_v51  ;;  %v6102_v6 = vrot.slane %v6097_v51, 4  ;;  %v12215_v30 = vpack.c.bf16 %v5904_v15, %v5904_v15  ;;  %v5870_v53 = vadd.f32 %v16279_v48, %v5831_v52  ;;  %v16431_v58 = vpop.f32.mrf.mxu0  ;;  %v16439_v15 = vld [vmem:[#allocation2 + $0x10] sm:$0xf] }
 0x2b4   : > { %v6366_v27 = vsel %vm14306_vm10, %v6092_v50, %v6365_v24  ;;  %v6118_v0 = vsel %vm14300_vm9, %v6110_v60, %v6117_v61  ;;  %v6377_v34 = vsel %vm14257_vm3, %v6119_v4, %v6376_v21  ;;  %v5834_v16 = vmul.f32 %v16250_v19, %v5795_v29 }
 0x2b5   : > { %6367 = vst [vmem:[#allocation2 + $0x3c] sm:$0xf] %v6366_v27  ;;  %6375 = vst [vmem:[#allocation2 + $0x4c] sm:$0xf] %v6118_v0  ;;  %v6101_v20 = vsel %vm14300_vm9, %v6093_v44, %v6100_v11  ;;  %v6370_v22 = vsel %vm14257_vm3, %v6102_v6, %v6369_v18  ;;  %v6138_v35 = vshrl.u32 %v12215_v30, 16  ;;  %v6141_v8 = vshll.u32 %v12215_v30, 16  ;;  %v5720_v30 = vpop.f32.mrf.mxu0 }
 0x2b6   : > { %6378 = vst [vmem:[#allocation2 + $0x50] sm:$0x1] %v6377_v34  ;;  %6368 = vst [vmem:[#allocation2 + $0x40] sm:$0xf] %v6101_v20  ;;  %v5902_v46 = vmax.f32 %v5870_v53, 0.0  ;;  %v5873_v5 = vadd.f32 %v16279_v48, %v5834_v16  ;;  %v5793_v49 = vadd.f32 %v5704_v59, %v16282_v25  ;;  %v5798_v36 = vadd.f32 %v13084_v17, %v16286_v10 }
 0x2b7   : > { %6371 = vst [vmem:[#allocation2 + $0x44] sm:$0x1] %v6370_v22  ;;  %v16426_v43 = vrot.slane %v6138_v35, 7  ;;  %v5796_v28 = vadd.f32 %v5717_v38, %v16291_v13  ;;  %v6538_v3 = vshrl.u32 %v6451_v2, 16  ;;  %v6541_v37 = vshll.u32 %v6451_v2, 16  ;;  %v13756_v38 = vld [vmem:[#allocation8 + $0xf0] sm:$0xff]  }
 0x2b8   : > { %v12213_v60 = vpack.c.bf16 %v5902_v46, %v5902_v46  ;;  %v5905_v56 = vmax.f32 %v5873_v5, 0.0  ;;  %v5832_v12 = vmul.f32 %v16250_v19, %v5793_v49  ;;  %v5837_v51 = vmul.f32 %v16250_v19, %v5798_v36  ;;  %v6453_v6 = vld [vmem:[#allocation2 + $0x18] sm:$0xf]  ;;  %v6379_v53 = vld [vmem:[#allocation2 + $0x54] sm:$0xf] }
 0x2b9   : > { %v6143_v31 = vor.u32 %v6141_v8, %v16426_v43  ;;  %v6144_v25 = vrot.slane %v16426_v43, 4  ;;  %v5835_v10 = vmul.f32 %v16250_v19, %v5796_v28  ;;  %v16436_v59 = vrot.slane %v6538_v3, 4  ;;  %v6390_v8 = vld [vmem:[#allocation2 + $0x68] sm:$0x1]  ;;  %v13758_v28 = vld [vmem:[#allocation8 + $0xe8] sm:$0xff]  }
 0x2ba   : > { %v6121_v13 = vshrl.u32 %v12213_v60, 16  ;;  %v6124_v17 = vshll.u32 %v12213_v60, 16  ;;  %v12216_v24 = vpack.c.bf16 %v5905_v56, %v5905_v56  ;;  %v5871_v21 = vadd.f32 %v16279_v48, %v5832_v12  ;;  %v13088_v60 = vpop.f32.mrf.mxu0  ;;  %v6383_v12 = vld [vmem:[#allocation2 + $0x5c] sm:$0x1] }
 0x2bb   : > { %v6387_v52 = vsel %vm14306_vm10, %v6143_v31, %v6386_v40  ;;  %v5876_v29 = vadd.f32 %v16279_v48, %v5837_v51  ;;  %v5874_v50 = vadd.f32 %v16279_v48, %v5835_v10  ;;  %v16445_v44 = vrot.slane %v6541_v37, 5 }
 0x2bc   : > { %6388 = vst [vmem:[#allocation2 + $0x60] sm:$0xf] %v6387_v52  ;;  %v16447_v61 = vrot.slane %v6121_v13, 7  ;;  %v6146_v4 = vshrl.u32 %v12216_v24, 16  ;;  %v6149_v18 = vshll.u32 %v12216_v24, 16  ;;  %v5903_v11 = vmax.f32 %v5871_v21, 0.0 }
 0x2bd   : > { %v5908_v27 = vmax.f32 %v5876_v29, 0.0  ;;  %v5906_v0 = vmax.f32 %v5874_v50, 0.0  ;;  %v6551_v34 = vshrl.u32 %v16439_v15, 16  ;;  %v11922_v16 = vcombine.low %v6451_v2, %v16439_v15  ;;  %v16456_v13 = vld [vmem:[#allocation2 + $0x1c] sm:$0xf] }
 0x2be   : > { %v6126_v20 = vor.u32 %v6124_v17, %v16447_v61  ;;  %v6127_v22 = vrot.slane %v16447_v61, 4  ;;  %v6148_v35 = vrot.slane %v6146_v4, 7  ;;  %v12214_v46 = vpack.c.bf16 %v5903_v11, %v5903_v11  ;;  %v6400_v52 = vld [vmem:[#allocation2 + $0x78] sm:$0xf]  ;;  %v6393_v50 = vld [vmem:[#allocation2 + $0x6c] sm:$0xf] }
 0x2bf   : > { %v12219_v5 = vpack.c.bf16 %v5908_v27, %v5908_v27  ;;  %v12217_v49 = vpack.c.bf16 %v5906_v0, %v5906_v0  ;;  %13163 = vmatmul.mubr.bf16.vlgmr.msra.gmra.mxu0 %v11922_v16  ;;  %v6562_v36 = vshrl.u32 %v6453_v6, 16  ;;  %v6565_v43 = vshll.u32 %v6453_v6, 16  ;;  %v13761_v11 = vld [vmem:[#allocation8 + $0xe0] sm:$0xff]   ;;  %v5733_v16 = vpop.f32.mrf.mxu0 }
 0x2c0   : > { %v6380_v3 = vsel %vm14306_vm10, %v6126_v20, %v6379_v53  ;;  %v6151_v37 = vor.u32 %v6149_v18, %v6148_v35  ;;  %v6153_v40 = vrot.slane %v6148_v35, 4  ;;  %v6129_v2 = vshrl.u32 %v12214_v46, 16  ;;  %13243 = vmatpush3.bf16.msra.mxu0 %v16348_v45  ;;  %v6455_v20 = vld [vmem:[#allocation2 + $0x24] sm:$0xf] }
 0x2c1   : > { %6381 = vst [vmem:[#allocation2 + $0x54] sm:$0xf] %v6380_v3  ;;  %v6132_v56 = vshll.u32 %v12214_v46, 16  ;;  %v6172_v51 = vshrl.u32 %v12219_v5, 16  ;;  %v6175_v31 = vshll.u32 %v12219_v5, 16  ;;  %v6155_v10 = vshrl.u32 %v12217_v49, 16  ;;  %13244 = vmatprep.subr.bf16.mxu0 %v13756_v38 }
 0x2c2   : > { %v6152_v17 = vsel %vm14300_vm9, %v6144_v25, %v6151_v37  ;;  %v6391_v24 = vsel %vm14257_vm3, %v6153_v40, %v6390_v8  ;;  %v6131_v21 = vrot.slane %v6129_v2, 7  ;;  %v6158_v29 = vshll.u32 %v12217_v49, 16  ;;  %v16476_v49 = vld [vmem:[#allocation2 + $0x28] sm:$0xf] }
 0x2c3   : > { %6389 = vst [vmem:[#allocation2 + $0x64] sm:$0xf] %v6152_v17  ;;  %6392 = vst [vmem:[#allocation2 + $0x68] sm:$0x1] %v6391_v24  ;;  %v16462_v45 = vrot.slane %v6172_v51, 7  ;;  %v16464_v61 = vrot.slane %v6155_v10, 7  ;;  %v11923_v0 = vcombine.low %v6453_v6, %v16456_v13  ;;  %v5802_v40 = vadd.f32 %v13088_v60, %v16303_v54 }
 0x2c4   : > { %v16466_v4 = vrot.slane %v6562_v36, 4  ;;  %v16468_v18 = vrot.slane %v6565_v43, 5  ;;  %v6134_v53 = vor.u32 %v6132_v56, %v6131_v21  ;;  %v6136_v25 = vrot.slane %v6131_v21, 4  ;;  %13245 = vmatpush3.bf16.msra.mxu0 %v13756_v38  ;;  %v6498_v54 = vld [vmem:[#allocation2 + $0x14] sm:$0x1] }
 0x2c5   : > { %v6575_v27 = vshrl.u32 %v16456_v13, 16  ;;  %v6177_v35 = vor.u32 %v6175_v31, %v16462_v45  ;;  %v6178_v8 = vrot.slane %v16462_v45, 4  ;;  %v6160_v46 = vor.u32 %v6158_v29, %v16464_v61  ;;  %13246 = vmatprep.subr.bf16.mxu0 %v13758_v28  ;;  %13166 = vmatprep.mubr.bf16.mxu0 %v11923_v0  ;;  %v16508_v29 = vld [vmem:[#allocation2 + $0x30] sm:$0xf] }
 0x2c6   : > { %v6161_v5 = vrot.slane %v16464_v61, 4  ;;  %v6135_v36 = vsel %vm14300_vm9, %v6127_v22, %v6134_v53  ;;  %v6384_v6 = vsel %vm14257_vm3, %v6136_v25, %v6383_v12  ;;  %v5799_v38 = vadd.f32 %v16431_v58, %v16295_v33 }
 0x2c7   : > { %v5797_v43 = vadd.f32 %v5720_v30, %v16298_v14  ;;  %6382 = vst [vmem:[#allocation2 + $0x58] sm:$0xf] %v6135_v36  ;;  %6385 = vst [vmem:[#allocation2 + $0x5c] sm:$0x1] %v6384_v6  ;;  %v6401_v3 = vsel %vm14306_vm10, %v6177_v35, %v6400_v52  ;;  %v6394_v37 = vsel %vm14306_vm10, %v6160_v46, %v6393_v50  ;;  %v6586_v58 = vshrl.u32 %v6455_v20, 16  ;;  %v16510_v50 = vpop.f32.mrf.mxu0 }
 0x2c8   : > { %v5800_v22 = vadd.f32 %v5733_v16, %v16309_v42  ;;  %6402 = vst [vmem:[#allocation2 + $0x78] sm:$0xf] %v6401_v3  ;;  %6395 = vst [vmem:[#allocation2 + $0x6c] sm:$0xf] %v6394_v37  ;;  %v5838_v2 = vmul.f32 %v16250_v19, %v5799_v38  ;;  %v6589_v14 = vshll.u32 %v6455_v20, 16  ;;  %13247 = vmatpush3.bf16.msra.mxu0 %v13758_v28  ;;  %v6599_v12 = vshrl.u32 %v16476_v49, 16 }
 0x2c9   : > { %v5836_v33 = vmul.f32 %v16250_v19, %v5797_v43  ;;  %v5841_v30 = vmul.f32 %v16250_v19, %v5802_v40  ;;  %v11924_v51 = vcombine.low %v6455_v20, %v16476_v49  ;;  %13248 = vmatprep.subr.bf16.mxu0 %v13761_v11  ;;  %v13763_v42 = vld [vmem:[#allocation8 + $0xd8] sm:$0xff]   ;;  %v16499_v10 = vrot.slane %v6586_v58, 4  ;;  %v16524_v40 = vpop.f32.mrf.mxu0 }
 0x2ca   : > { %v5839_v56 = vmul.f32 %v16250_v19, %v5800_v22  ;;  %v5877_v60 = vadd.f32 %v16279_v48, %v5838_v2  ;;  %v16501_v17 = vrot.slane %v6589_v14, 5  ;;  %v6544_v21 = vor.u32 %v16445_v44, %v16436_v59  ;;  %v13766_v59 = vld [vmem:[#allocation8 + $0xd0] sm:$0xff]   ;;  %v13768_v22 = vld [vmem:[#allocation8 + $0xc8] sm:$0xff]  }
 0x2cb   : > { %v5875_v31 = vadd.f32 %v16279_v48, %v5836_v33  ;;  %v5880_v28 = vadd.f32 %v16279_v48, %v5841_v30  ;;  %13167 = vmatmul.mubr.bf16.gmra.mxu0 %v11924_v51  ;;  %v6547_v52 = vshll.u32 %v16439_v15, 16  ;;  %v6553_v0 = vrot.slane %v6551_v34, 4  ;;  %v16526_v30 = vld [vmem:[#allocation2 + $0x34] sm:$0xf] }
 0x2cc   : > { %v5878_v24 = vadd.f32 %v16279_v48, %v5839_v56  ;;  %v5909_v53 = vmax.f32 %v5877_v60, 0.0  ;;  %v6557_v16 = vshll.u32 %v6498_v54, 16  ;;  %13249 = vmatpush3.bf16.msra.mxu0 %v13761_v11  ;;  %v16514_v46 = vrot.slane %v6544_v21, 4  ;;  %v6404_v56 = vld [vmem:[#allocation2 + $0x80] sm:$0x1] }
 0x2cd   : > { %v5907_v25 = vmax.f32 %v5875_v31, 0.0  ;;  %v5912_v20 = vmax.f32 %v5880_v28, 0.0  ;;  %v16516_v36 = vrot.slane %v6547_v52, 5  ;;  %13250 = vmatprep.subr.bf16.mxu0 %v13763_v42  ;;  %v6610_v43 = vshrl.u32 %v16508_v29, 16  ;;  %v6397_v21 = vld [vmem:[#allocation2 + $0x74] sm:$0x1] }
 0x2ce   : > { %v5910_v35 = vmax.f32 %v5878_v24, 0.0  ;;  %v12220_v44 = vpack.c.bf16 %v5909_v53, %v5909_v53  ;;  %v6559_v38 = vrot.slane %v6557_v16, 5  ;;  %v6613_v16 = vshll.u32 %v16508_v29, 16 }
 0x2cf   : > { %v12218_v6 = vpack.c.bf16 %v5907_v25, %v5907_v25  ;;  %v12223_v3 = vpack.c.bf16 %v5912_v20, %v5912_v20  ;;  %v6550_v34 = vsel %vm14318_vm11, %v16514_v46, %v16516_v36  ;;  %v6554_v11 = vor.u32 %v6553_v0, %v16516_v36  ;;  %v13092_v20 = vpop.f32.mrf.mxu0 }
 0x2d0   : > { %v12221_v37 = vpack.c.bf16 %v5910_v35, %v5910_v35  ;;  %v6180_v2 = vshrl.u32 %v12220_v44, 16  ;;  %v6183_v33 = vshll.u32 %v12220_v44, 16  ;;  %13251 = vmatpush3.bf16.msra.mxu0 %v13763_v42  ;;  %v16528_v53 = vrot.slane %v6610_v43, 4 }
 0x2d1   : > { %v6163_v58 = vshrl.u32 %v12218_v6, 16  ;;  %v6166_v14 = vshll.u32 %v12218_v6, 16  ;;  %v6206_v51 = vshrl.u32 %v12223_v3, 16  ;;  %v6209_v54 = vshll.u32 %v12223_v3, 16  ;;  %13252 = vmatprep.subr.bf16.mxu0 %v13766_v59  ;;  %v6414_v6 = vld [vmem:[#allocation2 + $0x90] sm:$0xf] }
 0x2d2   : > { %v6189_v60 = vshrl.u32 %v12221_v37, 16  ;;  %v6192_v31 = vshll.u32 %v12221_v37, 16  ;;  %v6182_v28 = vrot.slane %v6180_v2, 7  ;;  %v6555_v52 = vrot.slane %v6554_v11, 4  ;;  %v6407_v3 = vld [vmem:[#allocation2 + $0x84] sm:$0xf] }
 0x2d3   : > { %v6165_v24 = vrot.slane %v6163_v58, 7  ;;  %v16530_v25 = vrot.slane %v6206_v51, 7  ;;  %v6623_v42 = vshrl.u32 %v16526_v30, 16  ;;  %v13771_v58 = vld [vmem:[#allocation8 + $0xc0] sm:$0xff]  }
 0x2d4   : > { %v16532_v0 = vrot.slane %v6189_v60, 7  ;;  %v6185_v35 = vor.u32 %v6183_v33, %v6182_v28  ;;  %v6187_v46 = vrot.slane %v6182_v28, 4  ;;  %13253 = vmatpush3.bf16.msra.mxu0 %v13766_v59  ;;  %v6560_v61 = vsel %vm14318_vm11, %v6555_v52, %v6559_v38 }
 0x2d5   : > { %v6168_v36 = vor.u32 %v6166_v14, %v6165_v24  ;;  %v6170_v44 = vrot.slane %v6165_v24, 4  ;;  %v6211_v37 = vor.u32 %v6209_v54, %v16530_v25  ;;  %v6212_v43 = vrot.slane %v16530_v25, 4  ;;  %13254 = vmatprep.subr.bf16.mxu0 %v13768_v22  ;;  %v6499_v54 = vld [vmem:[#allocation2 + $0x20] sm:$0x1] }
 0x2d6   : > { %v6194_v11 = vor.u32 %v6192_v31, %v16532_v0  ;;  %v6195_v2 = vrot.slane %v16532_v0, 4  ;;  %v6186_v33 = vsel %vm14300_vm9, %v6178_v8, %v6185_v35  ;;  %v6405_v14 = vsel %vm14257_vm3, %v6187_v46, %v6404_v56  ;;  %v13748_v35 = vld [vmem:[#allocation8 + $0xb0] sm:$0xff]  }
 0x2d7   : > { %v6169_v59 = vsel %vm14300_vm9, %v6161_v5, %v6168_v36  ;;  %v6398_v51 = vsel %vm14257_vm3, %v6170_v44, %v6397_v21  ;;  %6403 = vst [vmem:[#allocation2 + $0x7c] sm:$0xf] %v6186_v33  ;;  %6406 = vst [vmem:[#allocation2 + $0x80] sm:$0x1] %v6405_v14  ;;  %v6415_v45 = vsel %vm14306_vm10, %v6211_v37, %v6414_v6  ;;  %v16558_v56 = vrot.slane %v6613_v16, 5  ;;  %v5749_v5 = vpop.f32.mrf.mxu0 }
 0x2d8   : > { %6396 = vst [vmem:[#allocation2 + $0x70] sm:$0xf] %v6169_v59  ;;  %6399 = vst [vmem:[#allocation2 + $0x74] sm:$0x1] %v6398_v51  ;;  %v6408_v8 = vsel %vm14306_vm10, %v6194_v11, %v6407_v3  ;;  %v11898_v60 = vcombine.low %v6550_v34, %v6560_v61  ;;  %v11925_v31 = vcombine.low %v16508_v29, %v16526_v30  ;;  %v6459_v21 = vld [vmem:[#allocation2 + $0x3c] sm:$0xf]  ;;  %13255 = vmatpush3.bf16.msra.mxu0 %v13768_v22 }
 0x2d9   : > { %6416 = vst [vmem:[#allocation2 + $0x90] sm:$0xf] %v6415_v45  ;;  %6409 = vst [vmem:[#allocation2 + $0x84] sm:$0xf] %v6408_v8  ;;  %v5803_v28 = vadd.f32 %v16510_v50, %v16313_v32  ;;  %v6568_v24 = vor.u32 %v16468_v18, %v16466_v4  ;;  %v6571_v38 = vshll.u32 %v16456_v13, 16  ;;  %v6577_v52 = vrot.slane %v6575_v27, 4  ;;  %13256 = vmatprep.subr.bf16.mxu0 %v13771_v58 }
 0x2da   : > { %v6581_v16 = vshll.u32 %v6499_v54, 16  ;;  %v5801_v34 = vadd.f32 %v16524_v40, %v16316_v39  ;;  %v16571_v29 = vld [vmem:[#allocation8 + $0x178] sm:$0xff]   ;;  %13115 = vmatmul.mubr.bf16.vlgmr.msra.gmra.mxu1 %v11898_v60  ;;  %13170 = vmatprep.mubr.bf16.mxu0 %v11925_v31  ;;  %v5806_v18 = vadd.f32 %v13092_v20, %v16322_v7  ;;  %v5804_v50 = vadd.f32 %v5749_v5, %v16326_v55  ;;  %v16580_v6 = vld [vmem:[#allocation2 + $0x40] sm:$0xf]  ;;  %v16596_v31 = vpop.f32.mrf.mxu0 }
 0x2db   : > { %v5842_v32 = vmul.f32 %v16250_v19, %v5803_v28  ;;  %v6569_v4 = vrot.slane %v6568_v24, 4  ;;  %v6573_v22 = vrot.slane %v6571_v38, 5  ;;  %v13868_v13 = vld [vmem:[#allocation8 + $0xb8] sm:$0xff]   ;;  %v6634_v36 = vshrl.u32 %v6459_v21, 16  ;;  %v13751_v7 = vld [vmem:[#allocation8 + $0xa8] sm:$0xff]   ;;  %v13755_v28 = vld [vmem:[#allocation8 + $0xa0] sm:$0xff]  }
 0x2dc   : > { %v6583_v46 = vrot.slane %v6581_v16, 5  ;;  %13195 = vmatpush3.bf16.msra.mxu1 %v13868_v13  ;;  %v5840_v27 = vmul.f32 %v16250_v19, %v5801_v34  ;;  %v5845_v40 = vmul.f32 %v16250_v19, %v5806_v18  ;;  %v5843_v44 = vmul.f32 %v16250_v19, %v5804_v50  ;;  %13257 = vmatpush3.bf16.msra.mxu0 %v13771_v58  ;;  %v13760_v50 = vld [vmem:[#allocation8 + $0x98] sm:$0xff]  }
 0x2dd   : > { %v5881_v39 = vadd.f32 %v16279_v48, %v5842_v32  ;;  %v6637_v3 = vshll.u32 %v6459_v21, 16  ;;  %13196 = vmatprep.subr.bf16.mxu1 %v13748_v35  ;;  %v6574_v55 = vsel %vm14318_vm11, %v6569_v4, %v6573_v22  ;;  %v6578_v20 = vor.u32 %v6577_v52, %v6573_v22  ;;  %13338 = vmatprep.subr.bf16.mxu0 %v16571_v29  ;;  %v16603_v32 = vld [vmem:[#allocation2 + $0x2c] sm:$0x1] }
 0x2de   : > { %v5879_v37 = vadd.f32 %v16279_v48, %v5840_v27  ;;  %v16585_v11 = vrot.slane %v6634_v36, 4  ;;  %v5884_v14 = vadd.f32 %v16279_v48, %v5845_v40  ;;  %v5882_v19 = vadd.f32 %v16279_v48, %v5843_v44 }
 0x2df   : > { %v5913_v33 = vmax.f32 %v5881_v39, 0.0  ;;  %v16590_v59 = vrot.slane %v6637_v3, 5  ;;  %v6579_v51 = vrot.slane %v6578_v20, 4  ;;  %v6647_v58 = vshrl.u32 %v16580_v6, 16  ;;  %v6411_v20 = vld [vmem:[#allocation2 + $0x8c] sm:$0x1] }
 0x2e0   : > { %v5911_v54 = vmax.f32 %v5879_v37, 0.0  ;;  %v11926_v45 = vcombine.low %v6459_v21, %v16580_v6  ;;  %13197 = vmatpush3.bf16.msra.mxu1 %v13748_v35  ;;  %v5916_v61 = vmax.f32 %v5884_v14, 0.0  ;;  %v5914_v5 = vmax.f32 %v5882_v19, 0.0  ;;  %v6428_v19 = vld [vmem:[#allocation2 + $0xa8] sm:$0xf] }
 0x2e1   : > { %v12224_v8 = vpack.c.bf16 %v5913_v33, %v5913_v33  ;;  %v6592_v60 = vor.u32 %v16501_v17, %v16499_v10  ;;  %13198 = vmatprep.subr.bf16.mxu1 %v13751_v7  ;;  %v6584_v48 = vsel %vm14318_vm11, %v6579_v51, %v6583_v46  ;;  %v6595_v38 = vshll.u32 %v16476_v49, 16  ;;  %v16607_v49 = vpop.f32.mrf.mxu0 }
 0x2e2   : > { %v12222_v24 = vpack.c.bf16 %v5911_v54, %v5911_v54  ;;  %13171 = vmatmul.mubr.bf16.gmra.mxu0 %v11926_v45  ;;  %v6601_v21 = vrot.slane %v6599_v12, 4  ;;  %v11899_v16 = vcombine.low %v6574_v55, %v6584_v48  ;;  %v12227_v34 = vpack.c.bf16 %v5916_v61, %v5916_v61  ;;  %v6418_v12 = vld [vmem:[#allocation2 + $0x98] sm:$0x1]  ;;  %v6461_v45 = vld [vmem:[#allocation2 + $0x48] sm:$0xf] }
 0x2e3   : > { %v6214_v35 = vshrl.u32 %v12224_v8, 16  ;;  %v6217_v52 = vshll.u32 %v12224_v8, 16  ;;  %v12225_v4 = vpack.c.bf16 %v5914_v5, %v5914_v5  ;;  %v16605_v18 = vrot.slane %v6592_v60, 4  ;;  %v6421_v48 = vld [vmem:[#allocation2 + $0x9c] sm:$0xf] }
 0x2e4   : > { %v6197_v10 = vshrl.u32 %v12222_v24, 16  ;;  %v6200_v17 = vshll.u32 %v12222_v24, 16  ;;  %13199 = vmatpush3.bf16.msra.mxu1 %v13751_v7  ;;  %13118 = vmatprep.mubr.bf16.mxu1 %v11899_v16  ;;  %v6240_v46 = vshrl.u32 %v12227_v34, 16  ;;  %v6243_v13 = vshll.u32 %v12227_v34, 16  ;;  %v16625_v24 = vld [vmem:[#allocation2 + $0x4c] sm:$0xf] }
 0x2e5   : > { %v6216_v22 = vrot.slane %v6214_v35, 7  ;;  %v6597_v27 = vrot.slane %v6595_v38, 5  ;;  %13200 = vmatprep.subr.bf16.mxu1 %v13755_v28  ;;  %v6223_v39 = vshrl.u32 %v12225_v4, 16  ;;  %v6226_v40 = vshll.u32 %v12225_v4, 16  ;;  %v13096_v38 = vpop.f32.mrf.mxu0 }
 0x2e6   : > { %v6199_v36 = vrot.slane %v6197_v10, 7  ;;  %v6605_v44 = vshll.u32 %v16603_v32, 16  ;;  %v16610_v37 = vrot.slane %v6240_v46, 7  ;;  %v6658_v10 = vshrl.u32 %v6461_v45, 16 }
 0x2e7   : > { %v6219_v3 = vor.u32 %v6217_v52, %v6216_v22  ;;  %v6221_v55 = vrot.slane %v6216_v22, 4  ;;  %v6598_v7 = vsel %vm14318_vm11, %v16605_v18, %v6597_v27  ;;  %v16615_v51 = vrot.slane %v6223_v39, 7  ;;  %v16641_v18 = vld [vmem:[#allocation2 + $0x38] sm:$0x1] }
 0x2e8   : > { %v6202_v33 = vor.u32 %v6200_v17, %v6199_v36  ;;  %v6204_v14 = vrot.slane %v6199_v36, 4  ;;  %v6602_v54 = vor.u32 %v6601_v21, %v6597_v27  ;;  %13201 = vmatpush3.bf16.msra.mxu1 %v13755_v28  ;;  %v6245_v5 = vor.u32 %v6243_v13, %v16610_v37  ;;  %v13765_v21 = vld [vmem:[#allocation8 + $0x90] sm:$0xff]   ;;  %v6463_v36 = vld [vmem:[#allocation2 + $0x54] sm:$0xf] }
 0x2e9   : > { %v6220_v8 = vsel %vm14300_vm9, %v6212_v43, %v6219_v3  ;;  %v6419_v61 = vsel %vm14257_vm3, %v6221_v55, %v6418_v12  ;;  %v6246_v60 = vrot.slane %v16610_v37, 4  ;;  %13202 = vmatprep.subr.bf16.mxu1 %v13760_v50  ;;  %v6228_v28 = vor.u32 %v6226_v40, %v16615_v51  ;;  %v5765_v12 = vpop.f32.mrf.mxu0  ;;  %v13769_v3 = vld [vmem:[#allocation8 + $0x88] sm:$0xff]  }
 0x2ea   : > { %6417 = vst [vmem:[#allocation2 + $0x94] sm:$0xf] %v6220_v8  ;;  %6420 = vst [vmem:[#allocation2 + $0x98] sm:$0x1] %v6419_v61  ;;  %v6203_v25 = vsel %vm14300_vm9, %v6195_v2, %v6202_v33  ;;  %v6412_v43 = vsel %vm14257_vm3, %v6204_v14, %v6411_v20  ;;  %v6229_v35 = vrot.slane %v16615_v51, 4  ;;  %v6429_v52 = vsel %vm14306_vm10, %v6245_v5, %v6428_v19  ;;  %v13773_v61 = vld [vmem:[#allocation8 + $0x80] sm:$0xff]  }
 0x2eb   : > { %6410 = vst [vmem:[#allocation2 + $0x88] sm:$0xf] %v6203_v25  ;;  %6413 = vst [vmem:[#allocation2 + $0x8c] sm:$0x1] %v6412_v43  ;;  %v6603_v16 = vrot.slane %v6602_v54, 4  ;;  %v6607_v34 = vrot.slane %v6605_v44, 5  ;;  %v6422_v0 = vsel %vm14306_vm10, %v6228_v28, %v6421_v48  ;;  %v11927_v4 = vcombine.low %v6461_v45, %v16625_v24 }
 0x2ec   : > { %6430 = vst [vmem:[#allocation2 + $0xa8] sm:$0xf] %v6429_v52  ;;  %v6661_v2 = vshll.u32 %v6461_v45, 16  ;;  %v6671_v17 = vshrl.u32 %v16625_v24, 16  ;;  %13203 = vmatpush3.bf16.msra.mxu1 %v13760_v50  ;;  %6423 = vst [vmem:[#allocation2 + $0x9c] sm:$0xf] %v6422_v0  ;;  %v5807_v13 = vadd.f32 %v16596_v31, %v16330_v47  ;;  %v6616_v27 = vor.u32 %v16558_v56, %v16528_v53 }
 0x2ed   : > { %v6608_v22 = vsel %vm14318_vm11, %v6603_v16, %v6607_v34  ;;  %v16645_v46 = vrot.slane %v6658_v10, 4  ;;  %13204 = vmatprep.subr.bf16.mxu1 %v13765_v21  ;;  %13174 = vmatprep.mubr.bf16.mxu0 %v11927_v4  ;;  %v6619_v50 = vshll.u32 %v16526_v30, 16  ;;  %v6625_v44 = vrot.slane %v6623_v42, 4  ;;  %v16659_v47 = vld [vmem:[%s18937_s2] ss:$0 sm:$0xff] }
 0x2ee   : > { %v11900_v39 = vcombine.low %v6598_v7, %v6608_v22  ;;  %v16651_v40 = vrot.slane %v6661_v2, 5  ;;  %v5846_v53 = vmul.f32 %v16659_v47, %v5807_v13  ;;  %v6617_v56 = vrot.slane %v6616_v27, 4  ;;  %v16670_v33 = vld [vmem:[%s18938_s3] ss:$0 sm:$0xff]  ;;  %v16674_v45 = vld [vmem:[#allocation2 + $0x58] sm:$0xf] }
 0x2ef   : > { %v6629_v31 = vshll.u32 %v16641_v18, 16  ;;  %v5805_v55 = vadd.f32 %v16607_v49, %v16333_v63  ;;  %v6621_v20 = vrot.slane %v6619_v50, 5  ;;  %v5810_v7 = vadd.f32 %v13096_v38, %v16338_v57  ;;  %v16694_v27 = vld [vmem:[#allocation8 + $0x138] sm:$0xff]  }
 0x2f0   : > { %13119 = vmatmul.mubr.bf16.gmra.mxu1 %v11900_v39  ;;  %v5808_v30 = vadd.f32 %v5765_v12, %v16341_v26  ;;  %v6682_v42 = vshrl.u32 %v6463_v36, 16  ;;  %v5885_v14 = vadd.f32 %v16670_v33, %v5846_v53  ;;  %v6685_v63 = vshll.u32 %v6463_v36, 16 }
 0x2f1   : > { %v6631_v19 = vrot.slane %v6629_v31, 5  ;;  %v5844_v54 = vmul.f32 %v16659_v47, %v5805_v55  ;;  %13205 = vmatpush3.bf16.msra.mxu1 %v13765_v21  ;;  %v6622_v57 = vsel %vm14318_vm11, %v6617_v56, %v6621_v20  ;;  %v6626_v49 = vor.u32 %v6625_v44, %v6621_v20  ;;  %v16696_v55 = vld [vmem:[#allocation2 + $0x44] sm:$0x1] }
 0x2f2   : > { %v5849_v26 = vmul.f32 %v16659_v47, %v5810_v7  ;;  %v5847_v8 = vmul.f32 %v16659_v47, %v5808_v30  ;;  %13206 = vmatprep.subr.bf16.mxu1 %v13769_v3  ;;  %v5917_v5 = vmax.f32 %v5885_v14, 0.0  ;;  %v16681_v38 = vrot.slane %v6682_v42, 4  ;;  %v6432_v7 = vld [vmem:[#allocation2 + $0xb0] sm:$0x1] }
 0x2f3   : > { %v5883_v48 = vadd.f32 %v16670_v33, %v5844_v54  ;;  %v16683_v25 = vrot.slane %v6685_v63, 5  ;;  %v6627_v43 = vrot.slane %v6626_v49, 4  ;;  %v6695_v52 = vshrl.u32 %v16674_v45, 16  ;;  %v6425_v49 = vld [vmem:[#allocation2 + $0xa4] sm:$0x1] }
 0x2f4   : > { %v5888_v21 = vadd.f32 %v16670_v33, %v5849_v26  ;;  %v5886_v28 = vadd.f32 %v16670_v33, %v5847_v8  ;;  %v12228_v16 = vpack.c.bf16 %v5917_v5, %v5917_v5  ;;  %v11928_v10 = vcombine.low %v6463_v36, %v16674_v45  ;;  %v6442_v5 = vld [vmem:[#allocation2 + $0xc0] sm:$0xf] }
 0x2f5   : > { %v5915_v34 = vmax.f32 %v5883_v48, 0.0  ;;  %v6640_v0 = vor.u32 %v16590_v59, %v16585_v11  ;;  %13207 = vmatpush3.bf16.msra.mxu1 %v13769_v3  ;;  %v6632_v2 = vsel %vm14318_vm11, %v6627_v43, %v6631_v19  ;;  %v6643_v13 = vshll.u32 %v16580_v6, 16 }
 0x2f6   : > { %v5920_v4 = vmax.f32 %v5888_v21, 0.0  ;;  %v5918_v22 = vmax.f32 %v5886_v28, 0.0  ;;  %13208 = vmatprep.subr.bf16.mxu1 %v13773_v61  ;;  %v6248_v12 = vshrl.u32 %v12228_v16, 16  ;;  %v6251_v39 = vshll.u32 %v12228_v16, 16  ;;  %13175 = vmatmul.mubr.bf16.gmra.mxu0 %v11928_v10  ;;  %v6435_v16 = vld [vmem:[#allocation2 + $0xb4] sm:$0xf]  ;;  %v13097_v10 = vpop.f32.mrf.mxu0 }
 0x2f7   : > { %v11901_v50 = vcombine.low %v6622_v57, %v6632_v2  ;;  %v12226_v44 = vpack.c.bf16 %v5915_v34, %v5915_v34  ;;  %v6641_v56 = vrot.slane %v6640_v0, 4  ;;  %v6645_v11 = vrot.slane %v6643_v13, 5  ;;  %v6465_v34 = vld [vmem:[#allocation2 + $0x60] sm:$0xf] }
 0x2f8   : > { %v12231_v36 = vpack.c.bf16 %v5920_v4, %v5920_v4  ;;  %v12229_v53 = vpack.c.bf16 %v5918_v22, %v5918_v22  ;;  %v6250_v59 = vrot.slane %v6248_v12, 7  ;;  %v6649_v20 = vrot.slane %v6647_v58, 4  ;;  %v16718_v22 = vld [vmem:[#allocation2 + $0x64] sm:$0xf] }
 0x2f9   : > { %13122 = vmatprep.mubr.bf16.mxu1 %v11901_v50  ;;  %v6231_v3 = vshrl.u32 %v12226_v44, 16  ;;  %v6234_v31 = vshll.u32 %v12226_v44, 16  ;;  %13209 = vmatpush3.bf16.msra.mxu1 %v13773_v61  ;;  %v6646_v26 = vsel %vm14318_vm11, %v6641_v56, %v6645_v11  ;;  %v6653_v61 = vshll.u32 %v16696_v55, 16  ;;  %v16726_v50 = vld [vmem:[#allocation2 + $0x50] sm:$0x1] }
 0x2fa   : > { %v6274_v30 = vshrl.u32 %v12231_v36, 16  ;;  %v6277_v42 = vshll.u32 %v12231_v36, 16  ;;  %v6257_v14 = vshrl.u32 %v12229_v53, 16  ;;  %v6260_v19 = vshll.u32 %v12229_v53, 16  ;;  %13290 = vmatprep.subr.bf16.mxu1 %v16694_v27 }
 0x2fb   : > { %v6253_v54 = vor.u32 %v6251_v39, %v6250_v59  ;;  %v6255_v63 = vrot.slane %v6250_v59, 4  ;;  %v6233_v57 = vrot.slane %v6231_v3, 7  ;;  %v6650_v58 = vor.u32 %v6649_v20, %v6645_v11  ;;  %v5768_v3 = vpop.f32.mrf.mxu0 }
 0x2fc   : > { %v16703_v8 = vrot.slane %v6274_v30, 7  ;;  %v16705_v6 = vrot.slane %v6257_v14, 7  ;;  %v6655_v39 = vrot.slane %v6653_v61, 5  ;;  %v6706_v53 = vshrl.u32 %v6465_v34, 16  ;;  %v16753_v61 = vld [vmem:[#allocation2 + $0x5c] sm:$0x1] }
 0x2fd   : > { %v6254_v48 = vsel %vm14300_vm9, %v6246_v60, %v6253_v54  ;;  %v6433_v43 = vsel %vm14257_vm3, %v6255_v63, %v6432_v7  ;;  %v6236_v21 = vor.u32 %v6234_v31, %v6233_v57  ;;  %v6238_v28 = vrot.slane %v6233_v57, 4  ;;  %v6467_v31 = vld [vmem:[#allocation2 + $0x6c] sm:$0xf] }
 0x2fe   : > { %6431 = vst [vmem:[#allocation2 + $0xac] sm:$0xf] %v6254_v48  ;;  %6434 = vst [vmem:[#allocation2 + $0xb0] sm:$0x1] %v6433_v43  ;;  %v6279_v0 = vor.u32 %v6277_v42, %v16703_v8  ;;  %v6280_v2 = vrot.slane %v16703_v8, 4  ;;  %v6262_v4 = vor.u32 %v6260_v19, %v16705_v6  ;;  %v6263_v37 = vrot.slane %v16705_v6, 4 }
 0x2ff   : > { %v6237_v60 = vsel %vm14300_vm9, %v6229_v35, %v6236_v21  ;;  %v6426_v13 = vsel %vm14257_vm3, %v6238_v28, %v6425_v49  ;;  %v6651_v12 = vrot.slane %v6650_v58, 4  ;;  %v6709_v51 = vshll.u32 %v6465_v34, 16  ;;  %v16743_v42 = vld [vmem:[#allocation2 + $0x70] sm:$0xf]  ;;  %v6469_v28 = vld [vmem:[#allocation2 + $0x78] sm:$0xf] }
 0x300   : > { %6424 = vst [vmem:[#allocation2 + $0xa0] sm:$0xf] %v6237_v60  ;;  %6427 = vst [vmem:[#allocation2 + $0xa4] sm:$0x1] %v6426_v13  ;;  %v6443_v44 = vsel %vm14306_vm10, %v6279_v0, %v6442_v5  ;;  %v6436_v36 = vsel %vm14306_vm10, %v6262_v4, %v6435_v16  ;;  %v6719_v56 = vshrl.u32 %v16718_v22, 16  ;;  %v11929_v11 = vcombine.low %v6465_v34, %v16718_v22 }
 0x301   : > { %6444 = vst [vmem:[#allocation2 + $0xc0] sm:$0xf] %v6443_v44  ;;  %6437 = vst [vmem:[#allocation2 + $0xb4] sm:$0xf] %v6436_v36  ;;  %v6656_v35 = vsel %vm14318_vm11, %v6651_v12, %v6655_v39  ;;  %v5811_v59 = vadd.f32 %v13097_v10, %v16344_v23  ;;  %v16737_v7 = vrot.slane %v6706_v53, 4  ;;  %v16739_v9 = vrot.slane %v6709_v51, 5 }
 0x302   : > { %v11902_v20 = vcombine.low %v6646_v26, %v6656_v35  ;;  %v6664_v30 = vor.u32 %v16651_v40, %v16645_v46  ;;  %13178 = vmatprep.mubr.bf16.mxu0 %v11929_v11  ;;  %v6667_v19 = vshll.u32 %v16625_v24, 16  ;;  %v6673_v23 = vrot.slane %v6671_v17, 4  ;;  %v16770_v13 = vld [vmem:[#allocation2 + $0x7c] sm:$0xf] }
 0x303   : > { %v5850_v14 = vmul.f32 %v16659_v47, %v5811_v59  ;;  %v6677_v54 = vshll.u32 %v16726_v50, 16  ;;  %v5809_v57 = vadd.f32 %v5768_v3, %v16346_v1  ;;  %v6730_v49 = vshrl.u32 %v6467_v31, 16  ;;  %v6475_v6 = vld [vmem:[#allocation2 + $0x9c] sm:$0xf] }
 0x304   : > { %13123 = vmatmul.mubr.bf16.gmra.mxu1 %v11902_v20  ;;  %v6665_v63 = vrot.slane %v6664_v30, 4  ;;  %v6733_v26 = vshll.u32 %v6467_v31, 16  ;;  %v6669_v40 = vrot.slane %v6667_v19, 5  ;;  %v6743_v58 = vshrl.u32 %v16743_v42, 16 }
 0x305   : > { %v5889_v46 = vadd.f32 %v16670_v33, %v5850_v14  ;;  %v6679_v5 = vrot.slane %v6677_v54, 5  ;;  %v5848_v48 = vmul.f32 %v16659_v47, %v5809_v57  ;;  %v16756_v43 = vrot.slane %v6730_v49, 4  ;;  %v16782_v54 = vld [vmem:[#allocation2 + $0x68] sm:$0x1] }
 0x306   : > { %v16758_v17 = vrot.slane %v6733_v26, 5  ;;  %v11930_v21 = vcombine.low %v6467_v31, %v16743_v42  ;;  %v6670_v16 = vsel %vm14318_vm11, %v6665_v63, %v6669_v40  ;;  %v6674_v34 = vor.u32 %v6673_v23, %v6669_v40  ;;  %v6446_v63 = vld [vmem:[#allocation2 + $0xc8] sm:$0x1] }
 0x307   : > { %v5921_v1 = vmax.f32 %v5889_v46, 0.0  ;;  %v6688_v10 = vor.u32 %v16683_v25, %v16681_v38  ;;  %v5887_v0 = vadd.f32 %v16670_v33, %v5848_v48  ;;  %v6691_v47 = vshll.u32 %v16674_v45, 16 }
 0x308   : > { %13179 = vmatmul.mubr.bf16.gmra.mxu0 %v11930_v21  ;;  %v6697_v4 = vrot.slane %v6695_v52, 4  ;;  %v6701_v60 = vshll.u32 %v16753_v61, 16  ;;  %v6675_v39 = vrot.slane %v6674_v34, 4  ;;  %v6754_v36 = vshrl.u32 %v6469_v28, 16 }
 0x309   : > { %v12232_v12 = vpack.c.bf16 %v5921_v1, %v5921_v1  ;;  %v6689_v44 = vrot.slane %v6688_v10, 4  ;;  %v5919_v53 = vmax.f32 %v5887_v0, 0.0  ;;  %v6693_v51 = vrot.slane %v6691_v47, 5  ;;  %v6471_v1 = vld [vmem:[#allocation2 + $0x84] sm:$0xf] }
 0x30a   : > { %v6703_v35 = vrot.slane %v6701_v60, 5  ;;  %v6757_v38 = vshll.u32 %v6469_v28, 16  ;;  %v6680_v11 = vsel %vm14318_vm11, %v6675_v39, %v6679_v5  ;;  %v16774_v59 = vrot.slane %v6754_v36, 4  ;;  %v16792_v0 = vld [vmem:[#allocation2 + $0x88] sm:$0xf] }
 0x30b   : > { %v6282_v25 = vshrl.u32 %v12232_v12, 16  ;;  %v6285_v33 = vshll.u32 %v12232_v12, 16  ;;  %v11903_v52 = vcombine.low %v6670_v16, %v6680_v11  ;;  %v12230_v3 = vpack.c.bf16 %v5919_v53, %v5919_v53  ;;  %v6439_v47 = vld [vmem:[#allocation2 + $0xbc] sm:$0x1]  ;;  %v16800_v60 = vld [vmem:[#allocation2 + $0x74] sm:$0x1] }
 0x30c   : > { %v6694_v31 = vsel %vm14318_vm11, %v6689_v44, %v6693_v51  ;;  %v6698_v20 = vor.u32 %v6697_v4, %v6693_v51  ;;  %v16778_v14 = vrot.slane %v6757_v38, 5  ;;  %v6767_v19 = vshrl.u32 %v16770_v13, 16  ;;  %v6473_v53 = vld [vmem:[#allocation2 + $0x90] sm:$0xf]  ;;  %v16805_v38 = vld [vmem:[#allocation2 + $0x94] sm:$0xf] }
 0x30d   : > { %v6284_v30 = vrot.slane %v6282_v25, 7  ;;  %v11931_v23 = vcombine.low %v6469_v28, %v16770_v13  ;;  %13126 = vmatprep.mubr.bf16.mxu1 %v11903_v52  ;;  %v6265_v57 = vshrl.u32 %v12230_v3, 16  ;;  %v6268_v49 = vshll.u32 %v12230_v3, 16 }
 0x30e   : > { %v6699_v26 = vrot.slane %v6698_v20, 4  ;;  %v6712_v46 = vor.u32 %v16739_v9, %v16737_v7  ;;  %v6715_v48 = vshll.u32 %v16718_v22, 16  ;;  %v6721_v21 = vrot.slane %v6719_v56, 4 }
 0x30f   : > { %v6287_v40 = vor.u32 %v6285_v33, %v6284_v30  ;;  %v6289_v5 = vrot.slane %v6284_v30, 4  ;;  %13182 = vmatprep.mubr.bf16.mxu0 %v11931_v23  ;;  %v6267_v28 = vrot.slane %v6265_v57, 7  ;;  %v6725_v10 = vshll.u32 %v16782_v54, 16  ;;  %v16817_v23 = vld [vmem:[#allocation2 + $0x80] sm:$0x1] }
 0x310   : > { %v6704_v16 = vsel %vm14318_vm11, %v6699_v26, %v6703_v35  ;;  %v6713_v34 = vrot.slane %v6712_v46, 4  ;;  %v6717_v4 = vrot.slane %v6715_v48, 5  ;;  %v6778_v36 = vshrl.u32 %v6471_v1, 16 }
 0x311   : > { %v6288_v7 = vsel %vm14300_vm9, %v6280_v2, %v6287_v40  ;;  %v6447_v9 = vsel %vm14257_vm3, %v6289_v5, %v6446_v63  ;;  %v11904_v56 = vcombine.low %v6694_v31, %v6704_v16  ;;  %v6270_v12 = vor.u32 %v6268_v49, %v6267_v28 }
 0x312   : > { %6445 = vst [vmem:[#allocation2 + $0xc4] sm:$0xf] %v6288_v7  ;;  %6448 = vst [vmem:[#allocation2 + $0xc8] sm:$0x1] %v6447_v9  ;;  %v6272_v39 = vrot.slane %v6267_v28, 4  ;;  %v6727_v44 = vrot.slane %v6725_v10, 5  ;;  %v6718_v8 = vsel %vm14318_vm11, %v6713_v34, %v6717_v4  ;;  %v6722_v2 = vor.u32 %v6721_v21, %v6717_v4 }
 0x313   : > { %13127 = vmatmul.mubr.bf16.gmra.mxu1 %v11904_v56  ;;  %v6781_v51 = vshll.u32 %v6471_v1, 16  ;;  %v6791_v35 = vshrl.u32 %v16792_v0, 16  ;;  %v6271_v25 = vsel %vm14300_vm9, %v6263_v37, %v6270_v12  ;;  %v6780_v11 = vrot.slane %v6778_v36, 4  ;;  %v16837_v12 = vld [vmem:[#allocation2 + $0x8c] sm:$0x1] }
 0x314   : > { %v6440_v33 = vsel %vm14257_vm3, %v6272_v39, %v6439_v47  ;;  %v11932_v52 = vcombine.low %v6471_v1, %v16792_v0  ;;  %6438 = vst [vmem:[#allocation2 + $0xb8] sm:$0xf] %v6271_v25  ;;  %v6723_v3 = vrot.slane %v6722_v2, 4  ;;  %v6736_v20 = vor.u32 %v16758_v17, %v16756_v43  ;;  %v16825_v17 = vld [vmem:[#allocation2 + $0xa0] sm:$0xf] }
 0x315   : > { %6441 = vst [vmem:[#allocation2 + $0xbc] sm:$0x1] %v6440_v33  ;;  %v6783_v31 = vrot.slane %v6781_v51, 5  ;;  %v6739_v30 = vshll.u32 %v16743_v42, 16  ;;  %v6745_v62 = vrot.slane %v6743_v58, 4  ;;  %v6749_v41 = vshll.u32 %v16800_v60, 16 }
 0x316   : > { %13183 = vmatmul.mubr.bf16.gmra.mxu0 %v11932_v52  ;;  %v6802_v37 = vshrl.u32 %v6473_v53, 16  ;;  %v6805_v63 = vshll.u32 %v6473_v53, 16  ;;  %v6728_v57 = vsel %vm14318_vm11, %v6723_v3, %v6727_v44  ;;  %v6737_v49 = vrot.slane %v6736_v20, 4  ;;  %v6477_v36 = vld [vmem:[#allocation2 + $0xa8] sm:$0xf] }
 0x317   : > { %v6741_v26 = vrot.slane %v6739_v30, 5  ;;  %v6815_v43 = vshrl.u32 %v16805_v38, 16  ;;  %v11905_v46 = vcombine.low %v6718_v8, %v6728_v57  ;;  %v6751_v40 = vrot.slane %v6749_v41, 5  ;;  %v16845_v51 = vld [vmem:[#allocation2 + $0xac] sm:$0xf] }
 0x318   : > { %v6804_v5 = vrot.slane %v6802_v37, 4  ;;  %v6807_v48 = vrot.slane %v6805_v63, 5  ;;  %v11933_v1 = vcombine.low %v6473_v53, %v16805_v38  ;;  %v6760_v28 = vor.u32 %v16778_v14, %v16774_v59  ;;  %v16852_v63 = vld [vmem:[#allocation2 + $0x98] sm:$0x1] }
 0x319   : > { %v6742_v58 = vsel %vm14318_vm11, %v6737_v49, %v6741_v26  ;;  %v6746_v21 = vor.u32 %v6745_v62, %v6741_v26  ;;  %13130 = vmatprep.mubr.bf16.mxu1 %v11905_v46  ;;  %v6763_v16 = vshll.u32 %v16770_v13, 16  ;;  %v6769_v34 = vrot.slane %v6767_v19, 4  ;;  %v6479_v46 = vld [vmem:[#allocation2 + $0xb4] sm:$0xf] }
 0x31a   : > { %v6773_v10 = vshll.u32 %v16817_v23, 16  ;;  %v6826_v7 = vshrl.u32 %v6475_v6, 16  ;;  %13186 = vmatprep.mubr.bf16.mxu0 %v11933_v1  ;;  %v6761_v47 = vrot.slane %v6760_v28, 4  ;;  %v6829_v56 = vshll.u32 %v6475_v6, 16 }
 0x31b   : > { %v6747_v9 = vrot.slane %v6746_v21, 4  ;;  %v6839_v4 = vshrl.u32 %v16825_v17, 16  ;;  %v6765_v39 = vrot.slane %v6763_v16, 5  ;;  %v11934_v14 = vcombine.low %v6475_v6, %v16825_v17  ;;  %v16859_v28 = vld [vmem:[#allocation2 + $0xb8] sm:$0xf] }
 0x31c   : > { %v6775_v44 = vrot.slane %v6773_v10, 5  ;;  %v16839_v59 = vrot.slane %v6826_v7, 4  ;;  %v6831_v53 = vrot.slane %v6829_v56, 5  ;;  %v6784_v8 = vor.u32 %v6783_v31, %v6780_v11 }
 0x31d   : > { %v6752_v19 = vsel %vm14318_vm11, %v6747_v9, %v6751_v40  ;;  %v6787_v2 = vshll.u32 %v16792_v0, 16  ;;  %v6766_v33 = vsel %vm14318_vm11, %v6761_v47, %v6765_v39  ;;  %v6770_v52 = vor.u32 %v6769_v34, %v6765_v39 }
 0x31e   : > { %v11906_v25 = vcombine.low %v6742_v58, %v6752_v19  ;;  %13187 = vmatmul.mubr.bf16.gmra.mxu0 %v11934_v14  ;;  %v6793_v3 = vrot.slane %v6791_v35, 4  ;;  %v6785_v20 = vrot.slane %v6784_v8, 4  ;;  %v6797_v6 = vshll.u32 %v16837_v12, 16  ;;  %v16868_v19 = vld [vmem:[#allocation2 + $0xb0] sm:$0x1] }
 0x31f   : > { %v6789_v30 = vrot.slane %v6787_v2, 5  ;;  %v6850_v62 = vshrl.u32 %v6477_v36, 16  ;;  %v6771_v41 = vrot.slane %v6770_v52, 4  ;;  %v6853_v37 = vshll.u32 %v6477_v36, 16 }
 0x320   : > { %13131 = vmatmul.mubr.bf16.gmra.mxu1 %v11906_v25  ;;  %v6863_v11 = vshrl.u32 %v16845_v51, 16  ;;  %v11935_v31 = vcombine.low %v6477_v36, %v16845_v51  ;;  %v6799_v26 = vrot.slane %v6797_v6, 5  ;;  %v6808_v21 = vor.u32 %v6807_v48, %v6804_v5  ;;  %v16866_v36 = vld [vmem:[#allocation2 + $0xa4] sm:$0x1] }
 0x321   : > { %v6790_v57 = vsel %vm14318_vm11, %v6785_v20, %v6789_v30  ;;  %v6794_v49 = vor.u32 %v6793_v3, %v6789_v30  ;;  %v6852_v35 = vrot.slane %v6850_v62, 4  ;;  %v6776_v40 = vsel %vm14318_vm11, %v6771_v41, %v6775_v44 }
 0x322   : > { %v6855_v58 = vrot.slane %v6853_v37, 5  ;;  %13190 = vmatprep.mubr.bf16.mxu0 %v11935_v31  ;;  %v6811_v1 = vshll.u32 %v16805_v38, 16  ;;  %v11907_v16 = vcombine.low %v6766_v33, %v6776_v40  ;;  %v6817_v10 = vrot.slane %v6815_v43, 4  ;;  %v13770_v33 = vld [vmem:[#allocation2 + $0xc] sm:$0xff]  }
 0x323   : > { %v6795_v34 = vrot.slane %v6794_v49, 4  ;;  %v6821_v7 = vshll.u32 %v16852_v63, 16  ;;  %v6809_v9 = vrot.slane %v6808_v21, 4  ;;  %v6874_v56 = vshrl.u32 %v6479_v46, 16  ;;  %v16879_v21 = vld [vmem:[#allocation2 + $0xbc] sm:$0x1] }
 0x324   : > { %v6813_v47 = vrot.slane %v6811_v1, 5  ;;  %v6877_v39 = vshll.u32 %v6479_v46, 16  ;;  %13134 = vmatprep.mubr.bf16.mxu1 %v11907_v16  ;;  %v6887_v5 = vshrl.u32 %v16859_v28, 16  ;;  %v11936_v48 = vcombine.low %v6479_v46, %v16859_v28  ;;  %v7491_v46 = vld [vmem:[#allocation2] sm:$0xe] }
 0x325   : > { %v6800_v44 = vsel %vm14318_vm11, %v6795_v34, %v6799_v26  ;;  %v6823_v14 = vrot.slane %v6821_v7, 5  ;;  %v6876_v25 = vrot.slane %v6874_v56, 4  ;;  %v6832_v3 = vor.u32 %v6831_v53, %v16839_v59  ;;  %v13772_v56 = vld [vmem:[#allocation2 + $0x18] sm:$0xff]  }
 0x326   : > { %v11908_v43 = vcombine.low %v6790_v57, %v6800_v44  ;;  %v6814_v8 = vsel %vm14318_vm11, %v6809_v9, %v6813_v47  ;;  %v6818_v2 = vor.u32 %v6817_v10, %v6813_v47  ;;  %v6879_v52 = vrot.slane %v6877_v39, 5  ;;  %13191 = vmatmul.mubr.bf16.gmra.mxu0 %v11936_v48  ;;  %v7492_v9 = vld [vmem:[#allocation2 + $0xc] sm:$0xe] }
 0x327   : > { %v6835_v20 = vshll.u32 %v16825_v17, 16  ;;  %v6841_v30 = vrot.slane %v6839_v4, 4  ;;  %v6845_v62 = vshll.u32 %v16866_v36, 16  ;;  %13258 = vmatprep.mubr.bf16.mxu0 %v13770_v33  ;;  %v6856_v41 = vor.u32 %v6855_v58, %v6852_v35  ;;  %v13871_v33 = vld [vmem:[#allocation2 + $0x4] sm:$0xf] }
 0x328   : > { %13135 = vmatmul.mubr.bf16.gmra.mxu1 %v11908_v43  ;;  %v6819_v6 = vrot.slane %v6818_v2, 4  ;;  %v6859_v37 = vshll.u32 %v16845_v51, 16  ;;  %v6833_v31 = vrot.slane %v6832_v3, 4  ;;  %v6865_v49 = vrot.slane %v6863_v11, 4  ;;  %v13774_v2 = vld [vmem:[#allocation2 + $0x24] sm:$0xff]  }
 0x329   : > { %v6837_v57 = vrot.slane %v6835_v20, 5  ;;  %v6869_v26 = vshll.u32 %v16868_v19, 16  ;;  %v6847_v53 = vrot.slane %v6845_v62, 5  ;;  %v6857_v40 = vrot.slane %v6856_v41, 4  ;;  %v13788_v20 = vld [vmem:[#allocation8 + $0x170] sm:$0xff]  }
 0x32a   : > { %v6824_v59 = vsel %vm14318_vm11, %v6819_v6, %v6823_v14  ;;  %v6861_v4 = vrot.slane %v6859_v37, 5  ;;  %v6880_v10 = vor.u32 %v6879_v52, %v6876_v25  ;;  %v6883_v7 = vshll.u32 %v16859_v28, 16  ;;  %v7493_v41 = vld [vmem:[#allocation2 + $0x18] sm:$0xe] }
 0x32b   : > { %v11909_v1 = vcombine.low %v6814_v8, %v6824_v59  ;;  %v6838_v35 = vsel %vm14318_vm11, %v6833_v31, %v6837_v57  ;;  %v6842_v58 = vor.u32 %v6841_v30, %v6837_v57  ;;  %v6871_v16 = vrot.slane %v6869_v26, 5  ;;  %v13872_v30 = vld [vmem:[#allocation2 + $0x8] sm:$0x1] }
 0x32c   : > { %v6862_v11 = vsel %vm14318_vm11, %v6857_v40, %v6861_v4  ;;  %v6866_v34 = vor.u32 %v6865_v49, %v6861_v4  ;;  %v6889_v39 = vrot.slane %v6887_v5, 4  ;;  %v6893_v44 = vshll.u32 %v16879_v21, 16  ;;  %v7494_v4 = vld [vmem:[#allocation2 + $0x24] sm:$0xe] }
 0x32d   : > { %13138 = vmatprep.mubr.bf16.mxu1 %v11909_v1  ;;  %v6843_v47 = vrot.slane %v6842_v58, 4  ;;  %v11945_v14 = vrot.slane %v7491_v46, 9  ;;  %v6881_v43 = vrot.slane %v6880_v10, 4  ;;  %v6885_v8 = vrot.slane %v6883_v7, 5  ;;  %v13790_v7 = vld [vmem:[#allocation8 + $0x168] sm:$0xff]  }
 0x32e   : > { %v6867_v48 = vrot.slane %v6866_v34, 4  ;;  %v7541_v3 = vrot.slane %v13871_v33, 5  ;;  %13259 = vmatmul.mubr.bf16.vlgmr.msra.gmra.mxu0 %v13772_v56  ;;  %v6895_v52 = vrot.slane %v6893_v44, 5  ;;  %v7544_v6 = vrot.slane %v13872_v30, 5  ;;  %v13875_v34 = vld [vmem:[#allocation2 + $0x1c] sm:$0xf] }
 0x32f   : > { %v6848_v25 = vsel %vm14318_vm11, %v6843_v47, %v6847_v53  ;;  %v11946_v62 = vrot.slane %v7492_v9, 9  ;;  %v6886_v31 = vsel %vm14318_vm11, %v6881_v43, %v6885_v8  ;;  %v6890_v57 = vor.u32 %v6889_v39, %v6885_v8  ;;  %13262 = vmatprep.mubr.bf16.mxu0 %v13774_v2  ;;  %v13873_v53 = vld [vmem:[#allocation2 + $0x10] sm:$0xf]  ;;  %13339 = vmatpush3.bf16.msra.mxu0 %v16571_v29  ;;  %v13876_v56 = vld [vmem:[#allocation2 + $0x20] sm:$0x1] }
 0x330   : > { %v11910_v5 = vcombine.low %v6838_v35, %v6848_v25  ;;  %v6872_v37 = vsel %vm14318_vm11, %v6867_v48, %v6871_v16  ;;  %v16895_v46 = vsel %vm14657_vm14, %v11945_v14, %v7541_v3  ;;  %v7543_v59 = vrot.slane %v7541_v3, 4  ;;  %v13874_v35 = vld [vmem:[#allocation2 + $0x14] sm:$0x1]  ;;  %13340 = vmatprep.subr.bf16.mxu0 %v13788_v20  ;;  %v7495_v39 = vld [vmem:[#allocation2 + $0x30] sm:$0xe] }
 0x331   : > { %v11911_v49 = vcombine.low %v6862_v11, %v6872_v37  ;;  %v7548_v40 = vrot.slane %v13873_v53, 5  ;;  %v6891_v1 = vrot.slane %v6890_v57, 4  ;;  %v7551_v58 = vrot.slane %v13874_v35, 5  ;;  %v13775_v2 = vld [vmem:[#allocation2 + $0x30] sm:$0xff]   ;;  %v13877_v25 = vld [vmem:[#allocation2 + $0x28] sm:$0xf] }
 0x332   : > { %13139 = vmatmul.mubr.bf16.gmra.mxu1 %v11910_v5  ;;  %v11947_v16 = vrot.slane %v7493_v41, 9  ;;  %v7555_v10 = vrot.slane %v13875_v34, 5  ;;  %v7545_v11 = vsel %vm14657_vm14, %v7543_v59, %v7544_v6  ;;  %v7558_v29 = vrot.slane %v13876_v56, 5  ;;  %v7496_v6 = vld [vmem:[#allocation2 + $0x3c] sm:$0xe] }
 0x333   : > { %13142 = vmatprep.mubr.bf16.mxu1 %v11911_v49  ;;  %v16902_v9 = vsel %vm14657_vm14, %v11946_v62, %v7548_v40  ;;  %v7550_v47 = vrot.slane %v7548_v40, 4  ;;  %v6896_v44 = vsel %vm14318_vm11, %v6891_v1, %v6895_v52  ;;  %v11961_v14 = vcombine.low %v16895_v46, %v7545_v11  ;;  %13341 = vmatpush3.bf16.msra.mxu0 %v13788_v20  ;;  %v13776_v62 = vld [vmem:[#allocation2 + $0x3c] sm:$0xff]   ;;  %v13878_v59 = vld [vmem:[#allocation2 + $0x34] sm:$0xf] }
 0x334   : > { %v16909_v48 = vsel %vm14657_vm14, %v11947_v16, %v7555_v10  ;;  %v7557_v43 = vrot.slane %v7555_v10, 4  ;;  %v11912_v8 = vcombine.low %v6886_v31, %v6896_v44  ;;  %v11948_v3 = vrot.slane %v7494_v4, 9  ;;  %v7497_v31 = vld [vmem:[#allocation2 + $0x48] sm:$0xe]  ;;  %13342 = vmatprep.subr.bf16.mxu0 %v13790_v7  ;;  %v13793_v57 = vld [vmem:[#allocation8 + $0x160] sm:$0xff]  }
 0x335   : > { %v16913_v33 = vsel %vm14657_vm14, %v7550_v47, %v7551_v58  ;;  %v7562_v30 = vrot.slane %v13877_v25, 5  ;;  %v7565_v5 = vrot.slane %v16603_v32, 5  ;;  %v11949_v37 = vrot.slane %v7495_v39, 9  ;;  %v13879_v32 = vld [vmem:[#allocation2 + $0x40] sm:$0xf] }
 0x336   : > { %v11962_v52 = vcombine.low %v16902_v9, %v16913_v33  ;;  %v16919_v41 = vsel %vm14657_vm14, %v7557_v43, %v7558_v29  ;;  %13263 = vmatmul.mubr.bf16.gmra.mxu0 %v13775_v2  ;;  %v7569_v53 = vrot.slane %v13878_v59, 5  ;;  %v7572_v40 = vrot.slane %v16641_v18, 5  ;;  %v7498_v58 = vld [vmem:[#allocation2 + $0x54] sm:$0xe]  ;;  %v7500_v25 = vld [vmem:[#allocation2 + $0x6c] sm:$0xe] }
 0x337   : > { %v11963_v49 = vcombine.low %v16909_v48, %v16919_v41  ;;  %v16926_v20 = vsel %vm14657_vm14, %v11948_v3, %v7562_v30  ;;  %v7564_v46 = vrot.slane %v7562_v30, 4  ;;  %13266 = vmatprep.mubr.bf16.mxu0 %v13776_v62  ;;  %v11950_v4 = vrot.slane %v7496_v6, 9  ;;  %13343 = vmatpush3.bf16.msra.mxu0 %v13790_v7  ;;  %v13795_v29 = vld [vmem:[#allocation8 + $0x158] sm:$0xff]   ;;  %v13778_v30 = vld [vmem:[#allocation2 + $0x48] sm:$0xff]   ;;  %v7504_v33 = vld [vmem:[#allocation2 + $0x9c] sm:$0xe] }
 0x338   : > { %v7576_v1 = vrot.slane %v13879_v32, 5  ;;  %v7579_v35 = vrot.slane %v16696_v55, 5  ;;  %v16936_v34 = vsel %vm14657_vm14, %v11949_v37, %v7569_v53  ;;  %v7571_v10 = vrot.slane %v7569_v53, 4  ;;  %13344 = vmatprep.subr.bf16.mxu0 %v13793_v57  ;;  %v13779_v6 = vld [vmem:[#allocation2 + $0x54] sm:$0xff]  }
 0x339   : > { %v16932_v16 = vsel %vm14657_vm14, %v7564_v46, %v7565_v5  ;;  %v11951_v11 = vrot.slane %v7497_v31, 9  ;;  %v7583_v56 = vrot.slane %v16625_v24, 5  ;;  %v7586_v7 = vrot.slane %v16726_v50, 5  ;;  %v7501_v53 = vld [vmem:[#allocation2 + $0x78] sm:$0xe] }
 0x33a   : > { %13143 = vmatmul.mubr.bf16.gmra.mxu1 %v11912_v8  ;;  %v11964_v18 = vcombine.low %v16926_v20, %v16932_v16  ;;  %v16942_v47 = vsel %vm14657_vm14, %v11950_v4, %v7576_v1  ;;  %v7578_v55 = vrot.slane %v7576_v1, 4  ;;  %v16947_v39 = vsel %vm14657_vm14, %v7571_v10, %v7572_v40  ;;  %v7499_v8 = vld [vmem:[#allocation2 + $0x60] sm:$0xe]  ;;  %v13798_v40 = vld [vmem:[#allocation8 + $0x150] sm:$0xff]   ;;  %v7502_v1 = vld [vmem:[#allocation2 + $0x84] sm:$0xe] }
 0x33b   : > { %13210 = vmatprep.mubr.bf16.mxu1 %v11961_v14  ;;  %v11952_v44 = vrot.slane %v7498_v58, 9  ;;  %v7590_v43 = vrot.slane %v16674_v45, 5  ;;  %v11965_v2 = vcombine.low %v16936_v34, %v16947_v39  ;;  %v16959_v24 = vsel %vm14657_vm14, %v11951_v11, %v7583_v56  ;;  %13345 = vmatpush3.bf16.msra.mxu0 %v13793_v57 }
 0x33c   : > { %v16955_v3 = vsel %vm14657_vm14, %v7578_v55, %v7579_v35  ;;  %v7585_v14 = vrot.slane %v7583_v56, 4  ;;  %v7593_v5 = vrot.slane %v16753_v61, 5  ;;  %v11953_v31 = vrot.slane %v7499_v8, 9  ;;  %13346 = vmatprep.subr.bf16.mxu0 %v13795_v29  ;;  %v13780_v35 = vld [vmem:[#allocation8 + $0x130] sm:$0xff]   ;;  %v7503_v8 = vld [vmem:[#allocation2 + $0x90] sm:$0xe] }
 0x33d   : > { %v11966_v50 = vcombine.low %v16942_v47, %v16955_v3  ;;  %v16965_v45 = vsel %vm14657_vm14, %v11952_v44, %v7590_v43  ;;  %v7592_v62 = vrot.slane %v7590_v43, 4  ;;  %v7597_v46 = vrot.slane %v16718_v22, 5 }
 0x33e   : > { %v16970_v37 = vsel %vm14657_vm14, %v7585_v14, %v7586_v7  ;;  %v7600_v59 = vrot.slane %v16782_v54, 5  ;;  %13267 = vmatmul.mubr.bf16.gmra.mxu0 %v13778_v30  ;;  %v11954_v57 = vrot.slane %v7500_v25, 9  ;;  %v7604_v32 = vrot.slane %v16743_v42, 5  ;;  %v13800_v14 = vld [vmem:[#allocation8 + $0x148] sm:$0xff]   ;;  %v17023_v25 = vld [vmem:[#allocation2 + $0x10] sm:$0xf] }
 0x33f   : > { %v11967_v4 = vcombine.low %v16959_v24, %v16970_v37  ;;  %v16978_v61 = vsel %vm14657_vm14, %v7592_v62, %v7593_v5  ;;  %13270 = vmatprep.mubr.bf16.mxu0 %v13779_v6  ;;  %v16985_v54 = vsel %vm14657_vm14, %v11953_v31, %v7597_v46  ;;  %v7599_v58 = vrot.slane %v7597_v46, 4  ;;  %13347 = vmatpush3.bf16.msra.mxu0 %v13795_v29  ;;  %v13783_v29 = vld [vmem:[#allocation8 + $0x128] sm:$0xff]   ;;  %v17031_v46 = vld [vmem:[#allocation2 + $0x14] sm:$0x1] }
 0x340   : > { %v11968_v22 = vcombine.low %v16965_v45, %v16978_v61  ;;  %v7607_v10 = vrot.slane %v16800_v60, 5  ;;  %v16990_v11 = vsel %vm14657_vm14, %v11954_v57, %v7604_v32  ;;  %v7606_v55 = vrot.slane %v7604_v32, 4  ;;  %13348 = vmatprep.subr.bf16.mxu0 %v13798_v40  ;;  %v13781_v30 = vld [vmem:[#allocation2 + $0x60] sm:$0xff]   ;;  %v13789_v37 = vld [vmem:[#allocation2 + $0x90] sm:$0xff]  }
 0x341   : > { %v11955_v56 = vrot.slane %v7501_v53, 9  ;;  %v7611_v42 = vrot.slane %v16770_v13, 5  ;;  %v16998_v7 = vsel %vm14657_vm14, %v7599_v58, %v7600_v59  ;;  %v7614_v44 = vrot.slane %v16817_v23, 5  ;;  %v13782_v59 = vld [vmem:[#allocation2 + $0x6c] sm:$0xff]   ;;  %v13802_v58 = vld [vmem:[#allocation8 + $0x140] sm:$0xff]  }
 0x342   : > { %13211 = vmatmul.mubr.bf16.vlgmr.msra.gmra.mxu1 %v11962_v52  ;;  %v11956_v60 = vrot.slane %v7502_v1, 9  ;;  %v7618_v43 = vrot.slane %v16792_v0, 5  ;;  %v11969_v13 = vcombine.low %v16985_v54, %v16998_v7  ;;  %v17010_v9 = vsel %vm14657_vm14, %v7606_v55, %v7607_v10  ;;  %v9110_v52 = vld [vmem:[#allocation2 + $0xc] sm:$0xe]  ;;  %v7505_v1 = vld [vmem:[#allocation2 + $0xa8] sm:$0xe] }
 0x343   : > { %13214 = vmatprep.mubr.bf16.mxu1 %v11963_v49  ;;  %13291 = vmatpush3.bf16.msra.mxu1 %v16694_v27  ;;  %v17014_v23 = vsel %vm14657_vm14, %v11955_v56, %v7611_v42  ;;  %v7613_v0 = vrot.slane %v7611_v42, 4  ;;  %v11970_v48 = vcombine.low %v16990_v11, %v17010_v9  ;;  %v7621_v49 = vrot.slane %v16837_v12, 5  ;;  %v9111_v55 = vld [vmem:[#allocation2 + $0x18] sm:$0xe]  ;;  %v17192_v54 = vld [vmem:[#allocation2 + $0x4c] sm:$0xf] }
 0x344   : > { %13292 = vmatprep.subr.bf16.mxu1 %v13780_v35  ;;  %v17020_v27 = vsel %vm14657_vm14, %v11956_v60, %v7618_v43  ;;  %v7620_v41 = vrot.slane %v7618_v43, 4  ;;  %v11957_v62 = vrot.slane %v7503_v8, 9  ;;  %v7625_v5 = vrot.slane %v16805_v38, 5  ;;  %13349 = vmatpush3.bf16.msra.mxu0 %v13798_v40  ;;  %v13787_v56 = vld [vmem:[#allocation8 + $0x120] sm:$0xff]   ;;  %v9115_v7 = vld [vmem:[#allocation2 + $0x48] sm:$0xe] }
 0x345   : > { %v17027_v6 = vsel %vm14657_vm14, %v7613_v0, %v7614_v44  ;;  %v7628_v31 = vrot.slane %v16852_v63, 5  ;;  %13350 = vmatprep.subr.bf16.mxu0 %v13800_v14  ;;  %v11958_v57 = vrot.slane %v7504_v33, 9  ;;  %v7632_v32 = vrot.slane %v16825_v17, 5  ;;  %v17052_v60 = vld [vmem:[#allocation2 + $0x1c] sm:$0xf] }
 0x346   : > { %v11971_v53 = vcombine.low %v17014_v23, %v17027_v6  ;;  %v17037_v12 = vsel %vm14657_vm14, %v7620_v41, %v7621_v49  ;;  %13271 = vmatmul.mubr.bf16.gmra.mxu0 %v13781_v30  ;;  %v17044_v63 = vsel %vm14657_vm14, %v11957_v62, %v7625_v5  ;;  %v7627_v40 = vrot.slane %v7625_v5, 4  ;;  %v17060_v33 = vld [vmem:[#allocation2 + $0x20] sm:$0x1]  ;;  %v17075_v30 = vld [vmem:[#allocation8 + $0x1f8] sm:$0xff]   ;;  %v9112_v5 = vld [vmem:[#allocation2 + $0x24] sm:$0xe] }
 0x347   : > { %13293 = vmatpush3.bf16.msra.mxu1 %v13780_v35  ;;  %v11972_v38 = vcombine.low %v17020_v27, %v17037_v12  ;;  %v7635_v10 = vrot.slane %v16866_v36, 5  ;;  %13274 = vmatprep.mubr.bf16.mxu0 %v13782_v59  ;;  %v17049_v17 = vsel %vm14657_vm14, %v11958_v57, %v7632_v32  ;;  %v7634_v35 = vrot.slane %v7632_v32, 4  ;;  %v13792_v59 = vld [vmem:[#allocation8 + $0x118] sm:$0xff]   ;;  %v13784_v32 = vld [vmem:[#allocation2 + $0x78] sm:$0xff]  }
 0x348   : > { %13294 = vmatprep.subr.bf16.mxu1 %v13783_v29  ;;  %v12033_v42 = vrot.slane %v9110_v52, 9  ;;  %v9176_v44 = vrot.slane %v17023_v25, 5  ;;  %v17056_v43 = vsel %vm14657_vm14, %v7627_v40, %v7628_v31  ;;  %13351 = vmatpush3.bf16.msra.mxu0 %v13800_v14  ;;  %v9179_v36 = vrot.slane %v17031_v46, 5  ;;  %v8357_v31 = vld [vmem:[#allocation2 + $0xc] sm:$0xf] }
 0x349   : > { %v11959_v8 = vrot.slane %v7505_v1, 9  ;;  %v7639_v0 = vrot.slane %v16845_v51, 5  ;;  %v17069_v41 = vsel %vm14657_vm14, %v7634_v35, %v7635_v10  ;;  %13352 = vmatprep.subr.bf16.mxu0 %v13802_v58  ;;  %v7506_v51 = vld [vmem:[#allocation2 + $0xb4] sm:$0xe]  ;;  %v7642_v62 = vrot.slane %v16868_v19, 5 }
 0x34a   : > { %13215 = vmatmul.mubr.bf16.gmra.mxu1 %v11964_v18  ;;  %v17073_v14 = vsel %vm14657_vm14, %v12033_v42, %v9176_v44  ;;  %v9178_v49 = vrot.slane %v9176_v44, 4  ;;  %v12034_v34 = vrot.slane %v9111_v55, 9  ;;  %v9183_v39 = vrot.slane %v17052_v60, 5  ;;  %v17102_v35 = vld [vmem:[#allocation2 + $0x2c] sm:$0x1]  ;;  %v13786_v55 = vld [vmem:[#allocation2 + $0x84] sm:$0xff]  }
 0x34b   : > { %13218 = vmatprep.mubr.bf16.mxu1 %v11965_v2  ;;  %13295 = vmatpush3.bf16.msra.mxu1 %v13783_v29  ;;  %v17084_v16 = vsel %vm14657_vm14, %v11959_v8, %v7639_v0  ;;  %v7641_v18 = vrot.slane %v7639_v0, 4  ;;  %v9186_v2 = vrot.slane %v17060_v33, 5  ;;  %v17093_v29 = vld [vmem:[#allocation2 + $0x28] sm:$0xf]  ;;  %v11960_v40 = vrot.slane %v7506_v51, 9 }
 0x34c   : > { %13296 = vmatprep.subr.bf16.mxu1 %v13787_v56  ;;  %v17089_v57 = vsel %vm14657_vm14, %v9178_v49, %v9179_v36  ;;  %13353 = vmatpush3.bf16.msra.mxu0 %v13802_v58  ;;  %v7646_v10 = vrot.slane %v16859_v28, 5  ;;  %v17108_v44 = vsel %vm14657_vm14, %v12034_v34, %v9183_v39  ;;  %v9185_v36 = vrot.slane %v9183_v39, 4  ;;  %v13797_v51 = vld [vmem:[#allocation8 + $0x110] sm:$0xff]   ;;  %v9114_v42 = vld [vmem:[#allocation2 + $0x3c] sm:$0xe] }
 0x34d   : > { %v12049_v1 = vcombine.low %v17073_v14, %v17089_v57  ;;  %v17099_v19 = vsel %vm14657_vm14, %v7641_v18, %v7642_v62  ;;  %v7649_v8 = vrot.slane %v16879_v21, 5  ;;  %13434 = vmatprep.subr.bf16.mxu0 %v17075_v30  ;;  %v12035_v0 = vrot.slane %v9112_v5, 9  ;;  %v17226_v11 = vld [vmem:[#allocation2 + $0x58] sm:$0xf] }
 0x34e   : > { %13275 = vmatmul.mubr.bf16.gmra.mxu0 %v13784_v32  ;;  %v17114_v28 = vsel %vm14657_vm14, %v11960_v40, %v7646_v10  ;;  %v7648_v58 = vrot.slane %v7646_v10, 4  ;;  %v9190_v49 = vrot.slane %v17093_v29, 5  ;;  %v17119_v18 = vsel %vm14657_vm14, %v9185_v36, %v9186_v2  ;;  %v17132_v10 = vld [vmem:[#allocation2 + $0x34] sm:$0xf]  ;;  %v8360_v2 = vld [vmem:[#allocation2 + $0x18] sm:$0xf] }
 0x34f   : > { %13297 = vmatpush3.bf16.msra.mxu1 %v13787_v56  ;;  %13278 = vmatprep.mubr.bf16.mxu0 %v13786_v55  ;;  %v9193_v21 = vrot.slane %v17102_v35, 5  ;;  %v8406_v62 = vshrl.u32 %v8357_v31, 16  ;;  %v8409_v34 = vshll.u32 %v8357_v31, 16  ;;  %v9113_v56 = vld [vmem:[#allocation2 + $0x30] sm:$0xe]  ;;  %v8419_v47 = vshrl.u32 %v17023_v25, 16 }
 0x350   : > { %13298 = vmatprep.subr.bf16.mxu1 %v13792_v59  ;;  %v17126_v5 = vsel %vm14657_vm14, %v7648_v58, %v7649_v8  ;;  %v17130_v32 = vsel %vm14657_vm14, %v12035_v0, %v9190_v49  ;;  %v9192_v40 = vrot.slane %v9190_v49, 4  ;;  %v8415_v8 = vshll.u32 %v17023_v25, 16  ;;  %v17140_v58 = vld [vmem:[#allocation2 + $0x38] sm:$0x1]  ;;  %v13801_v49 = vld [vmem:[#allocation8 + $0x108] sm:$0xff]  }
 0x351   : > { %v8408_v55 = vrot.slane %v8406_v62, 4  ;;  %v8411_v36 = vrot.slane %v8409_v34, 5  ;;  %v8425_v3 = vshll.u32 %v17031_v46, 16  ;;  %v9197_v24 = vrot.slane %v17132_v10, 5  ;;  %v13791_v25 = vld [vmem:[#allocation2 + $0x9c] sm:$0xff]  }
 0x352   : > { %13219 = vmatmul.mubr.bf16.gmra.mxu1 %v11966_v50  ;;  %v17147_v0 = vsel %vm14657_vm14, %v9192_v40, %v9193_v21  ;;  %v12036_v50 = vrot.slane %v9113_v56, 9  ;;  %v8417_v31 = vrot.slane %v8415_v8, 5  ;;  %v9200_v21 = vrot.slane %v17140_v58, 5  ;;  %v8363_v62 = vld [vmem:[#allocation2 + $0x24] sm:$0xf] }
 0x353   : > { %13222 = vmatprep.mubr.bf16.mxu1 %v11967_v4  ;;  %13299 = vmatpush3.bf16.msra.mxu1 %v13792_v59  ;;  %v8412_v34 = vor.u32 %v8411_v36, %v8408_v55  ;;  %v8421_v4 = vrot.slane %v8419_v47, 4  ;;  %v8427_v59 = vrot.slane %v8425_v3, 5  ;;  %v8430_v40 = vshrl.u32 %v8360_v2, 16  ;;  %v17161_v3 = vld [vmem:[#allocation2 + $0x40] sm:$0xf] }
 0x354   : > { %13300 = vmatprep.subr.bf16.mxu1 %v13797_v51  ;;  %v17157_v46 = vsel %vm14657_vm14, %v12036_v50, %v9197_v24  ;;  %v9199_v56 = vrot.slane %v9197_v24, 4  ;;  %v8433_v39 = vshll.u32 %v8360_v2, 16  ;;  %v8439_v8 = vshll.u32 %v17052_v60, 16 }
 0x355   : > { %v8413_v20 = vrot.slane %v8412_v34, 4  ;;  %v8422_v55 = vor.u32 %v8421_v4, %v8417_v31  ;;  %v8432_v36 = vrot.slane %v8430_v40, 4  ;;  %v8443_v47 = vshrl.u32 %v17052_v60, 16  ;;  %v13803_v34 = vld [vmem:[#allocation8 + $0x100] sm:$0xff]  }
 0x356   : > { %13279 = vmatmul.mubr.bf16.gmra.mxu0 %v13789_v37  ;;  %v17167_v2 = vsel %vm14657_vm14, %v9199_v56, %v9200_v21  ;;  %v8435_v24 = vrot.slane %v8433_v39, 5  ;;  %v17170_v37 = vld [vmem:[#allocation2 + $0x44] sm:$0x1]  ;;  %v8441_v40 = vrot.slane %v8439_v8, 5  ;;  %v12037_v52 = vrot.slane %v9114_v42, 9 }
 0x357   : > { %13301 = vmatpush3.bf16.msra.mxu1 %v13797_v51  ;;  %13282 = vmatprep.mubr.bf16.mxu0 %v13791_v25  ;;  %v8418_v50 = vsel %vm14318_vm11, %v8413_v20, %v8417_v31  ;;  %v8449_v51 = vshll.u32 %v17060_v33, 16  ;;  %v8423_v4 = vrot.slane %v8422_v55, 4  ;;  %v12052_v60 = vcombine.low %v17157_v46, %v17167_v2 }
 0x358   : > { %13302 = vmatprep.subr.bf16.mxu1 %v13801_v49  ;;  %v8445_v25 = vrot.slane %v8443_v47, 4  ;;  %v8436_v20 = vor.u32 %v8435_v24, %v8432_v36  ;;  %v9204_v21 = vrot.slane %v17161_v3, 5  ;;  %v9207_v56 = vrot.slane %v17170_v37, 5  ;;  %v17190_v36 = vld [vmem:[#allocation8 + $0x1b8] sm:$0xff]  }
 0x359   : > { %v8451_v31 = vrot.slane %v8449_v51, 5  ;;  %v8428_v33 = vsel %vm14318_vm11, %v8423_v4, %v8427_v59  ;;  %v8454_v55 = vshrl.u32 %v8363_v62, 16  ;;  %v8457_v47 = vshll.u32 %v8363_v62, 16 }
 0x35a   : > { %13223 = vmatmul.mubr.bf16.gmra.mxu1 %v11968_v22  ;;  %v8446_v39 = vor.u32 %v8445_v25, %v8441_v40  ;;  %v17184_v45 = vcombine.low %v8418_v50, %v8428_v33  ;;  %v8437_v61 = vrot.slane %v8436_v20, 4  ;;  %v17188_v22 = vsel %vm14657_vm14, %v12037_v52, %v9204_v21  ;;  %v13796_v50 = vld [vmem:[#allocation2 + $0xb4] sm:$0xff]   ;;  %v17203_v20 = vld [vmem:[#allocation2 + $0x50] sm:$0x1] }
 0x35b   : > { %13226 = vmatprep.mubr.bf16.mxu1 %v11969_v13  ;;  %13303 = vmatpush3.bf16.msra.mxu1 %v13801_v49  ;;  %v9206_v42 = vrot.slane %v9204_v21, 4  ;;  %v8366_v13 = vld [vmem:[#allocation2 + $0x30] sm:$0xf]  ;;  %v13794_v49 = vld [vmem:[#allocation2 + $0xa8] sm:$0xff]   ;;  %v8456_v8 = vrot.slane %v8454_v55, 4  ;;  %v8463_v24 = vshll.u32 %v17093_v29, 16 }
 0x35c   : > { %13304 = vmatprep.subr.bf16.mxu1 %v13803_v34  ;;  %v8447_v59 = vrot.slane %v8446_v39, 4  ;;  %v8442_v51 = vsel %vm14318_vm11, %v8437_v61, %v8441_v40  ;;  %v8467_v4 = vshrl.u32 %v17093_v29, 16  ;;  %v8473_v25 = vshll.u32 %v17102_v35, 16 }
 0x35d   : > { %v17199_v52 = vsel %vm14657_vm14, %v9206_v42, %v9207_v56  ;;  %v8459_v33 = vrot.slane %v8457_v47, 5  ;;  %v8465_v40 = vrot.slane %v8463_v24, 5  ;;  %v12038_v35 = vrot.slane %v9115_v7, 9  ;;  %v9116_v24 = vld [vmem:[#allocation2 + $0x54] sm:$0xe] }
 0x35e   : > { %13283 = vmatmul.mubr.bf16.gmra.mxu0 %v13794_v49  ;;  %v8452_v62 = vsel %vm14318_vm11, %v8447_v59, %v8451_v31  ;;  %v12053_v21 = vcombine.low %v17188_v22, %v17199_v52  ;;  %v8469_v29 = vrot.slane %v8467_v4, 4  ;;  %v8475_v56 = vrot.slane %v8473_v25, 5  ;;  %v17228_v25 = vld [vmem:[#allocation2 + $0x5c] sm:$0x1] }
 0x35f   : > { %13305 = vmatpush3.bf16.msra.mxu1 %v13803_v34  ;;  %13286 = vmatprep.mubr.bf16.mxu0 %v13796_v50  ;;  %v17209_v39 = vcombine.low %v8442_v51, %v8452_v62  ;;  %v8460_v55 = vor.u32 %v8459_v33, %v8456_v8  ;;  %v9211_v61 = vrot.slane %v17192_v54, 5  ;;  %v9214_v34 = vrot.slane %v17203_v20, 5  ;;  %v8369_v33 = vld [vmem:[#allocation2 + $0x3c] sm:$0xf] }
 0x360   : > { %13386 = vmatprep.subr.bf16.mxu1 %v17190_v36  ;;  %v8478_v42 = vshrl.u32 %v8366_v13, 16  ;;  %v8470_v31 = vor.u32 %v8469_v29, %v8465_v40  ;;  %v8481_v49 = vshll.u32 %v8366_v13, 16  ;;  %v8487_v59 = vshll.u32 %v17132_v10, 16 }
 0x361   : > { %v8491_v47 = vshrl.u32 %v17132_v10, 16  ;;  %v8461_v7 = vrot.slane %v8460_v55, 4  ;;  %v17224_v8 = vsel %vm14657_vm14, %v12038_v35, %v9211_v61  ;;  %v9213_v50 = vrot.slane %v9211_v61, 4  ;;  %v13799_v10 = vld [vmem:[#allocation2 + $0xc0] sm:$0xff]  }
 0x362   : > { %13227 = vmatmul.mubr.bf16.gmra.mxu1 %v11970_v48  ;;  %v8480_v51 = vrot.slane %v8478_v42, 4  ;;  %v8471_v9 = vrot.slane %v8470_v31, 4  ;;  %v8483_v48 = vrot.slane %v8481_v49, 5  ;;  %v8489_v13 = vrot.slane %v8487_v59, 5 }
 0x363   : > { %13230 = vmatprep.mubr.bf16.mxu1 %v11971_v53  ;;  %v8493_v4 = vrot.slane %v8491_v47, 4  ;;  %v8466_v23 = vsel %vm14318_vm11, %v8461_v7, %v8465_v40  ;;  %v17234_v6 = vsel %vm14657_vm14, %v9213_v50, %v9214_v34  ;;  %v8497_v53 = vshll.u32 %v17140_v58, 16  ;;  %v8372_v47 = vld [vmem:[#allocation2 + $0x48] sm:$0xf] }
 0x364   : > { %v12039_v62 = vrot.slane %v9116_v24, 9  ;;  %v8476_v29 = vsel %vm14318_vm11, %v8471_v9, %v8475_v56  ;;  %v12054_v35 = vcombine.low %v17224_v8, %v17234_v6  ;;  %v8484_v55 = vor.u32 %v8483_v48, %v8480_v51  ;;  %v9117_v9 = vld [vmem:[#allocation2 + $0x60] sm:$0xe]  ;;  %v17385_v8 = vld [vmem:[#allocation2 + $0x94] sm:$0xf] }
 0x365   : > { %v8494_v61 = vor.u32 %v8493_v4, %v8489_v13  ;;  %v17241_v42 = vcombine.low %v8466_v23, %v8476_v29  ;;  %v8499_v40 = vrot.slane %v8497_v53, 5  ;;  %v9218_v31 = vrot.slane %v17226_v11, 5  ;;  %v17261_v4 = vld [vmem:[#allocation2 + $0x64] sm:$0xf] }
 0x366   : > { %13287 = vmatmul.mubr.bf16.gmra.mxu0 %v13799_v10  ;;  %v9221_v34 = vrot.slane %v17228_v25, 5  ;;  %v8485_v58 = vrot.slane %v8484_v55, 4  ;;  %v8502_v56 = vshrl.u32 %v8369_v33, 16  ;;  %v8505_v59 = vshll.u32 %v8369_v33, 16  ;;  %v17263_v10 = vld [vmem:[#allocation2 + $0x68] sm:$0x1] }
 0x367   : > { %13354 = vmatprep.mubr.bf16.mxu0 %v12049_v1  ;;  %v8495_v49 = vrot.slane %v8494_v61, 4  ;;  %v17250_v24 = vsel %vm14657_vm14, %v12039_v62, %v9218_v31  ;;  %v9220_v7 = vrot.slane %v9218_v31, 4  ;;  %v8511_v50 = vshll.u32 %v17161_v3, 16  ;;  %v13809_v61 = vld [vmem:[#allocation8 + $0x1f0] sm:$0xff]  }
 0x368   : > { %v8515_v51 = vshrl.u32 %v17161_v3, 16  ;;  %v8490_v14 = vsel %vm14318_vm11, %v8485_v58, %v8489_v13  ;;  %v8504_v1 = vrot.slane %v8502_v56, 4  ;;  %v8507_v48 = vrot.slane %v8505_v59, 5  ;;  %v8375_v56 = vld [vmem:[#allocation2 + $0x54] sm:$0xf] }
 0x369   : > { %v8500_v57 = vsel %vm14318_vm11, %v8495_v49, %v8499_v40  ;;  %v19171_v3 = vcombine.low %v17044_v63, %v17056_v43  ;;  %v17272_v27 = vsel %vm14657_vm14, %v9220_v7, %v9221_v34  ;;  %v8513_v12 = vrot.slane %v8511_v50, 5  ;;  %v9118_v49 = vld [vmem:[#allocation2 + $0x6c] sm:$0xe] }
 0x36a   : > { %13231 = vmatmul.mubr.bf16.gmra.mxu1 %v11972_v38  ;;  %v17268_v23 = vcombine.low %v8490_v14, %v8500_v57  ;;  %v8517_v38 = vrot.slane %v8515_v51, 4  ;;  %v12055_v13 = vcombine.low %v17250_v24, %v17272_v27  ;;  %v8508_v53 = vor.u32 %v8507_v48, %v8504_v1 }
 0x36b   : > { %13234 = vmatprep.mubr.bf16.mxu1 %v19171_v3  ;;  %v8521_v62 = vshll.u32 %v17170_v37, 16  ;;  %v12040_v33 = vrot.slane %v9117_v9, 9  ;;  %v9225_v55 = vrot.slane %v17261_v4, 5  ;;  %v9228_v63 = vrot.slane %v17263_v10, 5  ;;  %v17287_v9 = vld [vmem:[#allocation2 + $0x70] sm:$0xf] }
 0x36c   : > { %v8518_v29 = vor.u32 %v8517_v38, %v8513_v12  ;;  %v8526_v43 = vshrl.u32 %v8372_v47, 16  ;;  %v8509_v40 = vrot.slane %v8508_v53, 4  ;;  %v8529_v34 = vshll.u32 %v8372_v47, 16 }
 0x36d   : > { %v8523_v31 = vrot.slane %v8521_v62, 5  ;;  %v8535_v58 = vshll.u32 %v17192_v54, 16  ;;  %v19172_v59 = vcombine.low %v17108_v44, %v17119_v18  ;;  %v17285_v7 = vsel %vm14657_vm14, %v12040_v33, %v9225_v55  ;;  %v17295_v18 = vld [vmem:[#allocation2 + $0x74] sm:$0x1] }
 0x36e   : > { %v8519_v37 = vrot.slane %v8518_v29, 4  ;;  %v9227_v50 = vrot.slane %v9225_v55, 4  ;;  %v8528_v51 = vrot.slane %v8526_v43, 4  ;;  %v19173_v47 = vcombine.low %v17130_v32, %v17147_v0 }
 0x36f   : > { %13355 = vmatmul.mubr.bf16.vlgmr.msra.gmra.mxu0 %v19172_v59  ;;  %v8514_v14 = vsel %vm14318_vm11, %v8509_v40, %v8513_v12  ;;  %v8531_v57 = vrot.slane %v8529_v34, 5  ;;  %v8537_v1 = vrot.slane %v8535_v58, 5  ;;  %v8539_v44 = vshrl.u32 %v17192_v54, 16  ;;  %v13810_v12 = vld [vmem:[#allocation8 + $0x1e8] sm:$0xff]   ;;  %v13812_v59 = vld [vmem:[#allocation8 + $0x1e0] sm:$0xff]  }
 0x370   : > { %13358 = vmatprep.mubr.bf16.mxu0 %v19173_v47  ;;  %13435 = vmatpush3.bf16.msra.mxu0 %v17075_v30  ;;  %v8524_v48 = vsel %vm14318_vm11, %v8519_v37, %v8523_v31  ;;  %v17302_v3 = vsel %vm14657_vm14, %v9227_v50, %v9228_v63  ;;  %v8545_v32 = vshll.u32 %v17203_v20, 16  ;;  %v12041_v0 = vrot.slane %v9118_v49, 9  ;;  %v9119_v31 = vld [vmem:[#allocation2 + $0x78] sm:$0xe]  ;;  %v17323_v49 = vld [vmem:[#allocation2 + $0x7c] sm:$0xf] }
 0x371   : > { %13436 = vmatprep.subr.bf16.mxu0 %v13809_v61  ;;  %v19174_v38 = vcombine.low %v17049_v17, %v17069_v41  ;;  %v17308_v54 = vcombine.low %v8514_v14, %v8524_v48  ;;  %v12056_v30 = vcombine.low %v17285_v7, %v17302_v3  ;;  %v8532_v53 = vor.u32 %v8531_v57, %v8528_v51  ;;  %v17327_v47 = vld [vmem:[#allocation2 + $0x80] sm:$0x1] }
 0x372   : > { %v8541_v62 = vrot.slane %v8539_v44, 4  ;;  %v19175_v33 = vcombine.low %v17084_v16, %v17099_v19  ;;  %v8547_v29 = vrot.slane %v8545_v32, 5  ;;  %v9232_v20 = vrot.slane %v17287_v9, 5  ;;  %v8378_v44 = vld [vmem:[#allocation2 + $0x60] sm:$0xf] }
 0x373   : > { %13235 = vmatmul.mubr.bf16.gmra.mxu1 %v19174_v38  ;;  %v9235_v55 = vrot.slane %v17295_v18, 5  ;;  %v8550_v63 = vshrl.u32 %v8375_v56, 16  ;;  %v8533_v43 = vrot.slane %v8532_v53, 4  ;;  %v8553_v41 = vshll.u32 %v8375_v56, 16  ;;  %v13813_v38 = vld [vmem:[#allocation8 + $0x1d8] sm:$0xff]  }
 0x374   : > { %13238 = vmatprep.mubr.bf16.mxu1 %v19175_v33  ;;  %v8542_v17 = vor.u32 %v8541_v62, %v8537_v1  ;;  %v8559_v40 = vshll.u32 %v17226_v11, 16  ;;  %13437 = vmatpush3.bf16.msra.mxu0 %v13809_v61  ;;  %v17320_v34 = vsel %vm14657_vm14, %v12041_v0, %v9232_v20  ;;  %v9234_v58 = vrot.slane %v9232_v20, 4 }
 0x375   : > { %v8552_v16 = vrot.slane %v8550_v63, 4  ;;  %v8563_v19 = vshrl.u32 %v17226_v11, 16  ;;  %13438 = vmatprep.subr.bf16.mxu0 %v13810_v12  ;;  %v8538_v37 = vsel %vm14318_vm11, %v8533_v43, %v8537_v1  ;;  %v8555_v50 = vrot.slane %v8553_v41, 5  ;;  %v8381_v63 = vld [vmem:[#allocation2 + $0x6c] sm:$0xf] }
 0x376   : > { %v8543_v56 = vrot.slane %v8542_v17, 4  ;;  %v8561_v51 = vrot.slane %v8559_v40, 5  ;;  %v17334_v61 = vsel %vm14657_vm14, %v9234_v58, %v9235_v55  ;;  %v8569_v14 = vshll.u32 %v17228_v25, 16  ;;  %v17365_v41 = vld [vmem:[#allocation2 + $0x88] sm:$0xf] }
 0x377   : > { %13359 = vmatmul.mubr.bf16.gmra.mxu0 %v12052_v60  ;;  %v8565_v11 = vrot.slane %v8563_v19, 4  ;;  %v12042_v57 = vrot.slane %v9119_v31, 9  ;;  %v12057_v46 = vcombine.low %v17320_v34, %v17334_v61  ;;  %v8556_v2 = vor.u32 %v8555_v50, %v8552_v16  ;;  %v13815_v16 = vld [vmem:[#allocation8 + $0x1d0] sm:$0xff]  }
 0x378   : > { %13362 = vmatprep.mubr.bf16.mxu0 %v12053_v21  ;;  %v8548_v1 = vsel %vm14318_vm11, %v8543_v56, %v8547_v29  ;;  %v9239_v60 = vrot.slane %v17323_v49, 5  ;;  %13439 = vmatpush3.bf16.msra.mxu0 %v13810_v12  ;;  %v8571_v25 = vrot.slane %v8569_v14, 5  ;;  %v9242_v0 = vrot.slane %v17327_v47, 5  ;;  %v9120_v12 = vld [vmem:[#allocation2 + $0x84] sm:$0xe] }
 0x379   : > { %v17345_v48 = vcombine.low %v8538_v37, %v8548_v1  ;;  %v8566_v32 = vor.u32 %v8565_v11, %v8561_v51  ;;  %13440 = vmatprep.subr.bf16.mxu0 %v13812_v59  ;;  %v19176_v22 = vcombine.low %v17114_v28, %v17126_v5  ;;  %v8557_v52 = vrot.slane %v8556_v2, 4  ;;  %v9121_v14 = vld [vmem:[#allocation2 + $0x90] sm:$0xe] }
 0x37a   : > { %v17353_v21 = vsel %vm14657_vm14, %v12042_v57, %v9239_v60  ;;  %v9241_v53 = vrot.slane %v9239_v60, 4  ;;  %v8574_v62 = vshrl.u32 %v8378_v44, 16  ;;  %v8577_v29 = vshll.u32 %v8378_v44, 16  ;;  %v13805_v57 = vld [vmem:[#allocation8 + $0x1b0] sm:$0xff]  }
 0x37b   : > { %13239 = vmatmul.mubr.bf16.gmra.mxu1 %v19176_v22  ;;  %v8567_v33 = vrot.slane %v8566_v32, 4  ;;  %v8583_v20 = vshll.u32 %v17261_v4, 16  ;;  %v8587_v55 = vshrl.u32 %v17261_v4, 16  ;;  %v8562_v28 = vsel %vm14318_vm11, %v8557_v52, %v8561_v51 }
 0x37c   : > { %13306 = vmatprep.mubr.bf16.mxu1 %v17184_v45  ;;  %v17362_v5 = vsel %vm14657_vm14, %v9241_v53, %v9242_v0  ;;  %v8576_v43 = vrot.slane %v8574_v62, 4  ;;  %v8593_v17 = vshll.u32 %v17263_v10, 16  ;;  %v17367_v45 = vld [vmem:[#allocation2 + $0x8c] sm:$0x1]  ;;  %13441 = vmatpush3.bf16.msra.mxu0 %v13812_v59  ;;  %v8579_v31 = vrot.slane %v8577_v29, 5 }
 0x37d   : > { %v8572_v40 = vsel %vm14318_vm11, %v8567_v33, %v8571_v25  ;;  %v12058_v4 = vcombine.low %v17353_v21, %v17362_v5  ;;  %v8585_v58 = vrot.slane %v8583_v20, 5  ;;  %13442 = vmatprep.subr.bf16.mxu0 %v13813_v38  ;;  %v8589_v37 = vrot.slane %v8587_v55, 4  ;;  %v17391_v0 = vld [vmem:[#allocation2 + $0x98] sm:$0x1] }
 0x37e   : > { %v17373_v19 = vcombine.low %v8562_v28, %v8572_v40  ;;  %v8595_v56 = vrot.slane %v8593_v17, 5  ;;  %v12043_v10 = vrot.slane %v9120_v12, 9  ;;  %v8580_v59 = vor.u32 %v8579_v31, %v8576_v43  ;;  %v13806_v12 = vld [vmem:[#allocation8 + $0x1a8] sm:$0xff]  }
 0x37f   : > { %13363 = vmatmul.mubr.bf16.gmra.mxu0 %v12054_v35  ;;  %v9246_v50 = vrot.slane %v17365_v41, 5  ;;  %v9249_v51 = vrot.slane %v17367_v45, 5  ;;  %v8598_v11 = vshrl.u32 %v8381_v63, 16  ;;  %v8590_v44 = vor.u32 %v8589_v37, %v8585_v58  ;;  %v8387_v31 = vld [vmem:[#allocation2 + $0x84] sm:$0xf]  ;;  %v13808_v37 = vld [vmem:[#allocation8 + $0x1a0] sm:$0xff]  }
 0x380   : > { %13366 = vmatprep.mubr.bf16.mxu0 %v12055_v13  ;;  %v8601_v1 = vshll.u32 %v8381_v63, 16  ;;  %v8607_v2 = vshll.u32 %v17287_v9, 16  ;;  %v8611_v60 = vshrl.u32 %v17287_v9, 16  ;;  %13443 = vmatpush3.bf16.msra.mxu0 %v13813_v38  ;;  %v8581_v6 = vrot.slane %v8580_v59, 4  ;;  %v13816_v9 = vld [vmem:[#allocation8 + $0x1c8] sm:$0xff]  }
 0x381   : > { %v17389_v35 = vsel %vm14657_vm14, %v12043_v10, %v9246_v50  ;;  %v9248_v32 = vrot.slane %v9246_v50, 4  ;;  %v8600_v25 = vrot.slane %v8598_v11, 4  ;;  %13444 = vmatprep.subr.bf16.mxu0 %v13815_v16  ;;  %v8591_v24 = vrot.slane %v8590_v44, 4  ;;  %v9122_v50 = vld [vmem:[#allocation2 + $0x9c] sm:$0xe] }
 0x382   : > { %v8603_v27 = vrot.slane %v8601_v1, 5  ;;  %v8609_v13 = vrot.slane %v8607_v2, 5  ;;  %v8613_v22 = vrot.slane %v8611_v60, 4  ;;  %v8586_v38 = vsel %vm14318_vm11, %v8581_v6, %v8585_v58  ;;  %v13818_v58 = vld [vmem:[#allocation8 + $0x1c0] sm:$0xff]   ;;  %v17427_v11 = vld [vmem:[#allocation2 + $0xa0] sm:$0xf] }
 0x383   : > { %13307 = vmatmul.mubr.bf16.vlgmr.msra.gmra.mxu1 %v17209_v39  ;;  %v17400_v52 = vsel %vm14657_vm14, %v9248_v32, %v9249_v51  ;;  %v8617_v53 = vshll.u32 %v17295_v18, 16  ;;  %v12044_v62 = vrot.slane %v9121_v14, 9  ;;  %v8384_v39 = vld [vmem:[#allocation2 + $0x78] sm:$0xf]  ;;  %v8596_v33 = vsel %vm14318_vm11, %v8591_v24, %v8595_v56  ;;  %v17429_v14 = vld [vmem:[#allocation2 + $0xa4] sm:$0x1] }
 0x384   : > { %13310 = vmatprep.mubr.bf16.mxu1 %v17241_v42  ;;  %13387 = vmatpush3.bf16.msra.mxu1 %v17190_v36  ;;  %v12059_v42 = vcombine.low %v17389_v35, %v17400_v52  ;;  %v8604_v36 = vor.u32 %v8603_v27, %v8600_v25  ;;  %v8614_v29 = vor.u32 %v8613_v22, %v8609_v13  ;;  %v9253_v63 = vrot.slane %v17385_v8, 5  ;;  %v9123_v27 = vld [vmem:[#allocation2 + $0xa8] sm:$0xe]  ;;  %v13811_v22 = vld [vmem:[#allocation8 + $0x198] sm:$0xff]  }
 0x385   : > { %13388 = vmatprep.subr.bf16.mxu1 %v13805_v57  ;;  %v17407_v20 = vcombine.low %v8586_v38, %v8596_v33  ;;  %v8619_v55 = vrot.slane %v8617_v53, 5  ;;  %v9256_v28 = vrot.slane %v17391_v0, 5  ;;  %13445 = vmatpush3.bf16.msra.mxu0 %v13815_v16  ;;  %v8622_v17 = vshrl.u32 %v8384_v39, 16  ;;  %v17453_v33 = vld [vmem:[#allocation2 + $0xac] sm:$0xf] }
 0x386   : > { %v8605_v18 = vrot.slane %v8604_v36, 4  ;;  %v8615_v43 = vrot.slane %v8614_v29, 4  ;;  %v8625_v40 = vshll.u32 %v8384_v39, 16  ;;  %13446 = vmatprep.subr.bf16.mxu0 %v13816_v9  ;;  %v17416_v56 = vsel %vm14657_vm14, %v12044_v62, %v9253_v63 }
 0x387   : > { %13367 = vmatmul.mubr.bf16.gmra.mxu0 %v12056_v30  ;;  %v9255_v10 = vrot.slane %v9253_v63, 4  ;;  %v8631_v16 = vshll.u32 %v17323_v49, 16  ;;  %v8635_v59 = vshrl.u32 %v17323_v49, 16  ;;  %v8624_v30 = vrot.slane %v8622_v17, 4 }
 0x388   : > { %13389 = vmatpush3.bf16.msra.mxu1 %v13805_v57  ;;  %13370 = vmatprep.mubr.bf16.mxu0 %v12057_v46  ;;  %v8610_v7 = vsel %vm14318_vm11, %v8605_v18, %v8609_v13  ;;  %v8620_v3 = vsel %vm14318_vm11, %v8615_v43, %v8619_v55  ;;  %v8627_v51 = vrot.slane %v8625_v40, 5  ;;  %v17431_v57 = vpop.f32.mrf.mxu0  ;;  %v8641_v2 = vshll.u32 %v17327_v47, 16  ;;  %v8390_v47 = vld [vmem:[#allocation2 + $0x90] sm:$0xf] }
 0x389   : > { %13390 = vmatprep.subr.bf16.mxu1 %v13806_v12  ;;  %v17433_v49 = vcombine.low %v8610_v7, %v8620_v3  ;;  %v17437_v34 = vsel %vm14657_vm14, %v9255_v10, %v9256_v28  ;;  %v8633_v61 = vrot.slane %v8631_v16, 5  ;;  %v8637_v46 = vrot.slane %v8635_v59, 4  ;;  %13447 = vmatpush3.bf16.msra.mxu0 %v13816_v9  ;;  %v17458_v28 = vld [vmem:[#allocation2 + $0xb0] sm:$0x1] }
 0x38a   : > { %v12060_v44 = vcombine.low %v17416_v56, %v17437_v34  ;;  %v8628_v1 = vor.u32 %v8627_v51, %v8624_v30  ;;  %v12045_v60 = vrot.slane %v9122_v50, 9  ;;  %13448 = vmatprep.subr.bf16.mxu0 %v13818_v58  ;;  %v9260_v32 = vrot.slane %v17427_v11, 5  ;;  %v17447_v53 = vpop.f32.mrf.mxu0  ;;  %v9124_v50 = vld [vmem:[#allocation2 + $0xb4] sm:$0xe] }
 0x38b   : > { %13311 = vmatmul.mubr.bf16.gmra.mxu1 %v17268_v23  ;;  %v8638_v6 = vor.u32 %v8637_v46, %v8633_v61  ;;  %v9263_v25 = vrot.slane %v17429_v14, 5  ;;  %v8646_v24 = vshrl.u32 %v8387_v31, 16  ;;  %v8643_v13 = vrot.slane %v8641_v2, 5 }
 0x38c   : > { %13314 = vmatprep.mubr.bf16.mxu1 %v17308_v54  ;;  %13391 = vmatpush3.bf16.msra.mxu1 %v13806_v12  ;;  %v8629_v23 = vrot.slane %v8628_v1, 4  ;;  %v8649_v9 = vshll.u32 %v8387_v31, 16  ;;  %v8655_v38 = vshll.u32 %v17365_v41, 16  ;;  %v17451_v54 = vsel %vm14657_vm14, %v12045_v60, %v9260_v32  ;;  %v17490_v60 = vld [vmem:[#allocation2 + $0xbc] sm:$0x1] }
 0x38d   : > { %13392 = vmatprep.subr.bf16.mxu1 %v13808_v37  ;;  %v8639_v62 = vrot.slane %v8638_v6, 4  ;;  %v9262_v39 = vrot.slane %v9260_v32, 4  ;;  %v8648_v12 = vrot.slane %v8646_v24, 4  ;;  %13449 = vmatpush3.bf16.msra.mxu0 %v13818_v58  ;;  %v8659_v63 = vshrl.u32 %v17365_v41, 16  ;;  %v17474_v58 = vpop.f32.mrf.mxu0 }
 0x38e   : > { %v8634_v36 = vsel %vm14318_vm11, %v8629_v23, %v8633_v61  ;;  %v8651_v29 = vrot.slane %v8649_v9, 5  ;;  %v8657_v55 = vrot.slane %v8655_v38, 5  ;;  %v8665_v17 = vshll.u32 %v17367_v45, 16  ;;  %v17486_v61 = vld [vmem:[#allocation2 + $0xb8] sm:$0xf] }
 0x38f   : > { %13371 = vmatmul.mubr.bf16.gmra.mxu0 %v12058_v4  ;;  %v8644_v18 = vsel %vm14318_vm11, %v8639_v62, %v8643_v13  ;;  %v9264_v43 = vsel %vm14657_vm14, %v9262_v39, %v9263_v25  ;;  %v12046_v40 = vrot.slane %v9123_v27, 9  ;;  %v8661_v5 = vrot.slane %v8659_v63, 4  ;;  %v13814_v4 = vld [vmem:[#allocation8 + $0x190] sm:$0xff]   ;;  %v17492_v6 = vpop.f32.mrf.mxu0  ;;  %v8393_v27 = vld [vmem:[#allocation2 + $0x9c] sm:$0xf] }
 0x390   : > { %13393 = vmatpush3.bf16.msra.mxu1 %v13808_v37  ;;  %13374 = vmatprep.mubr.bf16.mxu0 %v12059_v42  ;;  %v17471_v41 = vcombine.low %v8634_v36, %v8644_v18  ;;  %v12061_v31 = vcombine.low %v17451_v54, %v9264_v43  ;;  %v8652_v21 = vor.u32 %v8651_v29, %v8648_v12  ;;  %v8667_v37 = vrot.slane %v8665_v17, 5  ;;  %v9125_v29 = vld [vmem:[#allocation2 + $0xc0] sm:$0xe]  ;;  %v8396_v43 = vld [vmem:[#allocation2 + $0xa8] sm:$0xf] }
 0x391   : > { %13394 = vmatprep.subr.bf16.mxu1 %v13811_v22  ;;  %v9267_v10 = vrot.slane %v17453_v33, 5  ;;  %v9270_v45 = vrot.slane %v17458_v28, 5  ;;  %v8670_v16 = vshrl.u32 %v8390_v47, 16  ;;  %v8662_v52 = vor.u32 %v8661_v5, %v8657_v55  ;;  %v17509_v63 = vpop.f32.mrf.mxu0  ;;  %v17519_v5 = vld [vmem:[#allocation2 + $0xc4] sm:$0xf] }
 0x392   : > { %v8653_v35 = vrot.slane %v8652_v21, 4  ;;  %v8673_v42 = vshll.u32 %v8390_v47, 16  ;;  %v8679_v59 = vshll.u32 %v17385_v8, 16  ;;  %v8683_v51 = vshrl.u32 %v17385_v8, 16 }
 0x393   : > { %13315 = vmatmul.mubr.bf16.gmra.mxu1 %v17345_v48  ;;  %v17483_v7 = vsel %vm14657_vm14, %v12046_v40, %v9267_v10  ;;  %v9269_v3 = vrot.slane %v9267_v10, 4  ;;  %v8672_v30 = vrot.slane %v8670_v16, 4  ;;  %v8663_v46 = vrot.slane %v8662_v52, 4 }
 0x394   : > { %13318 = vmatprep.mubr.bf16.mxu1 %v17373_v19  ;;  %13395 = vmatpush3.bf16.msra.mxu1 %v13811_v22  ;;  %v8658_v48 = vsel %vm14318_vm11, %v8653_v35, %v8657_v55  ;;  %v8675_v1 = vrot.slane %v8673_v42, 5  ;;  %v8681_v2 = vrot.slane %v8679_v59, 5  ;;  %v13817_v19 = vld [vmem:[#allocation8 + $0x188] sm:$0xff]   ;;  %v8685_v25 = vrot.slane %v8683_v51, 4  ;;  %v13819_v55 = vld [vmem:[#allocation8 + $0x180] sm:$0xff]   ;;  %v17530_v42 = vpop.f32.mrf.mxu0 }
 0x395   : > { %13396 = vmatprep.subr.bf16.mxu1 %v13814_v4  ;;  %v9271_v32 = vsel %vm14657_vm14, %v9269_v3, %v9270_v45  ;;  %v8689_v8 = vshll.u32 %v17391_v0, 16  ;;  %v12047_v24 = vrot.slane %v9124_v50, 9  ;;  %v8668_v23 = vsel %vm14318_vm11, %v8663_v46, %v8667_v37  ;;  %v9992_v46 = vld [vmem:[#allocation2 + $0x18] sm:$0xf] }
 0x396   : > { %v12062_v13 = vcombine.low %v17483_v7, %v9271_v32  ;;  %v8676_v22 = vor.u32 %v8675_v1, %v8672_v30  ;;  %v9274_v9 = vrot.slane %v17486_v61, 5  ;;  %v17504_v38 = vcombine.low %v8658_v48, %v8668_v23  ;;  %v17539_v23 = vpop.f32.mrf.mxu0 }
 0x397   : > { %13375 = vmatmul.mubr.bf16.gmra.mxu0 %v12060_v44  ;;  %v8686_v47 = vor.u32 %v8685_v25, %v8681_v2  ;;  %v8691_v62 = vrot.slane %v8689_v8, 5  ;;  %v9277_v0 = vrot.slane %v17490_v60, 5  ;;  %v8694_v36 = vshrl.u32 %v8393_v27, 16 }
 0x398   : > { %13397 = vmatpush3.bf16.msra.mxu1 %v13814_v4  ;;  %13378 = vmatprep.mubr.bf16.mxu0 %v12061_v31  ;;  %v8677_v54 = vrot.slane %v8676_v22, 4  ;;  %v9275_v39 = vsel %vm14657_vm14, %v12047_v24, %v9274_v9  ;;  %v9276_v12 = vrot.slane %v9274_v9, 4  ;;  %v8697_v34 = vshll.u32 %v8393_v27, 16  ;;  %v17521_v4 = vld [vmem:[#allocation2 + $0xc8] sm:$0x1] }
 0x399   : > { %13398 = vmatprep.subr.bf16.mxu1 %v13817_v19  ;;  %v8687_v56 = vrot.slane %v8686_v47, 4  ;;  %v8703_v44 = vshll.u32 %v17427_v11, 16  ;;  %v8707_v18 = vshrl.u32 %v17427_v11, 16  ;;  %v8696_v31 = vrot.slane %v8694_v36, 4  ;;  %v17546_v9 = vld [vmem:[#allocation2 + $0x1c] sm:$0xf] }
 0x39a   : > { %v8682_v17 = vsel %vm14318_vm11, %v8677_v54, %v8681_v2  ;;  %v9278_v40 = vsel %vm14657_vm14, %v9276_v12, %v9277_v0  ;;  %v8713_v21 = vshll.u32 %v17429_v14, 16  ;;  %v12048_v52 = vrot.slane %v9125_v29, 9  ;;  %v17528_v14 = vld [vmem:[#allocation8 + $0x238] sm:$0xff]   ;;  %v17551_v12 = vld [vmem:[#allocation2 + $0x20] sm:$0x1] }
 0x39b   : > { %13319 = vmatmul.mubr.bf16.gmra.mxu1 %v17407_v20  ;;  %v8692_v11 = vsel %vm14318_vm11, %v8687_v56, %v8691_v62  ;;  %v12063_v37 = vcombine.low %v9275_v39, %v9278_v40  ;;  %v8699_v20 = vrot.slane %v8697_v34, 5  ;;  %v8705_v10 = vrot.slane %v8703_v44, 5  ;;  %v8399_v36 = vld [vmem:[#allocation2 + $0xb4] sm:$0xf] }
 0x39c   : > { %13322 = vmatprep.mubr.bf16.mxu1 %v17433_v49  ;;  %13399 = vmatpush3.bf16.msra.mxu1 %v13817_v19  ;;  %v17526_v45 = vcombine.low %v8682_v17, %v8692_v11  ;;  %v8709_v16 = vrot.slane %v8707_v18, 4  ;;  %v8715_v35 = vrot.slane %v8713_v21, 5  ;;  %v9281_v49 = vrot.slane %v17519_v5, 5  ;;  %v17558_v17 = vpop.f32.mrf.mxu0 }
 0x39d   : > { %13400 = vmatprep.subr.bf16.mxu1 %v13819_v55  ;;  %v8700_v59 = vor.u32 %v8699_v20, %v8696_v31  ;;  %v9284_v50 = vrot.slane %v17521_v4, 5  ;;  %v8718_v7 = vshrl.u32 %v8396_v43, 16  ;;  %v8721_v30 = vshll.u32 %v8396_v43, 16  ;;  %v17556_v43 = vpop.f32.mrf.mxu1  ;;  %19177 = vst [vmem:[#allocation23_spill] sm:$0xff] %v17558_v17 }
 0x39e   : > { %v8710_v3 = vor.u32 %v8709_v16, %v8705_v10  ;;  %v8727_v51 = vshll.u32 %v17453_v33, 16  ;;  %v8731_v48 = vshrl.u32 %v17453_v33, 16  ;;  %v9282_v2 = vsel %vm14657_vm14, %v12048_v52, %v9281_v49  ;;  %v9995_v16 = vld [vmem:[#allocation2 + $0x24] sm:$0xf] }
 0x39f   : > { %13379 = vmatmul.mubr.bf16.gmra.mxu0 %v12062_v13  ;;  %v8701_v1 = vrot.slane %v8700_v59, 4  ;;  %v9283_v19 = vrot.slane %v9281_v49, 4  ;;  %v8720_v32 = vrot.slane %v8718_v7, 4  ;;  %v8723_v8 = vrot.slane %v8721_v30, 5 }
 0x3a0   : > { %13401 = vmatpush3.bf16.msra.mxu1 %v13819_v55  ;;  %13382 = vmatprep.mubr.bf16.mxu0 %v12063_v37  ;;  %v8711_v25 = vrot.slane %v8710_v3, 4  ;;  %v8729_v24 = vrot.slane %v8727_v51, 5  ;;  %v8733_v27 = vrot.slane %v8731_v48, 4  ;;  %v8737_v22 = vshll.u32 %v17458_v28, 16  ;;  %v17567_v51 = vpop.f32.mrf.mxu1 }
 0x3a1   : > { %13482 = vmatprep.subr.bf16.mxu1 %v17528_v14  ;;  %v8706_v33 = vsel %vm14318_vm11, %v8701_v1, %v8705_v10  ;;  %v9285_v13 = vsel %vm14657_vm14, %v9283_v19, %v9284_v50  ;;  %v10041_v47 = vshrl.u32 %v9992_v46, 16  ;;  %v8724_v54 = vor.u32 %v8723_v8, %v8720_v32 }
 0x3a2   : > { %v8716_v62 = vsel %vm14318_vm11, %v8711_v25, %v8715_v35  ;;  %v12064_v0 = vcombine.low %v9282_v2, %v9285_v13  ;;  %v8734_v39 = vor.u32 %v8733_v27, %v8729_v24  ;;  %v8739_v55 = vrot.slane %v8737_v22, 5  ;;  %v17569_v48 = vpop.f32.mrf.mxu0  ;;  %v17572_v2 = vld [vmem:[#allocation2 + $0x28] sm:$0xf] }
 0x3a3   : > { %13323 = vmatmul.mubr.bf16.gmra.mxu1 %v17471_v41  ;;  %v12021_v29 = vcombine.low %v8706_v33, %v8716_v62  ;;  %v10043_v56 = vrot.slane %v10041_v47, 4  ;;  %v10044_v28 = vshll.u32 %v9992_v46, 16  ;;  %v8725_v34 = vrot.slane %v8724_v54, 4  ;;  %v17575_v33 = vld [vmem:[#allocation2 + $0x2c] sm:$0x1] }
 0x3a4   : > { %13326 = vmatprep.mubr.bf16.mxu1 %v17504_v38  ;;  %v8735_v44 = vrot.slane %v8734_v39, 4  ;;  %v10050_v18 = vshll.u32 %v17546_v9, 16  ;;  %v10054_v41 = vshrl.u32 %v17546_v9, 16  ;;  %v10060_v31 = vshll.u32 %v17551_v12, 16  ;;  %v17582_v39 = vpop.f32.mrf.mxu1 }
 0x3a5   : > { %v10046_v40 = vrot.slane %v10044_v28, 5  ;;  %v8742_v21 = vshrl.u32 %v8399_v36, 16  ;;  %v8745_v11 = vshll.u32 %v8399_v36, 16  ;;  %v8730_v38 = vsel %vm14318_vm11, %v8725_v34, %v8729_v24  ;;  %v17584_v36 = vpop.f32.mrf.mxu0 }
 0x3a6   : > { %v8740_v37 = vsel %vm14318_vm11, %v8735_v44, %v8739_v55  ;;  %v10052_v20 = vrot.slane %v10050_v18, 5  ;;  %v10056_v10 = vrot.slane %v10054_v41, 4  ;;  %v10062_v59 = vrot.slane %v10060_v31, 5 }
 0x3a7   : > { %13383 = vmatmul.mubr.bf16.gmra.mxu0 %v12064_v0  ;;  %v12022_v35 = vcombine.low %v8730_v38, %v8740_v37  ;;  %v10047_v52 = vor.u32 %v10046_v40, %v10043_v56  ;;  %v8744_v49 = vrot.slane %v8742_v21, 4  ;;  %v8747_v7 = vrot.slane %v8745_v11, 5  ;;  %v9998_v38 = vld [vmem:[#allocation2 + $0x30] sm:$0xf] }
 0x3a8   : > { %v10057_v50 = vor.u32 %v10056_v10, %v10052_v20  ;;  %v8751_v3 = vshll.u32 %v17486_v61, 16  ;;  %v8755_v30 = vshrl.u32 %v17486_v61, 16  ;;  %v8761_v1 = vshll.u32 %v17490_v60, 16  ;;  %v8402_v60 = vld [vmem:[#allocation2 + $0xc0] sm:$0xf] }
 0x3a9   : > { %v10048_v46 = vrot.slane %v10047_v52, 4  ;;  %v10065_v19 = vshrl.u32 %v9995_v16, 16  ;;  %v10068_v32 = vshll.u32 %v9995_v16, 16  ;;  %v8748_v8 = vor.u32 %v8747_v7, %v8744_v49  ;;  %v17594_v52 = vld [vmem:[#allocation2 + $0x34] sm:$0xf]  ;;  %v17598_v49 = vpop.f32.mrf.mxu0 }
 0x3aa   : > { %v10058_v25 = vrot.slane %v10057_v50, 4  ;;  %v8753_v24 = vrot.slane %v8751_v3, 5  ;;  %v8757_v27 = vrot.slane %v8755_v30, 4  ;;  %v8763_v13 = vrot.slane %v8761_v1, 5 }
 0x3ab   : > { %13327 = vmatmul.mubr.bf16.gmra.mxu1 %v17526_v45  ;;  %v10053_v61 = vsel %vm14318_vm11, %v10048_v46, %v10052_v20  ;;  %v10067_v22 = vrot.slane %v10065_v19, 4  ;;  %v10070_v47 = vrot.slane %v10068_v32, 5  ;;  %v8749_v0 = vrot.slane %v8748_v8, 4  ;;  %v17603_v8 = vld [vmem:[#allocation2 + $0x38] sm:$0x1] }
 0x3ac   : > { %13330 = vmatprep.mubr.bf16.mxu1 %v12021_v29  ;;  %v10063_v62 = vsel %vm14318_vm11, %v10058_v25, %v10062_v59  ;;  %v8758_v54 = vor.u32 %v8757_v27, %v8753_v24  ;;  %v10074_v45 = vshll.u32 %v17572_v2, 16  ;;  %v10078_v56 = vshrl.u32 %v17572_v2, 16  ;;  %v17596_v59 = vpop.f32.mrf.mxu1 }
 0x3ad   : > { %v12097_v55 = vcombine.low %v10053_v61, %v10063_v62  ;;  %v10071_v29 = vor.u32 %v10070_v47, %v10067_v22  ;;  %v10084_v28 = vshll.u32 %v17575_v33, 16  ;;  %v8754_v34 = vsel %vm14318_vm11, %v8749_v0, %v8753_v24  ;;  %v17609_v62 = vpop.f32.mrf.mxu0 }
 0x3ae   : > { %v8759_v44 = vrot.slane %v8758_v54, 4  ;;  %v10076_v18 = vrot.slane %v10074_v45, 5  ;;  %v8766_v41 = vshrl.u32 %v8402_v60, 16  ;;  %v10080_v31 = vrot.slane %v10078_v56, 4 }
 0x3af   : > { %13450 = vmatprep.mubr.bf16.mxu0 %v12097_v55  ;;  %v10072_v40 = vrot.slane %v10071_v29, 4  ;;  %v10086_v21 = vrot.slane %v10084_v28, 5  ;;  %v8769_v11 = vshll.u32 %v8402_v60, 16  ;;  %v8775_v10 = vshll.u32 %v17519_v5, 16  ;;  %v10001_v60 = vld [vmem:[#allocation2 + $0x3c] sm:$0xf] }
 0x3b0   : > { %v8764_v37 = vsel %vm14318_vm11, %v8759_v44, %v8763_v13  ;;  %v8768_v20 = vrot.slane %v8766_v41, 4  ;;  %v8779_v16 = vshrl.u32 %v17519_v5, 16  ;;  %v10081_v3 = vor.u32 %v10080_v31, %v10076_v18  ;;  %v17613_v55 = vld [vmem:[#allocation2 + $0x40] sm:$0xf] }
 0x3b1   : > { %v12023_v50 = vcombine.low %v8754_v34, %v8764_v37  ;;  %v10077_v7 = vsel %vm14318_vm11, %v10072_v40, %v10076_v18  ;;  %v8771_v30 = vrot.slane %v8769_v11, 5  ;;  %v8777_v46 = vrot.slane %v8775_v10, 5  ;;  %v17620_v11 = vld [vmem:[#allocation2 + $0x44] sm:$0x1]  ;;  %v10004_v37 = vld [vmem:[#allocation2 + $0x48] sm:$0xf] }
 0x3b2   : > { %v8781_v1 = vrot.slane %v8779_v16, 4  ;;  %v8785_v19 = vshll.u32 %v17521_v4, 16  ;;  %v10089_v32 = vshrl.u32 %v9998_v38, 16  ;;  %v10082_v5 = vrot.slane %v10081_v3, 4 }
 0x3b3   : > { %13331 = vmatmul.mubr.bf16.gmra.mxu1 %v12022_v35  ;;  %v8772_v25 = vor.u32 %v8771_v30, %v8768_v20  ;;  %v10092_v24 = vshll.u32 %v9998_v38, 16  ;;  %v10098_v27 = vshll.u32 %v17594_v52, 16  ;;  %v10102_v47 = vshrl.u32 %v17594_v52, 16  ;;  %v17607_v35 = vpop.f32.mrf.mxu1 }
 0x3b4   : > { %13334 = vmatprep.mubr.bf16.mxu1 %v12023_v50  ;;  %v8782_v61 = vor.u32 %v8781_v1, %v8777_v46  ;;  %v8787_v13 = vrot.slane %v8785_v19, 5  ;;  %v10091_v22 = vrot.slane %v10089_v32, 4  ;;  %v10087_v4 = vsel %vm14318_vm11, %v10082_v5, %v10086_v21  ;;  %v17628_v5 = vld [vmem:[#allocation2 + $0x4c] sm:$0xf] }
 0x3b5   : > { %v8773_v0 = vrot.slane %v8772_v25, 4  ;;  %v10094_v54 = vrot.slane %v10092_v24, 5  ;;  %v10100_v45 = vrot.slane %v10098_v27, 5  ;;  %v12098_v29 = vcombine.low %v10077_v7, %v10087_v4  ;;  %v17623_v20 = vpop.f32.mrf.mxu1  ;;  %v13820_v7 = vld [vmem:[#allocation2 + $0x18] sm:$0xff]  }
 0x3b6   : > { %v8783_v56 = vrot.slane %v8782_v61, 4  ;;  %v10104_v28 = vrot.slane %v10102_v47, 4  ;;  %v10108_v34 = vshll.u32 %v17603_v8, 16  ;;  %v10113_v18 = vshrl.u32 %v10001_v60, 16  ;;  %v17625_v10 = vpop.f32.mrf.mxu0  ;;  %v17635_v61 = vld [vmem:[#allocation2 + $0x50] sm:$0x1] }
 0x3b7   : > { %v10095_v44 = vor.u32 %v10094_v54, %v10091_v22  ;;  %v10116_v41 = vshll.u32 %v10001_v60, 16  ;;  %13451 = vmatmul.mubr.bf16.vlgmr.msra.gmra.mxu0 %v12098_v29  ;;  %v8778_v40 = vsel %vm14318_vm11, %v8773_v0, %v8777_v46  ;;  %v10122_v38 = vshll.u32 %v17613_v55, 16  ;;  %v17641_v0 = vpop.f32.mrf.mxu1 }
 0x3b8   : > { %v8788_v31 = vsel %vm14318_vm11, %v8783_v56, %v8787_v13  ;;  %v10105_v21 = vor.u32 %v10104_v28, %v10100_v45  ;;  %v10115_v3 = vrot.slane %v10113_v18, 4  ;;  %v10110_v46 = vrot.slane %v10108_v34, 5  ;;  %v17643_v54 = vpop.f32.mrf.mxu0  ;;  %v10007_v28 = vld [vmem:[#allocation2 + $0x54] sm:$0xf] }
 0x3b9   : > { %v12024_v16 = vcombine.low %v8778_v40, %v8788_v31  ;;  %v10096_v50 = vrot.slane %v10095_v44, 4  ;;  %v10118_v30 = vrot.slane %v10116_v41, 5  ;;  %v10124_v19 = vrot.slane %v10122_v38, 5  ;;  %v17648_v41 = vld [vmem:[#allocation2 + $0x58] sm:$0xf] }
 0x3ba   : > { %v10106_v1 = vrot.slane %v10105_v21, 4  ;;  %v10126_v32 = vshrl.u32 %v17613_v55, 16  ;;  %v10132_v24 = vshll.u32 %v17620_v11, 16  ;;  %v17633_v27 = vadd.f32 %v17431_v57, %v17556_v43 }
 0x3bb   : > { %13335 = vmatmul.mubr.bf16.gmra.mxu1 %v12024_v16  ;;  %v10119_v25 = vor.u32 %v10118_v30, %v10115_v3  ;;  %v10137_v13 = vshrl.u32 %v10004_v37, 16  ;;  %v10101_v22 = vsel %vm14318_vm11, %v10096_v50, %v10100_v45  ;;  %v10140_v4 = vshll.u32 %v10004_v37, 16  ;;  %v17660_v3 = vld [vmem:[#allocation2 + $0x5c] sm:$0x1]  ;;  %v17662_v30 = vpop.f32.mrf.mxu1 }
 0x3bc   : > { %v10111_v47 = vsel %vm14318_vm11, %v10106_v1, %v10110_v46  ;;  %13402 = vmatprep.mubr.bf16.mxu1 %v13820_v7  ;;  %v10128_v60 = vrot.slane %v10126_v32, 4  ;;  %v10146_v43 = vshll.u32 %v17628_v5, 16  ;;  %v10150_v45 = vshrl.u32 %v17628_v5, 16  ;;  %19179 = vst [vmem:[#allocation28_spill] sm:$0xff] %v17662_v30  ;;  %v17664_v1 = vpop.f32.mrf.mxu0  ;;  %v13821_v46 = vld [vmem:[#allocation2 + $0x24] sm:$0xff]  }
 0x3bd   : > { %v12099_v29 = vcombine.low %v10101_v22, %v10111_v47  ;;  %v10120_v56 = vrot.slane %v10119_v25, 4  ;;  %v10139_v57 = vrot.slane %v10137_v13, 4  ;;  %v10142_v44 = vrot.slane %v10140_v4, 5  ;;  %v13823_v13 = vld [vmem:[#allocation2 + $0x30] sm:$0xff]   ;;  %v10010_v47 = vld [vmem:[#allocation2 + $0x60] sm:$0xf] }
 0x3be   : > { %v10129_v34 = vor.u32 %v10128_v60, %v10124_v19  ;;  %v10156_v18 = vshll.u32 %v17635_v61, 16  ;;  %v10134_v40 = vrot.slane %v10132_v24, 5  ;;  %v10148_v31 = vrot.slane %v10146_v43, 5 }
 0x3bf   : > { %13454 = vmatprep.mubr.bf16.mxu0 %v12099_v29  ;;  %v17652_v21 = vadd.f32 %v17447_v53, %v17567_v51  ;;  %v17656_v38 = vadd.f32 %v17474_v58, %v17582_v39  ;;  %v10125_v37 = vsel %vm14318_vm11, %v10120_v56, %v10124_v19  ;;  %v10143_v50 = vor.u32 %v10142_v44, %v10139_v57  ;;  %v13825_v58 = vld [vmem:[#allocation8 + $0x230] sm:$0xff]   ;;  %v17670_v57 = vld [vmem:[#allocation2 + $0x64] sm:$0xf] }
 0x3c0   : > { %v10130_v16 = vrot.slane %v10129_v34, 4  ;;  %v10152_v7 = vrot.slane %v10150_v45, 4  ;;  %v10158_v32 = vrot.slane %v10156_v18, 5  ;;  %v10161_v53 = vshrl.u32 %v10007_v28, 16  ;;  %v17676_v18 = vpop.f32.mrf.mxu0 }
 0x3c1   : > { %19178 = vst [vmem:[#allocation22_spill] sm:$0xff] %v17656_v38  ;;  %v10164_v51 = vshll.u32 %v10007_v28, 16  ;;  %v10170_v25 = vshll.u32 %v17648_v41, 16  ;;  %v10144_v19 = vrot.slane %v10143_v50, 4  ;;  %v10174_v22 = vshrl.u32 %v17648_v41, 16  ;;  %v13829_v38 = vld [vmem:[#allocation2 + $0x60] sm:$0xff]  }
 0x3c2   : > { %v10135_v39 = vsel %vm14318_vm11, %v10130_v16, %v10134_v40  ;;  %v10153_v24 = vor.u32 %v10152_v7, %v10148_v31  ;;  %v10163_v4 = vrot.slane %v10161_v53, 4  ;;  %v10180_v44 = vshll.u32 %v17660_v3, 16  ;;  %v17682_v16 = vld [vmem:[#allocation2 + $0x68] sm:$0x1] }
 0x3c3   : > { %v12100_v60 = vcombine.low %v10125_v37, %v10135_v39  ;;  %13403 = vmatmul.mubr.bf16.vlgmr.msra.gmra.mxu1 %v13821_v46  ;;  %v10166_v29 = vrot.slane %v10164_v51, 5  ;;  %v10172_v56 = vrot.slane %v10170_v25, 5  ;;  %v10149_v43 = vsel %vm14318_vm11, %v10144_v19, %v10148_v31  ;;  %v13828_v51 = vld [vmem:[#allocation8 + $0x228] sm:$0xff]  }
 0x3c4   : > { %v10154_v28 = vrot.slane %v10153_v24, 4  ;;  %13406 = vmatprep.mubr.bf16.mxu1 %v13823_v13  ;;  %13483 = vmatpush3.bf16.msra.mxu1 %v17528_v14  ;;  %v10176_v34 = vrot.slane %v10174_v22, 4  ;;  %v13124_v45 = vpop.f32.mrf.mxu1  ;;  %v17680_v37 = vadd.f32 %v17509_v63, %v17607_v35  ;;  %v10185_v50 = vshrl.u32 %v10010_v47, 16  ;;  %v13824_v19 = vld [vmem:[#allocation2 + $0x3c] sm:$0xff]  }
 0x3c5   : > { %13455 = vmatmul.mubr.bf16.gmra.mxu0 %v12100_v60  ;;  %v10167_v40 = vor.u32 %v10166_v29, %v10163_v4  ;;  %v10188_v31 = vshll.u32 %v10010_v47, 16  ;;  %13484 = vmatprep.subr.bf16.mxu1 %v13825_v58  ;;  %v10182_v46 = vrot.slane %v10180_v44, 5  ;;  %v10194_v53 = vshll.u32 %v17670_v57, 16  ;;  %v17703_v44 = vld [vmem:[#allocation2 + $0x74] sm:$0x1] }
 0x3c6   : > { %19180 = vst [vmem:[#allocation25_spill] sm:$0xff] %v17680_v37  ;;  %v10159_v14 = vsel %vm14318_vm11, %v10154_v28, %v10158_v32  ;;  %v10177_v7 = vor.u32 %v10176_v34, %v10172_v56  ;;  %v10187_v24 = vrot.slane %v10185_v50, 4  ;;  %v17687_v63 = vpop.f32.mrf.mxu1  ;;  %v10198_v47 = vshrl.u32 %v17670_v57, 16  ;;  %v10013_v32 = vld [vmem:[#allocation2 + $0x6c] sm:$0xf]  ;;  %19183 = vst [vmem:[#allocation46_spill] sm:$0xff] %v17703_v44 }
 0x3c7   : > { %v12101_v25 = vcombine.low %v10149_v43, %v10159_v14  ;;  %v10168_v39 = vrot.slane %v10167_v40, 4  ;;  %v10190_v13 = vrot.slane %v10188_v31, 5  ;;  %v10196_v22 = vrot.slane %v10194_v53, 5  ;;  %v17701_v34 = vld [vmem:[#allocation2 + $0x70] sm:$0xf]  ;;  %v13831_v40 = vld [vmem:[#allocation8 + $0x220] sm:$0xff]  }
 0x3c8   : > { %v10178_v35 = vrot.slane %v10177_v7, 4  ;;  %v10204_v60 = vshll.u32 %v17682_v16, 16  ;;  %13485 = vmatpush3.bf16.msra.mxu1 %v13825_v58  ;;  %v17691_v4 = vpop.f32.mrf.mxu0  ;;  %v17695_v43 = vadd.f32 %v17530_v42, %v17623_v20  ;;  %v17699_v28 = vadd.f32 %v17539_v23, %v17641_v0  ;;  %v13826_v7 = vld [vmem:[#allocation2 + $0x48] sm:$0xff]  }
 0x3c9   : > { %13458 = vmatprep.mubr.bf16.mxu0 %v12101_v25  ;;  %v10191_v29 = vor.u32 %v10190_v13, %v10187_v24  ;;  %v10173_v58 = vsel %vm14318_vm11, %v10168_v39, %v10172_v56  ;;  %v10200_v31 = vrot.slane %v10198_v47, 4  ;;  %13486 = vmatprep.subr.bf16.mxu1 %v13828_v51  ;;  %v10209_v0 = vshrl.u32 %v10013_v32, 16  ;;  %v10016_v25 = vld [vmem:[#allocation2 + $0x78] sm:$0xf]  ;;  %v13125_v24 = vpop.f32.mrf.mxu1 }
 0x3ca   : > { %19181 = vst [vmem:[#allocation39_spill] sm:$0xff] %v17695_v43  ;;  %19182 = vst [vmem:[#allocation34_spill] sm:$0xff] %v17699_v28  ;;  %v10183_v50 = vsel %vm14318_vm11, %v10178_v35, %v10182_v46  ;;  %v10206_v14 = vrot.slane %v10204_v60, 5  ;;  %v17709_v42 = vpop.f32.mrf.mxu0  ;;  %v10212_v53 = vshll.u32 %v10013_v32, 16  ;;  %v10218_v56 = vshll.u32 %v17701_v34, 16 }
 0x3cb   : > { %v12102_v20 = vcombine.low %v10173_v58, %v10183_v50  ;;  %13407 = vmatmul.mubr.bf16.gmra.mxu1 %v13824_v19  ;;  %v10192_v23 = vrot.slane %v10191_v29, 4  ;;  %v10201_v13 = vor.u32 %v10200_v31, %v10196_v22  ;;  %v10222_v39 = vshrl.u32 %v17701_v34, 16  ;;  %v17714_v35 = vld [vmem:[#allocation2 + $0x7c] sm:$0xf]  ;;  %v17721_v29 = vld [vmem:[#allocation2 + $0x80] sm:$0x1] }
 0x3cc   : > { %13410 = vmatprep.mubr.bf16.mxu1 %v13826_v7  ;;  %v10228_v46 = vshll.u32 %v17703_v44, 16  ;;  %13487 = vmatpush3.bf16.msra.mxu1 %v13828_v51  ;;  %v10211_v47 = vrot.slane %v10209_v0, 4  ;;  %v10214_v60 = vrot.slane %v10212_v53, 5  ;;  %v17719_v32 = vadd.f32 %v17569_v48, %v13124_v45  ;;  %v13834_v58 = vld [vmem:[#allocation8 + $0x218] sm:$0xff]   ;;  %v17723_v17 = vpop.f32.mrf.mxu0 }
 0x3cd   : > { %13459 = vmatmul.mubr.bf16.gmra.mxu0 %v12102_v20  ;;  %v10197_v19 = vsel %vm14318_vm11, %v10192_v23, %v10196_v22  ;;  %13488 = vmatprep.subr.bf16.mxu1 %v13831_v40  ;;  %v10202_v50 = vrot.slane %v10201_v13, 4  ;;  %v10220_v31 = vrot.slane %v10218_v56, 5  ;;  %v10224_v7 = vrot.slane %v10222_v39, 4  ;;  %v7094_v23 = vpop.f32.mrf.mxu1  ;;  %v10019_v13 = vld [vmem:[#allocation2 + $0x84] sm:$0xf] }
 0x3ce   : > { %19184 = vst [vmem:[#allocation42_spill] sm:$0xff] %v17719_v32  ;;  %v10230_v28 = vrot.slane %v10228_v46, 5  ;;  %v10215_v51 = vor.u32 %v10214_v60, %v10211_v47  ;;  %v10233_v20 = vshrl.u32 %v10016_v25, 16  ;;  %v10236_v30 = vshll.u32 %v10016_v25, 16  ;;  %v13827_v46 = vld [vmem:[#allocation2 + $0x54] sm:$0xff]   ;;  %v17730_v44 = vpop.f32.mrf.mxu0 }
 0x3cf   : > { %v10242_v22 = vshll.u32 %v17714_v35, 16  ;;  %v10207_v48 = vsel %vm14318_vm11, %v10202_v50, %v10206_v14  ;;  %v10225_v45 = vor.u32 %v10224_v7, %v10220_v31  ;;  %v10246_v0 = vshrl.u32 %v17714_v35, 16  ;;  %v13837_v14 = vld [vmem:[#allocation8 + $0x210] sm:$0xff]  }
 0x3d0   : > { %v10252_v53 = vshll.u32 %v17721_v29, 16  ;;  %13489 = vmatpush3.bf16.msra.mxu1 %v13831_v40  ;;  %v12103_v56 = vcombine.low %v10197_v19, %v10207_v48  ;;  %v10216_v39 = vrot.slane %v10215_v51, 4  ;;  %v10235_v32 = vrot.slane %v10233_v20, 4  ;;  %v17740_v7 = vld [vmem:[#allocation2 + $0x8c] sm:$0x1] }
 0x3d1   : > { %v10238_v47 = vrot.slane %v10236_v30, 5  ;;  %13490 = vmatprep.subr.bf16.mxu1 %v13834_v58  ;;  %v10226_v25 = vrot.slane %v10225_v45, 4  ;;  %v10244_v60 = vrot.slane %v10242_v22, 5  ;;  %v10248_v43 = vrot.slane %v10246_v0, 4  ;;  %v17738_v30 = vld [vmem:[#allocation2 + $0x88] sm:$0xf] }
 0x3d2   : > { %v10254_v37 = vrot.slane %v10252_v53, 5  ;;  %13462 = vmatprep.mubr.bf16.mxu0 %v12103_v56  ;;  %v10221_v50 = vsel %vm14318_vm11, %v10216_v39, %v10220_v31  ;;  %v17736_v19 = vadd.f32 %v17584_v36, %v17687_v63  ;;  %v10257_v51 = vshrl.u32 %v10019_v13, 16  ;;  %v10022_v31 = vld [vmem:[#allocation2 + $0x90] sm:$0xf] }
 0x3d3   : > { %13411 = vmatmul.mubr.bf16.gmra.mxu1 %v13827_v46  ;;  %v10239_v40 = vor.u32 %v10238_v47, %v10235_v32  ;;  %v13128_v20 = vpop.f32.mrf.mxu1  ;;  %v10231_v22 = vsel %vm14318_vm11, %v10226_v25, %v10230_v28  ;;  %v10249_v48 = vor.u32 %v10248_v43, %v10244_v60  ;;  %v17745_v45 = vadd.f32 %v17598_v49, %v13125_v24  ;;  %v13840_v49 = vld [vmem:[#allocation8 + $0x208] sm:$0xff]  }
 0x3d4   : > { %19185 = vst [vmem:[#allocation47_spill] sm:$0xff] %v17736_v19  ;;  %13414 = vmatprep.mubr.bf16.mxu1 %v13829_v38  ;;  %v17748_v32 = vadd.f32 %v17609_v62, %v7094_v23  ;;  %v12104_v36 = vcombine.low %v10221_v50, %v10231_v22  ;;  %v10259_v0 = vrot.slane %v10257_v51, 4  ;;  %v10260_v53 = vshll.u32 %v10019_v13, 16  ;;  %13491 = vmatpush3.bf16.msra.mxu1 %v13834_v58  ;;  %v17760_v58 = vld [vmem:[#allocation2 + $0x94] sm:$0xf] }
 0x3d5   : > { %19186 = vst [vmem:[#allocation33_spill] sm:$0xff] %v17745_v45  ;;  %v10240_v63 = vrot.slane %v10239_v40, 4  ;;  %v7107_v56 = vpop.f32.mrf.mxu1  ;;  %v10250_v39 = vrot.slane %v10249_v48, 4  ;;  %v10266_v46 = vshll.u32 %v17738_v30, 16  ;;  %v10270_v28 = vshrl.u32 %v17738_v30, 16  ;;  %13492 = vmatprep.subr.bf16.mxu1 %v13837_v14 }
 0x3d6   : > { %19187 = vst [vmem:[#allocation24_spill] sm:$0xff] %v17748_v32  ;;  %v10276_v38 = vshll.u32 %v17740_v7, 16  ;;  %v17753_v43 = vpop.f32.mrf.mxu0  ;;  %13463 = vmatmul.mubr.bf16.gmra.mxu0 %v12104_v36  ;;  %v10262_v24 = vrot.slane %v10260_v53, 5  ;;  %v17758_v23 = vadd.f32 %v17625_v10, %v13128_v20  ;;  %v17762_v13 = vld [vmem:[#allocation2 + $0x98] sm:$0x1]  ;;  %v10281_v47 = vshrl.u32 %v10022_v31, 16 }
 0x3d7   : > { %v10245_v62 = vsel %vm14318_vm11, %v10240_v63, %v10244_v60  ;;  %19189 = vst [vmem:[#allocation37_spill] sm:$0xff] %v17762_v13  ;;  %v13129_v25 = vpop.f32.mrf.mxu1  ;;  %v10255_v50 = vsel %vm14318_vm11, %v10250_v39, %v10254_v37  ;;  %v10268_v40 = vrot.slane %v10266_v46, 5  ;;  %v10272_v51 = vrot.slane %v10270_v28, 4  ;;  %v13830_v63 = vld [vmem:[#allocation2 + $0x6c] sm:$0xff]   ;;  %v13832_v20 = vld [vmem:[#allocation2 + $0x78] sm:$0xff]  }
 0x3d8   : > { %19188 = vst [vmem:[#allocation32_spill] sm:$0xff] %v17758_v23  ;;  %v10278_v22 = vrot.slane %v10276_v38, 5  ;;  %v17766_v48 = vpop.f32.mrf.mxu0  ;;  %v12105_v36 = vcombine.low %v10245_v62, %v10255_v50  ;;  %v10263_v60 = vor.u32 %v10262_v24, %v10259_v0  ;;  %v10283_v53 = vrot.slane %v10281_v47, 4  ;;  %13493 = vmatpush3.bf16.msra.mxu1 %v13837_v14  ;;  %v10025_v39 = vld [vmem:[#allocation2 + $0x9c] sm:$0xf] }
 0x3d9   : > { %v10284_v10 = vshll.u32 %v10022_v31, 16  ;;  %v10273_v23 = vor.u32 %v10272_v51, %v10268_v40  ;;  %v10290_v32 = vshll.u32 %v17760_v58, 16  ;;  %v10294_v45 = vshrl.u32 %v17760_v58, 16  ;;  %v7110_v37 = vpop.f32.mrf.mxu1  ;;  %13494 = vmatprep.subr.bf16.mxu1 %v13840_v49  ;;  %v13843_v28 = vld [vmem:[#allocation8 + $0x200] sm:$0xff]   ;;  %v17779_v62 = vld [vmem:[#allocation2 + $0xa0] sm:$0xf] }
 0x3da   : > { %v10300_v19 = vshll.u32 %v17762_v13, 16  ;;  %v17771_v46 = vpop.f32.mrf.mxu0  ;;  %13466 = vmatprep.mubr.bf16.mxu0 %v12105_v36  ;;  %v10264_v0 = vrot.slane %v10263_v60, 4  ;;  %v17774_v31 = vadd.f32 %v17643_v54, %v7107_v56  ;;  %v17777_v14 = vadd.f32 %v17664_v1, %v13129_v25  ;;  %19192 = vst [vmem:[#allocation26_spill] sm:$0xff] %v17779_v62  ;;  %v17788_v54 = vld [vmem:[#allocation2 + $0xa4] sm:$0x1] }
 0x3db   : > { %13415 = vmatmul.mubr.bf16.gmra.mxu1 %v13830_v63  ;;  %v10286_v38 = vrot.slane %v10284_v10, 5  ;;  %v10274_v24 = vrot.slane %v10273_v23, 4  ;;  %v10292_v47 = vrot.slane %v10290_v32, 5  ;;  %v10296_v50 = vrot.slane %v10294_v45, 4  ;;  %19194 = vst [vmem:[#allocation43_spill] sm:$0xff] %v17788_v54 }
 0x3dc   : > { %19190 = vst [vmem:[#allocation36_spill] sm:$0xff] %v17774_v31  ;;  %19191 = vst [vmem:[#allocation29_spill] sm:$0xff] %v17777_v14  ;;  %v10302_v51 = vrot.slane %v10300_v19, 5  ;;  %13418 = vmatprep.mubr.bf16.mxu1 %v13832_v20  ;;  %v17781_v13 = vpop.f32.mrf.mxu0  ;;  %v10269_v36 = vsel %vm14318_vm11, %v10264_v0, %v10268_v40  ;;  %v17786_v63 = vadd.f32 %v17676_v18, %v7110_v37  ;;  %v10305_v1 = vshrl.u32 %v10025_v39, 16  ;;  %v10028_v23 = vld [vmem:[#allocation2 + $0xa8] sm:$0xf] }
 0x3dd   : > { %v10287_v60 = vor.u32 %v10286_v38, %v10283_v53  ;;  %13495 = vmatpush3.bf16.msra.mxu1 %v13840_v49  ;;  %v10279_v56 = vsel %vm14318_vm11, %v10274_v24, %v10278_v22  ;;  %v10297_v32 = vor.u32 %v10296_v50, %v10292_v47  ;;  %v10308_v45 = vshll.u32 %v10025_v39, 16  ;;  %v17797_v22 = vld [vmem:[#allocation2 + $0xac] sm:$0xf]  ;;  %v13835_v14 = vld [vmem:[#allocation2 + $0x90] sm:$0xff]  }
 0x3de   : > { %19193 = vst [vmem:[#allocation27_spill] sm:$0xff] %v17786_v63  ;;  %v10314_v19 = vshll.u32 %v17779_v62, 16  ;;  %v17793_v25 = vpop.f32.mrf.mxu0  ;;  %13496 = vmatprep.subr.bf16.mxu1 %v13843_v28  ;;  %v12106_v40 = vcombine.low %v10269_v36, %v10279_v56  ;;  %v10307_v10 = vrot.slane %v10305_v1, 4  ;;  %v10318_v18 = vshrl.u32 %v17779_v62, 16  ;;  %19195 = vst [vmem:[#allocation44_spill] sm:$0xff] %v17797_v22 }
 0x3df   : > { %v10288_v53 = vrot.slane %v10287_v60, 4  ;;  %v10298_v20 = vrot.slane %v10297_v32, 4  ;;  %v10310_v37 = vrot.slane %v10308_v45, 5  ;;  %v10324_v49 = vshll.u32 %v17788_v54, 16  ;;  %v13833_v60 = vld [vmem:[#allocation2 + $0x84] sm:$0xff]  }
 0x3e0   : > { %v10316_v0 = vrot.slane %v10314_v19, 5  ;;  %v13132_v38 = vpop.f32.mrf.mxu1  ;;  %v17799_v39 = vpop.f32.mrf.mxu0  ;;  %13467 = vmatmul.mubr.bf16.gmra.mxu0 %v12106_v40  ;;  %v10320_v50 = vrot.slane %v10318_v18, 4  ;;  %v17806_v1 = vld [vmem:[#allocation2 + $0xb0] sm:$0x1]  ;;  %v10329_v56 = vshrl.u32 %v10028_v23, 16  ;;  %v10332_v63 = vshll.u32 %v10028_v23, 16 }
 0x3e1   : > { %v10293_v24 = vsel %vm14318_vm11, %v10288_v53, %v10292_v47  ;;  %v17804_v36 = vadd.f32 %v17691_v4, %v13132_v38  ;;  %19197 = vst [vmem:[#allocation40_spill] sm:$0xff] %v17806_v1  ;;  %13497 = vmatpush3.bf16.msra.mxu1 %v13843_v28  ;;  %v10303_v32 = vsel %vm14318_vm11, %v10298_v20, %v10302_v51  ;;  %v10326_v19 = vrot.slane %v10324_v49, 5 }
 0x3e2   : > { %v10311_v45 = vor.u32 %v10310_v37, %v10307_v10  ;;  %v7123_v40 = vpop.f32.mrf.mxu1  ;;  %v17810_v31 = vpop.f32.mrf.mxu0  ;;  %v12107_v47 = vcombine.low %v10293_v24, %v10303_v32  ;;  %v10321_v53 = vor.u32 %v10320_v50, %v10316_v0  ;;  %v10331_v4 = vrot.slane %v10329_v56, 4  ;;  %v10031_v10 = vld [vmem:[#allocation2 + $0xb4] sm:$0xf]  ;;  %v17823_v50 = vld [vmem:[#allocation2 + $0xb8] sm:$0xf] }
 0x3e3   : > { %19196 = vst [vmem:[#allocation30_spill] sm:$0xff] %v17804_v36  ;;  %13419 = vmatmul.mubr.bf16.gmra.mxu1 %v13833_v60  ;;  %v10338_v18 = vshll.u32 %v17797_v22, 16  ;;  %v10334_v36 = vrot.slane %v10332_v63, 5  ;;  %v10342_v28 = vshrl.u32 %v17797_v22, 16  ;;  %v10348_v54 = vshll.u32 %v17806_v1, 16  ;;  %19200 = vst [vmem:[#allocation31_spill] sm:$0xff] %v17823_v50 }
 0x3e4   : > { %v10312_v38 = vrot.slane %v10311_v45, 4  ;;  %13422 = vmatprep.mubr.bf16.mxu1 %v13835_v14  ;;  %v13133_v51 = vpop.f32.mrf.mxu1  ;;  %v17815_v23 = vpop.f32.mrf.mxu0  ;;  %13470 = vmatprep.mubr.bf16.mxu0 %v12107_v47  ;;  %v10322_v20 = vrot.slane %v10321_v53, 4  ;;  %v17818_v49 = vadd.f32 %v17709_v42, %v7123_v40  ;;  %v17832_v47 = vld [vmem:[#allocation2 + $0xbc] sm:$0x1]  ;;  %v10353_v42 = vshrl.u32 %v10031_v10, 16 }
 0x3e5   : > { %v10340_v37 = vrot.slane %v10338_v18, 5  ;;  %v17821_v24 = vadd.f32 %v17723_v17, %v13133_v51  ;;  %v10335_v60 = vor.u32 %v10334_v36, %v10331_v4  ;;  %v10344_v14 = vrot.slane %v10342_v28, 4  ;;  %19202 = vst [vmem:[#allocation38_spill] sm:$0xff] %v17832_v47  ;;  %v13836_v4 = vld [vmem:[#allocation2 + $0x9c] sm:$0xff]   ;;  %v17848_v1 = vld [vmem:[#allocation2 + $0xc8] sm:$0x1] }
 0x3e6   : > { %19198 = vst [vmem:[#allocation45_spill] sm:$0xff] %v17818_v49  ;;  %v10317_v63 = vsel %vm14318_vm11, %v10312_v38, %v10316_v0  ;;  %v7126_v56 = vpop.f32.mrf.mxu1  ;;  %v10327_v32 = vsel %vm14318_vm11, %v10322_v20, %v10326_v19  ;;  %v10356_v40 = vshll.u32 %v10031_v10, 16  ;;  %v17834_v17 = vpop.f32.mrf.mxu0  ;;  %v10362_v0 = vshll.u32 %v17823_v50, 16  ;;  %v10034_v38 = vld [vmem:[#allocation2 + $0xc0] sm:$0xf] }
 0x3e7   : > { %19199 = vst [vmem:[#allocation48_spill] sm:$0xff] %v17821_v24  ;;  %v17830_v45 = vadd.f32 %v17730_v44, %v7126_v56  ;;  %v12108_v53 = vcombine.low %v10317_v63, %v10327_v32  ;;  %v10336_v18 = vrot.slane %v10335_v60, 4  ;;  %v10345_v51 = vor.u32 %v10344_v14, %v10340_v37  ;;  %v17838_v20 = vld [vmem:[#allocation2 + $0xc4] sm:$0xf]  ;;  %v13838_v14 = vld [vmem:[#allocation2 + $0xa8] sm:$0xff]  }
 0x3e8   : > { %v13136_v36 = vpop.f32.mrf.mxu1  ;;  %v10350_v28 = vrot.slane %v10348_v54, 5  ;;  %v10355_v24 = vrot.slane %v10353_v42, 4  ;;  %v10358_v19 = vrot.slane %v10356_v40, 5  ;;  %v10366_v44 = vshrl.u32 %v17823_v50, 16  ;;  %19203 = vst [vmem:[#allocation41_spill] sm:$0xff] %v17838_v20  ;;  %v17840_v56 = vpop.f32.mrf.mxu0 }
 0x3e9   : > { %19201 = vst [vmem:[#allocation35_spill] sm:$0xff] %v17830_v45  ;;  %13471 = vmatmul.mubr.bf16.gmra.mxu0 %v12108_v53  ;;  %v10346_v10 = vrot.slane %v10345_v51, 4  ;;  %v10364_v45 = vrot.slane %v10362_v0, 5  ;;  %v10372_v63 = vshll.u32 %v17832_v47, 16  ;;  %v17844_v60 = vadd.f32 %v17753_v43, %v13136_v36 }
 0x3ea   : > { %v7139_v32 = vpop.f32.mrf.mxu1  ;;  %v10341_v54 = vsel %vm14318_vm11, %v10336_v18, %v10340_v37  ;;  %v10359_v42 = vor.u32 %v10358_v19, %v10355_v24  ;;  %v10368_v40 = vrot.slane %v10366_v44, 4  ;;  %v10377_v49 = vshrl.u32 %v10034_v38, 16  ;;  %v17850_v22 = vpop.f32.mrf.mxu0 }
 0x3eb   : > { %19204 = vst [vmem:[#allocation49_spill] sm:$0xff] %v17844_v60  ;;  %13423 = vmatmul.mubr.bf16.gmra.mxu1 %v13836_v4  ;;  %v10351_v53 = vsel %vm14318_vm11, %v10346_v10, %v10350_v28  ;;  %v10380_v51 = vshll.u32 %v10034_v38, 16  ;;  %v10386_v43 = vshll.u32 %v17838_v20, 16  ;;  %v10390_v0 = vshrl.u32 %v17838_v20, 16  ;;  %v10745_v28 = vld [vmem:[#allocation2 + $0x18] sm:$0xe] }
 0x3ec   : > { %13426 = vmatprep.mubr.bf16.mxu1 %v13838_v14  ;;  %v13137_v36 = vpop.f32.mrf.mxu1  ;;  %v12109_v60 = vcombine.low %v10341_v54, %v10351_v53  ;;  %v10360_v37 = vrot.slane %v10359_v42, 4  ;;  %v10369_v24 = vor.u32 %v10368_v40, %v10364_v45  ;;  %v10379_v18 = vrot.slane %v10377_v49, 4  ;;  %v17856_v4 = vpop.f32.mrf.mxu0  ;;  %v10037_v49 = vld [vmem:[#allocation2 + $0xcc] sm:$0xf] }
 0x3ed   : > { %v10382_v19 = vrot.slane %v10380_v51, 5  ;;  %v10388_v44 = vrot.slane %v10386_v43, 5  ;;  %v10392_v47 = vrot.slane %v10390_v0, 4  ;;  %v10396_v50 = vshll.u32 %v17848_v1, 16  ;;  %v17877_v0 = vld [vmem:[#allocation2 + $0xd0] sm:$0xf] }
 0x3ee   : > { %v7142_v62 = vpop.f32.mrf.mxu1  ;;  %13474 = vmatprep.mubr.bf16.mxu0 %v12109_v60  ;;  %v10370_v38 = vrot.slane %v10369_v24, 4  ;;  %v10374_v10 = vrot.slane %v10372_v63, 5  ;;  %v17860_v20 = vadd.f32 %v17766_v48, %v7139_v32  ;;  %v17863_v14 = vadd.f32 %v17771_v46, %v13137_v36  ;;  %v17865_v54 = vpop.f32.mrf.mxu0  ;;  %v13839_v48 = vld [vmem:[#allocation2 + $0xb4] sm:$0xff]  }
 0x3ef   : > { %v10365_v42 = vsel %vm14318_vm11, %v10360_v37, %v10364_v45  ;;  %v10383_v40 = vor.u32 %v10382_v19, %v10379_v18  ;;  %v10393_v53 = vor.u32 %v10392_v47, %v10388_v44  ;;  %v17870_v51 = vadd.f32 %v17781_v13, %v7142_v62  ;;  %v13841_v47 = vld [vmem:[#allocation2 + $0xc0] sm:$0xff]   ;;  %v17883_v19 = vld [vmem:[#allocation2 + $0xd4] sm:$0x1] }
 0x3f0   : > { %v10375_v63 = vsel %vm14318_vm11, %v10370_v38, %v10374_v10  ;;  %v10398_v60 = vrot.slane %v10396_v50, 5  ;;  %v17874_v32 = vpop.f32.mrf.mxu0  ;;  %v12121_v46 = vrot.slane %v10745_v28, 9  ;;  %v10811_v43 = vrot.slane %v17546_v9, 5 }
 0x3f1   : > { %v12110_v36 = vcombine.low %v10365_v42, %v10375_v63  ;;  %v10384_v24 = vrot.slane %v10383_v40, 4  ;;  %v10394_v45 = vrot.slane %v10393_v53, 4  ;;  %v10401_v18 = vshrl.u32 %v10037_v49, 16 }
 0x3f2   : > { %v13140_v37 = vpop.f32.mrf.mxu1  ;;  %v10813_v62 = vrot.slane %v10811_v43, 4  ;;  %v10814_v50 = vrot.slane %v17551_v12, 5  ;;  %v10404_v28 = vshll.u32 %v10037_v49, 16  ;;  %v17885_v38 = vpop.f32.mrf.mxu0  ;;  %v10410_v40 = vshll.u32 %v17877_v0, 16 }
 0x3f3   : > { %v17880_v13 = vadd.f32 %v17793_v25, %v13140_v37  ;;  %13427 = vmatmul.mubr.bf16.gmra.mxu1 %v13839_v48  ;;  %13475 = vmatmul.mubr.bf16.gmra.mxu0 %v12110_v36  ;;  %v10389_v9 = vsel %vm14318_vm11, %v10384_v24, %v10388_v44  ;;  %v10399_v10 = vsel %vm14318_vm11, %v10394_v45, %v10398_v60  ;;  %v10403_v25 = vrot.slane %v10401_v18, 4  ;;  %v10746_v36 = vld [vmem:[#allocation2 + $0x24] sm:$0xe] }
 0x3f4   : > { %13430 = vmatprep.mubr.bf16.mxu1 %v13841_v47  ;;  %v7155_v42 = vpop.f32.mrf.mxu1  ;;  %v12111_v53 = vcombine.low %v10389_v9, %v10399_v10  ;;  %v10815_v49 = vsel %vm14657_vm14, %v10813_v62, %v10814_v50  ;;  %v10406_v63 = vrot.slane %v10404_v28, 5  ;;  %v17897_v48 = vpop.f32.mrf.mxu0  ;;  %v17901_v44 = vadd.f32 %v17492_v6, %v17596_v59  ;;  %v13842_v47 = vld [vmem:[#allocation2 + $0xcc] sm:$0xff]  }
 0x3f5   : > { %v17893_v12 = vadd.f32 %v17799_v39, %v7155_v42  ;;  %v10412_v24 = vrot.slane %v10410_v40, 5  ;;  %v10414_v45 = vshrl.u32 %v17877_v0, 16  ;;  %v10420_v37 = vshll.u32 %v17883_v19, 16  ;;  %v10747_v59 = vld [vmem:[#allocation2 + $0x30] sm:$0xe] }
 0x3f6   : > { %v13141_v60 = vpop.f32.mrf.mxu1  ;;  %13478 = vmatprep.mubr.bf16.mxu0 %v12111_v53  ;;  %v10812_v18 = vsel %vm14657_vm14, %v12121_v46, %v10811_v43  ;;  %v10407_v62 = vor.u32 %v10406_v63, %v10403_v25  ;;  %v17910_v50 = vpop.f32.mrf.mxu0  ;;  %v10818_v6 = vrot.slane %v17572_v2, 5  ;;  %v12122_v40 = vrot.slane %v10746_v36, 9  ;;  %v10748_v46 = vld [vmem:[#allocation2 + $0x3c] sm:$0xe] }
 0x3f7   : > { %19205 = vst [vmem:[#allocation50_spill] sm:$0xff] %v17893_v12  ;;  %v17906_v39 = vadd.f32 %v17810_v31, %v13141_v60  ;;  %v12137_v9 = vcombine.low %v10812_v18, %v10815_v49  ;;  %v10416_v10 = vrot.slane %v10414_v45, 4  ;;  %v10422_v42 = vrot.slane %v10420_v37, 5 }
 0x3f8   : > { %v7158_v28 = vpop.f32.mrf.mxu1  ;;  %v10408_v31 = vrot.slane %v10407_v62, 4  ;;  %v10820_v60 = vrot.slane %v10818_v6, 4  ;;  %v17917_v12 = vpop.f32.mrf.mxu0  ;;  %v10819_v2 = vsel %vm14657_vm14, %v12122_v40, %v10818_v6  ;;  %v12123_v63 = vrot.slane %v10747_v59, 9 }
 0x3f9   : > { %19206 = vst [vmem:[#allocation51_spill] sm:$0xff] %v17906_v39  ;;  %v17914_v53 = vadd.f32 %v17815_v23, %v7158_v28  ;;  %v10821_v39 = vrot.slane %v17575_v33, 5  ;;  %v10417_v25 = vor.u32 %v10416_v10, %v10412_v24  ;;  %v10825_v49 = vrot.slane %v17594_v52, 5 }
 0x3fa   : > { %v13144_v43 = vpop.f32.mrf.mxu1  ;;  %v10828_v33 = vrot.slane %v17603_v8, 5  ;;  %v17928_v45 = vpop.f32.mrf.mxu0  ;;  %v10832_v37 = vrot.slane %v17613_v55, 5  ;;  %v10413_v62 = vsel %vm14318_vm11, %v10408_v31, %v10412_v24  ;;  %v12124_v59 = vrot.slane %v10748_v46, 9 }
 0x3fb   : > { %v17923_v36 = vadd.f32 %v17834_v17, %v13144_v43  ;;  %13431 = vmatmul.mubr.bf16.gmra.mxu1 %v13842_v47  ;;  %v10822_v23 = vsel %vm14657_vm14, %v10820_v60, %v10821_v39  ;;  %v10418_v6 = vrot.slane %v10417_v25, 4  ;;  %v10827_v52 = vrot.slane %v10825_v49, 4  ;;  %v10749_v17 = vld [vmem:[#allocation2 + $0x48] sm:$0xe] }
 0x3fc   : > { %13498 = vmatprep.mubr.bf16.mxu1 %v12137_v9  ;;  %v7171_v18 = vpop.f32.mrf.mxu1  ;;  %v12138_v28 = vcombine.low %v10819_v2, %v10822_v23  ;;  %v17936_v39 = vpop.f32.mrf.mxu0  ;;  %v10834_v8 = vrot.slane %v10832_v37, 4  ;;  %v10835_v10 = vrot.slane %v17620_v11, 5  ;;  %v10826_v24 = vsel %vm14657_vm14, %v12123_v63, %v10825_v49  ;;  %v10751_v49 = vld [vmem:[#allocation2 + $0x60] sm:$0xe] }
 0x3fd   : > { %v17934_v47 = vadd.f32 %v17840_v56, %v7171_v18  ;;  %v10423_v55 = vsel %vm14318_vm11, %v10418_v6, %v10422_v42  ;;  %v10829_v40 = vsel %vm14657_vm14, %v10827_v52, %v10828_v33  ;;  %v10839_v31 = vrot.slane %v17628_v5, 5  ;;  %v10750_v42 = vld [vmem:[#allocation2 + $0x54] sm:$0xe] }
 0x3fe   : > { %v13145_v9 = vpop.f32.mrf.mxu1  ;;  %v12112_v56 = vcombine.low %v10413_v62, %v10423_v55  ;;  %v17949_v46 = vpop.f32.mrf.mxu0  ;;  %v17953_v11 = vsel %vm14657_vm14, %v10834_v8, %v10835_v10  ;;  %v12125_v15 = vrot.slane %v10749_v17, 9  ;;  %v12139_v25 = vcombine.low %v10826_v24, %v10829_v40 }
 0x3ff   : > { %v17947_v60 = vadd.f32 %v17850_v22, %v13145_v9  ;;  %v10833_v2 = vsel %vm14657_vm14, %v12124_v59, %v10832_v37  ;;  %v10841_v63 = vrot.slane %v10839_v31, 4  ;;  %v10842_v5 = vrot.slane %v17635_v61, 5 }
 0x400   : > { %v7174_v43 = vpop.f32.mrf.mxu1  ;;  %13479 = vmatmul.mubr.bf16.gmra.mxu0 %v12112_v56  ;;  %v12140_v23 = vcombine.low %v10833_v2, %v17953_v11  ;;  %v17962_v33 = vpop.f32.mrf.mxu0  ;;  %v10840_v18 = vsel %vm14657_vm14, %v12125_v15, %v10839_v31  ;;  %v10846_v62 = vrot.slane %v17648_v41, 5  ;;  %v12126_v52 = vrot.slane %v10750_v42, 9  ;;  %v10753_v31 = vld [vmem:[#allocation2 + $0x78] sm:$0xe]  ;;  %v10754_v2 = vld [vmem:[#allocation2 + $0x84] sm:$0xe] }
 0x401   : > { %19207 = vst [vmem:[#allocation52_spill] sm:$0xff] %v17947_v60  ;;  %v17959_v22 = vadd.f32 %v17856_v4, %v7174_v43  ;;  %v10843_v37 = vsel %vm14657_vm14, %v10841_v63, %v10842_v5  ;;  %v10849_v61 = vrot.slane %v17660_v3, 5  ;;  %v10853_v59 = vrot.slane %v17670_v57, 5  ;;  %v10752_v4 = vld [vmem:[#allocation2 + $0x6c] sm:$0xe]  ;;  %v19209_v43 = vld [vmem:[#allocation46_spill] sm:$0xff] }
 0x402   : > { %v13212_v6 = vpop.f32.mrf.mxu1  ;;  %v17974_v8 = vpop.f32.mrf.mxu0  ;;  %v10848_v10 = vrot.slane %v10846_v62, 4  ;;  %v12127_v55 = vrot.slane %v10751_v49, 9  ;;  %v10856_v41 = vrot.slane %v17682_v16, 5  ;;  %v12141_v24 = vcombine.low %v10840_v18, %v10843_v37  ;;  %v19210_v63 = vld [vmem:[#allocation22_spill] sm:$0xff]  ;;  %v19219_v42 = vld [vmem:[#allocation31_spill] sm:$0xff] }
 0x403   : > { %19208 = vst [vmem:[#allocation53_spill] sm:$0xff] %v17959_v22  ;;  %v17972_v17 = vadd.f32 %v13212_v6, %v17633_v27  ;;  %13499 = vmatmul.mubr.bf16.vlgmr.msra.gmra.mxu1 %v12138_v28  ;;  %v17979_v40 = vsel %vm14657_vm14, %v12126_v52, %v10846_v62  ;;  %v10855_v3 = vrot.slane %v10853_v59, 4  ;;  %v10860_v57 = vrot.slane %v17701_v34, 5 }
 0x404   : > { %13502 = vmatprep.mubr.bf16.mxu1 %v12139_v25  ;;  %v7813_v9 = vpop.f32.mrf.mxu1  ;;  %v17985_v28 = vpop.f32.mrf.mxu0  ;;  %v17989_v56 = vsel %vm14657_vm14, %v10848_v10, %v10849_v61  ;;  %v17993_v16 = vsel %vm14657_vm14, %v12127_v55, %v10853_v59  ;;  %v12128_v11 = vrot.slane %v10752_v4, 9  ;;  %v10863_v25 = vrot.slane %v19209_v43, 5  ;;  %v10755_v10 = vld [vmem:[#allocation2 + $0x90] sm:$0xe] }
 0x405   : > { %v17983_v27 = vadd.f32 %v7813_v9, %v17652_v21  ;;  %v17999_v34 = vsel %vm14657_vm14, %v10855_v3, %v10856_v41  ;;  %v10862_v21 = vrot.slane %v10860_v57, 4  ;;  %v12129_v62 = vrot.slane %v10753_v31, 9 }
 0x406   : > { %v13213_v15 = vpop.f32.mrf.mxu1  ;;  %v18005_v49 = vpop.f32.mrf.mxu0  ;;  %v12143_v18 = vcombine.low %v17993_v16, %v17999_v34  ;;  %v10867_v6 = vrot.slane %v17714_v35, 5  ;;  %v18012_v52 = vsel %vm14657_vm14, %v12128_v11, %v10860_v57  ;;  %v10870_v59 = vrot.slane %v17721_v29, 5  ;;  %v19211_v11 = vld [vmem:[#allocation25_spill] sm:$0xff] }
 0x407   : > { %v18003_v5 = vadd.f32 %v13213_v15, %v19210_v63  ;;  %v18016_v61 = vsel %vm14657_vm14, %v10862_v21, %v10863_v25  ;;  %v10874_v4 = vrot.slane %v17738_v30, 5  ;;  %v12130_v3 = vrot.slane %v10754_v2, 9  ;;  %v10756_v25 = vld [vmem:[#allocation2 + $0x9c] sm:$0xe] }
 0x408   : > { %v7816_v37 = vpop.f32.mrf.mxu1  ;;  %v18023_v41 = vpop.f32.mrf.mxu0  ;;  %v10869_v9 = vrot.slane %v10867_v6, 4  ;;  %v18029_v31 = vsel %vm14657_vm14, %v12129_v62, %v10867_v6  ;;  %v10877_v29 = vrot.slane %v17740_v7, 5  ;;  %v10881_v30 = vrot.slane %v17760_v58, 5  ;;  %v19212_v63 = vld [vmem:[#allocation37_spill] sm:$0xff]  ;;  %v19213_v6 = vld [vmem:[#allocation39_spill] sm:$0xff] }
 0x409   : > { %v18021_v55 = vadd.f32 %v7816_v37, %v17901_v44  ;;  %v10876_v16 = vrot.slane %v10874_v4, 4  ;;  %v18042_v21 = vsel %vm14657_vm14, %v12130_v3, %v10874_v4  ;;  %v12131_v43 = vrot.slane %v10755_v10, 9  ;;  %v19214_v10 = vld [vmem:[#allocation26_spill] sm:$0xff]  ;;  %v19216_v3 = vld [vmem:[#allocation23_spill] sm:$0xff] }
 0x40a   : > { %v13216_v57 = vpop.f32.mrf.mxu1  ;;  %v18034_v15 = vpop.f32.mrf.mxu0  ;;  %v18038_v34 = vsel %vm14657_vm14, %v10869_v9, %v10870_v59  ;;  %v10884_v62 = vrot.slane %v19212_v63, 5  ;;  %v19215_v9 = vld [vmem:[#allocation28_spill] sm:$0xff]  ;;  %v19218_v4 = vld [vmem:[#allocation43_spill] sm:$0xff] }
 0x40b   : > { %v7946_v44 = vadd.f32 %v13216_v57, %v19211_v11  ;;  %13503 = vmatmul.mubr.bf16.gmra.mxu1 %v12140_v23  ;;  %v12145_v7 = vcombine.low %v18029_v31, %v18038_v34  ;;  %v18048_v58 = vsel %vm14657_vm14, %v10876_v16, %v10877_v29  ;;  %v10883_v23 = vrot.slane %v10881_v30, 4  ;;  %v19217_v34 = vld [vmem:[#allocation34_spill] sm:$0xff] }
 0x40c   : > { %13506 = vmatprep.mubr.bf16.mxu1 %v12141_v24  ;;  %v7829_v2 = vpop.f32.mrf.mxu1  ;;  %v18052_v59 = vpop.f32.mrf.mxu0  ;;  %v10888_v24 = vrot.slane %v19214_v10, 5  ;;  %v7384_v57 = vadd.f32 %v19216_v3, %v19215_v9  ;;  %v18061_v16 = vsel %vm14657_vm14, %v12131_v43, %v10881_v30  ;;  %v12132_v11 = vrot.slane %v10756_v25, 9  ;;  %v10758_v3 = vld [vmem:[#allocation2 + $0xb4] sm:$0xe] }
 0x40d   : > { %v7944_v37 = vadd.f32 %v7829_v2, %v19213_v6  ;;  %v18065_v29 = vsel %vm14657_vm14, %v10883_v23, %v10884_v62  ;;  %v10891_v9 = vrot.slane %v19218_v4, 5  ;;  %v10902_v30 = vrot.slane %v19219_v42, 5  ;;  %v19220_v6 = vld [vmem:[#allocation38_spill] sm:$0xff] }
 0x40e   : > { %v13217_v31 = vpop.f32.mrf.mxu1  ;;  %v18068_v63 = vpop.f32.mrf.mxu0  ;;  %v10890_v10 = vrot.slane %v10888_v24, 4  ;;  %v18078_v25 = vsel %vm14657_vm14, %v12132_v11, %v10888_v24  ;;  %v12134_v4 = vrot.slane %v10758_v3, 9  ;;  %v10905_v60 = vrot.slane %v19220_v6, 5  ;;  %v19221_v42 = vld [vmem:[#allocation42_spill] sm:$0xff]  ;;  %v19223_v3 = vld [vmem:[#allocation47_spill] sm:$0xff] }
 0x40f   : > { %v7947_v2 = vadd.f32 %v13217_v31, %v19217_v34  ;;  %v10904_v34 = vrot.slane %v10902_v30, 4 }
 0x410   : > { %v7832_v35 = vpop.f32.mrf.mxu1  ;;  %v18074_v22 = vpop.f32.mrf.mxu0  ;;  %v18082_v23 = vsel %vm14657_vm14, %v10890_v10, %v10891_v9  ;;  %v18095_v10 = vsel %vm14657_vm14, %v12134_v4, %v10902_v30  ;;  %v18112_v30 = vadd.f32 %v17874_v32, %v17983_v27  ;;  %v19225_v32 = vld [vmem:[#allocation24_spill] sm:$0xff] }
 0x411   : > { %v7945_v43 = vadd.f32 %v7832_v35, %v7384_v57  ;;  %v19222_v57 = vcombine.low %v17979_v40, %v17989_v56  ;;  %v18099_v9 = vsel %vm14657_vm14, %v10904_v34, %v10905_v60  ;;  %v18119_v34 = vadd.f32 %v17885_v38, %v18003_v5 }
 0x412   : > { %v13220_v62 = vpop.f32.mrf.mxu1  ;;  %v18091_v24 = vpop.f32.mrf.mxu0  ;;  %v12150_v40 = vcombine.low %v18095_v10, %v18099_v9 }
 0x413   : > { %v7950_v35 = vadd.f32 %v13220_v62, %v19221_v42  ;;  %13507 = vmatmul.mubr.bf16.gmra.mxu1 %v19222_v57  ;;  %v19224_v62 = vld [vmem:[#allocation33_spill] sm:$0xff]  ;;  %v18123_v42 = vadd.f32 %v17897_v48, %v18021_v55  ;;  %v18138_v38 = vadd.f32 %v17936_v39, %v7945_v43  ;;  %v19226_v55 = vld [vmem:[#allocation32_spill] sm:$0xff] }
 0x414   : > { %13510 = vmatprep.mubr.bf16.mxu1 %v12143_v18  ;;  %v7845_v11 = vpop.f32.mrf.mxu1  ;;  %v18102_v31 = vpop.f32.mrf.mxu0  ;;  %v18108_v18 = vadd.f32 %v17865_v54, %v17972_v17  ;;  %v18126_v54 = vadd.f32 %v17910_v50, %v7946_v44  ;;  %v18129_v17 = vadd.f32 %v17917_v12, %v7944_v37  ;;  %v19227_v37 = vcombine.low %v18012_v52, %v18016_v61  ;;  %v19230_v52 = vld [vmem:[#allocation44_spill] sm:$0xff] }
 0x415   : > { %v7948_v6 = vadd.f32 %v7845_v11, %v19223_v3  ;;  %v18135_v3 = vadd.f32 %v17928_v45, %v7947_v2  ;;  %v18141_v48 = vadd.f32 %v17949_v46, %v7950_v35  ;;  %v19228_v2 = vld [vmem:[#allocation36_spill] sm:$0xff]  ;;  %v10895_v61 = vrot.slane %v19230_v52, 5 }
 0x416   : > { %v13221_v56 = vpop.f32.mrf.mxu1  ;;  %v18115_v60 = vpop.f32.mrf.mxu0 }
 0x417   : > { %v7951_v4 = vadd.f32 %v13221_v56, %v19224_v62  ;;  %v18144_v50 = vadd.f32 %v17962_v33, %v7948_v6  ;;  %v19229_v6 = vld [vmem:[#allocation29_spill] sm:$0xff] }
 0x418   : > { %v7848_v57 = vpop.f32.mrf.mxu1  ;;  %v18132_v11 = vpop.f32.mrf.mxu0 }
 0x419   : > { %v7949_v27 = vadd.f32 %v7848_v57, %v19225_v32  ;;  %v18147_v12 = vadd.f32 %v17974_v8, %v7951_v4 }
 0x41a   : > { %v13224_v5 = vpop.f32.mrf.mxu1  ;;  %v18153_v45 = vpop.f32.mrf.mxu0 }
 0x41b   : > { %v7954_v44 = vadd.f32 %v13224_v5, %v19226_v55  ;;  %13511 = vmatmul.mubr.bf16.gmra.mxu1 %v19227_v37  ;;  %v18156_v39 = vadd.f32 %v17985_v28, %v7949_v27  ;;  %v19232_v5 = vld [vmem:[#allocation30_spill] sm:$0xff]  ;;  %v10757_v37 = vld [vmem:[#allocation2 + $0xa8] sm:$0xe] }
 0x41c   : > { %13514 = vmatprep.mubr.bf16.mxu1 %v12145_v7  ;;  %v7861_v46 = vpop.f32.mrf.mxu1  ;;  %v18159_v33 = vpop.f32.mrf.mxu0  ;;  %v19231_v7 = vld [vmem:[#allocation27_spill] sm:$0xff] }
 0x41d   : > { %v7952_v43 = vadd.f32 %v7861_v46, %v19228_v2  ;;  %v18162_v8 = vadd.f32 %v18005_v49, %v7954_v44  ;;  %v19233_v44 = vcombine.low %v18042_v21, %v18048_v58  ;;  %v10897_v46 = vrot.slane %v10895_v61, 4 }
 0x41e   : > { %v13225_v35 = vpop.f32.mrf.mxu1  ;;  %v18165_v62 = vpop.f32.mrf.mxu0 }
 0x41f   : > { %v7955_v56 = vadd.f32 %v13225_v35, %v19229_v6  ;;  %v18169_v4 = vadd.f32 %v18023_v41, %v7952_v43  ;;  %v19234_v43 = vcombine.low %v18061_v16, %v18065_v29  ;;  %v19235_v35 = vld [vmem:[#allocation45_spill] sm:$0xff] }
 0x420   : > { %v7864_v28 = vpop.f32.mrf.mxu1  ;;  %v18172_v32 = vpop.f32.mrf.mxu0  ;;  %v19238_v16 = vld [vmem:[#allocation41_spill] sm:$0xff] }
 0x421   : > { %v7953_v57 = vadd.f32 %v7864_v28, %v19231_v7  ;;  %v18175_v27 = vadd.f32 %v18034_v15, %v7955_v56  ;;  %v19236_v56 = vld [vmem:[#allocation40_spill] sm:$0xff]  ;;  %v12133_v7 = vrot.slane %v10757_v37, 9  ;;  %v10909_v29 = vrot.slane %v19238_v16, 5 }
 0x422   : > { %v13228_v49 = vpop.f32.mrf.mxu1  ;;  %v18181_v2 = vpop.f32.mrf.mxu0  ;;  %v10898_v52 = vrot.slane %v19236_v56, 5 }
 0x423   : > { %v7958_v55 = vadd.f32 %v13228_v49, %v19232_v5  ;;  %13515 = vmatmul.mubr.bf16.gmra.mxu1 %v19233_v44  ;;  %v18184_v41 = vadd.f32 %v18052_v59, %v7953_v57  ;;  %v19237_v49 = vld [vmem:[#allocation48_spill] sm:$0xff] }
 0x424   : > { %13518 = vmatprep.mubr.bf16.mxu1 %v19234_v43  ;;  %v7877_v15 = vpop.f32.mrf.mxu1  ;;  %v18191_v28 = vpop.f32.mrf.mxu0  ;;  %v10899_v59 = vsel %vm14657_vm14, %v10897_v46, %v10898_v52  ;;  %v19240_v52 = vld [vmem:[#allocation49_spill] sm:$0xff] }
 0x425   : > { %v7956_v6 = vadd.f32 %v7877_v15, %v19235_v35  ;;  %v18194_v21 = vadd.f32 %v18068_v63, %v7958_v55  ;;  %v19239_v15 = vld [vmem:[#allocation35_spill] sm:$0xff]  ;;  %v10896_v63 = vsel %vm14657_vm14, %v12133_v7, %v10895_v61  ;;  %v10759_v7 = vld [vmem:[#allocation2 + $0xc0] sm:$0xe] }
 0x426   : > { %v13229_v58 = vpop.f32.mrf.mxu1  ;;  %v18199_v57 = vpop.f32.mrf.mxu0  ;;  %v12149_v46 = vcombine.low %v10896_v63, %v10899_v59  ;;  %v10912_v59 = vrot.slane %v17848_v1, 5 }
 0x427   : > { %v7959_v5 = vadd.f32 %v13229_v58, %v19237_v49  ;;  %v18203_v44 = vadd.f32 %v18074_v22, %v7956_v6  ;;  %v19241_v49 = vcombine.low %v18078_v25, %v18082_v23  ;;  %v10911_v22 = vrot.slane %v10909_v29, 4 }
 0x428   : > { %v7880_v43 = vpop.f32.mrf.mxu1  ;;  %v18208_v55 = vpop.f32.mrf.mxu0 }
 0x429   : > { %v7957_v35 = vadd.f32 %v7880_v43, %v19239_v15  ;;  %v18211_v37 = vadd.f32 %v18091_v24, %v7959_v5  ;;  %v10916_v24 = vrot.slane %v17877_v0, 5  ;;  %v10760_v15 = vld [vmem:[#allocation2 + $0xcc] sm:$0xe] }
 0x42a   : > { %v13232_v56 = vpop.f32.mrf.mxu1  ;;  %v18217_v6 = vpop.f32.mrf.mxu0 }
 0x42b   : > { %v7962_v58 = vadd.f32 %v13232_v56, %v19240_v52  ;;  %13519 = vmatmul.mubr.bf16.gmra.mxu1 %v19241_v49  ;;  %v18220_v16 = vadd.f32 %v18102_v31, %v7957_v35  ;;  %v12135_v56 = vrot.slane %v10759_v7, 9  ;;  %v10913_v31 = vsel %vm14657_vm14, %v10911_v22, %v10912_v59 }
 0x42c   : > { %13522 = vmatprep.mubr.bf16.mxu1 %v12149_v46  ;;  %v7893_v61 = vpop.f32.mrf.mxu1  ;;  %v8313_v43 = vpop.f32.mrf.mxu0  ;;  %v12136_v46 = vrot.slane %v10760_v15, 9  ;;  %v10918_v1 = vrot.slane %v10916_v24, 4  ;;  %v10919_v52 = vrot.slane %v17883_v19, 5 }
 0x42d   : > { %v7960_v5 = vadd.f32 %v7893_v61, %v17860_v20  ;;  %v18226_v25 = vadd.f32 %v18115_v60, %v7962_v58  ;;  %v10910_v58 = vsel %vm14657_vm14, %v12135_v56, %v10909_v29 }
 0x42e   : > { %v13233_v23 = vpop.f32.mrf.mxu1  ;;  %v12151_v61 = vcombine.low %v10910_v58, %v10913_v31  ;;  %v10917_v29 = vsel %vm14657_vm14, %v12136_v46, %v10916_v24 }
 0x42f   : > { %v7963_v63 = vadd.f32 %v13233_v23, %v17863_v14  ;;  %v18231_v35 = vpop.f32.mrf.mxu0  ;;  %v18234_v0 = vadd.f32 %v18132_v11, %v7960_v5  ;;  %v19242_v5 = vld [vmem:[#allocation50_spill] sm:$0xff] }
 0x430   : > { %v7896_v20 = vpop.f32.mrf.mxu1 }
 0x431   : > { %v7961_v60 = vadd.f32 %v7896_v20, %v17870_v51  ;;  %v18240_v14 = vpop.f32.mrf.mxu0  ;;  %v18243_v49 = vadd.f32 %v18153_v45, %v7963_v63  ;;  %v10920_v45 = vsel %vm14657_vm14, %v10918_v1, %v10919_v52 }
 0x433   : > { %v13236_v22 = vpop.f32.mrf.mxu1  ;;  %13523 = vmatmul.mubr.bf16.gmra.mxu1 %v12150_v40  ;;  %v18249_v7 = vpop.f32.mrf.mxu0  ;;  %v18252_v51 = vadd.f32 %v18159_v33, %v7961_v60  ;;  %v19243_v40 = vld [vmem:[#allocation51_spill] sm:$0xff]  ;;  %v12152_v33 = vcombine.low %v10917_v29, %v10920_v45 }
 0x434   : > { %v7966_v11 = vadd.f32 %v13236_v22, %v17880_v13  ;;  %13526 = vmatprep.mubr.bf16.mxu1 %v12151_v61 }
 0x435   : > { %v7909_v19 = vpop.f32.mrf.mxu1  ;;  %v18259_v13 = vpop.f32.mrf.mxu0 }
 0x436   : > { %v7964_v59 = vadd.f32 %v7909_v19, %v19242_v5  ;;  %v18262_v10 = vadd.f32 %v18165_v62, %v7966_v11  ;;  %v19245_v19 = vld [vmem:[#allocation53_spill] sm:$0xff] }
 0x437   : > { %v13237_v9 = vpop.f32.mrf.mxu1  ;;  %v18265_v23 = vpop.f32.mrf.mxu0 }
 0x438   : > { %v7967_v15 = vadd.f32 %v13237_v9, %v19243_v40  ;;  %v18268_v63 = vadd.f32 %v18172_v32, %v7964_v59 }
 0x439   : > { %v7912_v24 = vpop.f32.mrf.mxu1  ;;  %v18271_v56 = vpop.f32.mrf.mxu0 }
 0x43a   : > { %v7965_v26 = vadd.f32 %v7912_v24, %v17914_v53  ;;  %v18274_v31 = vadd.f32 %v18181_v2, %v7967_v15  ;;  %v19244_v2 = vld [vmem:[#allocation52_spill] sm:$0xff] }
 0x43b   : > { %v13240_v20 = vpop.f32.mrf.mxu1  ;;  %13527 = vmatmul.mubr.bf16.gmra.mxu1 %v12152_v33  ;;  %v18277_v46 = vpop.f32.mrf.mxu0 }
 0x43c   : > { %v7970_v62 = vadd.f32 %v13240_v20, %v17923_v36  ;;  %v18280_v1 = vadd.f32 %v18191_v28, %v7965_v26 }
 0x43d   : > { %v7925_v52 = vpop.f32.mrf.mxu1  ;;  %v18283_v60 = vpop.f32.mrf.mxu0 }
 0x43e   : > { %v7968_v32 = vadd.f32 %v7925_v52, %v17934_v47  ;;  %v18286_v53 = vadd.f32 %v18199_v57, %v7970_v62 }
 0x43f   : > { %v13241_v58 = vpop.f32.mrf.mxu1  ;;  %v18289_v61 = vpop.f32.mrf.mxu0 }
 0x440   : > { %v7971_v22 = vadd.f32 %v13241_v58, %v19244_v2  ;;  %v18292_v36 = vadd.f32 %v18208_v55, %v7968_v32 }
 0x441   : > { %v7928_v11 = vpop.f32.mrf.mxu1  ;;  %v18295_v29 = vpop.f32.mrf.mxu0 }
 0x442   : > { %v7969_v28 = vadd.f32 %v7928_v11, %v19245_v19  ;;  %v18298_v47 = vadd.f32 %v18217_v6, %v7971_v22 }
 0x443   : > { %v13308_v45 = vpop.f32.mrf.mxu1  ;;  %v18303_v5 = vpop.f32.mrf.mxu0 }
 0x444   : > { %v18301_v57 = vadd.f32 %v13308_v45, %v18108_v18  ;;  %v18305_v59 = vadd.f32 %v8313_v43, %v7969_v28 }
 0x445   : > { %v8951_v9 = vpop.f32.mrf.mxu1  ;;  %v18310_v40 = vpop.f32.mrf.mxu0 }
 0x446   : > { %v18308_v55 = vadd.f32 %v8951_v9, %v18112_v30 }
 0x447   : > { %v13309_v15 = vpop.f32.mrf.mxu1  ;;  %v18315_v6 = vpop.f32.mrf.mxu0 }
 0x448   : > { %v18313_v33 = vadd.f32 %v13309_v15, %v18119_v34 }
 0x449   : > { %v8954_v24 = vpop.f32.mrf.mxu1  ;;  %v18320_v26 = vpop.f32.mrf.mxu0 }
 0x44a   : > { %v18318_v18 = vadd.f32 %v8954_v24, %v18123_v42 }
 0x44b   : > { %v13312_v43 = vpop.f32.mrf.mxu1  ;;  %v18325_v30 = vpop.f32.mrf.mxu0 }
 0x44c   : > { %v18323_v20 = vadd.f32 %v13312_v43, %v18126_v54 }
 0x44d   : > { %v8967_v62 = vpop.f32.mrf.mxu1  ;;  %v18330_v34 = vpop.f32.mrf.mxu0 }
 0x44e   : > { %v18328_v52 = vadd.f32 %v8967_v62, %v18129_v17 }
 0x44f   : > { %v13313_v32 = vpop.f32.mrf.mxu1  ;;  %v18335_v42 = vpop.f32.mrf.mxu0 }
 0x450   : > { %v18333_v58 = vadd.f32 %v13313_v32, %v18135_v3 }
 0x451   : > { %v8970_v2 = vpop.f32.mrf.mxu1  ;;  %v18340_v54 = vpop.f32.mrf.mxu0 }
 0x452   : > { %v18338_v22 = vadd.f32 %v8970_v2, %v18138_v38 }
 0x453   : > { %v13316_v11 = vpop.f32.mrf.mxu1  ;;  %v18345_v17 = vpop.f32.mrf.mxu0 }
 0x454   : > { %v18343_v19 = vadd.f32 %v13316_v11, %v18141_v48 }
 0x455   : > { %v8983_v28 = vpop.f32.mrf.mxu1  ;;  %v18350_v3 = vpop.f32.mrf.mxu0 }
 0x456   : > { %v18348_v45 = vadd.f32 %v8983_v28, %v18144_v50 }
 0x457   : > { %v13317_v9 = vpop.f32.mrf.mxu1  ;;  %v18355_v38 = vpop.f32.mrf.mxu0 }
 0x458   : > { %v18353_v15 = vadd.f32 %v13317_v9, %v18147_v12  ;;  %19246 = vst [vmem:[#allocation54_spill] sm:$0xff] %v18355_v38 }
 0x459   : > { %v8986_v24 = vpop.f32.mrf.mxu1  ;;  %v18360_v48 = vpop.f32.mrf.mxu0 }
 0x45a   : > { %v18358_v43 = vadd.f32 %v8986_v24, %v18156_v39  ;;  %19247 = vst [vmem:[#allocation57_spill] sm:$0xff] %v18360_v48 }
 0x45b   : > { %v13320_v62 = vpop.f32.mrf.mxu1  ;;  %v18365_v50 = vpop.f32.mrf.mxu0 }
 0x45c   : > { %v18363_v32 = vadd.f32 %v13320_v62, %v18162_v8  ;;  %19248 = vst [vmem:[#allocation55_spill] sm:$0xff] %v18365_v50 }
 0x45d   : > { %v8999_v2 = vpop.f32.mrf.mxu1  ;;  %v18370_v28 = vpop.f32.mrf.mxu0 }
 0x45e   : > { %v18368_v11 = vadd.f32 %v8999_v2, %v18169_v4  ;;  %19249 = vst [vmem:[#allocation56_spill] sm:$0xff] %v18370_v28 }
 0x45f   : > { %v13321_v12 = vpop.f32.mrf.mxu1  ;;  %v18378_v38 = vpop.f32.mrf.mxu0 }
 0x460   : > { %v18373_v9 = vadd.f32 %v13321_v12, %v18175_v27  ;;  %19250 = vst [vmem:[#allocation60_spill] sm:$0xff] %v18378_v38 }
 0x461   : > { %v9002_v39 = vpop.f32.mrf.mxu1  ;;  %v18386_v50 = vpop.f32.mrf.mxu0 }
 0x462   : > { %v18376_v24 = vadd.f32 %v9002_v39, %v18184_v41  ;;  %19251 = vst [vmem:[#allocation58_spill] sm:$0xff] %v18386_v50 }
 0x463   : > { %v13324_v48 = vpop.f32.mrf.mxu1  ;;  %v18394_v28 = vpop.f32.mrf.mxu0 }
 0x464   : > { %v18381_v8 = vadd.f32 %v13324_v48, %v18194_v21  ;;  %19252 = vst [vmem:[#allocation59_spill] sm:$0xff] %v18394_v28 }
 0x465   : > { %v9015_v62 = vpop.f32.mrf.mxu1  ;;  %v18402_v38 = vpop.f32.mrf.mxu0 }
 0x466   : > { %v18384_v4 = vadd.f32 %v9015_v62, %v18203_v44  ;;  %19253 = vst [vmem:[#allocation63_spill] sm:$0xff] %v18402_v38 }
 0x467   : > { %v13325_v2 = vpop.f32.mrf.mxu1 }
 0x468   : > { %v18389_v27 = vadd.f32 %v13325_v2, %v18211_v37 }
 0x469   : > { %v9018_v12 = vpop.f32.mrf.mxu1 }
 0x46a   : > { %v18392_v41 = vadd.f32 %v9018_v12, %v18220_v16  ;;  %v18410_v12 = vpop.f32.mrf.mxu0 }
 0x46b   : > { %v13328_v39 = vpop.f32.mrf.mxu1  ;;  %19254 = vst [vmem:[#allocation61_spill] sm:$0xff] %v18410_v12 }
 0x46c   : > { %v18397_v21 = vadd.f32 %v13328_v39, %v18226_v25 }
 0x46d   : > { %v9031_v48 = vpop.f32.mrf.mxu1 }
 0x46e   : > { %v18400_v44 = vadd.f32 %v9031_v48, %v18234_v0  ;;  %v18418_v48 = vpop.f32.mrf.mxu0 }
 0x46f   : > { %v13329_v62 = vpop.f32.mrf.mxu1  ;;  %19256 = vst [vmem:[#allocation62_spill] sm:$0xff] %v18418_v48 }
 0x470   : > { %v18405_v37 = vadd.f32 %v13329_v62, %v18243_v49 }
 0x471   : > { %v9034_v2 = vpop.f32.mrf.mxu1 }
 0x472   : > { %v18408_v16 = vadd.f32 %v9034_v2, %v18252_v51  ;;  %v18426_v2 = vpop.f32.mrf.mxu0 }
 0x473   : > { %v13332_v28 = vpop.f32.mrf.mxu1  ;;  %19259 = vst [vmem:[#allocation66_spill] sm:$0xff] %v18426_v2 }
 0x474   : > { %v18413_v25 = vadd.f32 %v13332_v28, %v18262_v10  ;;  %v18431_v50 = vpop.f32.mrf.mxu0 }
 0x475   : > { %v9047_v39 = vpop.f32.mrf.mxu1  ;;  %19261 = vst [vmem:[#allocation68_spill] sm:$0xff] %v18431_v50 }
 0x476   : > { %v18416_v0 = vadd.f32 %v9047_v39, %v18268_v63 }
 0x477   : > { %v13333_v38 = vpop.f32.mrf.mxu1  ;;  %v18439_v48 = vpop.f32.mrf.mxu0 }
 0x478   : > { %19255 = vst [vmem:[#allocation65_spill] sm:$0xff] %v18416_v0  ;;  %v18421_v49 = vadd.f32 %v13333_v38, %v18274_v31 }
 0x479   : > { %v9050_v62 = vpop.f32.mrf.mxu1 }
 0x47a   : > { %19257 = vst [vmem:[#allocation67_spill] sm:$0xff] %v18421_v49  ;;  %v18424_v51 = vadd.f32 %v9050_v62, %v18280_v1 }
 0x47b   : > { %v13336_v12 = vpop.f32.mrf.mxu1 }
 0x47c   : > { %19258 = vst [vmem:[#allocation64_spill] sm:$0xff] %v18424_v51  ;;  %v18429_v10 = vadd.f32 %v13336_v12, %v18286_v53  ;;  %v18444_v53 = vpop.f32.mrf.mxu0 }
 0x47d   : > { %v9063_v28 = vpop.f32.mrf.mxu1 }
 0x47e   : > { %19260 = vst [vmem:[#allocation69_spill] sm:$0xff] %v18429_v10  ;;  %v18434_v63 = vadd.f32 %v9063_v28, %v18292_v36  ;;  %v18448_v50 = vpop.f32.mrf.mxu0 }
 0x47f   : > { %v13337_v39 = vpop.f32.mrf.mxu1 }
 0x480   : > { %19262 = vst [vmem:[#allocation71_spill] sm:$0xff] %v18434_v63  ;;  %v18437_v31 = vadd.f32 %v13337_v39, %v18298_v47  ;;  %v18454_v47 = vpop.f32.mrf.mxu0 }
 0x481   : > { %v9066_v38 = vpop.f32.mrf.mxu1  ;;  %19266 = vst [vmem:[#allocation74_spill] sm:$0xff] %v18454_v47 }
 0x482   : > { %19263 = vst [vmem:[#allocation70_spill] sm:$0xff] %v18437_v31  ;;  %v18442_v1 = vadd.f32 %v9066_v38, %v18305_v59 }
 0x483   : > { %v13404_v62 = vpop.f32.mrf.mxu1 }
 0x484   : > { %19264 = vst [vmem:[#allocation73_spill] sm:$0xff] %v18442_v1 }
 0x485   : > { %v9833_v2 = vpop.f32.mrf.mxu1  ;;  %v18460_v59 = vpop.f32.mrf.mxu0 }
 0x486   : > { %19269 = vst [vmem:[#allocation18_spill] sm:$0xff] %v18460_v59 }
 0x487   : > { %v13405_v12 = vpop.f32.mrf.mxu1  ;;  %v18466_v63 = vpop.f32.mrf.mxu0 }
 0x488   : > { %19272 = vst [vmem:[#allocation15_spill] sm:$0xff] %v18466_v63 }
 0x489   : > { %v18446_v10 = vpop.f32.mrf.mxu1  ;;  %v18472_v0 = vpop.f32.mrf.mxu0 }
 0x48a   : > { %19275 = vst [vmem:[#allocation16_spill] sm:$0xff] %v18472_v0 }
 0x48b   : > { %v18450_v36 = vpop.f32.mrf.mxu1 }
 0x48d   : > { %v18452_v28 = vpop.f32.mrf.mxu1 }
 0x48e   : > { %19265 = vst [vmem:[#allocation72_spill] sm:$0xff] %v18452_v28 }
 0x48f   : > { %v18456_v39 = vpop.f32.mrf.mxu1 }
 0x490   : > { %19267 = vst [vmem:[#allocation75_spill] sm:$0xff] %v18456_v39  ;;  %v18478_v39 = vpop.f32.mrf.mxu0 }
 0x491   : > { %v18458_v31 = vpop.f32.mrf.mxu1  ;;  %19278 = vst [vmem:[#allocation22_spill] sm:$0xff] %v18478_v39 }
 0x492   : > { %19268 = vst [vmem:[#allocation19_spill] sm:$0xff] %v18458_v31 }
 0x493   : > { %v18462_v38 = vpop.f32.mrf.mxu1 }
 0x494   : > { %19270 = vst [vmem:[#allocation21_spill] sm:$0xff] %v18462_v38  ;;  %v18484_v38 = vpop.f32.mrf.mxu0 }
 0x495   : > { %v18464_v1 = vpop.f32.mrf.mxu1  ;;  %19281 = vst [vmem:[#allocation39_spill] sm:$0xff] %v18484_v38 }
 0x496   : > { %19271 = vst [vmem:[#allocation20_spill] sm:$0xff] %v18464_v1 }
 0x497   : > { %v18468_v51 = vpop.f32.mrf.mxu1 }
 0x498   : > { %19273 = vst [vmem:[#allocation14_spill] sm:$0xff] %v18468_v51  ;;  %v18490_v51 = vpop.f32.mrf.mxu0 }
 0x499   : > { %v18470_v49 = vpop.f32.mrf.mxu1  ;;  %19284 = vst [vmem:[#allocation23_spill] sm:$0xff] %v18490_v51 }
 0x49a   : > { %19274 = vst [vmem:[#allocation13_spill] sm:$0xff] %v18470_v49 }
 0x49b   : > { %v18474_v28 = vpop.f32.mrf.mxu1 }
 0x49c   : > { %19276 = vst [vmem:[#allocation17_spill] sm:$0xff] %v18474_v28  ;;  %v18496_v28 = vpop.f32.mrf.mxu0 }
 0x49d   : > { %v18476_v47 = vpop.f32.mrf.mxu1  ;;  %19287 = vst [vmem:[#allocation31_spill] sm:$0xff] %v18496_v28 }
 0x49e   : > { %19277 = vst [vmem:[#allocation46_spill] sm:$0xff] %v18476_v47 }
 0x49f   : > { %v18480_v31 = vpop.f32.mrf.mxu1 }
 0x4a0   : > { %19279 = vst [vmem:[#allocation25_spill] sm:$0xff] %v18480_v31  ;;  %v18502_v31 = vpop.f32.mrf.mxu0 }
 0x4a1   : > { %v18482_v59 = vpop.f32.mrf.mxu1 }
 0x4a2   : > { %19280 = vst [vmem:[#allocation37_spill] sm:$0xff] %v18482_v59 }
 0x4a3   : > { %v18486_v1 = vpop.f32.mrf.mxu1 }
 0x4a4   : > { %19282 = vst [vmem:[#allocation26_spill] sm:$0xff] %v18486_v1  ;;  %v18508_v1 = vpop.f32.mrf.mxu0 }
 0x4a5   : > { %v18488_v63 = vpop.f32.mrf.mxu1  ;;  %19292 = vst [vmem:[#allocation24_spill] sm:$0xff] %v18508_v1 }
 0x4a6   : > { %19283 = vst [vmem:[#allocation28_spill] sm:$0xff] %v18488_v63 }
 0x4a7   : > { %v18492_v49 = vpop.f32.mrf.mxu1 }
 0x4a8   : > { %19285 = vst [vmem:[#allocation34_spill] sm:$0xff] %v18492_v49  ;;  %v18514_v49 = vpop.f32.mrf.mxu0 }
 0x4a9   : > { %v18494_v0 = vpop.f32.mrf.mxu1 }
 0x4aa   : > { %19286 = vst [vmem:[#allocation43_spill] sm:$0xff] %v18494_v0 }
 0x4ab   : > { %v18498_v47 = vpop.f32.mrf.mxu1 }
 0x4ac   : > { %19288 = vst [vmem:[#allocation38_spill] sm:$0xff] %v18498_v47  ;;  %v18520_v47 = vpop.f32.mrf.mxu0 }
 0x4ad   : > { %v18500_v39 = vpop.f32.mrf.mxu1  ;;  %19297 = vst [vmem:[#allocation27_spill] sm:$0xff] %v18520_v47 }
 0x4ae   : > { %19289 = vst [vmem:[#allocation42_spill] sm:$0xff] %v18500_v39 }
 0x4af   : > { %v18504_v59 = vpop.f32.mrf.mxu1 }
 0x4b0   : > { %19290 = vst [vmem:[#allocation47_spill] sm:$0xff] %v18504_v59  ;;  %v9577_v59 = vadd.f32 %v18231_v35, %v18301_v57  ;;  %v9579_v57 = vadd.f32 %v18271_v56, %v18328_v52  ;;  %v18558_v56 = vadd.f32 %v18310_v40, %v18358_v43  ;;  %v18579_v40 = vadd.f32 %v18330_v34, %v18376_v24  ;;  %v18592_v52 = vld [vmem:[%s18940_s5] ss:$0 sm:$0xff]  ;;  %v19301_v43 = vld [vmem:[#allocation55_spill] sm:$0xff] }
 0x4b1   : > { %v18506_v38 = vpop.f32.mrf.mxu1  ;;  %v18597_v34 = vadd.f32 %v18345_v17, %v18389_v27  ;;  %v18619_v17 = vld [vmem:[%s18941_s6] ss:$0 sm:$0xff] }
 0x4b2   : > { %19291 = vst [vmem:[#allocation33_spill] sm:$0xff] %v18506_v38  ;;  %v9962_v1 = vadd.f32 %v13404_v62, %v9577_v59  ;;  %v19311_v59 = vld [vmem:[#allocation64_spill] sm:$0xff] }
 0x4b3   : > { %v18510_v63 = vpop.f32.mrf.mxu1 }
 0x4b4   : > { %19293 = vst [vmem:[#allocation32_spill] sm:$0xff] %v18510_v63  ;;  %v9575_v63 = vadd.f32 %v18240_v14, %v18308_v55  ;;  %v9582_v14 = vadd.f32 %v18277_v46, %v18333_v58  ;;  %v9580_v55 = vadd.f32 %v18283_v60, %v18338_v22  ;;  %v18566_v60 = vadd.f32 %v18315_v6, %v18363_v32 }
 0x4b5   : > { %v18512_v51 = vpop.f32.mrf.mxu1  ;;  %v18587_v6 = vadd.f32 %v18340_v54, %v18384_v4  ;;  %v18602_v22 = vadd.f32 %v18350_v3, %v18392_v41  ;;  %v19299_v54 = vld [vmem:[#allocation54_spill] sm:$0xff]  ;;  %v18614_v32 = vadd.f32 %v19301_v43, %v18405_v37  ;;  %v19304_v37 = vld [vmem:[#allocation65_spill] sm:$0xff] }
 0x4b6   : > { %19294 = vst [vmem:[#allocation36_spill] sm:$0xff] %v18512_v51  ;;  %v18530_v51 = vpop.f32.mrf.mxu0  ;;  %v9960_v35 = vadd.f32 %v9833_v2, %v9575_v63  ;;  %v19306_v2 = vld [vmem:[#allocation67_spill] sm:$0xff] }
 0x4b7   : > { %v18516_v0 = vpop.f32.mrf.mxu1 }
 0x4b8   : > { %19295 = vst [vmem:[#allocation29_spill] sm:$0xff] %v18516_v0  ;;  %v9578_v0 = vadd.f32 %v18249_v7, %v18313_v33  ;;  %v9585_v7 = vadd.f32 %v18289_v61, %v18343_v19  ;;  %v18570_v61 = vadd.f32 %v18320_v26, %v18368_v11  ;;  %v18606_v19 = vadd.f32 %v19299_v54, %v18397_v21  ;;  %v19303_v21 = vld [vmem:[#allocation60_spill] sm:$0xff] }
 0x4b9   : > { %v18518_v28 = vpop.f32.mrf.mxu1 }
 0x4ba   : > { %19296 = vst [vmem:[#allocation44_spill] sm:$0xff] %v18518_v28  ;;  %v9576_v28 = vadd.f32 %v18259_v13, %v18318_v18  ;;  %v18550_v13 = vadd.f32 %v18295_v29, %v18348_v45  ;;  %v9963_v46 = vadd.f32 %v13405_v12, %v9578_v0  ;;  %v18562_v18 = vpop.f32.mrf.mxu0  ;;  %v10715_v29 = vadd.f32 %v18439_v48, %v9962_v1  ;;  %v19300_v45 = vld [vmem:[#allocation57_spill] sm:$0xff]  ;;  %v19305_v0 = vld [vmem:[#allocation58_spill] sm:$0xff] }
 0x4bb   : > { %v18522_v39 = vpop.f32.mrf.mxu1  ;;  %v18636_v48 = vadd.f32 %v19305_v0, %v19304_v37  ;;  %v19320_v0 = vld [vmem:[#allocation18_spill] sm:$0xff] }
 0x4bc   : > { %19298 = vst [vmem:[#allocation30_spill] sm:$0xff] %v18522_v39  ;;  %v9581_v39 = vadd.f32 %v18265_v23, %v18323_v20  ;;  %v18554_v23 = vadd.f32 %v18303_v5, %v18353_v15  ;;  %v18575_v5 = vadd.f32 %v18325_v30, %v18373_v9  ;;  %v18583_v20 = vadd.f32 %v18335_v42, %v18381_v8  ;;  %v18621_v3 = vpop.f32.mrf.mxu0  ;;  %v19302_v9 = vld [vmem:[#allocation56_spill] sm:$0xff] }
 0x4bd   : > { %v18526_v38 = vpop.f32.mrf.mxu1  ;;  %v9961_v30 = vadd.f32 %v18446_v10, %v9576_v28  ;;  %v10713_v42 = vadd.f32 %v18444_v53, %v9960_v35  ;;  %v18610_v15 = vadd.f32 %v19300_v45, %v18400_v44  ;;  %v18625_v24 = vadd.f32 %v19302_v9, %v18408_v16  ;;  %v19307_v10 = vld [vmem:[#allocation59_spill] sm:$0xff]  ;;  %v19308_v53 = vld [vmem:[#allocation74_spill] sm:$0xff] }
 0x4be   : > { %v10716_v27 = vadd.f32 %v18448_v50, %v9963_v46  ;;  %v9966_v41 = vadd.f32 %v18450_v36, %v9581_v39  ;;  %v18632_v44 = vadd.f32 %v19303_v21, %v18413_v25  ;;  %v18640_v63 = vadd.f32 %v19307_v10, %v19306_v2  ;;  %v19309_v36 = vld [vmem:[#allocation72_spill] sm:$0xff]  ;;  %v19310_v28 = vld [vmem:[#allocation75_spill] sm:$0xff]  ;;  %v18655_v54 = vpop.f32.mrf.mxu0  ;;  %v19319_v21 = vld [vmem:[#allocation66_spill] sm:$0xff] }
 0x4bf   : > { %v18538_v47 = vpop.f32.mrf.mxu1  ;;  %v10714_v12 = vadd.f32 %v19308_v53, %v9961_v30  ;;  %v9964_v25 = vadd.f32 %v19309_v36, %v9579_v57  ;;  %v9967_v39 = vadd.f32 %v19310_v28, %v9582_v14  ;;  %v19312_v35 = vld [vmem:[#allocation63_spill] sm:$0xff] }
 0x4c0   : > { %v18649_v46 = vadd.f32 %v19312_v35, %v19311_v59  ;;  %v19315_v57 = vld [vmem:[#allocation19_spill] sm:$0xff]  ;;  %v10719_v2 = vadd.f32 %v19320_v0, %v9966_v41  ;;  %v13882_v0 = vld [vmem:[%s14246_s17 + $0x18] sm:$0xff] }
 0x4c1   : > { %v18560_v33 = vpop.f32.mrf.mxu1  ;;  %v9965_v9 = vadd.f32 %v19315_v57, %v9580_v55  ;;  %v19316_v14 = vld [vmem:[#allocation71_spill] sm:$0xff]  ;;  %v19321_v55 = vld [vmem:[#allocation21_spill] sm:$0xff] }
 0x4c2   : > { %v19322_v28 = vld [vmem:[#allocation15_spill] sm:$0xff]  ;;  %v13881_v57 = vld [vmem:[%s14246_s17] sm:$0xff] }
 0x4c3   : > { %v13500_v26 = vpop.f32.mrf.mxu1  ;;  %v10717_v59 = vadd.f32 %v19322_v28, %v9964_v25  ;;  %v19325_v25 = vld [vmem:[#allocation22_spill] sm:$0xff] }
 0x4c4   : > { %v11212_v58 = vadd.f32 %v13500_v26, %v10715_v29  ;;  %v19313_v29 = vld [vmem:[#allocation69_spill] sm:$0xff] }
 0x4c5   : > { %v11083_v11 = vpop.f32.mrf.mxu1  ;;  %v19314_v26 = vld [vmem:[#allocation61_spill] sm:$0xff] }
 0x4c6   : > { %v11251_v8 = vmul.f32 %v18592_v52, %v11212_v58  ;;  %v11210_v4 = vadd.f32 %v11083_v11, %v10713_v42  ;;  %v18653_v58 = vadd.f32 %v19314_v26, %v19313_v29  ;;  %v19323_v29 = vld [vmem:[#allocation16_spill] sm:$0xff] }
 0x4c7   : > { %v13501_v16 = vpop.f32.mrf.mxu1  ;;  %v10720_v26 = vadd.f32 %v19323_v29, %v9967_v39 }
 0x4c8   : > { %v11290_v1 = vadd.f32 %v18619_v17, %v11251_v8  ;;  %v11249_v62 = vmul.f32 %v18592_v52, %v11210_v4  ;;  %v11213_v50 = vadd.f32 %v13501_v16, %v10716_v27  ;;  %v19317_v8 = vld [vmem:[#allocation62_spill] sm:$0xff]  ;;  %v13880_v16 = vld [vmem:[%s14246_s17 + $0x10] sm:$0xff] }
 0x4c9   : > { %v11086_v42 = vpop.f32.mrf.mxu1  ;;  %v18662_v4 = vadd.f32 %v19317_v8, %v19316_v14  ;;  %v19318_v27 = vld [vmem:[#allocation70_spill] sm:$0xff] }
 0x4ca   : > { %v11322_v45 = vmax.f32 %v11290_v1, 0.0  ;;  %v11288_v43 = vadd.f32 %v18619_v17, %v11249_v62  ;;  %v11252_v30 = vmul.f32 %v18592_v52, %v11213_v50  ;;  %v11211_v11 = vadd.f32 %v11086_v42, %v10714_v12  ;;  %v18675_v42 = vpop.f32.mrf.mxu0 }
 0x4cb   : > { %v18666_v37 = vadd.f32 %v19319_v21, %v19318_v27  ;;  %v13504_v10 = vpop.f32.mrf.mxu1  ;;  %v9970_v12 = vadd.f32 %v19321_v55, %v9585_v7  ;;  %v10718_v21 = vadd.f32 %v19325_v25, %v9965_v9  ;;  %v19330_v25 = vld [vmem:[#allocation17_spill] sm:$0xff] }
 0x4cc   : > { %v11354_v1 = vadd.f32 %v13880_v16, %v11322_v45  ;;  %v11320_v62 = vmax.f32 %v11288_v43, 0.0  ;;  %v11291_v50 = vadd.f32 %v18619_v17, %v11252_v30  ;;  %v11250_v53 = vmul.f32 %v18592_v52, %v11211_v11  ;;  %v19324_v11 = vld [vmem:[#allocation20_spill] sm:$0xff] }
 0x4cd   : > { %v11216_v36 = vadd.f32 %v13504_v10, %v10719_v2  ;;  %v11099_v35 = vpop.f32.mrf.mxu1  ;;  %v9968_v14 = vadd.f32 %v19324_v11, %v18550_v13  ;;  %v19326_v13 = vld [vmem:[#allocation14_spill] sm:$0xff] }
 0x4ce   : > { %v11386_v41 = vmax.f32 %v11354_v1, 0.0  ;;  %v11352_v45 = vadd.f32 %v13881_v57, %v11320_v62  ;;  %v11323_v43 = vmax.f32 %v11291_v50, 0.0  ;;  %v11289_v30 = vadd.f32 %v18619_v17, %v11250_v53  ;;  %v19327_v53 = vld [vmem:[#allocation39_spill] sm:$0xff] }
 0x4cf   : > { %v11255_v7 = vmul.f32 %v18592_v52, %v11216_v36  ;;  %v11214_v8 = vadd.f32 %v11099_v35, %v10717_v59  ;;  %v13505_v27 = vpop.f32.mrf.mxu1  ;;  %v9971_v1 = vadd.f32 %v19326_v13, %v18554_v23  ;;  %v10723_v55 = vadd.f32 %v19327_v53, %v9970_v12  ;;  %v18694_v36 = vpop.f32.mrf.mxu0  ;;  %v13883_v59 = vld [vmem:[%s14246_s17 + $0x8] sm:$0xff]  ;;  %v19328_v23 = vld [vmem:[#allocation13_spill] sm:$0xff] }
 0x4d0   : > { %11418 = vst [vmem:[%s18685_s30 + $0x10] sm:$0xff] %v11386_v41  ;;  %v11384_v39 = vmax.f32 %v11352_v45, 0.0  ;;  %v11355_v2 = vadd.f32 %v13882_v0, %v11323_v43  ;;  %v11321_v10 = vmax.f32 %v11289_v30, 0.0  ;;  %v11217_v16 = vadd.f32 %v13505_v27, %v10720_v26  ;;  %v19329_v30 = vld [vmem:[#allocation23_spill] sm:$0xff]  ;;  %v19332_v53 = vld [vmem:[#allocation46_spill] sm:$0xff] }
 0x4d1   : > { %v11294_v62 = vadd.f32 %v18619_v17, %v11255_v7  ;;  %v11253_v9 = vmul.f32 %v18592_v52, %v11214_v8  ;;  %v11102_v50 = vpop.f32.mrf.mxu1  ;;  %v9969_v41 = vadd.f32 %v19328_v23, %v18558_v56  ;;  %v10721_v12 = vadd.f32 %v19329_v30, %v9968_v14  ;;  %v18710_v13 = vpop.f32.mrf.mxu0 }
 0x4d2   : > { %11416 = vst [vmem:[%s18685_s30] sm:$0xff] %v11384_v39  ;;  %v11387_v28 = vmax.f32 %v11355_v2, 0.0  ;;  %v11353_v35 = vadd.f32 %v13883_v59, %v11321_v10  ;;  %v11256_v29 = vmul.f32 %v18592_v52, %v11217_v16  ;;  %v11215_v26 = vadd.f32 %v11102_v50, %v10718_v21  ;;  %v13884_v39 = vld [vmem:[%s14246_s17 + $0x30] sm:$0xff] }
 0x4d3   : > { %v11326_v57 = vmax.f32 %v11294_v62, 0.0  ;;  %v11292_v45 = vadd.f32 %v18619_v17, %v11253_v9  ;;  %v13508_v43 = vpop.f32.mrf.mxu1  ;;  %v9974_v21 = vadd.f32 %v19330_v25, %v18566_v60  ;;  %v19331_v10 = vld [vmem:[#allocation31_spill] sm:$0xff]  ;;  %v9972_v60 = vadd.f32 %v19332_v53, %v18570_v61 }
 0x4d4   : > { %11419 = vst [vmem:[%s18685_s30 + $0x18] sm:$0xff] %v11387_v28  ;;  %v11385_v11 = vmax.f32 %v11353_v35, 0.0  ;;  %v11295_v7 = vadd.f32 %v18619_v17, %v11256_v29  ;;  %v11254_v8 = vmul.f32 %v18592_v52, %v11215_v26  ;;  %v11220_v27 = vadd.f32 %v13508_v43, %v10723_v55  ;;  %v13885_v28 = vld [vmem:[%s14246_s17 + $0x20] sm:$0xff]  ;;  %v13886_v29 = vld [vmem:[%s14246_s17 + $0x38] sm:$0xff] }
 0x4d5   : > { %v11358_v56 = vadd.f32 %v13884_v39, %v11326_v57  ;;  %v11324_v0 = vmax.f32 %v11292_v45, 0.0  ;;  %v11115_v2 = vpop.f32.mrf.mxu1  ;;  %v10724_v16 = vadd.f32 %v19331_v10, %v9971_v1  ;;  %v10722_v1 = vadd.f32 %v18502_v31, %v9969_v41  ;;  %v19333_v43 = vld [vmem:[#allocation25_spill] sm:$0xff]  ;;  %v18726_v31 = vpop.f32.mrf.mxu0 }
 0x4d6   : > { %11417 = vst [vmem:[%s18685_s30 + $0x8] sm:$0xff] %v11385_v11  ;;  %v11327_v14 = vmax.f32 %v11295_v7, 0.0  ;;  %v11293_v62 = vadd.f32 %v18619_v17, %v11254_v8  ;;  %v11259_v9 = vmul.f32 %v18592_v52, %v11220_v27  ;;  %v11218_v50 = vadd.f32 %v11115_v2, %v10721_v12  ;;  %v19334_v7 = vld [vmem:[#allocation24_spill] sm:$0xff]  ;;  %v13887_v27 = vld [vmem:[%s14246_s17 + $0x28] sm:$0xff] }
 0x4d7   : > { %v11390_v55 = vmax.f32 %v11358_v56, 0.0  ;;  %v11356_v59 = vadd.f32 %v13885_v28, %v11324_v0  ;;  %v13509_v35 = vpop.f32.mrf.mxu1  ;;  %v9975_v30 = vadd.f32 %v19333_v43, %v18575_v5  ;;  %v10727_v8 = vadd.f32 %v19334_v7, %v9974_v21  ;;  %v19335_v0 = vld [vmem:[#allocation37_spill] sm:$0xff] }
 0x4d8   : > { %v11359_v26 = vadd.f32 %v13886_v29, %v11327_v14  ;;  %v11325_v23 = vmax.f32 %v11293_v62, 0.0  ;;  %v11298_v57 = vadd.f32 %v18619_v17, %v11259_v9  ;;  %v11257_v45 = vmul.f32 %v18592_v52, %v11218_v50  ;;  %v13888_v62 = vld [vmem:[%s14246_s17 + $0x50] sm:$0xff] }
 0x4d9   : > { %11422 = vst [vmem:[%s18685_s30 + $0x30] sm:$0xff] %v11390_v55  ;;  %v11388_v61 = vmax.f32 %v11356_v59, 0.0  ;;  %v11221_v12 = vadd.f32 %v13509_v35, %v10724_v16  ;;  %v11118_v11 = vpop.f32.mrf.mxu1  ;;  %v9973_v2 = vadd.f32 %v19335_v0, %v18579_v40  ;;  %v10725_v21 = vadd.f32 %v18514_v49, %v9972_v60  ;;  %v19336_v55 = vld [vmem:[#allocation26_spill] sm:$0xff]  ;;  %v13889_v60 = vld [vmem:[%s14246_s17 + $0x40] sm:$0xff] }
 0x4da   : > { %v11391_v41 = vmax.f32 %v11359_v26, 0.0  ;;  %v11357_v25 = vadd.f32 %v13887_v27, %v11325_v23  ;;  %v11330_v39 = vmax.f32 %v11298_v57, 0.0  ;;  %v11296_v56 = vadd.f32 %v18619_v17, %v11257_v45  ;;  %v18742_v26 = vpop.f32.mrf.mxu0 }
 0x4db   : > { %11420 = vst [vmem:[%s18685_s30 + $0x20] sm:$0xff] %v11388_v61  ;;  %v11260_v5 = vmul.f32 %v18592_v52, %v11221_v12  ;;  %v11219_v10 = vadd.f32 %v11118_v11, %v10722_v1  ;;  %v13512_v16 = vpop.f32.mrf.mxu1  ;;  %v9978_v28 = vadd.f32 %v19336_v55, %v18583_v20  ;;  %v19337_v1 = vld [vmem:[#allocation27_spill] sm:$0xff]  ;;  %v19338_v20 = vld [vmem:[#allocation28_spill] sm:$0xff] }
 0x4dc   : > { %11423 = vst [vmem:[%s18685_s30 + $0x38] sm:$0xff] %v11391_v41  ;;  %v11389_v14 = vmax.f32 %v11357_v25, 0.0  ;;  %v11362_v9 = vadd.f32 %v13888_v62, %v11330_v39  ;;  %v11328_v50 = vmax.f32 %v11296_v56, 0.0  ;;  %v11224_v53 = vadd.f32 %v13512_v16, %v10727_v8  ;;  %v19339_v25 = vld [vmem:[#allocation34_spill] sm:$0xff]  ;;  %v13890_v56 = vld [vmem:[%s14246_s17 + $0x58] sm:$0xff]  ;;  %v18758_v16 = vpop.f32.mrf.mxu0  ;;  %v19340_v62 = vld [vmem:[#allocation43_spill] sm:$0xff] }
 0x4dd   : > { %v11299_v40 = vadd.f32 %v18619_v17, %v11260_v5  ;;  %v11258_v59 = vmul.f32 %v18592_v52, %v11219_v10  ;;  %v11131_v35 = vpop.f32.mrf.mxu1  ;;  %v10728_v29 = vadd.f32 %v19337_v1, %v9975_v30  ;;  %v9976_v43 = vadd.f32 %v19338_v20, %v18587_v6  ;;  %v13893_v20 = vld [vmem:[%s14246_s17 + $0x60] sm:$0xff] }
 0x4de   : > { %11421 = vst [vmem:[%s18685_s30 + $0x28] sm:$0xff] %v11389_v14  ;;  %v11394_v49 = vmax.f32 %v11362_v9, 0.0  ;;  %v11360_v23 = vadd.f32 %v13889_v60, %v11328_v50  ;;  %v11263_v57 = vmul.f32 %v18592_v52, %v11224_v53  ;;  %v11222_v45 = vadd.f32 %v11131_v35, %v10725_v21  ;;  %v13891_v50 = vld [vmem:[%s14246_s17 + $0x48] sm:$0xff] }
 0x4df   : > { %v11331_v61 = vmax.f32 %v11299_v40, 0.0  ;;  %v11297_v12 = vadd.f32 %v18619_v17, %v11258_v59  ;;  %v13513_v11 = vpop.f32.mrf.mxu1  ;;  %v10726_v30 = vadd.f32 %v18530_v51, %v9973_v2  ;;  %v9979_v39 = vadd.f32 %v19339_v25, %v18597_v34 }
 0x4e0   : > { %11426 = vst [vmem:[%s18685_s30 + $0x50] sm:$0xff] %v11394_v49  ;;  %v11392_v7 = vmax.f32 %v11360_v23, 0.0  ;;  %v11302_v8 = vadd.f32 %v18619_v17, %v11263_v57  ;;  %v11261_v41 = vmul.f32 %v18592_v52, %v11222_v45  ;;  %v11225_v27 = vadd.f32 %v13513_v11, %v10728_v29  ;;  %v19341_v29 = vld [vmem:[#allocation38_spill] sm:$0xff] }
 0x4e1   : > { %v11363_v6 = vadd.f32 %v13890_v56, %v11331_v61  ;;  %v11329_v0 = vmax.f32 %v11297_v12, 0.0  ;;  %v11134_v5 = vpop.f32.mrf.mxu1  ;;  %v10731_v10 = vadd.f32 %v18562_v18, %v9978_v28  ;;  %v9977_v34 = vadd.f32 %v19340_v62, %v18602_v22  ;;  %v13892_v28 = vld [vmem:[%s14246_s17 + $0x70] sm:$0xff]  ;;  %v19342_v11 = vld [vmem:[#allocation42_spill] sm:$0xff] }
 0x4e2   : > { %11424 = vst [vmem:[%s18685_s30 + $0x40] sm:$0xff] %v11392_v7  ;;  %v11334_v51 = vmax.f32 %v11302_v8, 0.0  ;;  %v11300_v2 = vadd.f32 %v18619_v17, %v11261_v41  ;;  %v11264_v21 = vmul.f32 %v18592_v52, %v11225_v27  ;;  %v11223_v14 = vadd.f32 %v11134_v5, %v10726_v30  ;;  %v13894_v27 = vld [vmem:[%s14246_s17 + $0x78] sm:$0xff] }
 0x4e3   : > { %v11395_v9 = vmax.f32 %v11363_v6, 0.0  ;;  %v11361_v53 = vadd.f32 %v13891_v50, %v11329_v0  ;;  %v13516_v55 = vpop.f32.mrf.mxu1  ;;  %v10729_v18 = vadd.f32 %v18621_v3, %v9976_v43  ;;  %v9982_v49 = vadd.f32 %v19341_v29, %v18606_v19  ;;  %v18774_v3 = vpop.f32.mrf.mxu0  ;;  %v19343_v6 = vld [vmem:[#allocation47_spill] sm:$0xff] }
 0x4e4   : > { %v11366_v40 = vadd.f32 %v13892_v28, %v11334_v51  ;;  %v11332_v59 = vmax.f32 %v11300_v2, 0.0  ;;  %v11303_v35 = vadd.f32 %v18619_v17, %v11264_v21  ;;  %v11262_v1 = vmul.f32 %v18592_v52, %v11223_v14  ;;  %v13895_v21 = vld [vmem:[%s14246_s17 + $0x68] sm:$0xff]  ;;  %v13896_v29 = vld [vmem:[%s14246_s17 + $0x90] sm:$0xff] }
 0x4e5   : > { %11427 = vst [vmem:[%s18685_s30 + $0x58] sm:$0xff] %v11395_v9  ;;  %v11393_v22 = vmax.f32 %v11361_v53, 0.0  ;;  %v11228_v60 = vadd.f32 %v13516_v55, %v10731_v10  ;;  %v11147_v23 = vpop.f32.mrf.mxu1  ;;  %v10732_v57 = vadd.f32 %v18655_v54, %v9979_v39  ;;  %v9980_v30 = vadd.f32 %v19342_v11, %v18610_v15  ;;  %v18790_v2 = vpop.f32.mrf.mxu0 }
 0x4e6   : > { %v11398_v45 = vmax.f32 %v11366_v40, 0.0  ;;  %v11364_v43 = vadd.f32 %v13893_v20, %v11332_v59  ;;  %v11335_v61 = vmax.f32 %v11303_v35, 0.0  ;;  %v11301_v12 = vadd.f32 %v18619_v17, %v11262_v1  ;;  %v19345_v35 = vld [vmem:[#allocation32_spill] sm:$0xff] }
 0x4e7   : > { %11425 = vst [vmem:[%s18685_s30 + $0x48] sm:$0xff] %v11393_v22  ;;  %v11267_v19 = vmul.f32 %v18592_v52, %v11228_v60  ;;  %v11226_v7 = vadd.f32 %v11147_v23, %v10729_v18  ;;  %v13517_v8 = vpop.f32.mrf.mxu1  ;;  %v10730_v54 = vadd.f32 %v18675_v42, %v9977_v34  ;;  %v9983_v0 = vadd.f32 %v19343_v6, %v18614_v32  ;;  %v19344_v32 = vld [vmem:[#allocation33_spill] sm:$0xff]  ;;  %v10685_v23 = vpop.f32.mrf.mxu0 }
 0x4e8   : > { %11430 = vst [vmem:[%s18685_s30 + $0x70] sm:$0xff] %v11398_v45  ;;  %v11396_v41 = vmax.f32 %v11364_v43, 0.0  ;;  %v11367_v25 = vadd.f32 %v13894_v27, %v11335_v61  ;;  %v11333_v39 = vmax.f32 %v11301_v12, 0.0  ;;  %v11229_v56 = vadd.f32 %v13517_v8, %v10732_v57  ;;  %v19346_v43 = vld [vmem:[#allocation36_spill] sm:$0xff]  ;;  %v13897_v12 = vld [vmem:[%s14246_s17 + $0x80] sm:$0xff] }
 0x4e9   : > { %v11306_v15 = vadd.f32 %v18619_v17, %v11267_v19  ;;  %v11265_v5 = vmul.f32 %v18592_v52, %v11226_v7  ;;  %v11150_v10 = vpop.f32.mrf.mxu1  ;;  %v10735_v51 = vadd.f32 %v18694_v36, %v9982_v49  ;;  %v9981_v9 = vadd.f32 %v19344_v32, %v18625_v24  ;;  %v13898_v7 = vld [vmem:[%s14246_s17 + $0x98] sm:$0xff] }
 0x4ea   : > { %11428 = vst [vmem:[%s18685_s30 + $0x60] sm:$0xff] %v11396_v41  ;;  %v11399_v42 = vmax.f32 %v11367_v25, 0.0  ;;  %v11365_v14 = vadd.f32 %v13895_v21, %v11333_v39  ;;  %v11268_v62 = vmul.f32 %v18592_v52, %v11229_v56  ;;  %v11227_v34 = vadd.f32 %v11150_v10, %v10730_v54  ;;  %v19347_v25 = vld [vmem:[#allocation29_spill] sm:$0xff] }
 0x4eb   : > { %v11338_v50 = vmax.f32 %v11306_v15, 0.0  ;;  %v11304_v53 = vadd.f32 %v18619_v17, %v11265_v5  ;;  %v13520_v55 = vpop.f32.mrf.mxu1  ;;  %v10733_v36 = vadd.f32 %v18710_v13, %v9980_v30  ;;  %v9986_v1 = vadd.f32 %v19345_v35, %v18632_v44  ;;  %v13899_v15 = vld [vmem:[%s14246_s17 + $0x88] sm:$0xff] }
 0x4ec   : > { %11431 = vst [vmem:[%s18685_s30 + $0x78] sm:$0xff] %v11399_v42  ;;  %v11397_v18 = vmax.f32 %v11365_v14, 0.0  ;;  %v11307_v28 = vadd.f32 %v18619_v17, %v11268_v62  ;;  %v11266_v40 = vmul.f32 %v18592_v52, %v11227_v34  ;;  %v11232_v59 = vadd.f32 %v13520_v55, %v10735_v51  ;;  %v19348_v42 = vld [vmem:[#allocation44_spill] sm:$0xff] }
 0x4ed   : > { %v11370_v24 = vadd.f32 %v13896_v29, %v11338_v50  ;;  %v11336_v49 = vmax.f32 %v11304_v53, 0.0  ;;  %v11163_v22 = vpop.f32.mrf.mxu1  ;;  %v10736_v60 = vadd.f32 %v18726_v31, %v9983_v0  ;;  %v9984_v61 = vadd.f32 %v19346_v43, %v18636_v48  ;;  %v18813_v31 = vpop.f32.mrf.mxu0 }
 0x4ee   : > { %11429 = vst [vmem:[%s18685_s30 + $0x68] sm:$0xff] %v11397_v18  ;;  %v11339_v13 = vmax.f32 %v11307_v28, 0.0  ;;  %v11305_v57 = vadd.f32 %v18619_v17, %v11266_v40  ;;  %v11271_v45 = vmul.f32 %v18592_v52, %v11232_v59  ;;  %v11230_v20 = vadd.f32 %v11163_v22, %v10733_v36  ;;  %v19349_v36 = vld [vmem:[#allocation73_spill] sm:$0xff]  ;;  %v19350_v18 = vld [vmem:[#allocation68_spill] sm:$0xff]  ;;  %v19351_v22 = vld [vmem:[#allocation30_spill] sm:$0xff] }
 0x4ef   : > { %v11402_v44 = vmax.f32 %v11370_v24, 0.0  ;;  %v11368_v11 = vadd.f32 %v13897_v12, %v11336_v49  ;;  %v13521_v30 = vpop.f32.mrf.mxu1  ;;  %v10734_v19 = vadd.f32 %v18742_v26, %v9981_v9  ;;  %v9987_v48 = vadd.f32 %v19347_v25, %v18640_v63  ;;  %v10698_v32 = vpop.f32.mrf.mxu0  ;;  %v13900_v9 = vld [vmem:[%s14246_s17 + $0xb0] sm:$0xff] }
 0x4f0   : > { %v11371_v8 = vadd.f32 %v13898_v7, %v11339_v13  ;;  %v11337_v54 = vmax.f32 %v11305_v57, 0.0  ;;  %v11310_v41 = vadd.f32 %v18619_v17, %v11271_v45  ;;  %v11269_v27 = vmul.f32 %v18592_v52, %v11230_v20 }
 0x4f1   : > { %11434 = vst [vmem:[%s18685_s30 + $0x90] sm:$0xff] %v11402_v44  ;;  %v11400_v39 = vmax.f32 %v11368_v11, 0.0  ;;  %v11233_v56 = vadd.f32 %v13521_v30, %v10736_v60  ;;  %v11166_v6 = vpop.f32.mrf.mxu1  ;;  %v10739_v26 = vadd.f32 %v18758_v16, %v9986_v1  ;;  %v9985_v21 = vadd.f32 %v19348_v42, %v18649_v46  ;;  %v13901_v1 = vld [vmem:[%s14246_s17 + $0xa0] sm:$0xff]  ;;  %v13481_v43 = vpop.f32.mrf.mxu0  ;;  %v13902_v30 = vld [vmem:[%s14246_s17 + $0xb8] sm:$0xff] }
 0x4f2   : > { %v11403_v0 = vmax.f32 %v11371_v8, 0.0  ;;  %v11369_v5 = vadd.f32 %v13899_v15, %v11337_v54  ;;  %v11342_v10 = vmax.f32 %v11310_v41, 0.0  ;;  %v11308_v51 = vadd.f32 %v18619_v17, %v11269_v27 }
 0x4f3   : > { %11432 = vst [vmem:[%s18685_s30 + $0x80] sm:$0xff] %v11400_v39  ;;  %v11272_v63 = vmul.f32 %v18592_v52, %v11233_v56  ;;  %v11231_v14 = vadd.f32 %v11166_v6, %v10734_v19  ;;  %v13524_v62 = vpop.f32.mrf.mxu1  ;;  %v10737_v34 = vadd.f32 %v18774_v3, %v9984_v61  ;;  %v9604_v28 = vadd.f32 %v19350_v18, %v19349_v36  ;;  %v10701_v39 = vpop.f32.mrf.mxu0  ;;  %v13904_v56 = vld [vmem:[%s14246_s17 + $0xd0] sm:$0xff] }
 0x4f4   : > { %11435 = vst [vmem:[%s18685_s30 + $0x98] sm:$0xff] %v11403_v0  ;;  %v11401_v16 = vmax.f32 %v11369_v5, 0.0  ;;  %v11374_v50 = vadd.f32 %v13900_v9, %v11342_v10  ;;  %v11340_v53 = vmax.f32 %v11308_v51, 0.0  ;;  %v11236_v55 = vadd.f32 %v13524_v62, %v10739_v26 }
 0x4f5   : > { %v11311_v46 = vadd.f32 %v18619_v17, %v11272_v63  ;;  %v11270_v40 = vmul.f32 %v18592_v52, %v11231_v14  ;;  %v11179_v59 = vpop.f32.mrf.mxu1  ;;  %v10740_v35 = vadd.f32 %v18790_v2, %v9987_v48  ;;  %v9990_v60 = vadd.f32 %v19351_v22, %v18653_v58  ;;  %v13903_v48 = vld [vmem:[%s14246_s17 + $0xa8] sm:$0xff] }
 0x4f6   : > { %11433 = vst [vmem:[%s18685_s30 + $0x88] sm:$0xff] %v11401_v16  ;;  %v11406_v3 = vmax.f32 %v11374_v50, 0.0  ;;  %v11372_v29 = vadd.f32 %v13901_v1, %v11340_v53  ;;  %v11275_v24 = vmul.f32 %v18592_v52, %v11236_v55  ;;  %v11234_v49 = vadd.f32 %v11179_v59, %v10737_v34  ;;  %v13906_v53 = vld [vmem:[%s14246_s17 + $0xd8] sm:$0xff] }
 0x4f7   : > { %v11343_v13 = vmax.f32 %v11311_v46, 0.0  ;;  %v11309_v57 = vadd.f32 %v18619_v17, %v11270_v40  ;;  %v13525_v45 = vpop.f32.mrf.mxu1  ;;  %v10738_v20 = vadd.f32 %v10685_v23, %v9985_v21  ;;  %v9988_v11 = vadd.f32 %v18526_v38, %v18662_v4  ;;  %v13905_v21 = vld [vmem:[%s14246_s17 + $0xc0] sm:$0xff] }
 0x4f8   : > { %11438 = vst [vmem:[%s18685_s30 + $0xb0] sm:$0xff] %v11406_v3  ;;  %v11404_v2 = vmax.f32 %v11372_v29, 0.0  ;;  %v11314_v61 = vadd.f32 %v18619_v17, %v11275_v24  ;;  %v11273_v44 = vmul.f32 %v18592_v52, %v11234_v49  ;;  %v11237_v12 = vadd.f32 %v13525_v45, %v10740_v35  ;;  %v13907_v35 = vld [vmem:[%s14246_s17 + $0xc8] sm:$0xff] }
 0x4f9   : > { %v9991_v58 = vadd.f32 %v18538_v47, %v18666_v37  ;;  %v11375_v19 = vadd.f32 %v13902_v30, %v11343_v13  ;;  %v11341_v7 = vmax.f32 %v11309_v57, 0.0  ;;  %v11182_v23 = vpop.f32.mrf.mxu1  ;;  %v10743_v25 = vadd.f32 %v18813_v31, %v9990_v60  ;;  %v13908_v57 = vld [vmem:[%s14246_s17 + $0xf0] sm:$0xff] }
 0x4fa   : > { %11436 = vst [vmem:[%s18685_s30 + $0xa0] sm:$0xff] %v11404_v2  ;;  %v11346_v8 = vmax.f32 %v11314_v61, 0.0  ;;  %v11312_v54 = vadd.f32 %v18619_v17, %v11273_v44  ;;  %v11276_v41 = vmul.f32 %v18592_v52, %v11237_v12  ;;  %v11235_v27 = vadd.f32 %v11182_v23, %v10738_v20  ;;  %v13909_v44 = vld [vmem:[%s14246_s17 + $0xe0] sm:$0xff] }
 0x4fb   : > { %v9989_v38 = vadd.f32 %v18560_v33, %v9604_v28  ;;  %v11407_v4 = vmax.f32 %v11375_v19, 0.0  ;;  %v11373_v47 = vadd.f32 %v13903_v48, %v11341_v7  ;;  %v13528_v37 = vpop.f32.mrf.mxu1  ;;  %v10741_v5 = vadd.f32 %v10698_v32, %v9988_v11  ;;  %v13910_v11 = vld [vmem:[%s14246_s17 + $0xf8] sm:$0xff]  ;;  %v13911_v7 = vld [vmem:[%s14246_s17 + $0xe8] sm:$0xff]  ;;  %s14070_s17 = smov [#allocation9]  }
 0x4fc   : > { %v11378_v6 = vadd.f32 %v13904_v56, %v11346_v8  ;;  %v11344_v26 = vmax.f32 %v11312_v54, 0.0  ;;  %v11315_v0 = vadd.f32 %v18619_v17, %v11276_v41  ;;  %v11274_v15 = vmul.f32 %v18592_v52, %v11235_v27  ;;  %s13996_s13 = sshll.u32 %s14070_s17, 4  ;;  %s13997_s13 = int_to_ptr.vmem [resolvable:$false] %s13996_s13 }
 0x4fd   : > { %v10744_v10 = vadd.f32 %v13481_v43, %v9991_v58  ;;  %11439 = vst [vmem:[%s18685_s30 + $0xb8] sm:$0xff] %v11407_v4  ;;  %v11405_v33 = vmax.f32 %v11373_v47, 0.0  ;;  %v11240_v31 = vadd.f32 %v13528_v37, %v10743_v25  ;;  %v11195_v51 = vpop.f32.mrf.mxu1  ;;  %v10742_v34 = vadd.f32 %v10701_v39, %v9989_v38  ;;  %s13998_s19 = scalar_lea.vmem %s13997_s13, 8192  ;;  %p13999_p6 = scmp.lt.s32.totalorder %s18890_s9, %s13997_s13 }
 0x4fe   : > { %v11410_v42 = vmax.f32 %v11378_v6, 0.0  ;;  %v11376_v63 = vadd.f32 %v13905_v21, %v11344_v26  ;;  %v11347_v14 = vmax.f32 %v11315_v0, 0.0  ;;  %v11313_v62 = vadd.f32 %v18619_v17, %v11274_v15  ;;  %p14000_p12 = scmp.lt.s32.totalorder %s13998_s19, %s13992_s22 }
 0x4ff   : > { %11437 = vst [vmem:[%s18685_s30 + $0xa8] sm:$0xff] %v11405_v33  ;;  %v11279_v16 = vmul.f32 %v18592_v52, %v11240_v31  ;;  %v11238_v32 = vadd.f32 %v11195_v51, %v10741_v5  ;;  %v13529_v9 = vpop.f32.mrf.mxu1 }
 0x500   : > { %11442 = vst [vmem:[%s18685_s30 + $0xd0] sm:$0xff] %v11410_v42  ;;  %v11408_v50 = vmax.f32 %v11376_v63, 0.0  ;;  %v11379_v55 = vadd.f32 %v13906_v53, %v11347_v14  ;;  %v11345_v36 = vmax.f32 %v11313_v62, 0.0  ;;  %v11241_v18 = vadd.f32 %v13529_v9, %v10744_v10  ;;  %p14001_p7 = por %p14000_p12, %p13999_p6 }
 0x501   : > { %v11318_v28 = vadd.f32 %v18619_v17, %v11279_v16  ;;  %v11277_v46 = vmul.f32 %v18592_v52, %v11238_v32  ;;  %v11198_v40 = vpop.f32.mrf.mxu1 }
 0x502   : > { %11440 = vst [vmem:[%s18685_s30 + $0xc0] sm:$0xff] %v11408_v50  ;;  %v11411_v59 = vmax.f32 %v11379_v55, 0.0  ;;  %v11377_v3 = vadd.f32 %v13907_v35, %v11345_v36  ;;  %v11280_v1 = vmul.f32 %v18592_v52, %v11241_v18  ;;  %v11239_v29 = vadd.f32 %v11198_v40, %v10742_v34  ;;  %p14002_p9 = pnand %p14001_p7, %p13995_p2 }
 0x503   : > { %v11350_v24 = vmax.f32 %v11318_v28, 0.0  ;;  %v11316_v49 = vadd.f32 %v18619_v17, %v11277_v46 }
 0x504   : > { %11443 = vst [vmem:[%s18685_s30 + $0xd8] sm:$0xff] %v11411_v59  ;;  %v11409_v22 = vmax.f32 %v11377_v3, 0.0  ;;  %v11319_v60 = vadd.f32 %v18619_v17, %v11280_v1  ;;  %v11278_v13 = vmul.f32 %v18592_v52, %v11239_v29 }
 0x505   : > { %v11382_v45 = vadd.f32 %v13908_v57, %v11350_v24  ;;  %v11348_v20 = vmax.f32 %v11316_v49, 0.0 }
 0x506   : > { %11441 = vst [vmem:[%s18685_s30 + $0xc8] sm:$0xff] %v11409_v22  ;;  %v11351_v43 = vmax.f32 %v11319_v60, 0.0  ;;  %v11317_v2 = vadd.f32 %v18619_v17, %v11278_v13 }
 0x507   : > { %v11414_v61 = vmax.f32 %v11382_v45, 0.0  ;;  %v11380_v12 = vadd.f32 %v13909_v44, %v11348_v20 }
 0x508   : > { %v11383_v58 = vadd.f32 %v13910_v11, %v11351_v43  ;;  %v11349_v30 = vmax.f32 %v11317_v2, 0.0 }
 0x509   : > { %11446 = vst [vmem:[%s18685_s30 + $0xf0] sm:$0xff] %v11414_v61  ;;  %v11412_v52 = vmax.f32 %v11380_v12, 0.0 }
 0x50a   : > { %v11415_v19 = vmax.f32 %v11383_v58, 0.0  ;;  %v11381_v23 = vadd.f32 %v13911_v7, %v11349_v30 }
 0x50b   : > { %11444 = vst [vmem:[%s18685_s30 + $0xe0] sm:$0xff] %v11412_v52 }
 0x50c   : > { %11447 = vst [vmem:[%s18685_s30 + $0xf8] sm:$0xff] %v11415_v19  ;;  %v11413_v17 = vmax.f32 %v11381_v23, 0.0 }
 0x50e   : > { %11445 = vst [vmem:[%s18685_s30 + $0xe8] sm:$0xff] %v11413_v17 }
 0x50f   : > { %14005 = shalt.err (!%p14002_p9)
}
 0x510   : > { %s14006_s10 = scalar_lea.hbm %s18888_s21, 4096  ;;  %s14010_s16 = scalar_lea.hbm %s18942_s7, 8192 }
 0x511   : > { %p14007_p13 = scmp.ne.s32.totalorder %s18888_s21, %s14006_s10  ;;  %p14011_p4 = scmp.lt.s32.totalorder %s18888_s21, %s18942_s7 }
 0x512   : > { %p14012_p8 = scmp.lt.s32.totalorder %s14010_s16, %s14006_s10 }
 0x513   : > { %p14008_p5 = pnand %p14007_p13, %p19352_p10 }
 0x514   : > { %p14013_p3 = por %p14012_p8, %p14011_p4 }
 0x515   : > { %p14009_p0 = pneg %p14008_p5 }
 0x517   : > { %p14014_p11 = pnand %p14013_p3, %p14009_p0 }
 0x519   : > { %14017 = shalt.err (!%p14014_p11)
}
 0x51a   : > { %s14071_s18 = smov 128   ;;  %s14072_s20 = smov 8  }
 0x51b   : > { %13540 = dma.vmem_to_hbm [thread:$0]  (%p19352_p10), %s18890_s9, 4096, %s18888_s21, %s11449_s28, %s14071_s18, %s14071_s18, %s14072_s20  }
 0x51c PF: > { %s11477_s22 = sand.u32 1, %s14048_s24   ;;  %p19353_p1 = scmp.ne.s32.totalorder %s18974_s8, 0 }
 0x51d   : > { %p19354_p2 = scmp.ge.s32.totalorder %s14060_s27, 2  ;;  %s11478_s17 = scalar_lea.sflag [#allocation5], %s11477_s22 }
 0x51f   : > { %p13554_p6 = pnand %p19354_p2, %p19353_p1 }
 0x521   : > { %p13555_p12 = pneg %p13554_p6 }
 0x523   : > { %14043 = dma.done.wait (%p13555_p12), %s11478_s17, 4096  }
 0x524   : > { %14045 = vsyncadd (%p13555_p12), %s11478_s17, 4294963200  ;;  %p21_p7 = scmp.ge.s32.totalorder %s14185_s23, 4   ;;  %s19355_s24 = smov %s14052_s25 }
 0x525   : > { %s19356_s25 = smov %s14056_s26  ;;  %s19357_s26 = smov %s14201_s12 }
 0x526   : > { %s19358_s27 = smov %s14185_s23  ;;  %23 = sbr.rel (!%p21_p7) target bundleno = 8 (0x8), region = 104 }
 0x52b   :  { %11483 = vsyncpa [#allocation4], 1 }
 0x52c   :  { %11485 = vsyncpa [#allocation4 + $0x1], 1 }
 0x52d   :  { %11486 = vsyncpa [#allocation7], 1 }
 0x52e   :  { %11487 = vsyncpa [#allocation5], 1 }
 0x52f   :  { %11489 = vsyncpa [#allocation5 + $0x1], 1 }

</bundles_post_ra>
